<compile_context>
chip_gen: v7x
topology: tpu7x:2x2x1
jax: 0.10.0
libtpu: 0.0.40
codegen_flags: <defaults>
</compile_context>

<pallas_src>
import math
import functools

import jax
import jax.numpy as jnp
from jax.experimental import pallas as pl
from jax.experimental.pallas import tpu as pltpu


# ------------------------------------------------------------ in-kernel helpers

_SQRT1_2 = 0.7071067811865476


def _rms_normalize(x2, g, eps=1e-8):
    """x2: (M, D) f32, g: (1, D) f32.  torch RMSNorm: x / clamp(||x||*D^-0.5, eps) * g."""
    d = x2.shape[-1]
    ss = jnp.sum(x2 * x2, axis=-1, keepdims=True)
    denom = jnp.maximum(jnp.sqrt(ss) * (d ** -0.5), eps)
    # divide on the EUP; approx error is far below the bf16 matmul rounding downstream
    return x2 * pl.reciprocal(denom, approx=True) * g


def _erf_f32(x):
    # Abramowitz & Stegun 7.1.26 polynomial (|err| < 1.5e-7): exact-erf GELU at
    # f32 precision using only guaranteed-supported elementwise ops.
    a1, a2, a3, a4, a5 = (0.254829592, -0.284496736, 1.421413741,
                          -1.453152027, 1.061405429)
    p = 0.3275911
    ax = jnp.abs(x)
    t = 1.0 / (1.0 + p * ax)
    poly = ((((a5 * t + a4) * t + a3) * t + a2) * t + a1) * t
    y = 1.0 - poly * jnp.exp(-ax * ax)
    return jnp.where(x >= 0.0, y, -y)


def _gelu_exact(x):
    return 0.5 * x * (1.0 + _erf_f32(x * _SQRT1_2))


# ------------------------------------------------------------------ Pallas kernels

def _linear_kernel(x_ref, w_ref, b_ref, o_ref):
    # bf16 MXU operands (w already bf16), f32 accumulation, f32 bias add.
    o_ref[...] = (
        jnp.dot(x_ref[...].astype(jnp.bfloat16), w_ref[...],
                preferred_element_type=jnp.float32)
        + b_ref[...]
    )


def linear_pallas(x, w, b, *, block_m=512):
    """y = x @ w + b.  x: (M, K) f32, w: (K, N) bf16, b: (N,) f32 -> (M, N) f32."""
    M, K = x.shape
    N = w.shape[1]
    m8 = ((M + 7) // 8) * 8
    bm = min(block_m, m8)
    mp = ((m8 + bm - 1) // bm) * bm
    xp = jnp.pad(x, ((0, mp - M), (0, 0))) if mp != M else x
    out = pl.pallas_call(
        _linear_kernel,
        grid=(mp // bm,),
        in_specs=[
            pl.BlockSpec((bm, K), lambda i: (i, 0)),
            pl.BlockSpec((K, N), lambda i: (0, 0)),
            pl.BlockSpec((1, N), lambda i: (0, 0)),
        ],
        out_specs=pl.BlockSpec((bm, N), lambda i: (i, 0)),
        out_shape=jax.ShapeDtypeStruct((mp, N), jnp.float32),
        compiler_params=pltpu.CompilerParams(
            dimension_semantics=("parallel",)),
    )(xp, w, b.reshape(1, N))
    return out[:M] if mp != M else out


def _attn_kernel(xs_ref, xr_ref, g_ref, wq_ref, wkv_ref, wo_ref, bias_ref,
                 o_ref, *, heads, dim_head):
    # xs_ref: token-shifted input block (bt, n, d); xr_ref: residual input block.
    bt, n, d = xs_ref.shape
    xs2 = xs_ref[...].reshape(bt * n, d)             # n % 8 == 0 -> layout-free reshape
    xn2 = _rms_normalize(xs2, g_ref[...])
    xb = xn2.astype(jnp.bfloat16)                    # bf16 MXU operands, f32 accum

    q2 = jnp.dot(xb, wq_ref[...], preferred_element_type=jnp.float32)   # (bt*n, H*Dh)
    kv2 = jnp.dot(xb, wkv_ref[...], preferred_element_type=jnp.float32)  # (bt*n, 2*Dh)

    scale = dim_head ** -0.5
    q = (q2 * scale).reshape(bt, n, heads * dim_head)
    k = kv2[:, :dim_head].reshape(bt, n, dim_head).astype(jnp.bfloat16)
    v = kv2[:, dim_head:].reshape(bt, n, dim_head).astype(jnp.bfloat16)

    outs = []
    for h in range(heads):   # static unroll; K/V shared across heads (single KV head)
        qh = q[:, :, h * dim_head:(h + 1) * dim_head].astype(jnp.bfloat16)
        sim = jnp.einsum('bnd,bmd->bnm', qh, k,
                         preferred_element_type=jnp.float32)            # f32 logits
        sim = sim + bias_ref[h]          # alibi + causal mask (-1e30), kept in f32
        m = jnp.max(sim, axis=-1, keepdims=True)
        p = jnp.exp(sim - m)
        l = jnp.sum(p, axis=-1, keepdims=True)
        oh = jnp.einsum('bnm,bmd->bnd', p.astype(jnp.bfloat16), v,
                        preferred_element_type=jnp.float32)
        outs.append(oh * pl.reciprocal(l, approx=True))                 # softmax denom on EUP
    o_heads = jnp.concatenate(outs, axis=-1)                            # (bt, n, H*Dh)

    ob = o_heads.reshape(bt * n, heads * dim_head).astype(jnp.bfloat16)
    out2 = jnp.dot(ob, wo_ref[...], preferred_element_type=jnp.float32)  # ONE wo matmul
    o_ref[...] = out2.reshape(bt, n, d) + xr_ref[...]                    # fused residual


def attention_pallas(xs, xr, ap, bias, heads, dim_head, bt):
    """xs/xr: (Bp, Np, D) f32 (Np % 8 == 0, Bp % bt == 0) -> attn(xs) + xr."""
    Bp, Np, D = xs.shape
    inner = heads * dim_head
    kernel = functools.partial(_attn_kernel, heads=heads, dim_head=dim_head)
    return pl.pallas_call(
        kernel,
        grid=(Bp // bt,),
        in_specs=[
            pl.BlockSpec((bt, Np, D), lambda i: (i, 0, 0)),
            pl.BlockSpec((bt, Np, D), lambda i: (i, 0, 0)),
            pl.BlockSpec((1, D), lambda i: (0, 0)),
            pl.BlockSpec((D, inner), lambda i: (0, 0)),
            pl.BlockSpec((D, 2 * dim_head), lambda i: (0, 0)),
            pl.BlockSpec((inner, D), lambda i: (0, 0)),
            pl.BlockSpec((heads, Np, Np), lambda i: (0, 0, 0)),
        ],
        out_specs=pl.BlockSpec((bt, Np, D), lambda i: (i, 0, 0)),
        out_shape=jax.ShapeDtypeStruct((Bp, Np, D), jnp.float32),
        compiler_params=pltpu.CompilerParams(
            dimension_semantics=("parallel",)),
    )(xs, xr, ap['norm_g'].reshape(1, D), ap['wq'], ap['wkv'], ap['wo'], bias)


def _ffw_kernel(xs_ref, xr_ref, g_ref, w1_ref, b1_ref, w2_ref, b2_ref, o_ref):
    # Fused RMSNorm -> W1 -> exact GELU -> W2 -> residual; no HBM round trip for
    # the 4*dim intermediate.
    bt, n, d = xs_ref.shape
    xs2 = xs_ref[...].reshape(bt * n, d)
    xn2 = _rms_normalize(xs2, g_ref[...])
    hidden = jnp.dot(xn2.astype(jnp.bfloat16), w1_ref[...],
                     preferred_element_type=jnp.float32) + b1_ref[...]
    hidden = _gelu_exact(hidden)                       # f32 elementwise (v5e-safe)
    y = jnp.dot(hidden.astype(jnp.bfloat16), w2_ref[...],
                preferred_element_type=jnp.float32) + b2_ref[...]
    o_ref[...] = y.reshape(bt, n, d) + xr_ref[...]


def ffw_pallas(xs, xr, fp, bt):
    Bp, Np, D = xs.shape
    Hf = fp['w1'].shape[1]
    return pl.pallas_call(
        _ffw_kernel,
        grid=(Bp // bt,),
        in_specs=[
            pl.BlockSpec((bt, Np, D), lambda i: (i, 0, 0)),
            pl.BlockSpec((bt, Np, D), lambda i: (i, 0, 0)),
            pl.BlockSpec((1, D), lambda i: (0, 0)),
            pl.BlockSpec((D, Hf), lambda i: (0, 0)),
            pl.BlockSpec((1, Hf), lambda i: (0, 0)),
            pl.BlockSpec((Hf, D), lambda i: (0, 0)),
            pl.BlockSpec((1, D), lambda i: (0, 0)),
        ],
        out_specs=pl.BlockSpec((bt, Np, D), lambda i: (i, 0, 0)),
        out_shape=jax.ShapeDtypeStruct((Bp, Np, D), jnp.float32),
        compiler_params=pltpu.CompilerParams(
            dimension_semantics=("parallel",)),
    )(xs, xr, fp['norm_g'].reshape(1, D), fp['w1'], fp['b1'].reshape(1, Hf),
      fp['w2'], fp['b2'].reshape(1, D))


# ------------------------------------------------------------------ JAX glue

def rmsnorm(x, g, eps=1e-8):
    norm = jnp.sqrt(jnp.sum(x * x, axis=-1, keepdims=True)) * (x.shape[-1] ** -0.5)
    return x / jnp.maximum(norm, eps) * g


def layernorm(x, g, b, eps=1e-5):
    mu = jnp.mean(x, axis=-1, keepdims=True)
    var = jnp.mean((x - mu) ** 2, axis=-1, keepdims=True)
    return (x - mu) / jnp.sqrt(var + eps) * g + b


def token_shift(t):
    # TODO(synk): could be fused in-kernel via pltpu.roll along the seq axis; kept
    # in JAX glue for robustness, with the residual add fused in-kernel instead.
    d = t.shape[-1] // 2
    t1 = t[..., :d]
    t2 = t[..., d:]
    t2 = jnp.concatenate([jnp.zeros_like(t2[..., :1, :]), t2[..., :-1, :]], axis=-2)
    return jnp.concatenate([t1, t2], axis=-1)


def alibi_slopes(heads):
    def slopes_pow2(n):
        start = 2 ** (-2 ** (-(math.log2(n) - 3)))
        return [start * start ** i for i in range(n)]
    if math.log2(heads).is_integer():
        return slopes_pow2(heads)
    closest = 2 ** math.floor(math.log2(heads))
    return (slopes_pow2(closest)
            + slopes_pow2(2 * closest)[0::2][:heads - closest])


def transformer_forward(x, tp, heads, dim_head):
    """x: (B, N, D) f32.  Pads N to a multiple of 8 and B to a multiple of the
    batch tile once; padding never leaks into real rows (causal mask + row-wise
    ops), then un-pads before the final RMSNorm."""
    B, N, D = x.shape
    n_pad = (-N) % 8
    np_ = N + n_pad
    bt = min(B, 32)
    b_pad = (-B) % bt
    bp = B + b_pad
    xp = jnp.pad(x, ((0, b_pad), (0, n_pad), (0, 0))) if (n_pad or b_pad) else x

    # Combined alibi + causal additive bias, f32, shape (H, Np, Np).
    slopes = jnp.asarray(alibi_slopes(heads), dtype=jnp.float32)          # (H,)
    pos = jnp.arange(np_, dtype=jnp.int32)
    alibi = slopes[:, None, None] * pos.astype(jnp.float32)[None, None, :]
    allowed = (pos[None, :] <= pos[:, None])[None]                        # keys j <= i
    bias = jnp.where(allowed, alibi, jnp.float32(-1e30))                  # (H, Np, Np)

    for layer in tp['layers']:
        xp = attention_pallas(token_shift(xp), xp, layer['attn'], bias,
                              heads, dim_head, bt)
        xp = ffw_pallas(token_shift(xp), xp, layer['ff'], bt)

    x = xp[:B, :N] if (n_pad or b_pad) else xp
    return rmsnorm(x, tp['norm_g'])


def patch_embed(tokens, pe):
    # tokens: (b, p, r, d_in) -> (b, p, d_out)
    b, p, r, d = tokens.shape
    x = tokens.reshape(b, p, r * d)
    x = layernorm(x, pe['ln1_g'], pe['ln1_b'])
    x = linear_pallas(x.reshape(b * p, r * d), pe['w'], pe['b']).reshape(b, p, -1)
    x = layernorm(x, pe['ln2_g'], pe['ln2_b'])
    return x


def megabyte_forward(params, ids, *, cfg):
    """2-stage MEGABYTE forward, flattened ids of shape (batch, seq)."""
    num_tokens = cfg['num_tokens']
    dim = cfg['dim']
    msl = cfg['max_seq_len']
    heads, dim_head = cfg['heads'], cfg['dim_head']

    b, seq_len = ids.shape
    mult = msl[1]
    padding = (-seq_len) % mult
    ids_p = jnp.pad(ids, ((0, 0), (0, padding)), constant_values=cfg['pad_id'])
    ids_r = ids_p.reshape(b, -1, msl[1])               # (b, p, r)
    p, r = ids_r.shape[1], ids_r.shape[2]

    tokens = params['token_emb'][ids_r]                # (b, p, r, fine_dim)

    # stage-token preparation (fine first, then patch-embed to coarse)
    fine_stage = tokens + params['pos_embs'][1][:r]                       # (b,p,r,D1)
    reduced = patch_embed(tokens, params['patch_emb'][0])                 # (b,p,D0)
    coarse_stage = reduced + params['pos_embs'][0][:p]                    # (b,p,D0)

    # ---- stage 0 (coarse / global) ----
    start0 = jnp.broadcast_to(params['start_tokens'][0][None, None, :], (b, 1, dim[0]))
    st0 = jnp.concatenate([start0, coarse_stage], axis=1)                 # (b, p+1, D0)
    att0 = transformer_forward(st0, params['transformers'][0], heads, dim_head)

    lin = linear_pallas(att0[:, :-1, :].reshape(-1, dim[0]),
                        params['proj0_w'], params['proj0_b'])             # (b*p, D1*r)
    prev = lin.reshape(b * p, msl[1], dim[1])                             # (b*p, r, D1)

    # ---- stage 1 (fine / local) ----
    st1 = fine_stage.reshape(b * p, r, dim[1])
    start1 = jnp.broadcast_to(params['start_tokens'][1][None, None, :], (b * p, 1, dim[1]))
    st1 = jnp.concatenate([start1, st1], axis=1)                          # (b*p, r+1, D1)
    prev = jnp.pad(prev, ((0, 0), (1, 0), (0, 0)))                        # (b*p, r+1, D1)
    st1 = st1 + prev
    att1 = transformer_forward(st1, params['transformers'][1], heads, dim_head)
    att1 = att1.reshape(b, p, r + 1, dim[1])

    logits = linear_pallas(att1.reshape(-1, dim[1]),
                           params['to_logits_w'], params['to_logits_b'])
    logits = logits.reshape(b, p, r + 1, num_tokens)
    logits = logits[..., 1:, :]                                            # drop start-token slot
    logits = logits.reshape(b, p * r, num_tokens)[:, :seq_len]             # un-pad
    return logits


# ------------------------------------------------------------------ params

def _bf16(x):
    return x.astype(jnp.bfloat16)


def init_transformer_params(key, dim, layers, dim_head, heads, ff_mult):
    tp = {'layers': [], 'norm_g': jnp.ones((dim,), jnp.float32)}
    inner = dim_head * heads
    for _ in range(layers):
        key, k0, k1, k2, k3, k4 = jax.random.split(key, 6)
        attn = {
            'norm_g': jnp.ones((dim,), jnp.float32),
            'wq': _bf16(jax.random.normal(k0, (dim, inner)) * 0.02),
            'wkv': _bf16(jax.random.normal(k1, (dim, 2 * dim_head)) * 0.02),
            'wo': _bf16(jax.random.normal(k2, (inner, dim)) * 0.02),
        }
        ff = {
            'norm_g': jnp.ones((dim,), jnp.float32),
            'w1': _bf16(jax.random.normal(k3, (dim, dim * ff_mult)) * 0.02),
            'b1': jnp.zeros((dim * ff_mult,), jnp.float32),
            'w2': _bf16(jax.random.normal(k4, (dim * ff_mult, dim)) * 0.02),
            'b2': jnp.zeros((dim,), jnp.float32),
        }
        tp['layers'].append({'attn': attn, 'ff': ff})
    return tp, key


def init_params(key, cfg):
    dim, msl = cfg['dim'], cfg['max_seq_len']
    num_tokens, ff_mult = cfg['num_tokens'], cfg['ff_mult']
    heads, dim_head = cfg['heads'], cfg['dim_head']
    fine_dim = dim[-1]

    params = {}
    key, k = jax.random.split(key)
    params['token_emb'] = jax.random.normal(k, (num_tokens, fine_dim)) * 0.02

    params['start_tokens'] = []
    for d in dim:
        key, k = jax.random.split(key)
        params['start_tokens'].append(jax.random.normal(k, (d,)))

    params['pos_embs'] = []
    for d, s in zip(dim, msl):
        key, k = jax.random.split(key)
        params['pos_embs'].append(jax.random.normal(k, (s, d)) * 0.02)

    pe_in, pe_out = msl[1] * dim[1], dim[0]
    key, k = jax.random.split(key)
    params['patch_emb'] = [{
        'ln1_g': jnp.ones((pe_in,), jnp.float32), 'ln1_b': jnp.zeros((pe_in,), jnp.float32),
        'w': _bf16(jax.random.normal(k, (pe_in, pe_out)) * 0.02),
        'b': jnp.zeros((pe_out,), jnp.float32),
        'ln2_g': jnp.ones((pe_out,), jnp.float32), 'ln2_b': jnp.zeros((pe_out,), jnp.float32),
    }]

    params['transformers'] = []
    for d, layers in zip(dim, cfg['depth']):
        tp, key = init_transformer_params(key, d, layers, dim_head, heads, ff_mult)
        params['transformers'].append(tp)

    key, k = jax.random.split(key)
    params['proj0_w'] = _bf16(jax.random.normal(k, (dim[0], dim[1] * msl[1])) * 0.02)
    params['proj0_b'] = jnp.zeros((dim[1] * msl[1],), jnp.float32)

    key, k = jax.random.split(key)
    params['to_logits_w'] = _bf16(jax.random.normal(k, (fine_dim, num_tokens)) * 0.02)
    params['to_logits_b'] = jnp.zeros((num_tokens,), jnp.float32)
    return params


# ------------------------------------------------------------------ main

if __name__ == "__main__":
    cfg = dict(
        num_tokens=256,
        dim=(256, 128),          # (coarse_dim, fine_dim)
        depth=(1, 1),
        max_seq_len=(4, 4),
        dim_head=128,
        heads=2,
        ff_mult=4,
        pad_id=0,
    )

    key = jax.random.PRNGKey(0)
    k_params, k_ids = jax.random.split(key)
    params = init_params(k_params, cfg)

    batch, seq_len = 2, 13
    ids = jax.random.randint(k_ids, (batch, seq_len), 0, cfg['num_tokens'],
                             dtype=jnp.int32)

    fwd = jax.jit(functools.partial(megabyte_forward, cfg=cfg))
    logits = fwd(params, ids)
    logits = jax.block_until_ready(logits)

    assert logits.shape == (batch, seq_len, cfg['num_tokens']), logits.shape
    assert bool(jnp.all(jnp.isfinite(logits)))
    print("KERNEL_OK")
</pallas_src>

<mosaic_0001>
module attributes {stable_mosaic.version = 11 : i64} {
  func.func @_linear_kernel(%arg0: i32, %arg1: memref<8x512xf32, #tpu.memory_space<vmem>>, %arg2: memref<512x256xbf16, #tpu.memory_space<vmem>>, %arg3: memref<1x256xf32, #tpu.memory_space<vmem>>, %arg4: memref<8x256xf32, #tpu.memory_space<vmem>>) attributes {dimension_semantics = [#tpu.dimension_semantics<parallel>], iteration_bounds = array<i64: 1>, scalar_prefetch = 0 : i64, scratch_operands = 0 : i64, tpu.core_type = #tpu.core_type<tc>, window_params = [{transform_indices = @transform_0, window_bounds = array<i64: 8, 512>}, {pipeline_mode = #tpu.pipeline_mode<synchronous>, transform_indices = @transform_1, window_bounds = array<i64: 512, 256>}, {pipeline_mode = #tpu.pipeline_mode<synchronous>, transform_indices = @transform_2, window_bounds = array<i64: 1, 256>}, {transform_indices = @transform_3, window_bounds = array<i64: 8, 256>}]} {
    %c0 = arith.constant 0 : index
    %c0_0 = arith.constant 0 : index
    %0 = vector.load %arg1[%c0, %c0_0] : memref<8x512xf32, #tpu.memory_space<vmem>>, vector<8x512xf32>
    %1 = arith.truncf %0 : vector<8x512xf32> to vector<8x512xbf16>
    %c0_1 = arith.constant 0 : index
    %c0_2 = arith.constant 0 : index
    %2 = vector.load %arg2[%c0_1, %c0_2] : memref<512x256xbf16, #tpu.memory_space<vmem>>, vector<512x256xbf16>
    %cst = arith.constant dense<0.000000e+00> : vector<8x256xf32>
    %3 = tpu.matmul %1, %2, %cst {dimension_numbers = #tpu.dot_dimension_numbers<[1], [0], [0], [1], [0, 0, 1, 1], [], []>} : vector<8x512xbf16>, vector<512x256xbf16>, vector<8x256xf32> -> vector<8x256xf32>
    %c0_3 = arith.constant 0 : index
    %c0_4 = arith.constant 0 : index
    %4 = vector.load %arg3[%c0_3, %c0_4] : memref<1x256xf32, #tpu.memory_space<vmem>>, vector<1x256xf32>
    %5 = vector.broadcast %4 : vector<1x256xf32> to vector<8x256xf32>
    %6 = arith.addf %3, %5 : vector<8x256xf32>
    %c0_5 = arith.constant 0 : index
    %c0_6 = arith.constant 0 : index
    %7 = vector.load %arg4[%c0_5, %c0_6] : memref<8x256xf32, #tpu.memory_space<vmem>>, vector<8x256xf32>
    tpu.vector_store %arg4[%c0_5, %c0_6], %6 {strides = array<i32>} : memref<8x256xf32, #tpu.memory_space<vmem>>, vector<8x256xf32>,
    return
  }
  func.func @transform_0(%arg0: i32) -> (i32, i32) {
    %c0_i32 = arith.constant 0 : i32
    %c0_i32_0 = arith.constant 0 : i32
    return %arg0, %c0_i32 : i32, i32
  }
  func.func @transform_1(%arg0: i32) -> (i32, i32) {
    %c0_i32 = arith.constant 0 : i32
    %c0_i32_0 = arith.constant 0 : i32
    %c0_i32_1 = arith.constant 0 : i32
    return %c0_i32, %c0_i32_0 : i32, i32
  }
  func.func @transform_2(%arg0: i32) -> (i32, i32) {
    %c0_i32 = arith.constant 0 : i32
    %c0_i32_0 = arith.constant 0 : i32
    %c0_i32_1 = arith.constant 0 : i32
    return %c0_i32, %c0_i32_0 : i32, i32
  }
  func.func @transform_3(%arg0: i32) -> (i32, i32) {
    %c0_i32 = arith.constant 0 : i32
    %c0_i32_0 = arith.constant 0 : i32
    return %arg0, %c0_i32 : i32, i32
  }
}

module attributes {stable_mosaic.version = 11 : i64} {
  func.func @_attn_kernel(%arg0: i32, %arg1: memref<2x8x256xf32, #tpu.memory_space<vmem>>, %arg2: memref<2x8x256xf32, #tpu.memory_space<vmem>>, %arg3: memref<1x256xf32, #tpu.memory_space<vmem>>, %arg4: memref<256x256xbf16, #tpu.memory_space<vmem>>, %arg5: memref<256x256xbf16, #tpu.memory_space<vmem>>, %arg6: memref<256x256xbf16, #tpu.memory_space<vmem>>, %arg7: memref<2x8x8xf32, #tpu.memory_space<vmem>>, %arg8: memref<2x8x256xf32, #tpu.memory_space<vmem>>) attributes {dimension_semantics = [#tpu.dimension_semantics<parallel>], iteration_bounds = array<i64: 1>, scalar_prefetch = 0 : i64, scratch_operands = 0 : i64, tpu.core_type = #tpu.core_type<tc>, window_params = [{transform_indices = @transform_0, window_bounds = array<i64: 2, 8, 256>}, {transform_indices = @transform_1, window_bounds = array<i64: 2, 8, 256>}, {pipeline_mode = #tpu.pipeline_mode<synchronous>, transform_indices = @transform_2, window_bounds = array<i64: 1, 256>}, {pipeline_mode = #tpu.pipeline_mode<synchronous>, transform_indices = @transform_3, window_bounds = array<i64: 256, 256>}, {pipeline_mode = #tpu.pipeline_mode<synchronous>, transform_indices = @transform_4, window_bounds = array<i64: 256, 256>}, {pipeline_mode = #tpu.pipeline_mode<synchronous>, transform_indices = @transform_5, window_bounds = array<i64: 256, 256>}, {pipeline_mode = #tpu.pipeline_mode<synchronous>, transform_indices = @transform_6, window_bounds = array<i64: 2, 8, 8>}, {transform_indices = @transform_7, window_bounds = array<i64: 2, 8, 256>}]} {
    %c0 = arith.constant 0 : index
    %c0_0 = arith.constant 0 : index
    %c0_1 = arith.constant 0 : index
    %0 = vector.load %arg1[%c0, %c0_0, %c0_1] : memref<2x8x256xf32, #tpu.memory_space<vmem>>, vector<2x8x256xf32>
    %1 = vector.shape_cast %0 : vector<2x8x256xf32> to vector<16x256xf32>
    %c0_2 = arith.constant 0 : index
    %c0_3 = arith.constant 0 : index
    %2 = vector.load %arg3[%c0_2, %c0_3] : memref<1x256xf32, #tpu.memory_space<vmem>>, vector<1x256xf32>
    %3 = arith.mulf %1, %1 : vector<16x256xf32>
    %cst = arith.constant dense<0.000000e+00> : vector<16xf32>
    %4 = vector.multi_reduction <add>, %3, %cst [1] : vector<16x256xf32> to vector<16xf32>
    %5 = vector.shape_cast %4 : vector<16xf32> to vector<16x1xf32>
    %6 = math.sqrt %5 : vector<16x1xf32>
    %cst_4 = arith.constant 6.250000e-02 : f32
    %7 = vector.broadcast %cst_4 : f32 to vector<16x1xf32>
    %8 = arith.mulf %6, %7 : vector<16x1xf32>
    %cst_5 = arith.constant 9.99999993E-9 : f32
    %9 = vector.broadcast %cst_5 : f32 to vector<16x1xf32>
    %10 = arith.maximumf %8, %9 : vector<16x1xf32>
    %11 = tpu.reciprocal %10 {approx = true} : vector<16x1xf32> -> vector<16x1xf32>
    %12 = vector.broadcast %11 : vector<16x1xf32> to vector<16x256xf32>
    %13 = arith.mulf %1, %12 : vector<16x256xf32>
    %14 = vector.broadcast %2 : vector<1x256xf32> to vector<16x256xf32>
    %15 = arith.mulf %13, %14 : vector<16x256xf32>
    %16 = arith.truncf %15 : vector<16x256xf32> to vector<16x256xbf16>
    %c0_6 = arith.constant 0 : index
    %c0_7 = arith.constant 0 : index
    %17 = vector.load %arg4[%c0_6, %c0_7] : memref<256x256xbf16, #tpu.memory_space<vmem>>, vector<256x256xbf16>
    %cst_8 = arith.constant dense<0.000000e+00> : vector<16x256xf32>
    %18 = tpu.matmul %16, %17, %cst_8 {dimension_numbers = #tpu.dot_dimension_numbers<[1], [0], [0], [1], [0, 0, 1, 1], [], []>} : vector<16x256xbf16>, vector<256x256xbf16>, vector<16x256xf32> -> vector<16x256xf32>
    %c0_9 = arith.constant 0 : index
    %c0_10 = arith.constant 0 : index
    %19 = vector.load %arg5[%c0_9, %c0_10] : memref<256x256xbf16, #tpu.memory_space<vmem>>, vector<256x256xbf16>
    %cst_11 = arith.constant dense<0.000000e+00> : vector<16x256xf32>
    %20 = tpu.matmul %16, %19, %cst_11 {dimension_numbers = #tpu.dot_dimension_numbers<[1], [0], [0], [1], [0, 0, 1, 1], [], []>} : vector<16x256xbf16>, vector<256x256xbf16>, vector<16x256xf32> -> vector<16x256xf32>
    %cst_12 = arith.constant 0.0883883461 : f32
    %21 = vector.broadcast %cst_12 : f32 to vector<16x256xf32>
    %22 = arith.mulf %18, %21 : vector<16x256xf32>
    %23 = vector.shape_cast %22 : vector<16x256xf32> to vector<2x8x256xf32>
    %24 = vector.extract_strided_slice %20 {offsets = [0, 0], sizes = [16, 128], strides = [1, 1]} : vector<16x256xf32> to vector<16x128xf32>
    %25 = vector.shape_cast %24 : vector<16x128xf32> to vector<2x8x128xf32>
    %26 = arith.truncf %25 : vector<2x8x128xf32> to vector<2x8x128xbf16>
    %27 = vector.extract_strided_slice %20 {offsets = [0, 128], sizes = [16, 128], strides = [1, 1]} : vector<16x256xf32> to vector<16x128xf32>
    %28 = vector.shape_cast %27 : vector<16x128xf32> to vector<2x8x128xf32>
    %29 = arith.truncf %28 : vector<2x8x128xf32> to vector<2x8x128xbf16>
    %30 = vector.extract_strided_slice %23 {offsets = [0, 0, 0], sizes = [2, 8, 128], strides = [1, 1, 1]} : vector<2x8x256xf32> to vector<2x8x128xf32>
    %31 = arith.truncf %30 : vector<2x8x128xf32> to vector<2x8x128xbf16>
    "tpu.trace_start"() <{level = 10 : i32, message = "bnd,bmd->bnm"}> : () -> ()
    %cst_13 = arith.constant dense<0.000000e+00> : vector<2x8x8xf32>
    %32 = tpu.matmul %31, %26, %cst_13 {dimension_numbers = #tpu.dot_dimension_numbers<[2], [2], [1], [1], [0, 0, 0, 1, 1, 1], [0], [0]>} : vector<2x8x128xbf16>, vector<2x8x128xbf16>, vector<2x8x8xf32> -> vector<2x8x8xf32>
    "tpu.trace_stop"() : () -> ()
    %c0_14 = arith.constant 0 : index
    %c0_15 = arith.constant 0 : index
    %c0_16 = arith.constant 0 : index
    %33 = vector.load %arg7[%c0_14, %c0_15, %c0_16] : memref<2x8x8xf32, #tpu.memory_space<vmem>>, vector<1x8x8xf32>
    %34 = vector.shape_cast %33 : vector<1x8x8xf32> to vector<8x8xf32>
    %35 = vector.shape_cast %34 : vector<8x8xf32> to vector<1x8x8xf32>
    %36 = vector.broadcast %35 : vector<1x8x8xf32> to vector<2x8x8xf32>
    %37 = arith.addf %32, %36 : vector<2x8x8xf32>
    %cst_17 = arith.constant dense<0xFF800000> : vector<2x8xf32>
    %38 = vector.multi_reduction <maximumf>, %37, %cst_17 [2] : vector<2x8x8xf32> to vector<2x8xf32>
    %39 = vector.shape_cast %38 : vector<2x8xf32> to vector<2x8x1xf32>
    %40 = vector.broadcast %39 : vector<2x8x1xf32> to vector<2x8x8xf32>
    %41 = arith.subf %37, %40 : vector<2x8x8xf32>
    %42 = math.exp %41 : vector<2x8x8xf32>
    %cst_18 = arith.constant dense<0.000000e+00> : vector<2x8xf32>
    %43 = vector.multi_reduction <add>, %42, %cst_18 [2] : vector<2x8x8xf32> to vector<2x8xf32>
    %44 = vector.shape_cast %43 : vector<2x8xf32> to vector<2x8x1xf32>
    %45 = arith.truncf %42 : vector<2x8x8xf32> to vector<2x8x8xbf16>
    "tpu.trace_start"() <{level = 10 : i32, message = "bnm,bmd->bnd"}> : () -> ()
    %cst_19 = arith.constant dense<0.000000e+00> : vector<2x8x128xf32>
    %46 = tpu.matmul %45, %29, %cst_19 {dimension_numbers = #tpu.dot_dimension_numbers<[2], [1], [1], [2], [0, 0, 0, 1, 1, 2], [0], [0]>} : vector<2x8x8xbf16>, vector<2x8x128xbf16>, vector<2x8x128xf32> -> vector<2x8x128xf32>
    "tpu.trace_stop"() : () -> ()
    %47 = tpu.reciprocal %44 {approx = true} : vector<2x8x1xf32> -> vector<2x8x1xf32>
    %48 = vector.broadcast %47 : vector<2x8x1xf32> to vector<2x8x128xf32>
    %49 = arith.mulf %46, %48 : vector<2x8x128xf32>
    %50 = vector.extract_strided_slice %23 {offsets = [0, 0, 128], sizes = [2, 8, 128], strides = [1, 1, 1]} : vector<2x8x256xf32> to vector<2x8x128xf32>
    %51 = arith.truncf %50 : vector<2x8x128xf32> to vector<2x8x128xbf16>
    "tpu.trace_start"() <{level = 10 : i32, message = "bnd,bmd->bnm"}> : () -> ()
    %cst_20 = arith.constant dense<0.000000e+00> : vector<2x8x8xf32>
    %52 = tpu.matmul %51, %26, %cst_20 {dimension_numbers = #tpu.dot_dimension_numbers<[2], [2], [1], [1], [0, 0, 0, 1, 1, 1], [0], [0]>} : vector<2x8x128xbf16>, vector<2x8x128xbf16>, vector<2x8x8xf32> -> vector<2x8x8xf32>
    "tpu.trace_stop"() : () -> ()
    %c1 = arith.constant 1 : index
    %c0_21 = arith.constant 0 : index
    %c0_22 = arith.constant 0 : index
    %53 = vector.load %arg7[%c1, %c0_21, %c0_22] : memref<2x8x8xf32, #tpu.memory_space<vmem>>, vector<1x8x8xf32>
    %54 = vector.shape_cast %53 : vector<1x8x8xf32> to vector<8x8xf32>
    %55 = vector.shape_cast %54 : vector<8x8xf32> to vector<1x8x8xf32>
    %56 = vector.broadcast %55 : vector<1x8x8xf32> to vector<2x8x8xf32>
    %57 = arith.addf %52, %56 : vector<2x8x8xf32>
    %cst_23 = arith.constant dense<0xFF800000> : vector<2x8xf32>
    %58 = vector.multi_reduction <maximumf>, %57, %cst_23 [2] : vector<2x8x8xf32> to vector<2x8xf32>
    %59 = vector.shape_cast %58 : vector<2x8xf32> to vector<2x8x1xf32>
    %60 = vector.broadcast %59 : vector<2x8x1xf32> to vector<2x8x8xf32>
    %61 = arith.subf %57, %60 : vector<2x8x8xf32>
    %62 = math.exp %61 : vector<2x8x8xf32>
    %cst_24 = arith.constant dense<0.000000e+00> : vector<2x8xf32>
    %63 = vector.multi_reduction <add>, %62, %cst_24 [2] : vector<2x8x8xf32> to vector<2x8xf32>
    %64 = vector.shape_cast %63 : vector<2x8xf32> to vector<2x8x1xf32>
    %65 = arith.truncf %62 : vector<2x8x8xf32> to vector<2x8x8xbf16>
    "tpu.trace_start"() <{level = 10 : i32, message = "bnm,bmd->bnd"}> : () -> ()
    %cst_25 = arith.constant dense<0.000000e+00> : vector<2x8x128xf32>
    %66 = tpu.matmul %65, %29, %cst_25 {dimension_numbers = #tpu.dot_dimension_numbers<[2], [1], [1], [2], [0, 0, 0, 1, 1, 2], [0], [0]>} : vector<2x8x8xbf16>, vector<2x8x128xbf16>, vector<2x8x128xf32> -> vector<2x8x128xf32>
    "tpu.trace_stop"() : () -> ()
    %67 = tpu.reciprocal %64 {approx = true} : vector<2x8x1xf32> -> vector<2x8x1xf32>
    %68 = vector.broadcast %67 : vector<2x8x1xf32> to vector<2x8x128xf32>
    %69 = arith.mulf %66, %68 : vector<2x8x128xf32>
    %70 = tpu.concatenate %49, %69 in 2 : vector<2x8x128xf32>, vector<2x8x128xf32> -> vector<2x8x256xf32>
    %71 = vector.shape_cast %70 : vector<2x8x256xf32> to vector<16x256xf32>
    %72 = arith.truncf %71 : vector<16x256xf32> to vector<16x256xbf16>
    %c0_26 = arith.constant 0 : index
    %c0_27 = arith.constant 0 : index
    %73 = vector.load %arg6[%c0_26, %c0_27] : memref<256x256xbf16, #tpu.memory_space<vmem>>, vector<256x256xbf16>
    %cst_28 = arith.constant dense<0.000000e+00> : vector<16x256xf32>
    %74 = tpu.matmul %72, %73, %cst_28 {dimension_numbers = #tpu.dot_dimension_numbers<[1], [0], [0], [1], [0, 0, 1, 1], [], []>} : vector<16x256xbf16>, vector<256x256xbf16>, vector<16x256xf32> -> vector<16x256xf32>
    %75 = vector.shape_cast %74 : vector<16x256xf32> to vector<2x8x256xf32>
    %c0_29 = arith.constant 0 : index
    %c0_30 = arith.constant 0 : index
    %c0_31 = arith.constant 0 : index
    %76 = vector.load %arg2[%c0_29, %c0_30, %c0_31] : memref<2x8x256xf32, #tpu.memory_space<vmem>>, vector<2x8x256xf32>
    %77 = arith.addf %75, %76 : vector<2x8x256xf32>
    %c0_32 = arith.constant 0 : index
    %c0_33 = arith.constant 0 : index
    %c0_34 = arith.constant 0 : index
    %78 = vector.load %arg8[%c0_32, %c0_33, %c0_34] : memref<2x8x256xf32, #tpu.memory_space<vmem>>, vector<2x8x256xf32>
    tpu.vector_store %arg8[%c0_32, %c0_33, %c0_34], %77 {strides = array<i32>} : memref<2x8x256xf32, #tpu.memory_space<vmem>>, vector<2x8x256xf32>,
    return
  }
  func.func @transform_0(%arg0: i32) -> (i32, i32, i32) {
    %c0_i32 = arith.constant 0 : i32
    %c0_i32_0 = arith.constant 0 : i32
    %c0_i32_1 = arith.constant 0 : i32
    return %arg0, %c0_i32, %c0_i32_0 : i32, i32, i32
  }
  func.func @transform_1(%arg0: i32) -> (i32, i32, i32) {
    %c0_i32 = arith.constant 0 : i32
    %c0_i32_0 = arith.constant 0 : i32
    %c0_i32_1 = arith.constant 0 : i32
    return %arg0, %c0_i32, %c0_i32_0 : i32, i32, i32
  }
  func.func @transform_2(%arg0: i32) -> (i32, i32) {
    %c0_i32 = arith.constant 0 : i32
    %c0_i32_0 = arith.constant 0 : i32
    %c0_i32_1 = arith.constant 0 : i32
    return %c0_i32, %c0_i32_0 : i32, i32
  }
  func.func @transform_3(%arg0: i32) -> (i32, i32) {
    %c0_i32 = arith.constant 0 : i32
    %c0_i32_0 = arith.constant 0 : i32
    %c0_i32_1 = arith.constant 0 : i32
    return %c0_i32, %c0_i32_0 : i32, i32
  }
  func.func @transform_4(%arg0: i32) -> (i32, i32) {
    %c0_i32 = arith.constant 0 : i32
    %c0_i32_0 = arith.constant 0 : i32
    %c0_i32_1 = arith.constant 0 : i32
    return %c0_i32, %c0_i32_0 : i32, i32
  }
  func.func @transform_5(%arg0: i32) -> (i32, i32) {
    %c0_i32 = arith.constant 0 : i32
    %c0_i32_0 = arith.constant 0 : i32
    %c0_i32_1 = arith.constant 0 : i32
    return %c0_i32, %c0_i32_0 : i32, i32
  }
  func.func @transform_6(%arg0: i32) -> (i32, i32, i32) {
    %c0_i32 = arith.constant 0 : i32
    %c0_i32_0 = arith.constant 0 : i32
    %c0_i32_1 = arith.constant 0 : i32
    %c0_i32_2 = arith.constant 0 : i32
    return %c0_i32, %c0_i32_0, %c0_i32_1 : i32, i32, i32
  }
  func.func @transform_7(%arg0: i32) -> (i32, i32, i32) {
    %c0_i32 = arith.constant 0 : i32
    %c0_i32_0 = arith.constant 0 : i32
    %c0_i32_1 = arith.constant 0 : i32
    return %arg0, %c0_i32, %c0_i32_0 : i32, i32, i32
  }
}

module attributes {stable_mosaic.version = 11 : i64} {
  func.func @_ffw_kernel(%arg0: i32, %arg1: memref<2x8x256xf32, #tpu.memory_space<vmem>>, %arg2: memref<2x8x256xf32, #tpu.memory_space<vmem>>, %arg3: memref<1x256xf32, #tpu.memory_space<vmem>>, %arg4: memref<256x1024xbf16, #tpu.memory_space<vmem>>, %arg5: memref<1x1024xf32, #tpu.memory_space<vmem>>, %arg6: memref<1024x256xbf16, #tpu.memory_space<vmem>>, %arg7: memref<1x256xf32, #tpu.memory_space<vmem>>, %arg8: memref<2x8x256xf32, #tpu.memory_space<vmem>>) attributes {dimension_semantics = [#tpu.dimension_semantics<parallel>], iteration_bounds = array<i64: 1>, scalar_prefetch = 0 : i64, scratch_operands = 0 : i64, tpu.core_type = #tpu.core_type<tc>, window_params = [{transform_indices = @transform_0, window_bounds = array<i64: 2, 8, 256>}, {transform_indices = @transform_1, window_bounds = array<i64: 2, 8, 256>}, {pipeline_mode = #tpu.pipeline_mode<synchronous>, transform_indices = @transform_2, window_bounds = array<i64: 1, 256>}, {pipeline_mode = #tpu.pipeline_mode<synchronous>, transform_indices = @transform_3, window_bounds = array<i64: 256, 1024>}, {pipeline_mode = #tpu.pipeline_mode<synchronous>, transform_indices = @transform_4, window_bounds = array<i64: 1, 1024>}, {pipeline_mode = #tpu.pipeline_mode<synchronous>, transform_indices = @transform_5, window_bounds = array<i64: 1024, 256>}, {pipeline_mode = #tpu.pipeline_mode<synchronous>, transform_indices = @transform_6, window_bounds = array<i64: 1, 256>}, {transform_indices = @transform_7, window_bounds = array<i64: 2, 8, 256>}]} {
    %c0 = arith.constant 0 : index
    %c0_0 = arith.constant 0 : index
    %c0_1 = arith.constant 0 : index
    %0 = vector.load %arg1[%c0, %c0_0, %c0_1] : memref<2x8x256xf32, #tpu.memory_space<vmem>>, vector<2x8x256xf32>
    %1 = vector.shape_cast %0 : vector<2x8x256xf32> to vector<16x256xf32>
    %c0_2 = arith.constant 0 : index
    %c0_3 = arith.constant 0 : index
    %2 = vector.load %arg3[%c0_2, %c0_3] : memref<1x256xf32, #tpu.memory_space<vmem>>, vector<1x256xf32>
    %3 = arith.mulf %1, %1 : vector<16x256xf32>
    %cst = arith.constant dense<0.000000e+00> : vector<16xf32>
    %4 = vector.multi_reduction <add>, %3, %cst [1] : vector<16x256xf32> to vector<16xf32>
    %5 = vector.shape_cast %4 : vector<16xf32> to vector<16x1xf32>
    %6 = math.sqrt %5 : vector<16x1xf32>
    %cst_4 = arith.constant 6.250000e-02 : f32
    %7 = vector.broadcast %cst_4 : f32 to vector<16x1xf32>
    %8 = arith.mulf %6, %7 : vector<16x1xf32>
    %cst_5 = arith.constant 9.99999993E-9 : f32
    %9 = vector.broadcast %cst_5 : f32 to vector<16x1xf32>
    %10 = arith.maximumf %8, %9 : vector<16x1xf32>
    %11 = tpu.reciprocal %10 {approx = true} : vector<16x1xf32> -> vector<16x1xf32>
    %12 = vector.broadcast %11 : vector<16x1xf32> to vector<16x256xf32>
    %13 = arith.mulf %1, %12 : vector<16x256xf32>
    %14 = vector.broadcast %2 : vector<1x256xf32> to vector<16x256xf32>
    %15 = arith.mulf %13, %14 : vector<16x256xf32>
    %16 = arith.truncf %15 : vector<16x256xf32> to vector<16x256xbf16>
    %c0_6 = arith.constant 0 : index
    %c0_7 = arith.constant 0 : index
    %17 = vector.load %arg4[%c0_6, %c0_7] : memref<256x1024xbf16, #tpu.memory_space<vmem>>, vector<256x1024xbf16>
    %cst_8 = arith.constant dense<0.000000e+00> : vector<16x1024xf32>
    %18 = tpu.matmul %16, %17, %cst_8 {dimension_numbers = #tpu.dot_dimension_numbers<[1], [0], [0], [1], [0, 0, 1, 1], [], []>} : vector<16x256xbf16>, vector<256x1024xbf16>, vector<16x1024xf32> -> vector<16x1024xf32>
    %c0_9 = arith.constant 0 : index
    %c0_10 = arith.constant 0 : index
    %19 = vector.load %arg5[%c0_9, %c0_10] : memref<1x1024xf32, #tpu.memory_space<vmem>>, vector<1x1024xf32>
    %20 = vector.broadcast %19 : vector<1x1024xf32> to vector<16x1024xf32>
    %21 = arith.addf %18, %20 : vector<16x1024xf32>
    %cst_11 = arith.constant 5.000000e-01 : f32
    %22 = vector.broadcast %cst_11 : f32 to vector<16x1024xf32>
    %23 = arith.mulf %22, %21 : vector<16x1024xf32>
    %cst_12 = arith.constant 0.707106769 : f32
    %24 = vector.broadcast %cst_12 : f32 to vector<16x1024xf32>
    %25 = arith.mulf %21, %24 : vector<16x1024xf32>
    %26 = math.absf %25 : vector<16x1024xf32>
    %cst_13 = arith.constant 0.327591091 : f32
    %27 = vector.broadcast %cst_13 : f32 to vector<16x1024xf32>
    %28 = arith.mulf %27, %26 : vector<16x1024xf32>
    %cst_14 = arith.constant 1.000000e+00 : f32
    %29 = vector.broadcast %cst_14 : f32 to vector<16x1024xf32>
    %30 = arith.addf %29, %28 : vector<16x1024xf32>
    %cst_15 = arith.constant 1.000000e+00 : f32
    %31 = vector.broadcast %cst_15 : f32 to vector<16x1024xf32>
    %32 = arith.divf %31, %30 : vector<16x1024xf32>
    %cst_16 = arith.constant 1.06140542 : f32
    %33 = vector.broadcast %cst_16 : f32 to vector<16x1024xf32>
    %34 = arith.mulf %33, %32 : vector<16x1024xf32>
    %cst_17 = arith.constant -1.45315206 : f32
    %35 = vector.broadcast %cst_17 : f32 to vector<16x1024xf32>
    %36 = arith.addf %34, %35 : vector<16x1024xf32>
    %37 = arith.mulf %36, %32 : vector<16x1024xf32>
    %cst_18 = arith.constant 1.42141378 : f32
    %38 = vector.broadcast %cst_18 : f32 to vector<16x1024xf32>
    %39 = arith.addf %37, %38 : vector<16x1024xf32>
    %40 = arith.mulf %39, %32 : vector<16x1024xf32>
    %cst_19 = arith.constant -0.284496725 : f32
    %41 = vector.broadcast %cst_19 : f32 to vector<16x1024xf32>
    %42 = arith.addf %40, %41 : vector<16x1024xf32>
    %43 = arith.mulf %42, %32 : vector<16x1024xf32>
    %cst_20 = arith.constant 0.254829586 : f32
    %44 = vector.broadcast %cst_20 : f32 to vector<16x1024xf32>
    %45 = arith.addf %43, %44 : vector<16x1024xf32>
    %46 = arith.mulf %45, %32 : vector<16x1024xf32>
    %cst_21 = arith.constant 0.000000e+00 : f32
    %47 = vector.broadcast %cst_21 : f32 to vector<16x1024xf32>
    %48 = arith.subf %47, %26 : vector<16x1024xf32>
    %49 = arith.mulf %48, %26 : vector<16x1024xf32>
    %50 = math.exp %49 : vector<16x1024xf32>
    %51 = arith.mulf %46, %50 : vector<16x1024xf32>
    %cst_22 = arith.constant 1.000000e+00 : f32
    %52 = vector.broadcast %cst_22 : f32 to vector<16x1024xf32>
    %53 = arith.subf %52, %51 : vector<16x1024xf32>
    %cst_23 = arith.constant 0.000000e+00 : f32
    %54 = vector.broadcast %cst_23 : f32 to vector<16x1024xf32>
    %55 = arith.cmpf oge, %25, %54 : vector<16x1024xf32>
    %cst_24 = arith.constant 0.000000e+00 : f32
    %56 = vector.broadcast %cst_24 : f32 to vector<16x1024xf32>
    %57 = arith.subf %56, %53 : vector<16x1024xf32>
    %58 = arith.select %55, %53, %57 : vector<16x1024xi1>, vector<16x1024xf32>
    %cst_25 = arith.constant 1.000000e+00 : f32
    %59 = vector.broadcast %cst_25 : f32 to vector<16x1024xf32>
    %60 = arith.addf %59, %58 : vector<16x1024xf32>
    %61 = arith.mulf %23, %60 : vector<16x1024xf32>
    %62 = arith.truncf %61 : vector<16x1024xf32> to vector<16x1024xbf16>
    %c0_26 = arith.constant 0 : index
    %c0_27 = arith.constant 0 : index
    %63 = vector.load %arg6[%c0_26, %c0_27] : memref<1024x256xbf16, #tpu.memory_space<vmem>>, vector<1024x256xbf16>
    %cst_28 = arith.constant dense<0.000000e+00> : vector<16x256xf32>
    %64 = tpu.matmul %62, %63, %cst_28 {dimension_numbers = #tpu.dot_dimension_numbers<[1], [0], [0], [1], [0, 0, 1, 1], [], []>} : vector<16x1024xbf16>, vector<1024x256xbf16>, vector<16x256xf32> -> vector<16x256xf32>
    %c0_29 = arith.constant 0 : index
    %c0_30 = arith.constant 0 : index
    %65 = vector.load %arg7[%c0_29, %c0_30] : memref<1x256xf32, #tpu.memory_space<vmem>>, vector<1x256xf32>
    %66 = vector.broadcast %65 : vector<1x256xf32> to vector<16x256xf32>
    %67 = arith.addf %64, %66 : vector<16x256xf32>
    %68 = vector.shape_cast %67 : vector<16x256xf32> to vector<2x8x256xf32>
    %c0_31 = arith.constant 0 : index
    %c0_32 = arith.constant 0 : index
    %c0_33 = arith.constant 0 : index
    %69 = vector.load %arg2[%c0_31, %c0_32, %c0_33] : memref<2x8x256xf32, #tpu.memory_space<vmem>>, vector<2x8x256xf32>
    %70 = arith.addf %68, %69 : vector<2x8x256xf32>
    %c0_34 = arith.constant 0 : index
    %c0_35 = arith.constant 0 : index
    %c0_36 = arith.constant 0 : index
    %71 = vector.load %arg8[%c0_34, %c0_35, %c0_36] : memref<2x8x256xf32, #tpu.memory_space<vmem>>, vector<2x8x256xf32>
    tpu.vector_store %arg8[%c0_34, %c0_35, %c0_36], %70 {strides = array<i32>} : memref<2x8x256xf32, #tpu.memory_space<vmem>>, vector<2x8x256xf32>,
    return
  }
  func.func @transform_0(%arg0: i32) -> (i32, i32, i32) {
    %c0_i32 = arith.constant 0 : i32
    %c0_i32_0 = arith.constant 0 : i32
    %c0_i32_1 = arith.constant 0 : i32
    return %arg0, %c0_i32, %c0_i32_0 : i32, i32, i32
  }
  func.func @transform_1(%arg0: i32) -> (i32, i32, i32) {
    %c0_i32 = arith.constant 0 : i32
    %c0_i32_0 = arith.constant 0 : i32
    %c0_i32_1 = arith.constant 0 : i32
    return %arg0, %c0_i32, %c0_i32_0 : i32, i32, i32
  }
  func.func @transform_2(%arg0: i32) -> (i32, i32) {
    %c0_i32 = arith.constant 0 : i32
    %c0_i32_0 = arith.constant 0 : i32
    %c0_i32_1 = arith.constant 0 : i32
    return %c0_i32, %c0_i32_0 : i32, i32
  }
  func.func @transform_3(%arg0: i32) -> (i32, i32) {
    %c0_i32 = arith.constant 0 : i32
    %c0_i32_0 = arith.constant 0 : i32
    %c0_i32_1 = arith.constant 0 : i32
    return %c0_i32, %c0_i32_0 : i32, i32
  }
  func.func @transform_4(%arg0: i32) -> (i32, i32) {
    %c0_i32 = arith.constant 0 : i32
    %c0_i32_0 = arith.constant 0 : i32
    %c0_i32_1 = arith.constant 0 : i32
    return %c0_i32, %c0_i32_0 : i32, i32
  }
  func.func @transform_5(%arg0: i32) -> (i32, i32) {
    %c0_i32 = arith.constant 0 : i32
    %c0_i32_0 = arith.constant 0 : i32
    %c0_i32_1 = arith.constant 0 : i32
    return %c0_i32, %c0_i32_0 : i32, i32
  }
  func.func @transform_6(%arg0: i32) -> (i32, i32) {
    %c0_i32 = arith.constant 0 : i32
    %c0_i32_0 = arith.constant 0 : i32
    %c0_i32_1 = arith.constant 0 : i32
    return %c0_i32, %c0_i32_0 : i32, i32
  }
  func.func @transform_7(%arg0: i32) -> (i32, i32, i32) {
    %c0_i32 = arith.constant 0 : i32
    %c0_i32_0 = arith.constant 0 : i32
    %c0_i32_1 = arith.constant 0 : i32
    return %arg0, %c0_i32, %c0_i32_0 : i32, i32, i32
  }
}

module attributes {stable_mosaic.version = 11 : i64} {
  func.func @_linear_kernel(%arg0: i32, %arg1: memref<8x256xf32, #tpu.memory_space<vmem>>, %arg2: memref<256x512xbf16, #tpu.memory_space<vmem>>, %arg3: memref<1x512xf32, #tpu.memory_space<vmem>>, %arg4: memref<8x512xf32, #tpu.memory_space<vmem>>) attributes {dimension_semantics = [#tpu.dimension_semantics<parallel>], iteration_bounds = array<i64: 1>, scalar_prefetch = 0 : i64, scratch_operands = 0 : i64, tpu.core_type = #tpu.core_type<tc>, window_params = [{transform_indices = @transform_0, window_bounds = array<i64: 8, 256>}, {pipeline_mode = #tpu.pipeline_mode<synchronous>, transform_indices = @transform_1, window_bounds = array<i64: 256, 512>}, {pipeline_mode = #tpu.pipeline_mode<synchronous>, transform_indices = @transform_2, window_bounds = array<i64: 1, 512>}, {transform_indices = @transform_3, window_bounds = array<i64: 8, 512>}]} {
    %c0 = arith.constant 0 : index
    %c0_0 = arith.constant 0 : index
    %0 = vector.load %arg1[%c0, %c0_0] : memref<8x256xf32, #tpu.memory_space<vmem>>, vector<8x256xf32>
    %1 = arith.truncf %0 : vector<8x256xf32> to vector<8x256xbf16>
    %c0_1 = arith.constant 0 : index
    %c0_2 = arith.constant 0 : index
    %2 = vector.load %arg2[%c0_1, %c0_2] : memref<256x512xbf16, #tpu.memory_space<vmem>>, vector<256x512xbf16>
    %cst = arith.constant dense<0.000000e+00> : vector<8x512xf32>
    %3 = tpu.matmul %1, %2, %cst {dimension_numbers = #tpu.dot_dimension_numbers<[1], [0], [0], [1], [0, 0, 1, 1], [], []>} : vector<8x256xbf16>, vector<256x512xbf16>, vector<8x512xf32> -> vector<8x512xf32>
    %c0_3 = arith.constant 0 : index
    %c0_4 = arith.constant 0 : index
    %4 = vector.load %arg3[%c0_3, %c0_4] : memref<1x512xf32, #tpu.memory_space<vmem>>, vector<1x512xf32>
    %5 = vector.broadcast %4 : vector<1x512xf32> to vector<8x512xf32>
    %6 = arith.addf %3, %5 : vector<8x512xf32>
    %c0_5 = arith.constant 0 : index
    %c0_6 = arith.constant 0 : index
    %7 = vector.load %arg4[%c0_5, %c0_6] : memref<8x512xf32, #tpu.memory_space<vmem>>, vector<8x512xf32>
    tpu.vector_store %arg4[%c0_5, %c0_6], %6 {strides = array<i32>} : memref<8x512xf32, #tpu.memory_space<vmem>>, vector<8x512xf32>,
    return
  }
  func.func @transform_0(%arg0: i32) -> (i32, i32) {
    %c0_i32 = arith.constant 0 : i32
    %c0_i32_0 = arith.constant 0 : i32
    return %arg0, %c0_i32 : i32, i32
  }
  func.func @transform_1(%arg0: i32) -> (i32, i32) {
    %c0_i32 = arith.constant 0 : i32
    %c0_i32_0 = arith.constant 0 : i32
    %c0_i32_1 = arith.constant 0 : i32
    return %c0_i32, %c0_i32_0 : i32, i32
  }
  func.func @transform_2(%arg0: i32) -> (i32, i32) {
    %c0_i32 = arith.constant 0 : i32
    %c0_i32_0 = arith.constant 0 : i32
    %c0_i32_1 = arith.constant 0 : i32
    return %c0_i32, %c0_i32_0 : i32, i32
  }
  func.func @transform_3(%arg0: i32) -> (i32, i32) {
    %c0_i32 = arith.constant 0 : i32
    %c0_i32_0 = arith.constant 0 : i32
    return %arg0, %c0_i32 : i32, i32
  }
}

module attributes {stable_mosaic.version = 11 : i64} {
  func.func @_attn_kernel(%arg0: i32, %arg1: memref<8x8x128xf32, #tpu.memory_space<vmem>>, %arg2: memref<8x8x128xf32, #tpu.memory_space<vmem>>, %arg3: memref<1x128xf32, #tpu.memory_space<vmem>>, %arg4: memref<128x256xbf16, #tpu.memory_space<vmem>>, %arg5: memref<128x256xbf16, #tpu.memory_space<vmem>>, %arg6: memref<256x128xbf16, #tpu.memory_space<vmem>>, %arg7: memref<2x8x8xf32, #tpu.memory_space<vmem>>, %arg8: memref<8x8x128xf32, #tpu.memory_space<vmem>>) attributes {dimension_semantics = [#tpu.dimension_semantics<parallel>], iteration_bounds = array<i64: 1>, scalar_prefetch = 0 : i64, scratch_operands = 0 : i64, tpu.core_type = #tpu.core_type<tc>, window_params = [{transform_indices = @transform_0, window_bounds = array<i64: 8, 8, 128>}, {transform_indices = @transform_1, window_bounds = array<i64: 8, 8, 128>}, {pipeline_mode = #tpu.pipeline_mode<synchronous>, transform_indices = @transform_2, window_bounds = array<i64: 1, 128>}, {pipeline_mode = #tpu.pipeline_mode<synchronous>, transform_indices = @transform_3, window_bounds = array<i64: 128, 256>}, {pipeline_mode = #tpu.pipeline_mode<synchronous>, transform_indices = @transform_4, window_bounds = array<i64: 128, 256>}, {pipeline_mode = #tpu.pipeline_mode<synchronous>, transform_indices = @transform_5, window_bounds = array<i64: 256, 128>}, {pipeline_mode = #tpu.pipeline_mode<synchronous>, transform_indices = @transform_6, window_bounds = array<i64: 2, 8, 8>}, {transform_indices = @transform_7, window_bounds = array<i64: 8, 8, 128>}]} {
    %c0 = arith.constant 0 : index
    %c0_0 = arith.constant 0 : index
    %c0_1 = arith.constant 0 : index
    %0 = vector.load %arg1[%c0, %c0_0, %c0_1] : memref<8x8x128xf32, #tpu.memory_space<vmem>>, vector<8x8x128xf32>
    %1 = vector.shape_cast %0 : vector<8x8x128xf32> to vector<64x128xf32>
    %c0_2 = arith.constant 0 : index
    %c0_3 = arith.constant 0 : index
    %2 = vector.load %arg3[%c0_2, %c0_3] : memref<1x128xf32, #tpu.memory_space<vmem>>, vector<1x128xf32>
    %3 = arith.mulf %1, %1 : vector<64x128xf32>
    %cst = arith.constant dense<0.000000e+00> : vector<64xf32>
    %4 = vector.multi_reduction <add>, %3, %cst [1] : vector<64x128xf32> to vector<64xf32>
    %5 = vector.shape_cast %4 : vector<64xf32> to vector<64x1xf32>
    %6 = math.sqrt %5 : vector<64x1xf32>
    %cst_4 = arith.constant 0.0883883461 : f32
    %7 = vector.broadcast %cst_4 : f32 to vector<64x1xf32>
    %8 = arith.mulf %6, %7 : vector<64x1xf32>
    %cst_5 = arith.constant 9.99999993E-9 : f32
    %9 = vector.broadcast %cst_5 : f32 to vector<64x1xf32>
    %10 = arith.maximumf %8, %9 : vector<64x1xf32>
    %11 = tpu.reciprocal %10 {approx = true} : vector<64x1xf32> -> vector<64x1xf32>
    %12 = vector.broadcast %11 : vector<64x1xf32> to vector<64x128xf32>
    %13 = arith.mulf %1, %12 : vector<64x128xf32>
    %14 = vector.broadcast %2 : vector<1x128xf32> to vector<64x128xf32>
    %15 = arith.mulf %13, %14 : vector<64x128xf32>
    %16 = arith.truncf %15 : vector<64x128xf32> to vector<64x128xbf16>
    %c0_6 = arith.constant 0 : index
    %c0_7 = arith.constant 0 : index
    %17 = vector.load %arg4[%c0_6, %c0_7] : memref<128x256xbf16, #tpu.memory_space<vmem>>, vector<128x256xbf16>
    %cst_8 = arith.constant dense<0.000000e+00> : vector<64x256xf32>
    %18 = tpu.matmul %16, %17, %cst_8 {dimension_numbers = #tpu.dot_dimension_numbers<[1], [0], [0], [1], [0, 0, 1, 1], [], []>} : vector<64x128xbf16>, vector<128x256xbf16>, vector<64x256xf32> -> vector<64x256xf32>
    %c0_9 = arith.constant 0 : index
    %c0_10 = arith.constant 0 : index
    %19 = vector.load %arg5[%c0_9, %c0_10] : memref<128x256xbf16, #tpu.memory_space<vmem>>, vector<128x256xbf16>
    %cst_11 = arith.constant dense<0.000000e+00> : vector<64x256xf32>
    %20 = tpu.matmul %16, %19, %cst_11 {dimension_numbers = #tpu.dot_dimension_numbers<[1], [0], [0], [1], [0, 0, 1, 1], [], []>} : vector<64x128xbf16>, vector<128x256xbf16>, vector<64x256xf32> -> vector<64x256xf32>
    %cst_12 = arith.constant 0.0883883461 : f32
    %21 = vector.broadcast %cst_12 : f32 to vector<64x256xf32>
    %22 = arith.mulf %18, %21 : vector<64x256xf32>
    %23 = vector.shape_cast %22 : vector<64x256xf32> to vector<8x8x256xf32>
    %24 = vector.extract_strided_slice %20 {offsets = [0, 0], sizes = [64, 128], strides = [1, 1]} : vector<64x256xf32> to vector<64x128xf32>
    %25 = vector.shape_cast %24 : vector<64x128xf32> to vector<8x8x128xf32>
    %26 = arith.truncf %25 : vector<8x8x128xf32> to vector<8x8x128xbf16>
    %27 = vector.extract_strided_slice %20 {offsets = [0, 128], sizes = [64, 128], strides = [1, 1]} : vector<64x256xf32> to vector<64x128xf32>
    %28 = vector.shape_cast %27 : vector<64x128xf32> to vector<8x8x128xf32>
    %29 = arith.truncf %28 : vector<8x8x128xf32> to vector<8x8x128xbf16>
    %30 = vector.extract_strided_slice %23 {offsets = [0, 0, 0], sizes = [8, 8, 128], strides = [1, 1, 1]} : vector<8x8x256xf32> to vector<8x8x128xf32>
    %31 = arith.truncf %30 : vector<8x8x128xf32> to vector<8x8x128xbf16>
    "tpu.trace_start"() <{level = 10 : i32, message = "bnd,bmd->bnm"}> : () -> ()
    %cst_13 = arith.constant dense<0.000000e+00> : vector<8x8x8xf32>
    %32 = tpu.matmul %31, %26, %cst_13 {dimension_numbers = #tpu.dot_dimension_numbers<[2], [2], [1], [1], [0, 0, 0, 1, 1, 1], [0], [0]>} : vector<8x8x128xbf16>, vector<8x8x128xbf16>, vector<8x8x8xf32> -> vector<8x8x8xf32>
    "tpu.trace_stop"() : () -> ()
    %c0_14 = arith.constant 0 : index
    %c0_15 = arith.constant 0 : index
    %c0_16 = arith.constant 0 : index
    %33 = vector.load %arg7[%c0_14, %c0_15, %c0_16] : memref<2x8x8xf32, #tpu.memory_space<vmem>>, vector<1x8x8xf32>
    %34 = vector.shape_cast %33 : vector<1x8x8xf32> to vector<8x8xf32>
    %35 = vector.shape_cast %34 : vector<8x8xf32> to vector<1x8x8xf32>
    %36 = vector.broadcast %35 : vector<1x8x8xf32> to vector<8x8x8xf32>
    %37 = arith.addf %32, %36 : vector<8x8x8xf32>
    %cst_17 = arith.constant dense<0xFF800000> : vector<8x8xf32>
    %38 = vector.multi_reduction <maximumf>, %37, %cst_17 [2] : vector<8x8x8xf32> to vector<8x8xf32>
    %39 = vector.shape_cast %38 : vector<8x8xf32> to vector<8x8x1xf32>
    %40 = vector.broadcast %39 : vector<8x8x1xf32> to vector<8x8x8xf32>
    %41 = arith.subf %37, %40 : vector<8x8x8xf32>
    %42 = math.exp %41 : vector<8x8x8xf32>
    %cst_18 = arith.constant dense<0.000000e+00> : vector<8x8xf32>
    %43 = vector.multi_reduction <add>, %42, %cst_18 [2] : vector<8x8x8xf32> to vector<8x8xf32>
    %44 = vector.shape_cast %43 : vector<8x8xf32> to vector<8x8x1xf32>
    %45 = arith.truncf %42 : vector<8x8x8xf32> to vector<8x8x8xbf16>
    "tpu.trace_start"() <{level = 10 : i32, message = "bnm,bmd->bnd"}> : () -> ()
    %cst_19 = arith.constant dense<0.000000e+00> : vector<8x8x128xf32>
    %46 = tpu.matmul %45, %29, %cst_19 {dimension_numbers = #tpu.dot_dimension_numbers<[2], [1], [1], [2], [0, 0, 0, 1, 1, 2], [0], [0]>} : vector<8x8x8xbf16>, vector<8x8x128xbf16>, vector<8x8x128xf32> -> vector<8x8x128xf32>
    "tpu.trace_stop"() : () -> ()
    %47 = tpu.reciprocal %44 {approx = true} : vector<8x8x1xf32> -> vector<8x8x1xf32>
    %48 = vector.broadcast %47 : vector<8x8x1xf32> to vector<8x8x128xf32>
    %49 = arith.mulf %46, %48 : vector<8x8x128xf32>
    %50 = vector.extract_strided_slice %23 {offsets = [0, 0, 128], sizes = [8, 8, 128], strides = [1, 1, 1]} : vector<8x8x256xf32> to vector<8x8x128xf32>
    %51 = arith.truncf %50 : vector<8x8x128xf32> to vector<8x8x128xbf16>
    "tpu.trace_start"() <{level = 10 : i32, message = "bnd,bmd->bnm"}> : () -> ()
    %cst_20 = arith.constant dense<0.000000e+00> : vector<8x8x8xf32>
    %52 = tpu.matmul %51, %26, %cst_20 {dimension_numbers = #tpu.dot_dimension_numbers<[2], [2], [1], [1], [0, 0, 0, 1, 1, 1], [0], [0]>} : vector<8x8x128xbf16>, vector<8x8x128xbf16>, vector<8x8x8xf32> -> vector<8x8x8xf32>
    "tpu.trace_stop"() : () -> ()
    %c1 = arith.constant 1 : index
    %c0_21 = arith.constant 0 : index
    %c0_22 = arith.constant 0 : index
    %53 = vector.load %arg7[%c1, %c0_21, %c0_22] : memref<2x8x8xf32, #tpu.memory_space<vmem>>, vector<1x8x8xf32>
    %54 = vector.shape_cast %53 : vector<1x8x8xf32> to vector<8x8xf32>
    %55 = vector.shape_cast %54 : vector<8x8xf32> to vector<1x8x8xf32>
    %56 = vector.broadcast %55 : vector<1x8x8xf32> to vector<8x8x8xf32>
    %57 = arith.addf %52, %56 : vector<8x8x8xf32>
    %cst_23 = arith.constant dense<0xFF800000> : vector<8x8xf32>
    %58 = vector.multi_reduction <maximumf>, %57, %cst_23 [2] : vector<8x8x8xf32> to vector<8x8xf32>
    %59 = vector.shape_cast %58 : vector<8x8xf32> to vector<8x8x1xf32>
    %60 = vector.broadcast %59 : vector<8x8x1xf32> to vector<8x8x8xf32>
    %61 = arith.subf %57, %60 : vector<8x8x8xf32>
    %62 = math.exp %61 : vector<8x8x8xf32>
    %cst_24 = arith.constant dense<0.000000e+00> : vector<8x8xf32>
    %63 = vector.multi_reduction <add>, %62, %cst_24 [2] : vector<8x8x8xf32> to vector<8x8xf32>
    %64 = vector.shape_cast %63 : vector<8x8xf32> to vector<8x8x1xf32>
    %65 = arith.truncf %62 : vector<8x8x8xf32> to vector<8x8x8xbf16>
    "tpu.trace_start"() <{level = 10 : i32, message = "bnm,bmd->bnd"}> : () -> ()
    %cst_25 = arith.constant dense<0.000000e+00> : vector<8x8x128xf32>
    %66 = tpu.matmul %65, %29, %cst_25 {dimension_numbers = #tpu.dot_dimension_numbers<[2], [1], [1], [2], [0, 0, 0, 1, 1, 2], [0], [0]>} : vector<8x8x8xbf16>, vector<8x8x128xbf16>, vector<8x8x128xf32> -> vector<8x8x128xf32>
    "tpu.trace_stop"() : () -> ()
    %67 = tpu.reciprocal %64 {approx = true} : vector<8x8x1xf32> -> vector<8x8x1xf32>
    %68 = vector.broadcast %67 : vector<8x8x1xf32> to vector<8x8x128xf32>
    %69 = arith.mulf %66, %68 : vector<8x8x128xf32>
    %70 = tpu.concatenate %49, %69 in 2 : vector<8x8x128xf32>, vector<8x8x128xf32> -> vector<8x8x256xf32>
    %71 = vector.shape_cast %70 : vector<8x8x256xf32> to vector<64x256xf32>
    %72 = arith.truncf %71 : vector<64x256xf32> to vector<64x256xbf16>
    %c0_26 = arith.constant 0 : index
    %c0_27 = arith.constant 0 : index
    %73 = vector.load %arg6[%c0_26, %c0_27] : memref<256x128xbf16, #tpu.memory_space<vmem>>, vector<256x128xbf16>
    %cst_28 = arith.constant dense<0.000000e+00> : vector<64x128xf32>
    %74 = tpu.matmul %72, %73, %cst_28 {dimension_numbers = #tpu.dot_dimension_numbers<[1], [0], [0], [1], [0, 0, 1, 1], [], []>} : vector<64x256xbf16>, vector<256x128xbf16>, vector<64x128xf32> -> vector<64x128xf32>
    %75 = vector.shape_cast %74 : vector<64x128xf32> to vector<8x8x128xf32>
    %c0_29 = arith.constant 0 : index
    %c0_30 = arith.constant 0 : index
    %c0_31 = arith.constant 0 : index
    %76 = vector.load %arg2[%c0_29, %c0_30, %c0_31] : memref<8x8x128xf32, #tpu.memory_space<vmem>>, vector<8x8x128xf32>
    %77 = arith.addf %75, %76 : vector<8x8x128xf32>
    %c0_32 = arith.constant 0 : index
    %c0_33 = arith.constant 0 : index
    %c0_34 = arith.constant 0 : index
    %78 = vector.load %arg8[%c0_32, %c0_33, %c0_34] : memref<8x8x128xf32, #tpu.memory_space<vmem>>, vector<8x8x128xf32>
    tpu.vector_store %arg8[%c0_32, %c0_33, %c0_34], %77 {strides = array<i32>} : memref<8x8x128xf32, #tpu.memory_space<vmem>>, vector<8x8x128xf32>,
    return
  }
  func.func @transform_0(%arg0: i32) -> (i32, i32, i32) {
    %c0_i32 = arith.constant 0 : i32
    %c0_i32_0 = arith.constant 0 : i32
    %c0_i32_1 = arith.constant 0 : i32
    return %arg0, %c0_i32, %c0_i32_0 : i32, i32, i32
  }
  func.func @transform_1(%arg0: i32) -> (i32, i32, i32) {
    %c0_i32 = arith.constant 0 : i32
    %c0_i32_0 = arith.constant 0 : i32
    %c0_i32_1 = arith.constant 0 : i32
    return %arg0, %c0_i32, %c0_i32_0 : i32, i32, i32
  }
  func.func @transform_2(%arg0: i32) -> (i32, i32) {
    %c0_i32 = arith.constant 0 : i32
    %c0_i32_0 = arith.constant 0 : i32
    %c0_i32_1 = arith.constant 0 : i32
    return %c0_i32, %c0_i32_0 : i32, i32
  }
  func.func @transform_3(%arg0: i32) -> (i32, i32) {
    %c0_i32 = arith.constant 0 : i32
    %c0_i32_0 = arith.constant 0 : i32
    %c0_i32_1 = arith.constant 0 : i32
    return %c0_i32, %c0_i32_0 : i32, i32
  }
  func.func @transform_4(%arg0: i32) -> (i32, i32) {
    %c0_i32 = arith.constant 0 : i32
    %c0_i32_0 = arith.constant 0 : i32
    %c0_i32_1 = arith.constant 0 : i32
    return %c0_i32, %c0_i32_0 : i32, i32
  }
  func.func @transform_5(%arg0: i32) -> (i32, i32) {
    %c0_i32 = arith.constant 0 : i32
    %c0_i32_0 = arith.constant 0 : i32
    %c0_i32_1 = arith.constant 0 : i32
    return %c0_i32, %c0_i32_0 : i32, i32
  }
  func.func @transform_6(%arg0: i32) -> (i32, i32, i32) {
    %c0_i32 = arith.constant 0 : i32
    %c0_i32_0 = arith.constant 0 : i32
    %c0_i32_1 = arith.constant 0 : i32
    %c0_i32_2 = arith.constant 0 : i32
    return %c0_i32, %c0_i32_0, %c0_i32_1 : i32, i32, i32
  }
  func.func @transform_7(%arg0: i32) -> (i32, i32, i32) {
    %c0_i32 = arith.constant 0 : i32
    %c0_i32_0 = arith.constant 0 : i32
    %c0_i32_1 = arith.constant 0 : i32
    return %arg0, %c0_i32, %c0_i32_0 : i32, i32, i32
  }
}

module attributes {stable_mosaic.version = 11 : i64} {
  func.func @_ffw_kernel(%arg0: i32, %arg1: memref<8x8x128xf32, #tpu.memory_space<vmem>>, %arg2: memref<8x8x128xf32, #tpu.memory_space<vmem>>, %arg3: memref<1x128xf32, #tpu.memory_space<vmem>>, %arg4: memref<128x512xbf16, #tpu.memory_space<vmem>>, %arg5: memref<1x512xf32, #tpu.memory_space<vmem>>, %arg6: memref<512x128xbf16, #tpu.memory_space<vmem>>, %arg7: memref<1x128xf32, #tpu.memory_space<vmem>>, %arg8: memref<8x8x128xf32, #tpu.memory_space<vmem>>) attributes {dimension_semantics = [#tpu.dimension_semantics<parallel>], iteration_bounds = array<i64: 1>, scalar_prefetch = 0 : i64, scratch_operands = 0 : i64, tpu.core_type = #tpu.core_type<tc>, window_params = [{transform_indices = @transform_0, window_bounds = array<i64: 8, 8, 128>}, {transform_indices = @transform_1, window_bounds = array<i64: 8, 8, 128>}, {pipeline_mode = #tpu.pipeline_mode<synchronous>, transform_indices = @transform_2, window_bounds = array<i64: 1, 128>}, {pipeline_mode = #tpu.pipeline_mode<synchronous>, transform_indices = @transform_3, window_bounds = array<i64: 128, 512>}, {pipeline_mode = #tpu.pipeline_mode<synchronous>, transform_indices = @transform_4, window_bounds = array<i64: 1, 512>}, {pipeline_mode = #tpu.pipeline_mode<synchronous>, transform_indices = @transform_5, window_bounds = array<i64: 512, 128>}, {pipeline_mode = #tpu.pipeline_mode<synchronous>, transform_indices = @transform_6, window_bounds = array<i64: 1, 128>}, {transform_indices = @transform_7, window_bounds = array<i64: 8, 8, 128>}]} {
    %c0 = arith.constant 0 : index
    %c0_0 = arith.constant 0 : index
    %c0_1 = arith.constant 0 : index
    %0 = vector.load %arg1[%c0, %c0_0, %c0_1] : memref<8x8x128xf32, #tpu.memory_space<vmem>>, vector<8x8x128xf32>
    %1 = vector.shape_cast %0 : vector<8x8x128xf32> to vector<64x128xf32>
    %c0_2 = arith.constant 0 : index
    %c0_3 = arith.constant 0 : index
    %2 = vector.load %arg3[%c0_2, %c0_3] : memref<1x128xf32, #tpu.memory_space<vmem>>, vector<1x128xf32>
    %3 = arith.mulf %1, %1 : vector<64x128xf32>
    %cst = arith.constant dense<0.000000e+00> : vector<64xf32>
    %4 = vector.multi_reduction <add>, %3, %cst [1] : vector<64x128xf32> to vector<64xf32>
    %5 = vector.shape_cast %4 : vector<64xf32> to vector<64x1xf32>
    %6 = math.sqrt %5 : vector<64x1xf32>
    %cst_4 = arith.constant 0.0883883461 : f32
    %7 = vector.broadcast %cst_4 : f32 to vector<64x1xf32>
    %8 = arith.mulf %6, %7 : vector<64x1xf32>
    %cst_5 = arith.constant 9.99999993E-9 : f32
    %9 = vector.broadcast %cst_5 : f32 to vector<64x1xf32>
    %10 = arith.maximumf %8, %9 : vector<64x1xf32>
    %11 = tpu.reciprocal %10 {approx = true} : vector<64x1xf32> -> vector<64x1xf32>
    %12 = vector.broadcast %11 : vector<64x1xf32> to vector<64x128xf32>
    %13 = arith.mulf %1, %12 : vector<64x128xf32>
    %14 = vector.broadcast %2 : vector<1x128xf32> to vector<64x128xf32>
    %15 = arith.mulf %13, %14 : vector<64x128xf32>
    %16 = arith.truncf %15 : vector<64x128xf32> to vector<64x128xbf16>
    %c0_6 = arith.constant 0 : index
    %c0_7 = arith.constant 0 : index
    %17 = vector.load %arg4[%c0_6, %c0_7] : memref<128x512xbf16, #tpu.memory_space<vmem>>, vector<128x512xbf16>
    %cst_8 = arith.constant dense<0.000000e+00> : vector<64x512xf32>
    %18 = tpu.matmul %16, %17, %cst_8 {dimension_numbers = #tpu.dot_dimension_numbers<[1], [0], [0], [1], [0, 0, 1, 1], [], []>} : vector<64x128xbf16>, vector<128x512xbf16>, vector<64x512xf32> -> vector<64x512xf32>
    %c0_9 = arith.constant 0 : index
    %c0_10 = arith.constant 0 : index
    %19 = vector.load %arg5[%c0_9, %c0_10] : memref<1x512xf32, #tpu.memory_space<vmem>>, vector<1x512xf32>
    %20 = vector.broadcast %19 : vector<1x512xf32> to vector<64x512xf32>
    %21 = arith.addf %18, %20 : vector<64x512xf32>
    %cst_11 = arith.constant 5.000000e-01 : f32
    %22 = vector.broadcast %cst_11 : f32 to vector<64x512xf32>
    %23 = arith.mulf %22, %21 : vector<64x512xf32>
    %cst_12 = arith.constant 0.707106769 : f32
    %24 = vector.broadcast %cst_12 : f32 to vector<64x512xf32>
    %25 = arith.mulf %21, %24 : vector<64x512xf32>
    %26 = math.absf %25 : vector<64x512xf32>
    %cst_13 = arith.constant 0.327591091 : f32
    %27 = vector.broadcast %cst_13 : f32 to vector<64x512xf32>
    %28 = arith.mulf %27, %26 : vector<64x512xf32>
    %cst_14 = arith.constant 1.000000e+00 : f32
    %29 = vector.broadcast %cst_14 : f32 to vector<64x512xf32>
    %30 = arith.addf %29, %28 : vector<64x512xf32>
    %cst_15 = arith.constant 1.000000e+00 : f32
    %31 = vector.broadcast %cst_15 : f32 to vector<64x512xf32>
    %32 = arith.divf %31, %30 : vector<64x512xf32>
    %cst_16 = arith.constant 1.06140542 : f32
    %33 = vector.broadcast %cst_16 : f32 to vector<64x512xf32>
    %34 = arith.mulf %33, %32 : vector<64x512xf32>
    %cst_17 = arith.constant -1.45315206 : f32
    %35 = vector.broadcast %cst_17 : f32 to vector<64x512xf32>
    %36 = arith.addf %34, %35 : vector<64x512xf32>
    %37 = arith.mulf %36, %32 : vector<64x512xf32>
    %cst_18 = arith.constant 1.42141378 : f32
    %38 = vector.broadcast %cst_18 : f32 to vector<64x512xf32>
    %39 = arith.addf %37, %38 : vector<64x512xf32>
    %40 = arith.mulf %39, %32 : vector<64x512xf32>
    %cst_19 = arith.constant -0.284496725 : f32
    %41 = vector.broadcast %cst_19 : f32 to vector<64x512xf32>
    %42 = arith.addf %40, %41 : vector<64x512xf32>
    %43 = arith.mulf %42, %32 : vector<64x512xf32>
    %cst_20 = arith.constant 0.254829586 : f32
    %44 = vector.broadcast %cst_20 : f32 to vector<64x512xf32>
    %45 = arith.addf %43, %44 : vector<64x512xf32>
    %46 = arith.mulf %45, %32 : vector<64x512xf32>
    %cst_21 = arith.constant 0.000000e+00 : f32
    %47 = vector.broadcast %cst_21 : f32 to vector<64x512xf32>
    %48 = arith.subf %47, %26 : vector<64x512xf32>
    %49 = arith.mulf %48, %26 : vector<64x512xf32>
    %50 = math.exp %49 : vector<64x512xf32>
    %51 = arith.mulf %46, %50 : vector<64x512xf32>
    %cst_22 = arith.constant 1.000000e+00 : f32
    %52 = vector.broadcast %cst_22 : f32 to vector<64x512xf32>
    %53 = arith.subf %52, %51 : vector<64x512xf32>
    %cst_23 = arith.constant 0.000000e+00 : f32
    %54 = vector.broadcast %cst_23 : f32 to vector<64x512xf32>
    %55 = arith.cmpf oge, %25, %54 : vector<64x512xf32>
    %cst_24 = arith.constant 0.000000e+00 : f32
    %56 = vector.broadcast %cst_24 : f32 to vector<64x512xf32>
    %57 = arith.subf %56, %53 : vector<64x512xf32>
    %58 = arith.select %55, %53, %57 : vector<64x512xi1>, vector<64x512xf32>
    %cst_25 = arith.constant 1.000000e+00 : f32
    %59 = vector.broadcast %cst_25 : f32 to vector<64x512xf32>
    %60 = arith.addf %59, %58 : vector<64x512xf32>
    %61 = arith.mulf %23, %60 : vector<64x512xf32>
    %62 = arith.truncf %61 : vector<64x512xf32> to vector<64x512xbf16>
    %c0_26 = arith.constant 0 : index
    %c0_27 = arith.constant 0 : index
    %63 = vector.load %arg6[%c0_26, %c0_27] : memref<512x128xbf16, #tpu.memory_space<vmem>>, vector<512x128xbf16>
    %cst_28 = arith.constant dense<0.000000e+00> : vector<64x128xf32>
    %64 = tpu.matmul %62, %63, %cst_28 {dimension_numbers = #tpu.dot_dimension_numbers<[1], [0], [0], [1], [0, 0, 1, 1], [], []>} : vector<64x512xbf16>, vector<512x128xbf16>, vector<64x128xf32> -> vector<64x128xf32>
    %c0_29 = arith.constant 0 : index
    %c0_30 = arith.constant 0 : index
    %65 = vector.load %arg7[%c0_29, %c0_30] : memref<1x128xf32, #tpu.memory_space<vmem>>, vector<1x128xf32>
    %66 = vector.broadcast %65 : vector<1x128xf32> to vector<64x128xf32>
    %67 = arith.addf %64, %66 : vector<64x128xf32>
    %68 = vector.shape_cast %67 : vector<64x128xf32> to vector<8x8x128xf32>
    %c0_31 = arith.constant 0 : index
    %c0_32 = arith.constant 0 : index
    %c0_33 = arith.constant 0 : index
    %69 = vector.load %arg2[%c0_31, %c0_32, %c0_33] : memref<8x8x128xf32, #tpu.memory_space<vmem>>, vector<8x8x128xf32>
    %70 = arith.addf %68, %69 : vector<8x8x128xf32>
    %c0_34 = arith.constant 0 : index
    %c0_35 = arith.constant 0 : index
    %c0_36 = arith.constant 0 : index
    %71 = vector.load %arg8[%c0_34, %c0_35, %c0_36] : memref<8x8x128xf32, #tpu.memory_space<vmem>>, vector<8x8x128xf32>
    tpu.vector_store %arg8[%c0_34, %c0_35, %c0_36], %70 {strides = array<i32>} : memref<8x8x128xf32, #tpu.memory_space<vmem>>, vector<8x8x128xf32>,
    return
  }
  func.func @transform_0(%arg0: i32) -> (i32, i32, i32) {
    %c0_i32 = arith.constant 0 : i32
    %c0_i32_0 = arith.constant 0 : i32
    %c0_i32_1 = arith.constant 0 : i32
    return %arg0, %c0_i32, %c0_i32_0 : i32, i32, i32
  }
  func.func @transform_1(%arg0: i32) -> (i32, i32, i32) {
    %c0_i32 = arith.constant 0 : i32
    %c0_i32_0 = arith.constant 0 : i32
    %c0_i32_1 = arith.constant 0 : i32
    return %arg0, %c0_i32, %c0_i32_0 : i32, i32, i32
  }
  func.func @transform_2(%arg0: i32) -> (i32, i32) {
    %c0_i32 = arith.constant 0 : i32
    %c0_i32_0 = arith.constant 0 : i32
    %c0_i32_1 = arith.constant 0 : i32
    return %c0_i32, %c0_i32_0 : i32, i32
  }
  func.func @transform_3(%arg0: i32) -> (i32, i32) {
    %c0_i32 = arith.constant 0 : i32
    %c0_i32_0 = arith.constant 0 : i32
    %c0_i32_1 = arith.constant 0 : i32
    return %c0_i32, %c0_i32_0 : i32, i32
  }
  func.func @transform_4(%arg0: i32) -> (i32, i32) {
    %c0_i32 = arith.constant 0 : i32
    %c0_i32_0 = arith.constant 0 : i32
    %c0_i32_1 = arith.constant 0 : i32
    return %c0_i32, %c0_i32_0 : i32, i32
  }
  func.func @transform_5(%arg0: i32) -> (i32, i32) {
    %c0_i32 = arith.constant 0 : i32
    %c0_i32_0 = arith.constant 0 : i32
    %c0_i32_1 = arith.constant 0 : i32
    return %c0_i32, %c0_i32_0 : i32, i32
  }
  func.func @transform_6(%arg0: i32) -> (i32, i32) {
    %c0_i32 = arith.constant 0 : i32
    %c0_i32_0 = arith.constant 0 : i32
    %c0_i32_1 = arith.constant 0 : i32
    return %c0_i32, %c0_i32_0 : i32, i32
  }
  func.func @transform_7(%arg0: i32) -> (i32, i32, i32) {
    %c0_i32 = arith.constant 0 : i32
    %c0_i32_0 = arith.constant 0 : i32
    %c0_i32_1 = arith.constant 0 : i32
    return %arg0, %c0_i32, %c0_i32_0 : i32, i32, i32
  }
}

module attributes {stable_mosaic.version = 11 : i64} {
  func.func @_linear_kernel(%arg0: i32, %arg1: memref<40x128xf32, #tpu.memory_space<vmem>>, %arg2: memref<128x256xbf16, #tpu.memory_space<vmem>>, %arg3: memref<1x256xf32, #tpu.memory_space<vmem>>, %arg4: memref<40x256xf32, #tpu.memory_space<vmem>>) attributes {dimension_semantics = [#tpu.dimension_semantics<parallel>], iteration_bounds = array<i64: 1>, scalar_prefetch = 0 : i64, scratch_operands = 0 : i64, tpu.core_type = #tpu.core_type<tc>, window_params = [{transform_indices = @transform_0, window_bounds = array<i64: 40, 128>}, {pipeline_mode = #tpu.pipeline_mode<synchronous>, transform_indices = @transform_1, window_bounds = array<i64: 128, 256>}, {pipeline_mode = #tpu.pipeline_mode<synchronous>, transform_indices = @transform_2, window_bounds = array<i64: 1, 256>}, {transform_indices = @transform_3, window_bounds = array<i64: 40, 256>}]} {
    %c0 = arith.constant 0 : index
    %c0_0 = arith.constant 0 : index
    %0 = vector.load %arg1[%c0, %c0_0] : memref<40x128xf32, #tpu.memory_space<vmem>>, vector<40x128xf32>
    %1 = arith.truncf %0 : vector<40x128xf32> to vector<40x128xbf16>
    %c0_1 = arith.constant 0 : index
    %c0_2 = arith.constant 0 : index
    %2 = vector.load %arg2[%c0_1, %c0_2] : memref<128x256xbf16, #tpu.memory_space<vmem>>, vector<128x256xbf16>
    %cst = arith.constant dense<0.000000e+00> : vector<40x256xf32>
    %3 = tpu.matmul %1, %2, %cst {dimension_numbers = #tpu.dot_dimension_numbers<[1], [0], [0], [1], [0, 0, 1, 1], [], []>} : vector<40x128xbf16>, vector<128x256xbf16>, vector<40x256xf32> -> vector<40x256xf32>
    %c0_3 = arith.constant 0 : index
    %c0_4 = arith.constant 0 : index
    %4 = vector.load %arg3[%c0_3, %c0_4] : memref<1x256xf32, #tpu.memory_space<vmem>>, vector<1x256xf32>
    %5 = vector.broadcast %4 : vector<1x256xf32> to vector<40x256xf32>
    %6 = arith.addf %3, %5 : vector<40x256xf32>
    %c0_5 = arith.constant 0 : index
    %c0_6 = arith.constant 0 : index
    %7 = vector.load %arg4[%c0_5, %c0_6] : memref<40x256xf32, #tpu.memory_space<vmem>>, vector<40x256xf32>
    tpu.vector_store %arg4[%c0_5, %c0_6], %6 {strides = array<i32>} : memref<40x256xf32, #tpu.memory_space<vmem>>, vector<40x256xf32>,
    return
  }
  func.func @transform_0(%arg0: i32) -> (i32, i32) {
    %c0_i32 = arith.constant 0 : i32
    %c0_i32_0 = arith.constant 0 : i32
    return %arg0, %c0_i32 : i32, i32
  }
  func.func @transform_1(%arg0: i32) -> (i32, i32) {
    %c0_i32 = arith.constant 0 : i32
    %c0_i32_0 = arith.constant 0 : i32
    %c0_i32_1 = arith.constant 0 : i32
    return %c0_i32, %c0_i32_0 : i32, i32
  }
  func.func @transform_2(%arg0: i32) -> (i32, i32) {
    %c0_i32 = arith.constant 0 : i32
    %c0_i32_0 = arith.constant 0 : i32
    %c0_i32_1 = arith.constant 0 : i32
    return %c0_i32, %c0_i32_0 : i32, i32
  }
  func.func @transform_3(%arg0: i32) -> (i32, i32) {
    %c0_i32 = arith.constant 0 : i32
    %c0_i32_0 = arith.constant 0 : i32
    return %arg0, %c0_i32 : i32, i32
  }
}

</mosaic_0001>

<bundles_post_ra>
// kernel: megabyte_forward.7
= control target key start
LH: loop header
LB: loop body
LE: loop exit
PB: predicated region body
PF: predicated region fallthrough
CT: control target
= control target key end

     0   :  { %s903_s1 = inlined_call_operand.vmem [shape: bf16[512,256], index: 1, kind: input, shape index: {}]   ;;  %s904_s0 = inlined_call_operand.vmem [shape: f32[8,512], index: 0, kind: input, shape index: {}]   ;;  %s905_s2 = inlined_call_operand.vmem [shape: f32[1,256], index: 2, kind: input, shape index: {}]   ;;  %s906_s3 = inlined_call_operand.vmem [shape: f32[8,256], index: 3, kind: output, shape index: {}]  }
   0x1   :  { %v574_v0 = vld [vmem:[%s903_s1 + $0x4] ss:$8 sps:$4 sm:$0xff]   ;;  %v578_v2 = vld [vmem:[%s903_s1] ss:$8 sps:$4 sm:$0xff]   ;;  %v580_v4 = vld [vmem:[%s903_s1 + $0x14] ss:$8 sps:$4 sm:$0xff]  }
   0x2   :  { %v576_v1 = vld [vmem:[%s903_s1 + $0x104] ss:$8 sps:$4 sm:$0xff]   ;;  %418 = vmatprep.subr.bf16.mxu1 %v574_v0  ;;  %v579_v3 = vld [vmem:[%s903_s1 + $0x100] ss:$8 sps:$4 sm:$0xff]   ;;  %v582_v5 = vld [vmem:[%s903_s1 + $0x114] ss:$8 sps:$4 sm:$0xff]  }
   0x3   :  { %459 = vmatprep.subr.bf16.mxu0 %v576_v1  ;;  %419 = vmatpush1.bf16.msra.mxu1 %v578_v2  ;;  %v584_v6 = vld [vmem:[%s903_s1 + $0x10] ss:$8 sps:$4 sm:$0xff]   ;;  %v586_v8 = vld [vmem:[%s903_s1 + $0x24] ss:$8 sps:$4 sm:$0xff]   ;;  %v590_v10 = vld [vmem:[%s903_s1 + $0x20] ss:$8 sps:$4 sm:$0xff]  }
   0x4   :  { %460 = vmatpush1.bf16.msra.mxu0 %v579_v3  ;;  %420 = vmatprep.subr.bf16.mxu1 %v580_v4  ;;  %v585_v7 = vld [vmem:[%s903_s1 + $0x110] ss:$8 sps:$4 sm:$0xff]   ;;  %v588_v9 = vld [vmem:[%s903_s1 + $0x124] ss:$8 sps:$4 sm:$0xff]   ;;  %v591_v11 = vld [vmem:[%s903_s1 + $0x120] ss:$8 sps:$4 sm:$0xff]  }
   0x5   :  { %461 = vmatprep.subr.bf16.mxu0 %v582_v5  ;;  %v592_v12 = vld [vmem:[%s903_s1 + $0x34] ss:$8 sps:$4 sm:$0xff]   ;;  %v596_v14 = vld [vmem:[%s903_s1 + $0x30] ss:$8 sps:$4 sm:$0xff]   ;;  %v598_v16 = vld [vmem:[%s903_s1 + $0x44] ss:$8 sps:$4 sm:$0xff]  }
   0x6   :  { %v594_v13 = vld [vmem:[%s903_s1 + $0x134] ss:$8 sps:$4 sm:$0xff]   ;;  %v597_v15 = vld [vmem:[%s903_s1 + $0x130] ss:$8 sps:$4 sm:$0xff]   ;;  %v600_v17 = vld [vmem:[%s903_s1 + $0x144] ss:$8 sps:$4 sm:$0xff]  }
   0x7   :  { %421 = vmatpush1.bf16.msra.mxu1 %v584_v6  ;;  %v602_v18 = vld [vmem:[%s903_s1 + $0x40] ss:$8 sps:$4 sm:$0xff]   ;;  %v604_v20 = vld [vmem:[%s903_s1 + $0x54] ss:$8 sps:$4 sm:$0xff]   ;;  %v608_v22 = vld [vmem:[%s903_s1 + $0x50] ss:$8 sps:$4 sm:$0xff]  }
   0x8   :  { %462 = vmatpush1.bf16.msra.mxu0 %v585_v7  ;;  %422 = vmatprep.subr.bf16.mxu1 %v586_v8  ;;  %v603_v19 = vld [vmem:[%s903_s1 + $0x140] ss:$8 sps:$4 sm:$0xff]   ;;  %v606_v21 = vld [vmem:[%s903_s1 + $0x154] ss:$8 sps:$4 sm:$0xff]   ;;  %v609_v23 = vld [vmem:[%s903_s1 + $0x150] ss:$8 sps:$4 sm:$0xff]   ;;  %v88_v8 = vlaneseq }
   0x9   :  { %463 = vmatprep.subr.bf16.mxu0 %v588_v9  ;;  %v610_v24 = vld [vmem:[%s903_s1 + $0x64] ss:$8 sps:$4 sm:$0xff]   ;;  %v614_v26 = vld [vmem:[%s903_s1 + $0x60] ss:$8 sps:$4 sm:$0xff]   ;;  %v616_v28 = vld [vmem:[%s903_s1 + $0x74] ss:$8 sps:$4 sm:$0xff]  }
   0xa   :  { %v612_v25 = vld [vmem:[%s903_s1 + $0x164] ss:$8 sps:$4 sm:$0xff]   ;;  %v615_v27 = vld [vmem:[%s903_s1 + $0x160] ss:$8 sps:$4 sm:$0xff]   ;;  %v618_v29 = vld [vmem:[%s903_s1 + $0x174] ss:$8 sps:$4 sm:$0xff]  }
   0xb   :  { %423 = vmatpush1.bf16.msra.mxu1 %v590_v10  ;;  %v620_v30 = vld [vmem:[%s903_s1 + $0x70] ss:$8 sps:$4 sm:$0xff]   ;;  %v622_v32 = vld [vmem:[%s903_s1 + $0x84] ss:$8 sps:$4 sm:$0xff]   ;;  %v626_v34 = vld [vmem:[%s903_s1 + $0x80] ss:$8 sps:$4 sm:$0xff]  }
   0xc   :  { %464 = vmatpush1.bf16.msra.mxu0 %v591_v11  ;;  %424 = vmatprep.subr.bf16.mxu1 %v592_v12  ;;  %v621_v31 = vld [vmem:[%s903_s1 + $0x170] ss:$8 sps:$4 sm:$0xff]   ;;  %v624_v33 = vld [vmem:[%s903_s1 + $0x184] ss:$8 sps:$4 sm:$0xff]   ;;  %v627_v35 = vld [vmem:[%s903_s1 + $0x180] ss:$8 sps:$4 sm:$0xff]  }
   0xd   :  { %465 = vmatprep.subr.bf16.mxu0 %v594_v13  ;;  %v628_v36 = vld [vmem:[%s903_s1 + $0x94] ss:$8 sps:$4 sm:$0xff]   ;;  %v632_v38 = vld [vmem:[%s903_s1 + $0x90] ss:$8 sps:$4 sm:$0xff]   ;;  %v634_v40 = vld [vmem:[%s903_s1 + $0xa4] ss:$8 sps:$4 sm:$0xff]  }
   0xe   :  { %v630_v37 = vld [vmem:[%s903_s1 + $0x194] ss:$8 sps:$4 sm:$0xff]   ;;  %v633_v39 = vld [vmem:[%s903_s1 + $0x190] ss:$8 sps:$4 sm:$0xff]   ;;  %v636_v41 = vld [vmem:[%s903_s1 + $0x1a4] ss:$8 sps:$4 sm:$0xff]  }
   0xf   :  { %425 = vmatpush1.bf16.msra.mxu1 %v596_v14  ;;  %v638_v42 = vld [vmem:[%s903_s1 + $0xa0] ss:$8 sps:$4 sm:$0xff]   ;;  %v640_v44 = vld [vmem:[%s903_s1 + $0xb4] ss:$8 sps:$4 sm:$0xff]   ;;  %v644_v49 = vld [vmem:[%s903_s1 + $0xb0] ss:$8 sps:$4 sm:$0xff]  }
  0x10   :  { %466 = vmatpush1.bf16.msra.mxu0 %v597_v15  ;;  %426 = vmatprep.subr.bf16.mxu1 %v598_v16  ;;  %v639_v43 = vld [vmem:[%s903_s1 + $0x1a0] ss:$8 sps:$4 sm:$0xff]   ;;  %v642_v45 = vld [vmem:[%s903_s1 + $0x1b4] ss:$8 sps:$4 sm:$0xff]   ;;  %v645_v50 = vld [vmem:[%s903_s1 + $0x1b0] ss:$8 sps:$4 sm:$0xff]  }
  0x11   :  { %467 = vmatprep.subr.bf16.mxu0 %v600_v17  ;;  %v15_v46 = vld [vmem:[%s904_s0 + $0x8] sm:$0xff]  ;;  %v17_v48 = vld [vmem:[%s904_s0 + $0x18] sm:$0xff]  ;;  %v14_v4 = vld [vmem:[%s904_s0] sm:$0xff]  ;;  %v89_v9 = vshrl.u32 %v88_v8, 7 }
  0x12   :  { %v19_v47 = vpack.c.bf16 %v15_v46, %v15_v46  ;;  %v21_v51 = vpack.c.bf16 %v17_v48, %v17_v48  ;;  %v646_v52 = vld [vmem:[%s903_s1 + $0xc4] ss:$8 sps:$4 sm:$0xff]   ;;  %v650_v54 = vld [vmem:[%s903_s1 + $0xc0] ss:$8 sps:$4 sm:$0xff]   ;;  %v652_v56 = vld [vmem:[%s903_s1 + $0xd4] ss:$8 sps:$4 sm:$0xff]   ;;  %v18_v6 = vpack.c.bf16 %v14_v4, %v14_v4 }
  0x13   :  { %427 = vmatpush1.bf16.msra.mxu1 %v602_v18  ;;  %v648_v53 = vld [vmem:[%s903_s1 + $0x1c4] ss:$8 sps:$4 sm:$0xff]   ;;  %v651_v55 = vld [vmem:[%s903_s1 + $0x1c0] ss:$8 sps:$4 sm:$0xff]   ;;  %v654_v57 = vld [vmem:[%s903_s1 + $0x1d4] ss:$8 sps:$4 sm:$0xff]  }
  0x14   :  { %468 = vmatpush1.bf16.msra.mxu0 %v603_v19  ;;  %428 = vmatprep.subr.bf16.mxu1 %v604_v20  ;;  %v656_v58 = vld [vmem:[%s903_s1 + $0xd0] ss:$8 sps:$4 sm:$0xff]   ;;  %v658_v60 = vld [vmem:[%s903_s1 + $0xe4] ss:$8 sps:$4 sm:$0xff]   ;;  %v662_v62 = vld [vmem:[%s903_s1 + $0xe0] ss:$8 sps:$4 sm:$0xff]  }
  0x15   :  { %469 = vmatprep.subr.bf16.mxu0 %v606_v21  ;;  %450 = vmatprep.mubr.bf16.mxu1 %v19_v47  ;;  %v657_v59 = vld [vmem:[%s903_s1 + $0x1d0] ss:$8 sps:$4 sm:$0xff]   ;;  %v660_v61 = vld [vmem:[%s903_s1 + $0x1e4] ss:$8 sps:$4 sm:$0xff]   ;;  %v663_v63 = vld [vmem:[%s903_s1 + $0x1e0] ss:$8 sps:$4 sm:$0xff]  }
  0x16   :  { %491 = vmatprep.mubr.bf16.mxu0 %v21_v51  ;;  %v664_v0 = vld [vmem:[%s903_s1 + $0xf4] ss:$8 sps:$4 sm:$0xff]   ;;  %v668_v2 = vld [vmem:[%s903_s1 + $0xf0] ss:$8 sps:$4 sm:$0xff]   ;;  %v90_v10 = vsub.s32 0, %v89_v9  ;;  %v94_v12 = vsub.s32 1, %v89_v9 }
  0x17   :  { %429 = vmatpush1.bf16.msra.mxu1 %v608_v22  ;;  %v666_v1 = vld [vmem:[%s903_s1 + $0x1f4] ss:$8 sps:$4 sm:$0xff]   ;;  %v669_v3 = vld [vmem:[%s903_s1 + $0x1f0] ss:$8 sps:$4 sm:$0xff]   ;;  %v86_v11 = vld [vmem:[%s905_s2] sm:$0x3] }
  0x18   :  { %470 = vmatpush1.bf16.msra.mxu0 %v609_v23  ;;  %430 = vmatprep.subr.bf16.mxu1 %v610_v24  ;;  %v16_v5 = vld [vmem:[%s904_s0 + $0x10] sm:$0xff]  ;;  %v91_v13 = vrot.slane %v86_v11, %v90_v10  ;;  %v95_v14 = vrot.slane %v86_v11, %v94_v12 }
  0x19   :  { %471 = vmatprep.subr.bf16.mxu0 %v612_v25  ;;  %v20_v7 = vpack.c.bf16 %v16_v5, %v16_v5 }
  0x1b   :  { %431 = vmatpush1.bf16.msra.mxu1 %v614_v26 }
  0x1c   :  { %472 = vmatpush1.bf16.msra.mxu0 %v615_v27  ;;  %432 = vmatprep.subr.bf16.mxu1 %v616_v28 }
  0x1d   :  { %473 = vmatprep.subr.bf16.mxu0 %v618_v29 }
  0x1f   :  { %433 = vmatpush1.bf16.msra.mxu1 %v620_v30 }
  0x20   :  { %474 = vmatpush1.bf16.msra.mxu0 %v621_v31  ;;  %434 = vmatprep.subr.bf16.mxu1 %v622_v32 }
  0x21   :  { %475 = vmatprep.subr.bf16.mxu0 %v624_v33 }
  0x23   :  { %435 = vmatpush1.bf16.msra.mxu1 %v626_v34 }
  0x24   :  { %476 = vmatpush1.bf16.msra.mxu0 %v627_v35  ;;  %436 = vmatprep.subr.bf16.mxu1 %v628_v36 }
  0x25   :  { %477 = vmatprep.subr.bf16.mxu0 %v630_v37 }
  0x27   :  { %437 = vmatpush1.bf16.msra.mxu1 %v632_v38 }
  0x28   :  { %478 = vmatpush1.bf16.msra.mxu0 %v633_v39  ;;  %438 = vmatprep.subr.bf16.mxu1 %v634_v40 }
  0x29   :  { %479 = vmatprep.subr.bf16.mxu0 %v636_v41 }
  0x2b   :  { %439 = vmatpush1.bf16.msra.mxu1 %v638_v42 }
  0x2c   :  { %480 = vmatpush1.bf16.msra.mxu0 %v639_v43  ;;  %440 = vmatprep.subr.bf16.mxu1 %v640_v44 }
  0x2d   :  { %481 = vmatprep.subr.bf16.mxu0 %v642_v45 }
  0x2f   :  { %441 = vmatpush1.bf16.msra.mxu1 %v644_v49 }
  0x30   :  { %482 = vmatpush1.bf16.msra.mxu0 %v645_v50  ;;  %442 = vmatprep.subr.bf16.mxu1 %v646_v52 }
  0x31   :  { %483 = vmatprep.subr.bf16.mxu0 %v648_v53 }
  0x33   :  { %443 = vmatpush1.bf16.msra.mxu1 %v650_v54 }
  0x34   :  { %484 = vmatpush1.bf16.msra.mxu0 %v651_v55  ;;  %444 = vmatprep.subr.bf16.mxu1 %v652_v56 }
  0x35   :  { %485 = vmatprep.subr.bf16.mxu0 %v654_v57 }
  0x37   :  { %445 = vmatpush1.bf16.msra.mxu1 %v656_v58 }
  0x38   :  { %486 = vmatpush1.bf16.msra.mxu0 %v657_v59  ;;  %446 = vmatprep.subr.bf16.mxu1 %v658_v60 }
  0x39   :  { %487 = vmatprep.subr.bf16.mxu0 %v660_v61 }
  0x3b   :  { %447 = vmatpush1.bf16.msra.mxu1 %v662_v62 }
  0x3c   :  { %488 = vmatpush1.bf16.msra.mxu0 %v663_v63  ;;  %448 = vmatprep.subr.bf16.mxu1 %v664_v0 }
  0x3d   :  { %489 = vmatprep.subr.bf16.mxu0 %v666_v1 }
  0x3f   :  { %449 = vmatpush1.bf16.msra.mxu1 %v668_v2 }
  0x40   :  { %490 = vmatpush1.bf16.msra.mxu0 %v669_v3 }
  0x42   :  { %451 = vmatmul.mubr.bf16.vlgmr.msra.gmra.mrb[0].mxu1 %v18_v6 }
  0x43   :  { %492 = vmatmul.mubr.bf16.vlgmr.msra.gmra.mrb[0].mxu0 %v20_v7 }
 0x115   :  { %v452_v15 = vpop.f32.mrb[0].mxu1 }
 0x116   :  { %v493_v16 = vpop.f32.mrb[0].mxu0  ;;  %v453_v17 = vadd.f32 %v452_v15, %v91_v13  ;;  %v454_v18 = vpop.f32.mrb[1].mxu1 }
 0x117   :  { %v495_v19 = vpop.f32.mrb[1].mxu0  ;;  %v455_v20 = vadd.f32 %v454_v18, %v95_v14  ;;  %v456_v21 = vpop.f32.mrb[2].mxu1 }
 0x118   :  { %v497_v22 = vpop.f32.mrb[2].mxu0  ;;  %v494_v23 = vadd.f32 %v493_v16, %v453_v17  ;;  %v457_v24 = vpop.f32.mrb[3].mxu1 }
 0x119   :  { %v498_v25 = vpop.f32.mrb[3].mxu0  ;;  %v496_v26 = vadd.f32 %v495_v19, %v455_v20 }
 0x11a   :  { %500 = vst [vmem:[%s906_s3] sm:$0xff] %v494_v23 }
 0x11b   :  { %501 = vst [vmem:[%s906_s3 + $0x8] sm:$0xff] %v496_v26 }

// kernel: megabyte_forward.10
= control target key start
LH: loop header
LB: loop body
LE: loop exit
PB: predicated region body
PF: predicated region fallthrough
CT: control target
= control target key end

     0   :  { %s907_s1 = inlined_call_operand.vmem [shape: bf16[256,512], index: 1, kind: input, shape index: {}]   ;;  %s908_s0 = inlined_call_operand.vmem [shape: f32[8,256], index: 0, kind: input, shape index: {}]   ;;  %s909_s2 = inlined_call_operand.vmem [shape: f32[1,512], index: 2, kind: input, shape index: {}]   ;;  %s910_s3 = inlined_call_operand.vmem [shape: f32[8,512], index: 3, kind: output, shape index: {}]  }
   0x1   :  { %v578_v0 = vld [vmem:[%s907_s1 + $0x4] ss:$16 sps:$4 sm:$0xff]   ;;  %v580_v1 = vld [vmem:[%s907_s1 + $0xc] ss:$16 sps:$4 sm:$0xff]   ;;  %v582_v2 = vld [vmem:[%s907_s1] ss:$16 sps:$4 sm:$0xff]  }
   0x2   :  { %424 = vmatprep.subr.bf16.mxu0 %v578_v0  ;;  %v583_v3 = vld [vmem:[%s907_s1 + $0x8] ss:$16 sps:$4 sm:$0xff]   ;;  %465 = vmatprep.subr.bf16.mxu1 %v580_v1  ;;  %v584_v4 = vld [vmem:[%s907_s1 + $0x24] ss:$16 sps:$4 sm:$0xff]   ;;  %v586_v5 = vld [vmem:[%s907_s1 + $0x2c] ss:$16 sps:$4 sm:$0xff]  }
   0x3   :  { %425 = vmatpush1.bf16.msra.mxu0 %v582_v2  ;;  %466 = vmatpush1.bf16.msra.mxu1 %v583_v3  ;;  %v588_v6 = vld [vmem:[%s907_s1 + $0x20] ss:$16 sps:$4 sm:$0xff]   ;;  %v589_v7 = vld [vmem:[%s907_s1 + $0x28] ss:$16 sps:$4 sm:$0xff]   ;;  %v590_v8 = vld [vmem:[%s907_s1 + $0x44] ss:$16 sps:$4 sm:$0xff]  }
   0x4   :  { %426 = vmatprep.subr.bf16.mxu0 %v584_v4  ;;  %467 = vmatprep.subr.bf16.mxu1 %v586_v5  ;;  %v592_v9 = vld [vmem:[%s907_s1 + $0x4c] ss:$16 sps:$4 sm:$0xff]   ;;  %v594_v10 = vld [vmem:[%s907_s1 + $0x40] ss:$16 sps:$4 sm:$0xff]   ;;  %v595_v11 = vld [vmem:[%s907_s1 + $0x48] ss:$16 sps:$4 sm:$0xff]   ;;  %v84_v4 = vlaneseq }
   0x5   :  { %v596_v12 = vld [vmem:[%s907_s1 + $0x64] ss:$16 sps:$4 sm:$0xff]   ;;  %v598_v13 = vld [vmem:[%s907_s1 + $0x6c] ss:$16 sps:$4 sm:$0xff]   ;;  %v600_v14 = vld [vmem:[%s907_s1 + $0x60] ss:$16 sps:$4 sm:$0xff]  }
   0x6   :  { %v601_v15 = vld [vmem:[%s907_s1 + $0x68] ss:$16 sps:$4 sm:$0xff]   ;;  %v602_v16 = vld [vmem:[%s907_s1 + $0x84] ss:$16 sps:$4 sm:$0xff]   ;;  %v604_v17 = vld [vmem:[%s907_s1 + $0x8c] ss:$16 sps:$4 sm:$0xff]  }
   0x7   :  { %427 = vmatpush1.bf16.msra.mxu0 %v588_v6  ;;  %468 = vmatpush1.bf16.msra.mxu1 %v589_v7  ;;  %v606_v18 = vld [vmem:[%s907_s1 + $0x80] ss:$16 sps:$4 sm:$0xff]   ;;  %v607_v19 = vld [vmem:[%s907_s1 + $0x88] ss:$16 sps:$4 sm:$0xff]   ;;  %v608_v20 = vld [vmem:[%s907_s1 + $0xa4] ss:$16 sps:$4 sm:$0xff]  }
   0x8   :  { %428 = vmatprep.subr.bf16.mxu0 %v590_v8  ;;  %469 = vmatprep.subr.bf16.mxu1 %v592_v9  ;;  %v610_v21 = vld [vmem:[%s907_s1 + $0xac] ss:$16 sps:$4 sm:$0xff]   ;;  %v612_v22 = vld [vmem:[%s907_s1 + $0xa0] ss:$16 sps:$4 sm:$0xff]   ;;  %v613_v23 = vld [vmem:[%s907_s1 + $0xa8] ss:$16 sps:$4 sm:$0xff]  }
   0x9   :  { %v614_v24 = vld [vmem:[%s907_s1 + $0xc4] ss:$16 sps:$4 sm:$0xff]   ;;  %v616_v25 = vld [vmem:[%s907_s1 + $0xcc] ss:$16 sps:$4 sm:$0xff]   ;;  %v618_v26 = vld [vmem:[%s907_s1 + $0xc0] ss:$16 sps:$4 sm:$0xff]  }
   0xa   :  { %v619_v27 = vld [vmem:[%s907_s1 + $0xc8] ss:$16 sps:$4 sm:$0xff]   ;;  %v620_v28 = vld [vmem:[%s907_s1 + $0xe4] ss:$16 sps:$4 sm:$0xff]   ;;  %v622_v29 = vld [vmem:[%s907_s1 + $0xec] ss:$16 sps:$4 sm:$0xff]  }
   0xb   :  { %429 = vmatpush1.bf16.msra.mxu0 %v594_v10  ;;  %470 = vmatpush1.bf16.msra.mxu1 %v595_v11  ;;  %v624_v30 = vld [vmem:[%s907_s1 + $0xe0] ss:$16 sps:$4 sm:$0xff]   ;;  %v625_v31 = vld [vmem:[%s907_s1 + $0xe8] ss:$16 sps:$4 sm:$0xff]   ;;  %v626_v32 = vld [vmem:[%s907_s1 + $0x104] ss:$16 sps:$4 sm:$0xff]  }
   0xc   :  { %430 = vmatprep.subr.bf16.mxu0 %v596_v12  ;;  %471 = vmatprep.subr.bf16.mxu1 %v598_v13  ;;  %v628_v33 = vld [vmem:[%s907_s1 + $0x10c] ss:$16 sps:$4 sm:$0xff]   ;;  %v630_v34 = vld [vmem:[%s907_s1 + $0x100] ss:$16 sps:$4 sm:$0xff]   ;;  %v631_v35 = vld [vmem:[%s907_s1 + $0x108] ss:$16 sps:$4 sm:$0xff]  }
   0xd   :  { %v632_v36 = vld [vmem:[%s907_s1 + $0x124] ss:$16 sps:$4 sm:$0xff]   ;;  %v634_v37 = vld [vmem:[%s907_s1 + $0x12c] ss:$16 sps:$4 sm:$0xff]   ;;  %v636_v38 = vld [vmem:[%s907_s1 + $0x120] ss:$16 sps:$4 sm:$0xff]  }
   0xe   :  { %v637_v39 = vld [vmem:[%s907_s1 + $0x128] ss:$16 sps:$4 sm:$0xff]   ;;  %v638_v40 = vld [vmem:[%s907_s1 + $0x144] ss:$16 sps:$4 sm:$0xff]   ;;  %v640_v41 = vld [vmem:[%s907_s1 + $0x14c] ss:$16 sps:$4 sm:$0xff]  }
   0xf   :  { %431 = vmatpush1.bf16.msra.mxu0 %v600_v14  ;;  %472 = vmatpush1.bf16.msra.mxu1 %v601_v15  ;;  %v642_v42 = vld [vmem:[%s907_s1 + $0x140] ss:$16 sps:$4 sm:$0xff]   ;;  %v643_v43 = vld [vmem:[%s907_s1 + $0x148] ss:$16 sps:$4 sm:$0xff]   ;;  %v644_v44 = vld [vmem:[%s907_s1 + $0x164] ss:$16 sps:$4 sm:$0xff]  }
  0x10   :  { %432 = vmatprep.subr.bf16.mxu0 %v602_v16  ;;  %473 = vmatprep.subr.bf16.mxu1 %v604_v17  ;;  %v646_v45 = vld [vmem:[%s907_s1 + $0x16c] ss:$16 sps:$4 sm:$0xff]   ;;  %v648_v47 = vld [vmem:[%s907_s1 + $0x160] ss:$16 sps:$4 sm:$0xff]   ;;  %v649_v48 = vld [vmem:[%s907_s1 + $0x168] ss:$16 sps:$4 sm:$0xff]  }
  0x11   :  { %v15_v46 = vld [vmem:[%s908_s0 + $0x8] sm:$0xff]  ;;  %v650_v50 = vld [vmem:[%s907_s1 + $0x184] ss:$16 sps:$4 sm:$0xff]   ;;  %v654_v52 = vld [vmem:[%s907_s1 + $0x180] ss:$16 sps:$4 sm:$0xff]   ;;  %v85_v5 = vshrl.u32 %v84_v4, 7 }
  0x12   :  { %v17_v49 = vpack.c.bf16 %v15_v46, %v15_v46  ;;  %v652_v51 = vld [vmem:[%s907_s1 + $0x18c] ss:$16 sps:$4 sm:$0xff]   ;;  %v655_v53 = vld [vmem:[%s907_s1 + $0x188] ss:$16 sps:$4 sm:$0xff]   ;;  %v656_v54 = vld [vmem:[%s907_s1 + $0x1a4] ss:$16 sps:$4 sm:$0xff]  }
  0x13   :  { %433 = vmatpush1.bf16.msra.mxu0 %v606_v18  ;;  %474 = vmatpush1.bf16.msra.mxu1 %v607_v19  ;;  %v658_v55 = vld [vmem:[%s907_s1 + $0x1ac] ss:$16 sps:$4 sm:$0xff]   ;;  %v660_v56 = vld [vmem:[%s907_s1 + $0x1a0] ss:$16 sps:$4 sm:$0xff]   ;;  %v661_v57 = vld [vmem:[%s907_s1 + $0x1a8] ss:$16 sps:$4 sm:$0xff]  }
  0x14   :  { %434 = vmatprep.subr.bf16.mxu0 %v608_v20  ;;  %475 = vmatprep.subr.bf16.mxu1 %v610_v21  ;;  %v662_v58 = vld [vmem:[%s907_s1 + $0x1c4] ss:$16 sps:$4 sm:$0xff]   ;;  %v664_v59 = vld [vmem:[%s907_s1 + $0x1cc] ss:$16 sps:$4 sm:$0xff]   ;;  %v666_v60 = vld [vmem:[%s907_s1 + $0x1c0] ss:$16 sps:$4 sm:$0xff]  }
  0x15   :  { %456 = vmatprep.mubr.bf16.mxu0 %v17_v49  ;;  %497 = vmatprep.mubr.bf16.mxu1 %v17_v49  ;;  %v667_v61 = vld [vmem:[%s907_s1 + $0x1c8] ss:$16 sps:$4 sm:$0xff]   ;;  %v668_v62 = vld [vmem:[%s907_s1 + $0x1e4] ss:$16 sps:$4 sm:$0xff]   ;;  %v670_v63 = vld [vmem:[%s907_s1 + $0x1ec] ss:$16 sps:$4 sm:$0xff]  }
  0x16   :  { %v672_v0 = vld [vmem:[%s907_s1 + $0x1e0] ss:$16 sps:$4 sm:$0xff]   ;;  %v673_v1 = vld [vmem:[%s907_s1 + $0x1e8] ss:$16 sps:$4 sm:$0xff]   ;;  %v86_v6 = vsub.s32 0, %v85_v5  ;;  %v94_v7 = vsub.s32 2, %v85_v5 }
  0x17   :  { %435 = vmatpush1.bf16.msra.mxu0 %v612_v22  ;;  %476 = vmatpush1.bf16.msra.mxu1 %v613_v23  ;;  %v14_v2 = vld [vmem:[%s908_s0] sm:$0xff]  ;;  %v90_v9 = vsub.s32 1, %v85_v5  ;;  %v98_v10 = vsub.s32 3, %v85_v5 }
  0x18   :  { %436 = vmatprep.subr.bf16.mxu0 %v614_v24  ;;  %477 = vmatprep.subr.bf16.mxu1 %v616_v25  ;;  %v16_v3 = vpack.c.bf16 %v14_v2, %v14_v2  ;;  %v82_v8 = vld [vmem:[%s909_s2] sm:$0xf] }
  0x19   :  { %v87_v11 = vrot.slane %v82_v8, %v86_v6  ;;  %v95_v12 = vrot.slane %v82_v8, %v94_v7  ;;  %v91_v13 = vrot.slane %v82_v8, %v90_v9  ;;  %v99_v14 = vrot.slane %v82_v8, %v98_v10 }
  0x1b   :  { %437 = vmatpush1.bf16.msra.mxu0 %v618_v26  ;;  %478 = vmatpush1.bf16.msra.mxu1 %v619_v27 }
  0x1c   :  { %438 = vmatprep.subr.bf16.mxu0 %v620_v28  ;;  %479 = vmatprep.subr.bf16.mxu1 %v622_v29 }
  0x1f   :  { %439 = vmatpush1.bf16.msra.mxu0 %v624_v30  ;;  %480 = vmatpush1.bf16.msra.mxu1 %v625_v31 }
  0x20   :  { %440 = vmatprep.subr.bf16.mxu0 %v626_v32  ;;  %481 = vmatprep.subr.bf16.mxu1 %v628_v33 }
  0x23   :  { %441 = vmatpush1.bf16.msra.mxu0 %v630_v34  ;;  %482 = vmatpush1.bf16.msra.mxu1 %v631_v35 }
  0x24   :  { %442 = vmatprep.subr.bf16.mxu0 %v632_v36  ;;  %483 = vmatprep.subr.bf16.mxu1 %v634_v37 }
  0x27   :  { %443 = vmatpush1.bf16.msra.mxu0 %v636_v38  ;;  %484 = vmatpush1.bf16.msra.mxu1 %v637_v39 }
  0x28   :  { %444 = vmatprep.subr.bf16.mxu0 %v638_v40  ;;  %485 = vmatprep.subr.bf16.mxu1 %v640_v41 }
  0x2b   :  { %445 = vmatpush1.bf16.msra.mxu0 %v642_v42  ;;  %486 = vmatpush1.bf16.msra.mxu1 %v643_v43 }
  0x2c   :  { %446 = vmatprep.subr.bf16.mxu0 %v644_v44  ;;  %487 = vmatprep.subr.bf16.mxu1 %v646_v45 }
  0x2f   :  { %447 = vmatpush1.bf16.msra.mxu0 %v648_v47  ;;  %488 = vmatpush1.bf16.msra.mxu1 %v649_v48 }
  0x30   :  { %448 = vmatprep.subr.bf16.mxu0 %v650_v50  ;;  %489 = vmatprep.subr.bf16.mxu1 %v652_v51 }
  0x33   :  { %449 = vmatpush1.bf16.msra.mxu0 %v654_v52  ;;  %490 = vmatpush1.bf16.msra.mxu1 %v655_v53 }
  0x34   :  { %450 = vmatprep.subr.bf16.mxu0 %v656_v54  ;;  %491 = vmatprep.subr.bf16.mxu1 %v658_v55 }
  0x37   :  { %451 = vmatpush1.bf16.msra.mxu0 %v660_v56  ;;  %492 = vmatpush1.bf16.msra.mxu1 %v661_v57 }
  0x38   :  { %452 = vmatprep.subr.bf16.mxu0 %v662_v58  ;;  %493 = vmatprep.subr.bf16.mxu1 %v664_v59 }
  0x3b   :  { %453 = vmatpush1.bf16.msra.mxu0 %v666_v60  ;;  %494 = vmatpush1.bf16.msra.mxu1 %v667_v61 }
  0x3c   :  { %454 = vmatprep.subr.bf16.mxu0 %v668_v62  ;;  %495 = vmatprep.subr.bf16.mxu1 %v670_v63 }
  0x3f   :  { %455 = vmatpush1.bf16.msra.mxu0 %v672_v0  ;;  %496 = vmatpush1.bf16.msra.mxu1 %v673_v1 }
  0x42   :  { %457 = vmatmul.mubr.bf16.vlgmr.msra.gmra.mrb[0].mxu0 %v16_v3  ;;  %498 = vmatmul.mubr.bf16.vlgmr.msra.gmra.mrb[0].mxu1 %v16_v3 }
 0x115   :  { %v458_v15 = vpop.f32.mrb[0].mxu0  ;;  %v499_v16 = vpop.f32.mrb[0].mxu1 }
 0x116   :  { %v459_v17 = vadd.f32 %v458_v15, %v87_v11  ;;  %v500_v18 = vadd.f32 %v499_v16, %v95_v12  ;;  %v460_v19 = vpop.f32.mrb[1].mxu0  ;;  %v501_v20 = vpop.f32.mrb[1].mxu1 }
 0x117   :  { %v461_v21 = vadd.f32 %v460_v19, %v91_v13  ;;  %v502_v22 = vadd.f32 %v501_v20, %v99_v14  ;;  %v462_v23 = vpop.f32.mrb[2].mxu0  ;;  %v503_v24 = vpop.f32.mrb[2].mxu1 }
 0x118   :  { %506 = vst [vmem:[%s910_s3] sm:$0xff] %v459_v17  ;;  %508 = vst [vmem:[%s910_s3 + $0x10] sm:$0xff] %v500_v18  ;;  %v463_v25 = vpop.f32.mrb[3].mxu0  ;;  %v504_v26 = vpop.f32.mrb[3].mxu1 }
 0x119   :  { %507 = vst [vmem:[%s910_s3 + $0x8] sm:$0xff] %v461_v21  ;;  %509 = vst [vmem:[%s910_s3 + $0x18] sm:$0xff] %v502_v22 }

// kernel: megabyte_forward.8
= control target key start
LH: loop header
LB: loop body
LE: loop exit
PB: predicated region body
PF: predicated region fallthrough
CT: control target
= control target key end

     0   :  { %12 = vsyncpa [#allocation3], 0  ;;  %s1880_s0 = inlined_call_operand.vmem [shape: f32[2,8,256], index: 0, kind: input, shape index: {}]   ;;  %s1881_s1 = inlined_call_operand.vmem [shape: f32[2,8,256], index: 1, kind: input, shape index: {}]   ;;  %s1882_s2 = inlined_call_operand.vmem [shape: f32[1,256], index: 2, kind: input, shape index: {}]   ;;  %s1883_s3 = inlined_call_operand.hbm [shape: bf16[256,256], index: 3, kind: input, shape index: {}]   ;;  %s1884_s4 = inlined_call_operand.hbm [shape: bf16[256,256], index: 4, kind: input, shape index: {}]   ;;  %s1885_s5 = inlined_call_operand.hbm [shape: bf16[256,256], index: 5, kind: input, shape index: {}]   ;;  %s1886_s6 = inlined_call_operand.vmem [shape: f32[2,8,8], index: 6, kind: input, shape index: {}]   ;;  %s1887_s7 = inlined_call_operand.vmem [shape: f32[2,8,256], index: 7, kind: output, shape index: {}]  }
   0x1   :  { %13 = vsyncpa [#allocation5], 0  ;;  %s1662_s24 = smov [#allocation4]   ;;  %s1663_s26 = smov [#allocation2]  }
   0x2   :  { %s37_s25 = sshll.u32 %s1662_s24, 4  ;;  %s25_s27 = sshll.u32 %s1663_s26, 4  ;;  %s38_s25 = int_to_ptr.vmem [resolvable:$true] %s37_s25  ;;  %s1709_s27 = int_to_ptr.vmem [resolvable:$true] %s25_s27 }
   0x3   :  { %s1592_s30 = scalar_lea.hbm %s1884_s4, 4096 }
   0x4   :  { %p1593_p0 = scmp.ne.s32.totalorder %s1884_s4, %s1592_s30  ;;  %p1596_p1 = scmp.lt.u32.totalorder %s1592_s30, %s1884_s4 }
   0x6   :  { %p1598_p2 = pnand %p1596_p1, %p1593_p0 }
   0x8   :  { %1601 = shalt.err (!%p1598_p2)
}
   0x9   :  { %s1602_s12 = scalar_lea.vmem %s38_s25, 4096  ;;  %p1607_p4 = scmp.lt.s32.totalorder %s38_s25, %s38_s25 }
   0xa   :  { %p1603_p3 = scmp.ne.s32.totalorder %s38_s25, %s1602_s12  ;;  %p1608_p5 = scmp.lt.s32.totalorder %s1602_s12, %s1602_s12 }
   0xc   :  { %p1609_p6 = por %p1608_p5, %p1607_p4 }
   0xe   :  { %p1610_p7 = pnand %p1609_p6, %p1603_p3 }
  0x10   :  { %1613 = shalt.err (!%p1610_p7)
}
  0x11   :  { %s1664_s13 = smov 128   ;;  %s1665_s14 = smov 8  }
  0x12   :  { %43 = dma.hbm_to_vmem [thread:$0]  %s1884_s4, 4096, %s38_s25, [#allocation5], %s1664_s13, %s1664_s13, %s1665_s14  }
  0x13   :  { %s1614_s19 = scalar_lea.hbm %s1883_s3, 4096 }
  0x14   :  { %p1615_p8 = scmp.ne.s32.totalorder %s1883_s3, %s1614_s19  ;;  %p1618_p9 = scmp.lt.u32.totalorder %s1614_s19, %s1883_s3 }
  0x16   :  { %p1620_p10 = pnand %p1618_p9, %p1615_p8 }
  0x18   :  { %1623 = shalt.err (!%p1620_p10)
}
  0x19   :  { %s1624_s24 = scalar_lea.vmem %s1709_s27, 4096  ;;  %p1629_p12 = scmp.lt.s32.totalorder %s1709_s27, %s1709_s27 }
  0x1a   :  { %p1625_p11 = scmp.ne.s32.totalorder %s1709_s27, %s1624_s24  ;;  %p1630_p13 = scmp.lt.s32.totalorder %s1624_s24, %s1624_s24 }
  0x1c   :  { %p1631_p0 = por %p1630_p13, %p1629_p12 }
  0x1e   :  { %p1632_p1 = pnand %p1631_p0, %p1625_p11 }
  0x20   :  { %1635 = shalt.err (!%p1632_p1)
}
  0x21   :  { %31 = dma.hbm_to_vmem [thread:$0]  %s1883_s3, 4096, %s1709_s27, [#allocation3], %s1664_s13, %s1664_s13, %s1665_s14  }
  0x22   :  { %s1666_s26 = smov [#allocation6]   ;;  %s1636_s8 = scalar_lea.hbm %s1885_s5, 4096 }
  0x23   :  { %s49_s28 = sshll.u32 %s1666_s26, 4  ;;  %p1637_p2 = scmp.ne.s32.totalorder %s1885_s5, %s1636_s8  ;;  %s50_s28 = int_to_ptr.vmem [resolvable:$true] %s49_s28 }
  0x24   :  { %p1640_p3 = scmp.lt.u32.totalorder %s1636_s8, %s1885_s5 }
  0x26   :  { %p1642_p4 = pnand %p1640_p3, %p1637_p2 }
  0x28   :  { %1645 = shalt.err (!%p1642_p4)
}
  0x29   :  { %s1646_s15 = scalar_lea.vmem %s50_s28, 4096  ;;  %p1651_p6 = scmp.lt.s32.totalorder %s50_s28, %s50_s28 }
  0x2a   :  { %p1647_p5 = scmp.ne.s32.totalorder %s50_s28, %s1646_s15  ;;  %p1652_p7 = scmp.lt.s32.totalorder %s1646_s15, %s1646_s15 }
  0x2c   :  { %p1653_p8 = por %p1652_p7, %p1651_p6 }
  0x2e   :  { %p1654_p9 = pnand %p1653_p8, %p1647_p5 }
  0x30   :  { %1657 = shalt.err (!%p1654_p9)
}
  0x31   :  { %55 = dma.hbm_to_vmem [thread:$0]  %s1885_s5, 4096, %s50_s28, [#allocation5], %s1664_s13, %s1664_s13, %s1665_s14  }
  0x32   :  { %1658 = dma.done.wait [#allocation3], 4096  }
  0x33   :  { %1659 = vsyncadd [#allocation3], 4294963200 }
  0x34   :  { %1660 = dma.done.wait [#allocation5], 8192  }
  0x35   :  { %1661 = vsyncadd [#allocation5], 4294959104  ;;  %v1764_v0 = vld [vmem:[%s1880_s0] sm:$0xff]  ;;  %v1769_v1 = vld [vmem:[%s1880_s0 + $0x8] sm:$0xff]  ;;  %vm1668_vm4 = vmmov 0   ;;  %vm709_vm5 = vcmask 1043456  }
  0x36   :  { %v1774_v2 = vld [vmem:[%s1880_s0 + $0x10] sm:$0xff]  ;;  %v73_v3 = vmul.f32 %v1764_v0, %v1764_v0  ;;  %v74_v4 = vmul.f32 %v1769_v1, %v1769_v1  ;;  %v1783_v5 = vld [vmem:[%s1880_s0 + $0x18] sm:$0xff]  ;;  %v1424_v8 = vld [vmem:[#allocation2 + $0x4] ss:$8 sps:$4 sm:$0xff]   ;;  %vm685_vm6 = vcmask 64512  }
  0x37   :  { %v75_v6 = vmul.f32 %v1774_v2, %v1774_v2  ;;  %v76_v7 = vmul.f32 %v1783_v5, %v1783_v5  ;;  %v1426_v10 = vld [vmem:[#allocation4 + $0x4] ss:$8 sps:$4 sm:$0xff]   ;;  %v1428_v11 = vld [vmem:[#allocation2] ss:$8 sps:$4 sm:$0xff]   ;;  %316 = vmatprep.subr.bf16.mxu0 %v1424_v8  ;;  %v1430_v13 = vld [vmem:[#allocation2 + $0x14] ss:$8 sps:$4 sm:$0xff]  }
  0x38   :  { %v77_v9 = vadd.f32 %v74_v4, %v73_v3  ;;  %v1429_v12 = vld [vmem:[#allocation4] ss:$8 sps:$4 sm:$0xff]   ;;  %551 = vmatprep.subr.bf16.mxu1 %v1426_v10  ;;  %v1432_v15 = vld [vmem:[#allocation4 + $0x14] ss:$8 sps:$4 sm:$0xff]   ;;  %317 = vmatpush1.bf16.msra.mxu0 %v1428_v11  ;;  %v1434_v16 = vld [vmem:[#allocation2 + $0x10] ss:$8 sps:$4 sm:$0xff]  }
  0x39   :  { %v80_v14 = vadd.f32 %v76_v7, %v75_v6  ;;  %552 = vmatpush1.bf16.msra.mxu1 %v1429_v12  ;;  %v1435_v17 = vld [vmem:[#allocation4 + $0x10] ss:$8 sps:$4 sm:$0xff]   ;;  %318 = vmatprep.subr.bf16.mxu0 %v1430_v13  ;;  %v1436_v18 = vld [vmem:[#allocation2 + $0x24] ss:$8 sps:$4 sm:$0xff]   ;;  %v1440_v20 = vld [vmem:[#allocation2 + $0x20] ss:$8 sps:$4 sm:$0xff]  }
  0x3a   :  { %78 = vadd.xlane.f32.xlu0 %v77_v9  ;;  %553 = vmatprep.subr.bf16.mxu1 %v1432_v15  ;;  %v1438_v19 = vld [vmem:[#allocation4 + $0x24] ss:$8 sps:$4 sm:$0xff]   ;;  %v1441_v21 = vld [vmem:[#allocation4 + $0x20] ss:$8 sps:$4 sm:$0xff]   ;;  %v1442_v22 = vld [vmem:[#allocation2 + $0x34] ss:$8 sps:$4 sm:$0xff]  }
  0x3b   :  { %v1444_v23 = vld [vmem:[#allocation4 + $0x34] ss:$8 sps:$4 sm:$0xff]   ;;  %v1446_v24 = vld [vmem:[#allocation2 + $0x30] ss:$8 sps:$4 sm:$0xff]   ;;  %v1448_v26 = vld [vmem:[#allocation2 + $0x44] ss:$8 sps:$4 sm:$0xff]  }
  0x3c   :  { %319 = vmatpush1.bf16.msra.mxu0 %v1434_v16  ;;  %v1447_v25 = vld [vmem:[#allocation4 + $0x30] ss:$8 sps:$4 sm:$0xff]   ;;  %v1450_v27 = vld [vmem:[#allocation4 + $0x44] ss:$8 sps:$4 sm:$0xff]   ;;  %v1452_v28 = vld [vmem:[#allocation2 + $0x40] ss:$8 sps:$4 sm:$0xff]  }
  0x3d   :  { %554 = vmatpush1.bf16.msra.mxu1 %v1435_v17  ;;  %320 = vmatprep.subr.bf16.mxu0 %v1436_v18  ;;  %v1453_v29 = vld [vmem:[#allocation4 + $0x40] ss:$8 sps:$4 sm:$0xff]   ;;  %v1454_v30 = vld [vmem:[#allocation2 + $0x54] ss:$8 sps:$4 sm:$0xff]   ;;  %v1458_v32 = vld [vmem:[#allocation2 + $0x50] ss:$8 sps:$4 sm:$0xff]  }
  0x3e   :  { %81 = vadd.xlane.f32.xlu0 %v80_v14  ;;  %555 = vmatprep.subr.bf16.mxu1 %v1438_v19  ;;  %v1456_v31 = vld [vmem:[#allocation4 + $0x54] ss:$8 sps:$4 sm:$0xff]   ;;  %v1459_v33 = vld [vmem:[#allocation4 + $0x50] ss:$8 sps:$4 sm:$0xff]   ;;  %v1460_v34 = vld [vmem:[#allocation2 + $0x64] ss:$8 sps:$4 sm:$0xff]  }
  0x3f   :  { %v1462_v35 = vld [vmem:[#allocation4 + $0x64] ss:$8 sps:$4 sm:$0xff]   ;;  %v1464_v36 = vld [vmem:[#allocation2 + $0x60] ss:$8 sps:$4 sm:$0xff]   ;;  %v1466_v38 = vld [vmem:[#allocation2 + $0x74] ss:$8 sps:$4 sm:$0xff]  }
  0x40   :  { %321 = vmatpush1.bf16.msra.mxu0 %v1440_v20  ;;  %v1465_v37 = vld [vmem:[#allocation4 + $0x60] ss:$8 sps:$4 sm:$0xff]   ;;  %v1468_v39 = vld [vmem:[#allocation4 + $0x74] ss:$8 sps:$4 sm:$0xff]   ;;  %v1470_v40 = vld [vmem:[#allocation2 + $0x70] ss:$8 sps:$4 sm:$0xff]  }
  0x41   :  { %556 = vmatpush1.bf16.msra.mxu1 %v1441_v21  ;;  %322 = vmatprep.subr.bf16.mxu0 %v1442_v22  ;;  %v1471_v41 = vld [vmem:[#allocation4 + $0x70] ss:$8 sps:$4 sm:$0xff]   ;;  %v1472_v42 = vld [vmem:[#allocation2 + $0x84] ss:$8 sps:$4 sm:$0xff]   ;;  %v1476_v44 = vld [vmem:[#allocation2 + $0x80] ss:$8 sps:$4 sm:$0xff]  }
  0x42   :  { %557 = vmatprep.subr.bf16.mxu1 %v1444_v23  ;;  %v1474_v43 = vld [vmem:[#allocation4 + $0x84] ss:$8 sps:$4 sm:$0xff]   ;;  %v1477_v45 = vld [vmem:[#allocation4 + $0x80] ss:$8 sps:$4 sm:$0xff]   ;;  %v1478_v46 = vld [vmem:[#allocation2 + $0x94] ss:$8 sps:$4 sm:$0xff]  }
  0x43   :  { %v1480_v47 = vld [vmem:[#allocation4 + $0x94] ss:$8 sps:$4 sm:$0xff]   ;;  %v1482_v48 = vld [vmem:[#allocation2 + $0x90] ss:$8 sps:$4 sm:$0xff]   ;;  %v1484_v50 = vld [vmem:[#allocation2 + $0xa4] ss:$8 sps:$4 sm:$0xff]  }
  0x44   :  { %323 = vmatpush1.bf16.msra.mxu0 %v1446_v24  ;;  %v1483_v49 = vld [vmem:[#allocation4 + $0x90] ss:$8 sps:$4 sm:$0xff]   ;;  %v1486_v51 = vld [vmem:[#allocation4 + $0xa4] ss:$8 sps:$4 sm:$0xff]   ;;  %v1488_v52 = vld [vmem:[#allocation2 + $0xa0] ss:$8 sps:$4 sm:$0xff]  }
  0x45   :  { %558 = vmatpush1.bf16.msra.mxu1 %v1447_v25  ;;  %324 = vmatprep.subr.bf16.mxu0 %v1448_v26  ;;  %v1489_v53 = vld [vmem:[#allocation4 + $0xa0] ss:$8 sps:$4 sm:$0xff]   ;;  %v1490_v54 = vld [vmem:[#allocation2 + $0xb4] ss:$8 sps:$4 sm:$0xff]   ;;  %v1494_v56 = vld [vmem:[#allocation2 + $0xb0] ss:$8 sps:$4 sm:$0xff]  }
  0x46   :  { %559 = vmatprep.subr.bf16.mxu1 %v1450_v27  ;;  %v1492_v55 = vld [vmem:[#allocation4 + $0xb4] ss:$8 sps:$4 sm:$0xff]   ;;  %v1495_v57 = vld [vmem:[#allocation4 + $0xb0] ss:$8 sps:$4 sm:$0xff]   ;;  %v1496_v58 = vld [vmem:[#allocation2 + $0xc4] ss:$8 sps:$4 sm:$0xff]  }
  0x47   :  { %v1498_v59 = vld [vmem:[#allocation4 + $0xc4] ss:$8 sps:$4 sm:$0xff]   ;;  %v1500_v60 = vld [vmem:[#allocation2 + $0xc0] ss:$8 sps:$4 sm:$0xff]   ;;  %v1502_v62 = vld [vmem:[#allocation2 + $0xd4] ss:$8 sps:$4 sm:$0xff]  }
  0x48   :  { %325 = vmatpush1.bf16.msra.mxu0 %v1452_v28  ;;  %v1501_v61 = vld [vmem:[#allocation4 + $0xc0] ss:$8 sps:$4 sm:$0xff]   ;;  %v1504_v63 = vld [vmem:[#allocation4 + $0xd4] ss:$8 sps:$4 sm:$0xff]   ;;  %v1506_v3 = vld [vmem:[#allocation2 + $0xd0] ss:$8 sps:$4 sm:$0xff]  }
  0x49   :  { %560 = vmatpush1.bf16.msra.mxu1 %v1453_v29  ;;  %326 = vmatprep.subr.bf16.mxu0 %v1454_v30  ;;  %v1507_v4 = vld [vmem:[#allocation4 + $0xd0] ss:$8 sps:$4 sm:$0xff]   ;;  %v1508_v6 = vld [vmem:[#allocation2 + $0xe4] ss:$8 sps:$4 sm:$0xff]   ;;  %v1512_v8 = vld [vmem:[#allocation2 + $0xe0] ss:$8 sps:$4 sm:$0xff]   ;;  %v108_v29 = vlaneseq }
  0x4a   :  { %561 = vmatprep.subr.bf16.mxu1 %v1456_v31  ;;  %v1510_v7 = vld [vmem:[#allocation4 + $0xe4] ss:$8 sps:$4 sm:$0xff]   ;;  %v1513_v9 = vld [vmem:[#allocation4 + $0xe0] ss:$8 sps:$4 sm:$0xff]   ;;  %v1514_v10 = vld [vmem:[#allocation2 + $0xf4] ss:$8 sps:$4 sm:$0xff]  }
  0x4b   :  { %v1516_v11 = vld [vmem:[#allocation4 + $0xf4] ss:$8 sps:$4 sm:$0xff]   ;;  %v1518_v12 = vld [vmem:[#allocation2 + $0xf0] ss:$8 sps:$4 sm:$0xff]   ;;  %v109_v31 = vshrl.u32 %v108_v29, 7 }
  0x4c   :  { %327 = vmatpush1.bf16.msra.mxu0 %v1458_v32  ;;  %v1519_v13 = vld [vmem:[#allocation4 + $0xf0] ss:$8 sps:$4 sm:$0xff]  }
  0x4d   :  { %562 = vmatpush1.bf16.msra.mxu1 %v1459_v33  ;;  %328 = vmatprep.subr.bf16.mxu0 %v1460_v34  ;;  %v110_v32 = vsub.s32 0, %v109_v31  ;;  %v114_v33 = vsub.s32 1, %v109_v31 }
  0x4e   :  { %563 = vmatprep.subr.bf16.mxu1 %v1462_v35  ;;  %v72_v35 = vld [vmem:[%s1882_s2] sm:$0x3] }
  0x50   :  { %329 = vmatpush1.bf16.msra.mxu0 %v1464_v36 }
  0x51   :  { %564 = vmatpush1.bf16.msra.mxu1 %v1465_v37  ;;  %330 = vmatprep.subr.bf16.mxu0 %v1466_v38  ;;  %v111_v37 = vrot.slane %v72_v35, %v110_v32  ;;  %v115_v38 = vrot.slane %v72_v35, %v114_v33 }
  0x52   :  { %565 = vmatprep.subr.bf16.mxu1 %v1468_v39 }
  0x54   :  { %331 = vmatpush1.bf16.msra.mxu0 %v1470_v40 }
  0x55   :  { %566 = vmatpush1.bf16.msra.mxu1 %v1471_v41  ;;  %332 = vmatprep.subr.bf16.mxu0 %v1472_v42 }
  0x56   :  { %567 = vmatprep.subr.bf16.mxu1 %v1474_v43 }
  0x58   :  { %333 = vmatpush1.bf16.msra.mxu0 %v1476_v44 }
  0x59   :  { %568 = vmatpush1.bf16.msra.mxu1 %v1477_v45  ;;  %334 = vmatprep.subr.bf16.mxu0 %v1478_v46 }
  0x5a   :  { %569 = vmatprep.subr.bf16.mxu1 %v1480_v47 }
  0x5c   :  { %335 = vmatpush1.bf16.msra.mxu0 %v1482_v48 }
  0x5d   :  { %570 = vmatpush1.bf16.msra.mxu1 %v1483_v49  ;;  %336 = vmatprep.subr.bf16.mxu0 %v1484_v50 }
  0x5e   :  { %571 = vmatprep.subr.bf16.mxu1 %v1486_v51 }
  0x60   :  { %337 = vmatpush1.bf16.msra.mxu0 %v1488_v52 }
  0x61   :  { %572 = vmatpush1.bf16.msra.mxu1 %v1489_v53  ;;  %338 = vmatprep.subr.bf16.mxu0 %v1490_v54 }
  0x62   :  { %573 = vmatprep.subr.bf16.mxu1 %v1492_v55 }
  0x64   :  { %339 = vmatpush1.bf16.msra.mxu0 %v1494_v56 }
  0x65   :  { %574 = vmatpush1.bf16.msra.mxu1 %v1495_v57  ;;  %340 = vmatprep.subr.bf16.mxu0 %v1496_v58 }
  0x66   :  { %575 = vmatprep.subr.bf16.mxu1 %v1498_v59 }
  0x68   :  { %341 = vmatpush1.bf16.msra.mxu0 %v1500_v60 }
  0x69   :  { %576 = vmatpush1.bf16.msra.mxu1 %v1501_v61  ;;  %342 = vmatprep.subr.bf16.mxu0 %v1502_v62 }
  0x6a   :  { %577 = vmatprep.subr.bf16.mxu1 %v1504_v63 }
  0x6c   :  { %343 = vmatpush1.bf16.msra.mxu0 %v1506_v3  ;;  %v604_v3 = vld [vmem:[%s1886_s6] sm:$0xff] }
  0x6d   :  { %578 = vmatpush1.bf16.msra.mxu1 %v1507_v4  ;;  %344 = vmatprep.subr.bf16.mxu0 %v1508_v6 }
  0x6e   :  { %579 = vmatprep.subr.bf16.mxu1 %v1510_v7 }
  0x70   :  { %345 = vmatpush1.bf16.msra.mxu0 %v1512_v8 }
  0x71   :  { %580 = vmatpush1.bf16.msra.mxu1 %v1513_v9  ;;  %346 = vmatprep.subr.bf16.mxu0 %v1514_v10 }
  0x72   :  { %581 = vmatprep.subr.bf16.mxu1 %v1516_v11 }
  0x74   :  { %347 = vmatpush1.bf16.msra.mxu0 %v1518_v12 }
  0x75   :  { %582 = vmatpush1.bf16.msra.mxu1 %v1519_v13 }
  0xc7   :  { %v79_v14 = vpop.xlane.xlu0 %78 }
  0xc8   :  { %1568 = vrsqrt.f32 %v79_v14  ;;  %vm85_vm0 = vcmp.eq.f32.partialorder %v79_v14, inf  ;;  %v88_v18 = vand.u32 2147483648, %v79_v14  ;;  %vm87_vm1 = vcmp.eq.f32.partialorder %v79_v14, 0.0 }
  0xcb   :  { %v82_v15 = vpop.xlane.xlu0 %81 }
  0xcc   :  { %1570 = vrsqrt.f32 %v82_v15  ;;  %vm92_vm2 = vcmp.eq.f32.partialorder %v82_v15, inf  ;;  %v95_v24 = vand.u32 2147483648, %v82_v15  ;;  %vm94_vm3 = vcmp.eq.f32.partialorder %v82_v15, 0.0 }
  0xd2   :  { %v1569_v16 = vpop.eup %1568 }
  0xd3   :  { %v84_v17 = vmul.f32 %v1569_v16, %v79_v14 }
  0xd5   :  { %v86_v19 = vsel %vm85_vm0, %v79_v14, %v84_v17 }
  0xd6   :  { %v1571_v20 = vpop.eup %1570  ;;  %v89_v21 = vsel %vm87_vm1, %v88_v18, %v86_v19 }
  0xd7   :  { %v97_v22 = vmul.f32 0.0625, %v89_v21  ;;  %v91_v23 = vmul.f32 %v1571_v20, %v82_v15 }
  0xd9   :  { %v99_v25 = vmax.f32 %v97_v22, 1e-08  ;;  %v93_v26 = vsel %vm92_vm2, %v82_v15, %v91_v23 }
  0xda   :  { %v96_v27 = vsel %vm94_vm3, %v95_v24, %v93_v26 }
  0xdb   :  { %1572 = vrcp.f32 %v99_v25  ;;  %v98_v28 = vmul.f32 0.0625, %v96_v27 }
  0xdd   :  { %v100_v30 = vmax.f32 %v98_v28, 1e-08 }
  0xdf   :  { %1574 = vrcp.f32 %v100_v30 }
  0xe5   :  { %v1573_v34 = vpop.eup %1572 }
  0xe6   :  { %v104_v36 = vmul.f32 %v1573_v34, %v1769_v1  ;;  %v103_v39 = vmul.f32 %v1573_v34, %v1764_v0  ;;  %v1667_v1 = vmov 0.0  }
  0xe7   :  { %1369 = vmatprep.subr.bf16.mxu1 %v1667_v1 }
  0xe8   :  { %v119_v43 = vmul.f32 %v115_v38, %v104_v36  ;;  %v118_v45 = vmul.f32 %v111_v37, %v103_v39  ;;  %v1318_v39 = vld [vmem:[%s1886_s6 + $0x8] sm:$0xff] }
  0xe9   :  { %v1575_v40 = vpop.eup %1574 }
  0xea   :  { %v106_v41 = vmul.f32 %v1575_v40, %v1783_v5  ;;  %v105_v42 = vmul.f32 %v1575_v40, %v1774_v2 }
  0xec   :  { %v121_v44 = vmul.f32 %v115_v38, %v106_v41  ;;  %v120_v46 = vmul.f32 %v111_v37, %v105_v42 }
  0xee   :  { %v123_v47 = vpack.c.bf16 %v121_v44, %v119_v43  ;;  %v122_v48 = vpack.c.bf16 %v120_v46, %v118_v45 }
  0xf0   :  { %348 = vmatprep.mubr.bf16.mxu0 %v123_v47  ;;  %583 = vmatprep.mubr.bf16.mxu1 %v123_v47 }
  0xf1   :  { %349 = vmatmul.mubr.bf16.vlgmr.msra.gmra.mrb[0].mxu0 %v122_v48  ;;  %584 = vmatmul.mubr.bf16.vlgmr.msra.gmra.mrb[0].mxu1 %v122_v48 }
  0xf2   :  { %1371 = vmatprep.mubr.msk.bf16.mxu1 %vm1668_vm4, %v1667_v1 }
 0x1c4   :  { %v350_v0 = vpop.f32.mrb[0].mxu0  ;;  %v585_v5 = vpop.f32.mrb[0].mxu1 }
 0x1c5   :  { %v598_v2 = vpack.c.bf16 %v585_v5, %v585_v5  ;;  %v352_v49 = vpop.f32.mrb[1].mxu0  ;;  %v587_v50 = vpop.f32.mrb[1].mxu1  ;;  %v594_v55 = vmul.f32 0.088388346, %v350_v0 }
 0x1c6   :  { %v354_v51 = vpop.f32.mrb[2].mxu0  ;;  %v589_v52 = vpop.f32.mrb[2].mxu1  ;;  %v600_v61 = vpack.c.bf16 %v587_v50, %v587_v50  ;;  %v595_v27 = vmul.f32 0.088388346, %v352_v49 }
 0x1c7   :  { %v1799_v53 = vpop.f32.mrb[3].mxu0  ;;  %v591_v54 = vpop.f32.mrb[3].mxu1  ;;  %1370 = vmatpush3.bf16.xpose.msra.mxu1 %v598_v2  ;;  %v602_v58 = vpack.c.bf16 %v594_v55, %v594_v55  ;;  %v599_v59 = vpack.c.bf16 %v589_v52, %v589_v52  ;;  %v596_v60 = vmul.f32 0.088388346, %v354_v51 }
 0x1c8   :  { %v601_v56 = vpack.c.bf16 %v591_v54, %v591_v54  ;;  %1375 = vmatprep.subr.bf16.mxu1 %v1667_v1  ;;  %v711_v63 = vsel %vm709_vm5, %v600_v61, 0  ;;  %v803_v28 = vpack.c.bf16 %v595_v27, %v595_v27  ;;  %v597_v29 = vmul.f32 0.088388346, %v1799_v53  ;;  %v1556_v27 = vld [vmem:[#allocation6 + $0xc0] ss:$8 sps:$4 sm:$0xff]  }
 0x1c9   :  { %v603_v62 = vpack.c.bf16 %v596_v60, %v596_v60 }
 0x1ca   :  { %v1802_v57 = vsel %vm709_vm5, %v601_v56, 0  ;;  %v804_v30 = vpack.c.bf16 %v597_v29, %v597_v29  ;;  %v1559_v29 = vld [vmem:[#allocation6 + $0xd0] ss:$8 sps:$4 sm:$0xff]  }
 0x1ce   :  { %1372 = vmatmul.mubr.bf16.vlgmr.msra.gmra.mrb[4].mxu1 %v602_v58 }
 0x1cf   :  { %1376 = vmatpush3.bf16.xpose.msra.mxu1 %v599_v59  ;;  %1377 = vmatprep.mubr.msk.bf16.mxu1 %vm1668_vm4, %v1667_v1 }
 0x1d0   :  { %1381 = vmatprep.subr.bf16.mxu1 %v1667_v1 }
 0x1d6   :  { %1378 = vmatmul.mubr.bf16.vlgmr.msra.gmra.mrb[8].mxu1 %v603_v62 }
 0x1d7   :  { %1382 = vmatpush3.bf16.msra.mxu1 %v711_v63  ;;  %1383 = vmatprep.mubr.msk.bf16.mxu1 %vm1668_vm4, %v1667_v1 }
 0x1d8   :  { %1387 = vmatprep.subr.bf16.mxu1 %v1667_v1 }
 0x2a1   :  { %v639_v4 = vpop.f32.mrb[4].mxu1 }
 0x2a2   :  { %v640_v6 = vadd.f32 %v639_v4, %v604_v3  ;;  %v1373_v7 = vpop.f32.mrb[5].mxu1  ;;  %v1522_v4 = vld [vmem:[#allocation6 + $0x4] ss:$8 sps:$4 sm:$0xff]  }
 0x2a3   :  { %v642_v8 = vpop.f32.mrb[6].mxu1  ;;  %1191 = vmatprep.subr.bf16.mxu0 %v1522_v4  ;;  %v1526_v7 = vld [vmem:[#allocation6 + $0x20] ss:$8 sps:$4 sm:$0xff]  }
 0x2a4   :  { %v1374_v9 = vpop.f32.mrb[7].mxu1  ;;  %v686_v10 = vsel %vm685_vm6, %v640_v6, -inf  ;;  %v1531_v8 = vld [vmem:[#allocation6 + $0x34] ss:$8 sps:$4 sm:$0xff]  }
 0x2a5   :  { %687 = vmax.xlane.f32.xlu1 %v686_v10  ;;  %v1529_v9 = vld [vmem:[#allocation6 + $0x30] ss:$8 sps:$4 sm:$0xff]   ;;  %v1534_v10 = vld [vmem:[#allocation6 + $0x44] ss:$8 sps:$4 sm:$0xff]  }
 0x2a9   :  { %v679_v11 = vpop.f32.mrb[8].mxu1 }
 0x2aa   :  { %v680_v12 = vadd.f32 %v679_v11, %v604_v3  ;;  %v1379_v13 = vpop.f32.mrb[9].mxu1  ;;  %v1520_v3 = vld [vmem:[#allocation6] ss:$8 sps:$4 sm:$0xff]  }
 0x2ab   :  { %v682_v14 = vpop.f32.mrb[10].mxu1  ;;  %1192 = vmatpush1.bf16.msra.mxu0 %v1520_v3  ;;  %v1532_v11 = vld [vmem:[#allocation6 + $0x40] ss:$8 sps:$4 sm:$0xff]   ;;  %v1535_v13 = vld [vmem:[#allocation6 + $0x50] ss:$8 sps:$4 sm:$0xff]  }
 0x2ac   :  { %v1380_v15 = vpop.f32.mrb[11].mxu1  ;;  %v689_v16 = vsel %vm685_vm6, %v680_v12, -inf  ;;  %v1540_v14 = vld [vmem:[#allocation6 + $0x64] ss:$8 sps:$4 sm:$0xff]  }
 0x2ad   :  { %690 = vmax.xlane.f32.xlu1 %v689_v16  ;;  %v1538_v15 = vld [vmem:[#allocation6 + $0x60] ss:$8 sps:$4 sm:$0xff]   ;;  %v1543_v16 = vld [vmem:[#allocation6 + $0x74] ss:$8 sps:$4 sm:$0xff]  }
 0x332   :  { %v688_v17 = vpop.xlane.xlu1 %687 }
 0x333   :  { %v692_v18 = vsub.f32 %v640_v6, %v688_v17  ;;  %v1528_v6 = vld [vmem:[#allocation6 + $0x24] ss:$8 sps:$4 sm:$0xff]   ;;  %v1541_v17 = vld [vmem:[#allocation6 + $0x70] ss:$8 sps:$4 sm:$0xff]  }
 0x335   :  { %v694_v19 = vmul.f32 1.442695, %v692_v18  ;;  %v1546_v18 = vld [vmem:[#allocation6 + $0x84] ss:$8 sps:$4 sm:$0xff]  }
 0x337   :  { %1576 = vpow2.f32 %v694_v19  ;;  %v1544_v19 = vld [vmem:[#allocation6 + $0x80] ss:$8 sps:$4 sm:$0xff]  }
 0x33a   :  { %v691_v20 = vpop.xlane.xlu1 %690 }
 0x33b   :  { %v693_v21 = vsub.f32 %v680_v12, %v691_v20  ;;  %v1537_v12 = vld [vmem:[#allocation6 + $0x54] ss:$8 sps:$4 sm:$0xff]  }
 0x33c   :  { %v1549_v20 = vld [vmem:[#allocation6 + $0x94] ss:$8 sps:$4 sm:$0xff]  }
 0x33d   :  { %v696_v22 = vmul.f32 1.442695, %v693_v21  ;;  %v1547_v21 = vld [vmem:[#allocation6 + $0x90] ss:$8 sps:$4 sm:$0xff]  }
 0x33f   :  { %1578 = vpow2.f32 %v696_v22  ;;  %v1552_v22 = vld [vmem:[#allocation6 + $0xa4] ss:$8 sps:$4 sm:$0xff]  }
 0x341   :  { %v1577_v23 = vpop.eup %1576 }
 0x342   :  { %v704_v24 = vpack.c.bf16 %v1577_v23, %v1577_v23 }
 0x344   :  { %1384 = vmatmul.mubr.msk.bf16.vlgmr.msra.gmra.mrb[12].mxu1 %vm685_vm6, %v704_v24  ;;  %v1555_v24 = vld [vmem:[#allocation6 + $0xb4] ss:$8 sps:$4 sm:$0xff]  }
 0x345   :  { %1388 = vmatpush3.bf16.msra.mxu1 %v1802_v57  ;;  %1389 = vmatprep.mubr.msk.bf16.mxu1 %vm1668_vm4, %v1667_v1 }
 0x346   :  { %1393 = vmatprep.subr.bf16.mxu1 %v1667_v1 }
 0x349   :  { %v1820_v25 = vpop.eup %1578 }
 0x34a   :  { %v705_v26 = vpack.c.bf16 %v1820_v25, %v1820_v25 }
 0x34c   :  { %1390 = vmatmul.mubr.msk.bf16.vlgmr.msra.gmra.mrb[16].mxu1 %vm685_vm6, %v705_v26  ;;  %v1558_v26 = vld [vmem:[#allocation6 + $0xc4] ss:$8 sps:$4 sm:$0xff]  }
 0x34d   :  { %1395 = vmatprep.mubr.msk.bf16.mxu1 %vm1668_vm4, %v1667_v1 }
 0x34e   :  { %1394 = vmatpush3.bf16.xpose.msra.mxu1 %v598_v2 }
 0x34f   :  { %1399 = vmatprep.subr.bf16.mxu1 %v1667_v1 }
 0x355   :  { %1396 = vmatmul.mubr.bf16.vlgmr.msra.gmra.mrb[20].mxu1 %v803_v28  ;;  %v1561_v28 = vld [vmem:[#allocation6 + $0xd4] ss:$8 sps:$4 sm:$0xff]  }
 0x356   :  { %1400 = vmatpush3.bf16.xpose.msra.mxu1 %v599_v59  ;;  %1401 = vmatprep.mubr.msk.bf16.mxu1 %vm1668_vm4, %v1667_v1  ;;  %v698_v59 = vsel %vm685_vm6, %v1577_v23, 0.0  ;;  %v1550_v23 = vld [vmem:[#allocation6 + $0xa0] ss:$8 sps:$4 sm:$0xff]  }
 0x357   :  { %1405 = vmatprep.subr.bf16.mxu1 %v1667_v1 }
 0x35d   :  { %1402 = vmatmul.mubr.bf16.vlgmr.msra.gmra.mrb[24].mxu1 %v804_v30  ;;  %v1564_v30 = vld [vmem:[#allocation6 + $0xe4] ss:$8 sps:$4 sm:$0xff]  }
 0x35e   :  { %1406 = vmatpush3.bf16.msra.mxu1 %v711_v63  ;;  %1407 = vmatprep.mubr.msk.bf16.mxu1 %vm1668_vm4, %v1667_v1  ;;  %v701_v63 = vsel %vm685_vm6, %v1820_v25, 0.0  ;;  %v1553_v25 = vld [vmem:[#allocation6 + $0xb0] ss:$8 sps:$4 sm:$0xff]  }
 0x35f   :  { %1411 = vmatprep.subr.bf16.mxu1 %v1667_v1 }
 0x417   :  { %v1835_v31 = vpop.f32.mrb[12].mxu1 }
 0x418   :  { %v1385_v32 = vpop.f32.mrb[13].mxu1 }
 0x419   :  { %v750_v33 = vpop.f32.mrb[14].mxu1  ;;  %v1562_v32 = vld [vmem:[#allocation6 + $0xe0] ss:$8 sps:$4 sm:$0xff]  }
 0x41a   :  { %v1386_v34 = vpop.f32.mrb[15].mxu1  ;;  %v1567_v33 = vld [vmem:[#allocation6 + $0xf4] ss:$8 sps:$4 sm:$0xff]  }
 0x41b   :  { %v1565_v34 = vld [vmem:[#allocation6 + $0xf0] ss:$8 sps:$4 sm:$0xff]  }
 0x41f   :  { %v1837_v35 = vpop.f32.mrb[16].mxu1 }
 0x420   :  { %v1391_v36 = vpop.f32.mrb[17].mxu1 }
 0x421   :  { %v796_v37 = vpop.f32.mrb[18].mxu1 }
 0x422   :  { %v1392_v38 = vpop.f32.mrb[19].mxu1 }
 0x428   :  { %v841_v40 = vpop.f32.mrb[20].mxu1 }
 0x429   :  { %v842_v41 = vadd.f32 %v1318_v39, %v841_v40  ;;  %v1397_v42 = vpop.f32.mrb[21].mxu1 }
 0x42a   :  { %v844_v43 = vpop.f32.mrb[22].mxu1 }
 0x42b   :  { %v1398_v44 = vpop.f32.mrb[23].mxu1  ;;  %v887_v45 = vsel %vm685_vm6, %v842_v41, -inf }
 0x42c   :  { %888 = vmax.xlane.f32.xlu0 %v887_v45 }
 0x430   :  { %v881_v46 = vpop.f32.mrb[24].mxu1 }
 0x431   :  { %v882_v47 = vadd.f32 %v1318_v39, %v881_v46  ;;  %v1403_v48 = vpop.f32.mrb[25].mxu1 }
 0x432   :  { %v884_v0 = vpop.f32.mrb[26].mxu1 }
 0x433   :  { %v1404_v5 = vpop.f32.mrb[27].mxu1  ;;  %v890_v2 = vsel %vm685_vm6, %v882_v47, -inf }
 0x434   :  { %891 = vmax.xlane.f32.xlu1 %v890_v2 }
 0x4b9   :  { %v889_v49 = vpop.xlane.xlu0 %888 }
 0x4ba   :  { %v893_v50 = vsub.f32 %v842_v41, %v889_v49 }
 0x4bc   :  { %v895_v51 = vmul.f32 1.442695, %v893_v50 }
 0x4be   :  { %1580 = vpow2.f32 %v895_v51 }
 0x4c1   :  { %v892_v52 = vpop.xlane.xlu1 %891 }
 0x4c2   :  { %v894_v53 = vsub.f32 %v882_v47, %v892_v52 }
 0x4c4   :  { %v897_v54 = vmul.f32 1.442695, %v894_v53 }
 0x4c6   :  { %1582 = vpow2.f32 %v897_v54 }
 0x4c8   :  { %v1581_v55 = vpop.eup %1580 }
 0x4c9   :  { %v899_v56 = vsel %vm685_vm6, %v1581_v55, 0.0  ;;  %v905_v58 = vpack.c.bf16 %v1581_v55, %v1581_v55 }
 0x4ca   :  { %900 = vadd.xlane.f32.xlu0 %v899_v56  ;;  %v1236_v56 = vld [vmem:[%s1881_s1 + $0x10] sm:$0xff] }
 0x4cb   :  { %1408 = vmatmul.mubr.msk.bf16.vlgmr.msra.gmra.mrb[28].mxu1 %vm685_vm6, %v905_v58 }
 0x4cc   :  { %1412 = vmatpush3.bf16.msra.mxu1 %v1802_v57  ;;  %1413 = vmatprep.mubr.msk.bf16.mxu1 %vm1668_vm4, %v1667_v1  ;;  %v1525_v57 = vld [vmem:[#allocation6 + $0x14] ss:$8 sps:$4 sm:$0xff]   ;;  %v1523_v1 = vld [vmem:[#allocation6 + $0x10] ss:$8 sps:$4 sm:$0xff]  }
 0x4cd   :  { %1193 = vmatprep.subr.bf16.mxu0 %v1525_v57 }
 0x4ce   :  { %699 = vadd.xlane.f32.xlu0 %v698_v59  ;;  %1194 = vmatpush1.bf16.msra.mxu0 %v1523_v1 }
 0x4cf   :  { %1195 = vmatprep.subr.bf16.mxu0 %v1528_v6 }
 0x4d0   :  { %v1583_v60 = vpop.eup %1582 }
 0x4d1   :  { %v902_v61 = vsel %vm685_vm6, %v1583_v60, 0.0  ;;  %v906_v62 = vpack.c.bf16 %v1583_v60, %v1583_v60  ;;  %v1237_v60 = vld [vmem:[%s1881_s1 + $0x18] sm:$0xff] }
 0x4d2   :  { %903 = vadd.xlane.f32.xlu1 %v902_v61  ;;  %1196 = vmatpush1.bf16.msra.mxu0 %v1526_v7 }
 0x4d3   :  { %1414 = vmatmul.mubr.msk.bf16.vlgmr.msra.gmra.mrb[32].mxu1 %vm685_vm6, %v906_v62  ;;  %1197 = vmatprep.subr.bf16.mxu0 %v1531_v8 }
 0x4d6   :  { %702 = vadd.xlane.f32.xlu1 %v701_v63  ;;  %1198 = vmatpush1.bf16.msra.mxu0 %v1529_v9 }
 0x4d7   :  { %1199 = vmatprep.subr.bf16.mxu0 %v1534_v10 }
 0x4da   :  { %1200 = vmatpush1.bf16.msra.mxu0 %v1532_v11 }
 0x4db   :  { %1201 = vmatprep.subr.bf16.mxu0 %v1537_v12 }
 0x4de   :  { %1202 = vmatpush1.bf16.msra.mxu0 %v1535_v13 }
 0x4df   :  { %1203 = vmatprep.subr.bf16.mxu0 %v1540_v14 }
 0x4e2   :  { %1204 = vmatpush1.bf16.msra.mxu0 %v1538_v15 }
 0x4e3   :  { %1205 = vmatprep.subr.bf16.mxu0 %v1543_v16 }
 0x4e6   :  { %1206 = vmatpush1.bf16.msra.mxu0 %v1541_v17 }
 0x4e7   :  { %1207 = vmatprep.subr.bf16.mxu0 %v1546_v18 }
 0x4ea   :  { %1208 = vmatpush1.bf16.msra.mxu0 %v1544_v19 }
 0x4eb   :  { %1209 = vmatprep.subr.bf16.mxu0 %v1549_v20 }
 0x4ee   :  { %1210 = vmatpush1.bf16.msra.mxu0 %v1547_v21 }
 0x4ef   :  { %1211 = vmatprep.subr.bf16.mxu0 %v1552_v22 }
 0x4f2   :  { %1212 = vmatpush1.bf16.msra.mxu0 %v1550_v23 }
 0x4f3   :  { %1213 = vmatprep.subr.bf16.mxu0 %v1555_v24 }
 0x4f6   :  { %1214 = vmatpush1.bf16.msra.mxu0 %v1553_v25 }
 0x4f7   :  { %1215 = vmatprep.subr.bf16.mxu0 %v1558_v26 }
 0x4fa   :  { %1216 = vmatpush1.bf16.msra.mxu0 %v1556_v27 }
 0x4fb   :  { %1217 = vmatprep.subr.bf16.mxu0 %v1561_v28 }
 0x4fe   :  { %1218 = vmatpush1.bf16.msra.mxu0 %v1559_v29 }
 0x4ff   :  { %1219 = vmatprep.subr.bf16.mxu0 %v1564_v30 }
 0x502   :  { %1220 = vmatpush1.bf16.msra.mxu0 %v1562_v32 }
 0x503   :  { %1221 = vmatprep.subr.bf16.mxu0 %v1567_v33 }
 0x506   :  { %1222 = vmatpush1.bf16.msra.mxu0 %v1565_v34 }
 0x557   :  { %v901_v36 = vpop.xlane.xlu0 %900 }
 0x55b   :  { %v700_v37 = vpop.xlane.xlu0 %699 }
 0x55c   :  { %1584 = vrcp.f32 %v700_v37 }
 0x55f   :  { %v904_v38 = vpop.xlane.xlu1 %903 }
 0x563   :  { %v703_v39 = vpop.xlane.xlu1 %702 }
 0x564   :  { %1586 = vrcp.f32 %v703_v39 }
 0x565   :  { %1588 = vrcp.f32 %v901_v36 }
 0x566   :  { %v1585_v40 = vpop.eup %1584  ;;  %1590 = vrcp.f32 %v904_v38 }
 0x567   :  { %v801_v42 = vmul.f32 %v1585_v40, %v1835_v31  ;;  %v1234_v31 = vld [vmem:[%s1881_s1] sm:$0xff] }
 0x56e   :  { %v1587_v41 = vpop.eup %1586 }
 0x56f   :  { %v802_v43 = vmul.f32 %v1587_v41, %v1837_v35  ;;  %v1589_v0 = vpop.eup %1588  ;;  %v1235_v35 = vld [vmem:[%s1881_s1 + $0x8] sm:$0xff] }
 0x570   :  { %v1591_v5 = vpop.eup %1590 }
 0x571   :  { %v997_v44 = vpack.c.bf16 %v802_v43, %v801_v42 }
 0x59e   :  { %v944_v45 = vpop.f32.mrb[28].mxu1 }
 0x59f   :  { %v1409_v46 = vpop.f32.mrb[29].mxu1  ;;  %v995_v49 = vmul.f32 %v1589_v0, %v944_v45 }
 0x5a0   :  { %v947_v47 = vpop.f32.mrb[30].mxu1 }
 0x5a1   :  { %v1410_v48 = vpop.f32.mrb[31].mxu1 }
 0x5a6   :  { %v987_v2 = vpop.f32.mrb[32].mxu1 }
 0x5a7   :  { %v996_v50 = vmul.f32 %v1591_v5, %v987_v2  ;;  %v1415_v51 = vpop.f32.mrb[33].mxu1 }
 0x5a8   :  { %v990_v52 = vpop.f32.mrb[34].mxu1 }
 0x5a9   :  { %v998_v53 = vpack.c.bf16 %v996_v50, %v995_v49  ;;  %v1416_v54 = vpop.f32.mrb[35].mxu1 }
 0x5ab   :  { %1223 = vmatprep.mubr.bf16.mxu0 %v998_v53 }
 0x5ac   :  { %1224 = vmatmul.mubr.bf16.vlgmr.msra.gmra.mrb[4].mxu0 %v997_v44 }
 0x67f   :  { %v1225_v55 = vpop.f32.mrb[4].mxu0 }
 0x680   :  { %v1238_v58 = vadd.f32 %v1234_v31, %v1225_v55  ;;  %v1227_v59 = vpop.f32.mrb[5].mxu0 }
 0x681   :  { %v1239_v61 = vadd.f32 %v1235_v35, %v1227_v59  ;;  %v1229_v62 = vpop.f32.mrb[6].mxu0 }
 0x682   :  { %1242 = vst [vmem:[%s1887_s7] sm:$0xff] %v1238_v58  ;;  %v1240_v63 = vadd.f32 %v1236_v56, %v1229_v62  ;;  %v1231_v3 = vpop.f32.mrb[7].mxu0 }
 0x683   :  { %1243 = vst [vmem:[%s1887_s7 + $0x8] sm:$0xff] %v1239_v61  ;;  %v1241_v4 = vadd.f32 %v1237_v60, %v1231_v3 }
 0x684   :  { %1244 = vst [vmem:[%s1887_s7 + $0x10] sm:$0xff] %v1240_v63 }
 0x685   :  { %1245 = vst [vmem:[%s1887_s7 + $0x18] sm:$0xff] %v1241_v4 }
 0x686   :  { %1250 = vsyncpa [#allocation3], 1 }
 0x687   :  { %1251 = vsyncpa [#allocation5], 1 }

// kernel: megabyte_forward.9
= control target key start
LH: loop header
LB: loop body
LE: loop exit
PB: predicated region body
PF: predicated region fallthrough
CT: control target
= control target key end

     0   :  { %s4124_s0 = inlined_call_operand.vmem [shape: f32[2,8,256], index: 0, kind: input, shape index: {}]   ;;  %s4125_s3 = inlined_call_operand.vmem [shape: bf16[256,1024], index: 3, kind: input, shape index: {}]   ;;  %s4126_s2 = inlined_call_operand.vmem [shape: f32[1,256], index: 2, kind: input, shape index: {}]   ;;  %s4127_s5 = inlined_call_operand.vmem [shape: bf16[1024,256], index: 5, kind: input, shape index: {}]   ;;  %s4128_s4 = inlined_call_operand.vmem [shape: f32[1,1024], index: 4, kind: input, shape index: {}]   ;;  %s4129_s6 = inlined_call_operand.vmem [shape: f32[1,256], index: 6, kind: input, shape index: {}]   ;;  %s4130_s1 = inlined_call_operand.vmem [shape: f32[2,8,256], index: 1, kind: input, shape index: {}]   ;;  %s4131_s7 = inlined_call_operand.vmem [shape: f32[2,8,256], index: 7, kind: output, shape index: {}]  }
   0x1   :  { %v3052_v0 = vld [vmem:[%s4124_s0] sm:$0xff]  ;;  %v3057_v1 = vld [vmem:[%s4124_s0 + $0x8] sm:$0xff]  ;;  %v3062_v2 = vld [vmem:[%s4124_s0 + $0x10] sm:$0xff] }
   0x2   :  { %v31_v3 = vmul.f32 %v3052_v0, %v3052_v0  ;;  %v32_v4 = vmul.f32 %v3057_v1, %v3057_v1  ;;  %v3071_v5 = vld [vmem:[%s4124_s0 + $0x18] sm:$0xff]  ;;  %v33_v6 = vmul.f32 %v3062_v2, %v3062_v2  ;;  %v82_v7 = vld [vmem:[%s4125_s3] sm:$0xff] }
   0x3   :  { %v86_v8 = vld [vmem:[%s4125_s3 + $0x20] sm:$0xff]  ;;  %v34_v9 = vmul.f32 %v3071_v5, %v3071_v5 }
   0x4   :  { %v2473_v10 = vcombine.high %v82_v7, %v86_v8  ;;  %v2472_v11 = vcombine.low %v82_v7, %v86_v8  ;;  %v90_v12 = vld [vmem:[%s4125_s3 + $0x40] sm:$0xff]  ;;  %v35_v14 = vadd.f32 %v32_v4, %v31_v3 }
   0x5   :  { %v94_v13 = vld [vmem:[%s4125_s3 + $0x60] sm:$0xff]  ;;  %v38_v18 = vadd.f32 %v34_v9, %v33_v6 }
   0x6   :  { %v2481_v15 = vcombine.high %v90_v12, %v94_v13  ;;  %v98_v16 = vld [vmem:[%s4125_s3 + $0x80] sm:$0xff]  ;;  %892 = vmatprep.subr.bf16.mxu1 %v2473_v10  ;;  %36 = vadd.xlane.f32.xlu0 %v35_v14  ;;  %v2480_v19 = vcombine.low %v90_v12, %v94_v13  ;;  %v3181_v12 = vld [vmem:[%s4125_s3 + $0x28] sm:$0xff] }
   0x7   :  { %v102_v17 = vld [vmem:[%s4125_s3 + $0xa0] sm:$0xff]  ;;  %893 = vmatpush1.bf16.msra.mxu1 %v2472_v11  ;;  %v3176_v11 = vld [vmem:[%s4125_s3 + $0x8] sm:$0xff] }
   0x8   :  { %894 = vmatprep.subr.bf16.mxu1 %v2481_v15  ;;  %v2489_v20 = vcombine.high %v98_v16, %v102_v17  ;;  %v106_v21 = vld [vmem:[%s4125_s3 + $0xc0] sm:$0xff]  ;;  %v2488_v23 = vcombine.low %v98_v16, %v102_v17  ;;  %v2474_v15 = vcombine.low %v3176_v11, %v3181_v12  ;;  %v2475_v17 = vcombine.high %v3176_v11, %v3181_v12  ;;  %v139_v12 = vld [vmem:[%s4125_s3 + $0x1c8] sm:$0xff] }
   0x9   :  { %v110_v22 = vld [vmem:[%s4125_s3 + $0xe0] sm:$0xff] }
   0xa   :  { %39 = vadd.xlane.f32.xlu0 %v38_v18  ;;  %v2497_v24 = vcombine.high %v106_v21, %v110_v22  ;;  %v114_v25 = vld [vmem:[%s4125_s3 + $0x100] sm:$0xff]  ;;  %v2496_v27 = vcombine.low %v106_v21, %v110_v22 }
   0xb   :  { %895 = vmatpush1.bf16.msra.mxu1 %v2480_v19  ;;  %v118_v26 = vld [vmem:[%s4125_s3 + $0x120] sm:$0xff] }
   0xc   :  { %896 = vmatprep.subr.bf16.mxu1 %v2489_v20  ;;  %v2505_v28 = vcombine.high %v114_v25, %v118_v26  ;;  %v122_v29 = vld [vmem:[%s4125_s3 + $0x140] sm:$0xff]  ;;  %v2504_v31 = vcombine.low %v114_v25, %v118_v26 }
   0xd   :  { %v126_v30 = vld [vmem:[%s4125_s3 + $0x160] sm:$0xff] }
   0xe   :  { %v2513_v32 = vcombine.high %v122_v29, %v126_v30  ;;  %v130_v33 = vld [vmem:[%s4125_s3 + $0x180] sm:$0xff]  ;;  %v2512_v35 = vcombine.low %v122_v29, %v126_v30 }
   0xf   :  { %897 = vmatpush1.bf16.msra.mxu1 %v2488_v23  ;;  %v134_v34 = vld [vmem:[%s4125_s3 + $0x1a0] sm:$0xff] }
  0x10   :  { %898 = vmatprep.subr.bf16.mxu1 %v2497_v24  ;;  %v2521_v36 = vcombine.high %v130_v33, %v134_v34  ;;  %v138_v37 = vld [vmem:[%s4125_s3 + $0x1c0] sm:$0xff]  ;;  %v2520_v39 = vcombine.low %v130_v33, %v134_v34  ;;  %v66_v33 = vlaneseq }
  0x11   :  { %v142_v38 = vld [vmem:[%s4125_s3 + $0x1e0] sm:$0xff] }
  0x12   :  { %v2529_v40 = vcombine.high %v138_v37, %v142_v38  ;;  %v146_v41 = vld [vmem:[%s4125_s3 + $0x200] sm:$0xff]  ;;  %v2528_v43 = vcombine.low %v138_v37, %v142_v38 }
  0x13   :  { %899 = vmatpush1.bf16.msra.mxu1 %v2496_v27  ;;  %v150_v42 = vld [vmem:[%s4125_s3 + $0x220] sm:$0xff] }
  0x14   :  { %900 = vmatprep.subr.bf16.mxu1 %v2505_v28  ;;  %v2537_v44 = vcombine.high %v146_v41, %v150_v42  ;;  %v154_v45 = vld [vmem:[%s4125_s3 + $0x240] sm:$0xff]  ;;  %v2536_v47 = vcombine.low %v146_v41, %v150_v42 }
  0x15   :  { %v158_v46 = vld [vmem:[%s4125_s3 + $0x260] sm:$0xff] }
  0x16   :  { %v2545_v48 = vcombine.high %v154_v45, %v158_v46  ;;  %v162_v49 = vld [vmem:[%s4125_s3 + $0x280] sm:$0xff]  ;;  %v2544_v51 = vcombine.low %v154_v45, %v158_v46 }
  0x17   :  { %901 = vmatpush1.bf16.msra.mxu1 %v2504_v31  ;;  %v166_v50 = vld [vmem:[%s4125_s3 + $0x2a0] sm:$0xff] }
  0x18   :  { %902 = vmatprep.subr.bf16.mxu1 %v2513_v32  ;;  %v2553_v52 = vcombine.high %v162_v49, %v166_v50  ;;  %v170_v53 = vld [vmem:[%s4125_s3 + $0x2c0] sm:$0xff]  ;;  %v2552_v55 = vcombine.low %v162_v49, %v166_v50 }
  0x19   :  { %v174_v54 = vld [vmem:[%s4125_s3 + $0x2e0] sm:$0xff] }
  0x1a   :  { %v2561_v56 = vcombine.high %v170_v53, %v174_v54  ;;  %v178_v57 = vld [vmem:[%s4125_s3 + $0x300] sm:$0xff]  ;;  %v2560_v59 = vcombine.low %v170_v53, %v174_v54 }
  0x1b   :  { %903 = vmatpush1.bf16.msra.mxu1 %v2512_v35  ;;  %v182_v58 = vld [vmem:[%s4125_s3 + $0x320] sm:$0xff]  ;;  %v3187_v35 = vshrl.u32 %v66_v33, 7  ;;  %v183_v33 = vld [vmem:[%s4125_s3 + $0x328] sm:$0xff] }
  0x1c   :  { %904 = vmatprep.subr.bf16.mxu1 %v2521_v36  ;;  %v2569_v60 = vcombine.high %v178_v57, %v182_v58  ;;  %v186_v61 = vld [vmem:[%s4125_s3 + $0x340] sm:$0xff]  ;;  %v2568_v63 = vcombine.low %v178_v57, %v182_v58  ;;  %v111_v57 = vld [vmem:[%s4125_s3 + $0xe8] sm:$0xff] }
  0x1d   :  { %v190_v62 = vld [vmem:[%s4125_s3 + $0x360] sm:$0xff]  ;;  %v3190_v36 = vsub.s32 1, %v3187_v35  ;;  %v3193_v37 = vsub.s32 0, %v3187_v35 }
  0x1e   :  { %v2577_v3 = vcombine.high %v186_v61, %v190_v62  ;;  %v194_v4 = vld [vmem:[%s4125_s3 + $0x380] sm:$0xff]  ;;  %v2576_v7 = vcombine.low %v186_v61, %v190_v62  ;;  %v119_v61 = vld [vmem:[%s4125_s3 + $0x128] sm:$0xff] }
  0x1f   :  { %905 = vmatpush1.bf16.msra.mxu1 %v2520_v39  ;;  %v198_v6 = vld [vmem:[%s4125_s3 + $0x3a0] sm:$0xff] }
  0x20   :  { %906 = vmatprep.subr.bf16.mxu1 %v2529_v40  ;;  %v2585_v8 = vcombine.high %v194_v4, %v198_v6  ;;  %v202_v9 = vld [vmem:[%s4125_s3 + $0x3c0] sm:$0xff]  ;;  %v2584_v13 = vcombine.low %v194_v4, %v198_v6  ;;  %v127_v4 = vld [vmem:[%s4125_s3 + $0x168] sm:$0xff] }
  0x21   :  { %v206_v10 = vld [vmem:[%s4125_s3 + $0x3e0] sm:$0xff] }
  0x22   :  { %v2593_v14 = vcombine.high %v202_v9, %v206_v10  ;;  %v2592_v16 = vcombine.low %v202_v9, %v206_v10  ;;  %v30_v39 = vld [vmem:[%s4126_s2] sm:$0x3]  ;;  %v135_v9 = vld [vmem:[%s4125_s3 + $0x1a8] sm:$0xff] }
  0x23   :  { %907 = vmatpush1.bf16.msra.mxu1 %v2528_v43  ;;  %v73_v41 = vrot.slane %v30_v39, %v3190_v36  ;;  %v69_v43 = vrot.slane %v30_v39, %v3193_v37  ;;  %v187_v39 = vld [vmem:[%s4125_s3 + $0x348] sm:$0xff] }
  0x24   :  { %908 = vmatprep.subr.bf16.mxu1 %v2537_v44 }
  0x27   :  { %909 = vmatpush1.bf16.msra.mxu1 %v2536_v47 }
  0x28   :  { %910 = vmatprep.subr.bf16.mxu1 %v2545_v48 }
  0x2b   :  { %911 = vmatpush1.bf16.msra.mxu1 %v2544_v51  ;;  %v91_v51 = vld [vmem:[%s4125_s3 + $0x48] sm:$0xff] }
  0x2c   :  { %912 = vmatprep.subr.bf16.mxu1 %v2553_v52 }
  0x2f   :  { %913 = vmatpush1.bf16.msra.mxu1 %v2552_v55 }
  0x30   :  { %914 = vmatprep.subr.bf16.mxu1 %v2561_v56  ;;  %v107_v56 = vld [vmem:[%s4125_s3 + $0xc8] sm:$0xff] }
  0x31   :  { %v2498_v62 = vcombine.low %v107_v56, %v111_v57 }
  0x33   :  { %915 = vmatpush1.bf16.msra.mxu1 %v2560_v59  ;;  %v2499_v59 = vcombine.high %v107_v56, %v111_v57  ;;  %v100_v57 = vld [vmem:[%s4125_s3 + $0x90] sm:$0xff] }
  0x34   :  { %916 = vmatprep.subr.bf16.mxu1 %v2569_v60  ;;  %v115_v60 = vld [vmem:[%s4125_s3 + $0x108] sm:$0xff] }
  0x35   :  { %v2506_v6 = vcombine.low %v115_v60, %v119_v61 }
  0x37   :  { %917 = vmatpush1.bf16.msra.mxu1 %v2568_v63  ;;  %v2507_v63 = vcombine.high %v115_v60, %v119_v61  ;;  %v108_v60 = vld [vmem:[%s4125_s3 + $0xd0] sm:$0xff]  ;;  %v2744_v61 = vld [vmem:[%s4127_s5 + $0x4] ss:$8 sps:$4 sm:$0xff]  }
  0x38   :  { %918 = vmatprep.subr.bf16.mxu1 %v2577_v3  ;;  %v123_v3 = vld [vmem:[%s4125_s3 + $0x148] sm:$0xff]  ;;  %2284 = vmatprep.subr.bf16.mxu0 %v2744_v61 }
  0x39   :  { %v2514_v10 = vcombine.low %v123_v3, %v127_v4 }
  0x3b   :  { %919 = vmatpush1.bf16.msra.mxu1 %v2576_v7  ;;  %v2515_v7 = vcombine.high %v123_v3, %v127_v4  ;;  %v112_v3 = vld [vmem:[%s4125_s3 + $0xf0] sm:$0xff] }
  0x3c   :  { %920 = vmatprep.subr.bf16.mxu1 %v2585_v8  ;;  %v131_v8 = vld [vmem:[%s4125_s3 + $0x188] sm:$0xff]  ;;  %v2747_v4 = vld [vmem:[%s4127_s5 + $0x14] ss:$8 sps:$4 sm:$0xff]  }
  0x3d   :  { %v2523_v11 = vcombine.high %v131_v8, %v135_v9 }
  0x3f   :  { %921 = vmatpush1.bf16.msra.mxu1 %v2584_v13  ;;  %v143_v13 = vld [vmem:[%s4125_s3 + $0x1e8] sm:$0xff] }
  0x40   :  { %922 = vmatprep.subr.bf16.mxu1 %v2593_v14  ;;  %v2522_v14 = vcombine.low %v131_v8, %v135_v9  ;;  %v116_v8 = vld [vmem:[%s4125_s3 + $0x110] sm:$0xff] }
  0x41   :  { %v120_v9 = vld [vmem:[%s4125_s3 + $0x130] sm:$0xff] }
  0x43   :  { %923 = vmatpush1.bf16.msra.mxu1 %v2592_v16  ;;  %v147_v16 = vld [vmem:[%s4125_s3 + $0x208] sm:$0xff] }
  0x44   :  { %935 = vmatprep.subr.bf16.mxu1 %v2475_v17  ;;  %v151_v17 = vld [vmem:[%s4125_s3 + $0x228] sm:$0xff] }
  0x93   :  { %v37_v18 = vpop.xlane.xlu0 %36 }
  0x94   :  { %2936 = vrsqrt.f32 %v37_v18  ;;  %vm43_vm0 = vcmp.eq.f32.partialorder %v37_v18, inf  ;;  %v46_v22 = vand.u32 2147483648, %v37_v18  ;;  %vm45_vm1 = vcmp.eq.f32.partialorder %v37_v18, 0.0 }
  0x97   :  { %v40_v19 = vpop.xlane.xlu0 %39 }
  0x98   :  { %2938 = vrsqrt.f32 %v40_v19  ;;  %vm50_vm2 = vcmp.eq.f32.partialorder %v40_v19, inf  ;;  %v53_v28 = vand.u32 2147483648, %v40_v19  ;;  %vm52_vm3 = vcmp.eq.f32.partialorder %v40_v19, 0.0 }
  0x9e   :  { %v2937_v20 = vpop.eup %2936 }
  0x9f   :  { %v42_v21 = vmul.f32 %v2937_v20, %v37_v18  ;;  %v155_v20 = vld [vmem:[%s4125_s3 + $0x248] sm:$0xff] }
  0xa1   :  { %v44_v23 = vsel %vm43_vm0, %v37_v18, %v42_v21  ;;  %v2530_v18 = vcombine.low %v139_v12, %v143_v13  ;;  %v159_v21 = vld [vmem:[%s4125_s3 + $0x268] sm:$0xff] }
  0xa2   :  { %v2939_v24 = vpop.eup %2938  ;;  %v47_v25 = vsel %vm45_vm1, %v46_v22, %v44_v23  ;;  %v2538_v22 = vcombine.low %v147_v16, %v151_v17  ;;  %v2547_v23 = vcombine.high %v155_v20, %v159_v21 }
  0xa3   :  { %v55_v26 = vmul.f32 0.0625, %v47_v25  ;;  %v49_v27 = vmul.f32 %v2939_v24, %v40_v19  ;;  %v163_v24 = vld [vmem:[%s4125_s3 + $0x288] sm:$0xff] }
  0xa4   :  { %v167_v25 = vld [vmem:[%s4125_s3 + $0x2a8] sm:$0xff] }
  0xa5   :  { %v57_v29 = vmax.f32 %v55_v26, 1e-08  ;;  %v51_v30 = vsel %vm50_vm2, %v40_v19, %v49_v27  ;;  %v2539_v19 = vcombine.high %v147_v16, %v151_v17  ;;  %v2546_v26 = vcombine.low %v155_v20, %v159_v21  ;;  %v132_v16 = vld [vmem:[%s4125_s3 + $0x190] sm:$0xff] }
  0xa6   :  { %v54_v31 = vsel %vm52_vm3, %v53_v28, %v51_v30  ;;  %v2555_v27 = vcombine.high %v163_v24, %v167_v25  ;;  %v171_v28 = vld [vmem:[%s4125_s3 + $0x2c8] sm:$0xff]  ;;  %v2554_v30 = vcombine.low %v163_v24, %v167_v25  ;;  %v136_v17 = vld [vmem:[%s4125_s3 + $0x1b0] sm:$0xff] }
  0xa7   :  { %2940 = vrcp.f32 %v57_v29  ;;  %v56_v32 = vmul.f32 0.0625, %v54_v31  ;;  %v175_v29 = vld [vmem:[%s4125_s3 + $0x2e8] sm:$0xff]  ;;  %v140_v20 = vld [vmem:[%s4125_s3 + $0x1d0] sm:$0xff]  ;;  %v2524_v25 = vcombine.low %v132_v16, %v136_v17 }
  0xa8   :  { %v2563_v31 = vcombine.high %v171_v28, %v175_v29  ;;  %v144_v21 = vld [vmem:[%s4125_s3 + $0x1f0] sm:$0xff]  ;;  %v2752_v24 = vld [vmem:[%s4127_s5 + $0x20] ss:$8 sps:$4 sm:$0xff]  }
  0xa9   :  { %v58_v34 = vmax.f32 %v56_v32, 1e-08  ;;  %v179_v32 = vld [vmem:[%s4125_s3 + $0x308] sm:$0xff] }
  0xab   :  { %2942 = vrcp.f32 %v58_v34  ;;  %v2562_v34 = vcombine.low %v171_v28, %v175_v29  ;;  %v2533_v28 = vcombine.high %v140_v20, %v144_v21  ;;  %v2753_v29 = vld [vmem:[%s4127_s5 + $0x34] ss:$8 sps:$4 sm:$0xff]  }
  0xb1   :  { %v2941_v38 = vpop.eup %2940 }
  0xb2   :  { %v62_v40 = vmul.f32 %v2941_v38, %v3057_v1  ;;  %v61_v42 = vmul.f32 %v2941_v38, %v3052_v0  ;;  %v95_v1 = vld [vmem:[%s4125_s3 + $0x68] sm:$0xff]  ;;  %v2571_v38 = vcombine.high %v179_v32, %v183_v33 }
  0xb3   :  { %v2483_v53 = vcombine.high %v91_v51, %v95_v1  ;;  %v2482_v54 = vcombine.low %v91_v51, %v95_v1  ;;  %v84_v51 = vld [vmem:[%s4125_s3 + $0x10] sm:$0xff] }
  0xb4   :  { %v77_v47 = vmul.f32 %v73_v41, %v62_v40  ;;  %v76_v49 = vmul.f32 %v69_v43, %v61_v42  ;;  %v191_v40 = vld [vmem:[%s4125_s3 + $0x368] sm:$0xff]  ;;  %v88_v1 = vld [vmem:[%s4125_s3 + $0x30] sm:$0xff] }
  0xb5   :  { %v2943_v44 = vpop.eup %2942  ;;  %v2579_v42 = vcombine.high %v187_v39, %v191_v40 }
  0xb6   :  { %v64_v45 = vmul.f32 %v2943_v44, %v3071_v5  ;;  %v63_v46 = vmul.f32 %v2943_v44, %v3062_v2  ;;  %v99_v2 = vld [vmem:[%s4125_s3 + $0x88] sm:$0xff] }
  0xb7   :  { %v103_v5 = vld [vmem:[%s4125_s3 + $0xa8] sm:$0xff] }
  0xb8   :  { %v79_v48 = vmul.f32 %v73_v41, %v64_v45  ;;  %v78_v50 = vmul.f32 %v69_v43, %v63_v46  ;;  %v2491_v55 = vcombine.high %v99_v2, %v103_v5  ;;  %v2490_v58 = vcombine.low %v99_v2, %v103_v5  ;;  %v195_v43 = vld [vmem:[%s4125_s3 + $0x388] sm:$0xff]  ;;  %v92_v5 = vld [vmem:[%s4125_s3 + $0x50] sm:$0xff] }
  0xb9   :  { %v2570_v41 = vcombine.low %v179_v32, %v183_v33  ;;  %v199_v44 = vld [vmem:[%s4125_s3 + $0x3a8] sm:$0xff]  ;;  %v2578_v45 = vcombine.low %v187_v39, %v191_v40  ;;  %v2477_v2 = vcombine.high %v84_v51, %v88_v1  ;;  %v160_v32 = vld [vmem:[%s4125_s3 + $0x270] sm:$0xff] }
  0xba   :  { %v3210_v0 = vpack.c.bf16 %v79_v48, %v77_v47  ;;  %v3212_v52 = vpack.c.bf16 %v78_v50, %v76_v49  ;;  %v2587_v46 = vcombine.high %v195_v43, %v199_v44  ;;  %v203_v47 = vld [vmem:[%s4125_s3 + $0x3c8] sm:$0xff]  ;;  %v2586_v49 = vcombine.low %v195_v43, %v199_v44  ;;  %v2755_v33 = vld [vmem:[%s4127_s5 + $0x30] ss:$8 sps:$4 sm:$0xff]   ;;  %v2759_v44 = vld [vmem:[%s4127_s5 + $0x54] ss:$8 sps:$4 sm:$0xff]  }
  0xbb   :  { %v207_v48 = vld [vmem:[%s4125_s3 + $0x3e8] sm:$0xff]  ;;  %v164_v40 = vld [vmem:[%s4125_s3 + $0x290] sm:$0xff] }
  0xbc   :  { %924 = vmatprep.mubr.bf16.mxu1 %v3210_v0  ;;  %v2595_v50 = vcombine.high %v203_v47, %v207_v48 }
  0xbd   :  { %925 = vmatmul.mubr.bf16.vlgmr.msra.gmra.mrb[0].mxu1 %v3212_v52 }
  0xbe   :  { %936 = vmatpush1.bf16.msra.mxu1 %v2474_v15  ;;  %967 = vmatprep.mubr.bf16.mxu1 %v3210_v0  ;;  %v2531_v15 = vcombine.high %v139_v12, %v143_v13  ;;  %v124_v12 = vld [vmem:[%s4125_s3 + $0x150] sm:$0xff] }
  0xbf   :  { %937 = vmatprep.subr.bf16.mxu1 %v2483_v53  ;;  %v2594_v53 = vcombine.low %v203_v47, %v207_v48  ;;  %v128_v13 = vld [vmem:[%s4125_s3 + $0x170] sm:$0xff] }
  0xc0   :  { %v176_v47 = vld [vmem:[%s4125_s3 + $0x2f0] sm:$0xff] }
  0xc1   :  { %v2761_v48 = vld [vmem:[%s4127_s5 + $0x50] ss:$8 sps:$4 sm:$0xff]  }
  0xc2   :  { %938 = vmatpush1.bf16.msra.mxu1 %v2482_v54  ;;  %v96_v54 = vld [vmem:[%s4125_s3 + $0x70] sm:$0xff] }
  0xc3   :  { %939 = vmatprep.subr.bf16.mxu1 %v2491_v55  ;;  %v2476_v55 = vcombine.low %v84_v51, %v88_v1  ;;  %v2485_v56 = vcombine.high %v92_v5, %v96_v54  ;;  %v180_v1 = vld [vmem:[%s4125_s3 + $0x310] sm:$0xff] }
  0xc6   :  { %940 = vmatpush1.bf16.msra.mxu1 %v2490_v58  ;;  %v104_v58 = vld [vmem:[%s4125_s3 + $0xb0] sm:$0xff] }
  0xc7   :  { %941 = vmatprep.subr.bf16.mxu1 %v2499_v59  ;;  %v2484_v59 = vcombine.low %v92_v5, %v96_v54  ;;  %v2765_v54 = vld [vmem:[%s4127_s5 + $0x74] ss:$8 sps:$4 sm:$0xff]  }
  0xca   :  { %942 = vmatpush1.bf16.msra.mxu1 %v2498_v62  ;;  %v2493_v62 = vcombine.high %v100_v57, %v104_v58 }
  0xcb   :  { %943 = vmatprep.subr.bf16.mxu1 %v2507_v63  ;;  %v2746_v63 = vld [vmem:[%s4127_s5] ss:$8 sps:$4 sm:$0xff]  }
  0xcc   :  { %2285 = vmatpush1.bf16.msra.mxu0 %v2746_v63  ;;  %v200_v63 = vld [vmem:[%s4125_s3 + $0x3b0] sm:$0xff] }
  0xcd   :  { %2286 = vmatprep.subr.bf16.mxu0 %v2747_v4 }
  0xce   :  { %944 = vmatpush1.bf16.msra.mxu1 %v2506_v6  ;;  %v2749_v6 = vld [vmem:[%s4127_s5 + $0x10] ss:$8 sps:$4 sm:$0xff]  }
  0xcf   :  { %945 = vmatprep.subr.bf16.mxu1 %v2515_v7  ;;  %v2492_v7 = vcombine.low %v100_v57, %v104_v58  ;;  %v192_v57 = vld [vmem:[%s4125_s3 + $0x370] sm:$0xff] }
  0xd0   :  { %2287 = vmatpush1.bf16.msra.mxu0 %v2749_v6  ;;  %v2767_v58 = vld [vmem:[%s4127_s5 + $0x70] ss:$8 sps:$4 sm:$0xff]   ;;  %v2771_v6 = vld [vmem:[%s4127_s5 + $0x94] ss:$8 sps:$4 sm:$0xff]  }
  0xd2   :  { %946 = vmatpush1.bf16.msra.mxu1 %v2514_v10  ;;  %v2501_v10 = vcombine.high %v108_v60, %v112_v3 }
  0xd3   :  { %947 = vmatprep.subr.bf16.mxu1 %v2523_v11  ;;  %v2500_v11 = vcombine.low %v108_v60, %v112_v3  ;;  %v2768_v60 = vld [vmem:[%s4127_s5 + $0x84] ss:$8 sps:$4 sm:$0xff]   ;;  %v2770_v3 = vld [vmem:[%s4127_s5 + $0x80] ss:$8 sps:$4 sm:$0xff]  }
  0xd6   :  { %948 = vmatpush1.bf16.msra.mxu1 %v2522_v14  ;;  %v2509_v14 = vcombine.high %v116_v8, %v120_v9 }
  0xd7   :  { %949 = vmatprep.subr.bf16.mxu1 %v2531_v15  ;;  %v2508_v15 = vcombine.low %v116_v8, %v120_v9  ;;  %v2773_v8 = vld [vmem:[%s4127_s5 + $0x90] ss:$8 sps:$4 sm:$0xff]  }
  0xda   :  { %950 = vmatpush1.bf16.msra.mxu1 %v2530_v18  ;;  %v2517_v18 = vcombine.high %v124_v12, %v128_v13 }
  0xdb   :  { %951 = vmatprep.subr.bf16.mxu1 %v2539_v19  ;;  %v2516_v19 = vcombine.low %v124_v12, %v128_v13  ;;  %v2774_v12 = vld [vmem:[%s4127_s5 + $0xa4] ss:$8 sps:$4 sm:$0xff]  }
  0xde   :  { %952 = vmatpush1.bf16.msra.mxu1 %v2538_v22  ;;  %v2525_v22 = vcombine.high %v132_v16, %v136_v17  ;;  %v85_v16 = vld [vmem:[%s4125_s3 + $0x18] sm:$0xff] }
  0xdf   :  { %953 = vmatprep.subr.bf16.mxu1 %v2547_v23  ;;  %v2750_v23 = vld [vmem:[%s4127_s5 + $0x24] ss:$8 sps:$4 sm:$0xff]   ;;  %v89_v17 = vld [vmem:[%s4125_s3 + $0x38] sm:$0xff] }
  0xe0   :  { %2288 = vmatprep.subr.bf16.mxu0 %v2750_v23  ;;  %v97_v23 = vld [vmem:[%s4125_s3 + $0x78] sm:$0xff] }
  0xe1   :  { %2289 = vmatpush1.bf16.msra.mxu0 %v2752_v24  ;;  %v2780_v24 = vld [vmem:[%s4127_s5 + $0xc4] ss:$8 sps:$4 sm:$0xff]  }
  0xe2   :  { %954 = vmatpush1.bf16.msra.mxu1 %v2546_v26  ;;  %v148_v26 = vld [vmem:[%s4125_s3 + $0x210] sm:$0xff]  ;;  %2290 = vmatprep.subr.bf16.mxu0 %v2753_v29  ;;  %v105_v29 = vld [vmem:[%s4125_s3 + $0xb8] sm:$0xff] }
  0xe3   :  { %955 = vmatprep.subr.bf16.mxu1 %v2555_v27  ;;  %v152_v27 = vld [vmem:[%s4125_s3 + $0x230] sm:$0xff] }
  0xe4   :  { %v2540_v39 = vcombine.low %v148_v26, %v152_v27 }
  0xe5   :  { %2291 = vmatpush1.bf16.msra.mxu0 %v2755_v33 }
  0xe6   :  { %956 = vmatpush1.bf16.msra.mxu1 %v2554_v30  ;;  %v2532_v30 = vcombine.low %v140_v20, %v144_v21  ;;  %v2779_v20 = vld [vmem:[%s4127_s5 + $0xb0] ss:$8 sps:$4 sm:$0xff]   ;;  %v2479_v21 = vcombine.high %v85_v16, %v89_v17 }
  0xe7   :  { %957 = vmatprep.subr.bf16.mxu1 %v2563_v31  ;;  %v156_v31 = vld [vmem:[%s4125_s3 + $0x250] sm:$0xff] }
  0xe8   :  { %v2549_v43 = vcombine.high %v156_v31, %v160_v32 }
  0xea   :  { %958 = vmatpush1.bf16.msra.mxu1 %v2562_v34  ;;  %v2541_v34 = vcombine.high %v148_v26, %v152_v27  ;;  %v2782_v26 = vld [vmem:[%s4127_s5 + $0xc0] ss:$8 sps:$4 sm:$0xff]  }
  0xeb   :  { %959 = vmatprep.subr.bf16.mxu1 %v2571_v38  ;;  %v2756_v38 = vld [vmem:[%s4127_s5 + $0x44] ss:$8 sps:$4 sm:$0xff]  }
  0xec   :  { %2292 = vmatprep.subr.bf16.mxu0 %v2756_v38  ;;  %v113_v38 = vld [vmem:[%s4125_s3 + $0xf8] sm:$0xff] }
  0xee   :  { %960 = vmatpush1.bf16.msra.mxu1 %v2570_v41  ;;  %v168_v41 = vld [vmem:[%s4125_s3 + $0x2b0] sm:$0xff] }
  0xef   :  { %961 = vmatprep.subr.bf16.mxu1 %v2579_v42  ;;  %v2758_v42 = vld [vmem:[%s4127_s5 + $0x40] ss:$8 sps:$4 sm:$0xff]   ;;  %v2556_v51 = vcombine.low %v164_v40, %v168_v41 }
  0xf0   :  { %2293 = vmatpush1.bf16.msra.mxu0 %v2758_v42  ;;  %v117_v42 = vld [vmem:[%s4125_s3 + $0x118] sm:$0xff] }
  0xf1   :  { %2294 = vmatprep.subr.bf16.mxu0 %v2759_v44  ;;  %v2789_v44 = vld [vmem:[%s4127_s5 + $0xf4] ss:$8 sps:$4 sm:$0xff]  }
  0xf2   :  { %962 = vmatpush1.bf16.msra.mxu1 %v2578_v45  ;;  %v2548_v45 = vcombine.low %v156_v31, %v160_v32  ;;  %v2785_v32 = vld [vmem:[%s4127_s5 + $0xd0] ss:$8 sps:$4 sm:$0xff]  }
  0xf3   :  { %963 = vmatprep.subr.bf16.mxu1 %v2587_v46  ;;  %v172_v46 = vld [vmem:[%s4125_s3 + $0x2d0] sm:$0xff] }
  0xf4   :  { %2295 = vmatpush1.bf16.msra.mxu0 %v2761_v48  ;;  %v2565_v5 = vcombine.high %v172_v46, %v176_v47  ;;  %v125_v48 = vld [vmem:[%s4125_s3 + $0x158] sm:$0xff] }
  0xf6   :  { %964 = vmatpush1.bf16.msra.mxu1 %v2586_v49  ;;  %v2557_v49 = vcombine.high %v164_v40, %v168_v41  ;;  %v2788_v40 = vld [vmem:[%s4127_s5 + $0xe0] ss:$8 sps:$4 sm:$0xff]  }
  0xf7   :  { %965 = vmatprep.subr.bf16.mxu1 %v2595_v50  ;;  %v2762_v50 = vld [vmem:[%s4127_s5 + $0x64] ss:$8 sps:$4 sm:$0xff]  }
  0xf8   :  { %2296 = vmatprep.subr.bf16.mxu0 %v2762_v50  ;;  %v2794_v50 = vld [vmem:[%s4127_s5 + $0x104] ss:$8 sps:$4 sm:$0xff]  }
  0xfa   :  { %966 = vmatpush1.bf16.msra.mxu1 %v2594_v53  ;;  %v184_v53 = vld [vmem:[%s4125_s3 + $0x330] sm:$0xff] }
  0xfb   :  { %978 = vmatprep.subr.bf16.mxu1 %v2477_v2  ;;  %v2764_v2 = vld [vmem:[%s4127_s5 + $0x60] ss:$8 sps:$4 sm:$0xff]   ;;  %v2572_v61 = vcombine.low %v180_v1, %v184_v53 }
  0xfc   :  { %2297 = vmatpush1.bf16.msra.mxu0 %v2764_v2  ;;  %v137_v2 = vld [vmem:[%s4125_s3 + $0x1b8] sm:$0xff] }
  0xfd   :  { %968 = vmatmul.mubr.bf16.vlgmr.msra.gmra.mrb[4].mxu1 %v3212_v52  ;;  %2298 = vmatprep.subr.bf16.mxu0 %v2765_v54 }
  0xfe   :  { %979 = vmatpush1.bf16.msra.mxu1 %v2476_v55  ;;  %1010 = vmatprep.mubr.bf16.mxu1 %v3210_v0  ;;  %v2564_v55 = vcombine.low %v172_v46, %v176_v47 }
  0xff   :  { %980 = vmatprep.subr.bf16.mxu1 %v2485_v56  ;;  %v188_v56 = vld [vmem:[%s4125_s3 + $0x350] sm:$0xff] }
 0x100   :  { %2299 = vmatpush1.bf16.msra.mxu0 %v2767_v58  ;;  %v2581_v4 = vcombine.high %v188_v56, %v192_v57 }
 0x101   :  { %2300 = vmatprep.subr.bf16.mxu0 %v2768_v60  ;;  %v153_v60 = vld [vmem:[%s4125_s3 + $0x238] sm:$0xff] }
 0x102   :  { %981 = vmatpush1.bf16.msra.mxu1 %v2484_v59  ;;  %v2573_v59 = vcombine.high %v180_v1, %v184_v53  ;;  %v133_v53 = vld [vmem:[%s4125_s3 + $0x198] sm:$0xff] }
 0x103   :  { %982 = vmatprep.subr.bf16.mxu1 %v2493_v62  ;;  %v196_v62 = vld [vmem:[%s4125_s3 + $0x390] sm:$0xff]  ;;  %v2527_v54 = vcombine.high %v133_v53, %v137_v2 }
 0x104   :  { %2301 = vmatpush1.bf16.msra.mxu0 %v2770_v3  ;;  %v2589_v9 = vcombine.high %v196_v62, %v200_v63  ;;  %v2588_v13 = vcombine.low %v196_v62, %v200_v63  ;;  %v157_v63 = vld [vmem:[%s4125_s3 + $0x258] sm:$0xff] }
 0x105   :  { %2302 = vmatprep.subr.bf16.mxu0 %v2771_v6  ;;  %v161_v3 = vld [vmem:[%s4125_s3 + $0x278] sm:$0xff] }
 0x106   :  { %983 = vmatpush1.bf16.msra.mxu1 %v2492_v7  ;;  %v2580_v7 = vcombine.low %v188_v56, %v192_v57  ;;  %v145_v56 = vld [vmem:[%s4125_s3 + $0x1f8] sm:$0xff]  ;;  %v2526_v57 = vcombine.low %v133_v53, %v137_v2  ;;  %v2551_v6 = vcombine.high %v157_v63, %v161_v3 }
 0x107   :  { %984 = vmatprep.subr.bf16.mxu1 %v2501_v10  ;;  %v204_v10 = vld [vmem:[%s4125_s3 + $0x3d0] sm:$0xff] }
 0x108   :  { %2303 = vmatpush1.bf16.msra.mxu0 %v2773_v8  ;;  %v169_v8 = vld [vmem:[%s4125_s3 + $0x2b8] sm:$0xff] }
 0x109   :  { %2304 = vmatprep.subr.bf16.mxu0 %v2774_v12  ;;  %v177_v12 = vld [vmem:[%s4125_s3 + $0x2f8] sm:$0xff] }
 0x10a   :  { %985 = vmatpush1.bf16.msra.mxu1 %v2500_v11  ;;  %v208_v11 = vld [vmem:[%s4125_s3 + $0x3f0] sm:$0xff] }
 0x10b   :  { %986 = vmatprep.subr.bf16.mxu1 %v2509_v14  ;;  %v2776_v14 = vld [vmem:[%s4127_s5 + $0xa0] ss:$8 sps:$4 sm:$0xff]  }
 0x10c   :  { %2305 = vmatpush1.bf16.msra.mxu0 %v2776_v14 }
 0x10e   :  { %987 = vmatpush1.bf16.msra.mxu1 %v2508_v15  ;;  %v2597_v15 = vcombine.high %v204_v10, %v208_v11 }
 0x10f   :  { %988 = vmatprep.subr.bf16.mxu1 %v2517_v18  ;;  %v2777_v18 = vld [vmem:[%s4127_s5 + $0xb4] ss:$8 sps:$4 sm:$0xff]  }
 0x110   :  { %2306 = vmatprep.subr.bf16.mxu0 %v2777_v18 }
 0x111   :  { %2307 = vmatpush1.bf16.msra.mxu0 %v2779_v20  ;;  %v193_v20 = vld [vmem:[%s4125_s3 + $0x378] sm:$0xff] }
 0x112   :  { %989 = vmatpush1.bf16.msra.mxu1 %v2516_v19  ;;  %v2596_v19 = vcombine.low %v204_v10, %v208_v11  ;;  %2308 = vmatprep.subr.bf16.mxu0 %v2780_v24  ;;  %v173_v11 = vld [vmem:[%s4125_s3 + $0x2d8] sm:$0xff] }
 0x113   :  { %990 = vmatprep.subr.bf16.mxu1 %v2525_v22  ;;  %v93_v22 = vld [vmem:[%s4125_s3 + $0x58] sm:$0xff]  ;;  %v2567_v14 = vcombine.high %v173_v11, %v177_v12 }
 0x114   :  { %v2487_v27 = vcombine.high %v93_v22, %v97_v23  ;;  %v2486_v31 = vcombine.low %v93_v22, %v97_v23  ;;  %v197_v23 = vld [vmem:[%s4125_s3 + $0x398] sm:$0xff] }
 0x115   :  { %2309 = vmatpush1.bf16.msra.mxu0 %v2782_v26  ;;  %v201_v24 = vld [vmem:[%s4125_s3 + $0x3b8] sm:$0xff] }
 0x116   :  { %991 = vmatpush1.bf16.msra.mxu1 %v2524_v25  ;;  %v2478_v25 = vcombine.low %v85_v16, %v89_v17  ;;  %v185_v16 = vld [vmem:[%s4125_s3 + $0x338] sm:$0xff]  ;;  %v2566_v17 = vcombine.low %v173_v11, %v177_v12  ;;  %v2591_v26 = vcombine.high %v197_v23, %v201_v24 }
 0x117   :  { %992 = vmatprep.subr.bf16.mxu1 %v2533_v28  ;;  %v101_v28 = vld [vmem:[%s4125_s3 + $0x98] sm:$0xff] }
 0x118   :  { %v2495_v33 = vcombine.high %v101_v28, %v105_v29 }
 0x11a   :  { %993 = vmatpush1.bf16.msra.mxu1 %v2532_v30  ;;  %v2783_v30 = vld [vmem:[%s4127_s5 + $0xd4] ss:$8 sps:$4 sm:$0xff]  }
 0x11b   :  { %994 = vmatprep.subr.bf16.mxu1 %v2541_v34  ;;  %2310 = vmatprep.subr.bf16.mxu0 %v2783_v30  ;;  %v109_v34 = vld [vmem:[%s4125_s3 + $0xd8] sm:$0xff] }
 0x11c   :  { %2311 = vmatpush1.bf16.msra.mxu0 %v2785_v32  ;;  %v2503_v41 = vcombine.high %v109_v34, %v113_v38  ;;  %v2502_v46 = vcombine.low %v109_v34, %v113_v38  ;;  %v3600_v32 = vld [vmem:[%s4128_s4] sm:$0xff] }
 0x11d   :  { %v219_v34 = vrot.slane %v3600_v32, %v3190_v36 }
 0x11e   :  { %995 = vmatpush1.bf16.msra.mxu1 %v2540_v39  ;;  %v2494_v39 = vcombine.low %v101_v28, %v105_v29  ;;  %v209_v28 = vld [vmem:[%s4125_s3 + $0x3f8] sm:$0xff]  ;;  %v2590_v29 = vcombine.low %v197_v23, %v201_v24 }
 0x11f   :  { %996 = vmatprep.subr.bf16.mxu1 %v2549_v43  ;;  %v121_v43 = vld [vmem:[%s4125_s3 + $0x138] sm:$0xff] }
 0x120   :  { %v2511_v47 = vcombine.high %v117_v42, %v121_v43 }
 0x122   :  { %997 = vmatpush1.bf16.msra.mxu1 %v2548_v45  ;;  %v2791_v45 = vld [vmem:[%s4127_s5 + $0xf0] ss:$8 sps:$4 sm:$0xff]  }
 0x123   :  { %998 = vmatprep.subr.bf16.mxu1 %v2557_v49  ;;  %v129_v49 = vld [vmem:[%s4125_s3 + $0x178] sm:$0xff] }
 0x124   :  { %v2519_v1 = vcombine.high %v125_v48, %v129_v49 }
 0x126   :  { %999 = vmatpush1.bf16.msra.mxu1 %v2556_v51  ;;  %v2510_v51 = vcombine.low %v117_v42, %v121_v43 }
 0x127   :  { %1000 = vmatprep.subr.bf16.mxu1 %v2565_v5  ;;  %v2518_v5 = vcombine.low %v125_v48, %v129_v49 }
 0x12a   :  { %1001 = vmatpush1.bf16.msra.mxu1 %v2564_v55  ;;  %v141_v55 = vld [vmem:[%s4125_s3 + $0x1d8] sm:$0xff] }
 0x12b   :  { %1002 = vmatprep.subr.bf16.mxu1 %v2573_v59  ;;  %v2535_v58 = vcombine.high %v141_v55, %v145_v56  ;;  %v149_v59 = vld [vmem:[%s4125_s3 + $0x218] sm:$0xff] }
 0x12c   :  { %v2543_v62 = vcombine.high %v149_v59, %v153_v60 }
 0x12e   :  { %1003 = vmatpush1.bf16.msra.mxu1 %v2572_v61  ;;  %v2534_v61 = vcombine.low %v141_v55, %v145_v56 }
 0x12f   :  { %1004 = vmatprep.subr.bf16.mxu1 %v2581_v4  ;;  %v2542_v4 = vcombine.low %v149_v59, %v153_v60 }
 0x132   :  { %1005 = vmatpush1.bf16.msra.mxu1 %v2580_v7  ;;  %v165_v7 = vld [vmem:[%s4125_s3 + $0x298] sm:$0xff] }
 0x133   :  { %1006 = vmatprep.subr.bf16.mxu1 %v2589_v9  ;;  %v2550_v9 = vcombine.low %v157_v63, %v161_v3  ;;  %v2559_v10 = vcombine.high %v165_v7, %v169_v8 }
 0x136   :  { %1007 = vmatpush1.bf16.msra.mxu1 %v2588_v13  ;;  %v2558_v13 = vcombine.low %v165_v7, %v169_v8 }
 0x137   :  { %1008 = vmatprep.subr.bf16.mxu1 %v2597_v15  ;;  %v181_v15 = vld [vmem:[%s4125_s3 + $0x318] sm:$0xff] }
 0x138   :  { %v2575_v18 = vcombine.high %v181_v15, %v185_v16 }
 0x13a   :  { %1009 = vmatpush1.bf16.msra.mxu1 %v2596_v19  ;;  %v189_v19 = vld [vmem:[%s4125_s3 + $0x358] sm:$0xff] }
 0x13b   :  { %1021 = vmatprep.subr.bf16.mxu1 %v2479_v21  ;;  %v2574_v21 = vcombine.low %v181_v15, %v185_v16  ;;  %v2583_v22 = vcombine.high %v189_v19, %v193_v20 }
 0x13d   :  { %1011 = vmatmul.mubr.bf16.vlgmr.msra.gmra.mrb[8].mxu1 %v3212_v52 }
 0x13e   :  { %1022 = vmatpush1.bf16.msra.mxu1 %v2478_v25  ;;  %1053 = vmatprep.mubr.bf16.mxu1 %v3210_v0  ;;  %v2786_v0 = vld [vmem:[%s4127_s5 + $0xe4] ss:$8 sps:$4 sm:$0xff]   ;;  %v2582_v25 = vcombine.low %v189_v19, %v193_v20 }
 0x13f   :  { %1023 = vmatprep.subr.bf16.mxu1 %v2487_v27  ;;  %2312 = vmatprep.subr.bf16.mxu0 %v2786_v0  ;;  %v205_v27 = vld [vmem:[%s4125_s3 + $0x3d8] sm:$0xff] }
 0x140   :  { %2313 = vmatpush1.bf16.msra.mxu0 %v2788_v40  ;;  %v2599_v30 = vcombine.high %v205_v27, %v209_v28 }
 0x141   :  { %2314 = vmatprep.subr.bf16.mxu0 %v2789_v44 }
 0x142   :  { %1024 = vmatpush1.bf16.msra.mxu1 %v2486_v31  ;;  %v2598_v31 = vcombine.low %v205_v27, %v209_v28 }
 0x143   :  { %1025 = vmatprep.subr.bf16.mxu1 %v2495_v33  ;;  %v215_v33 = vrot.slane %v3600_v32, %v3193_v37 }
 0x144   :  { %2315 = vmatpush1.bf16.msra.mxu0 %v2791_v45 }
 0x145   :  { %2327 = vmatprep.subr.bf16.mxu0 %v2794_v50 }
 0x146   :  { %1026 = vmatpush1.bf16.msra.mxu1 %v2494_v39 }
 0x147   :  { %1027 = vmatprep.subr.bf16.mxu1 %v2503_v41 }
 0x14a   :  { %1028 = vmatpush1.bf16.msra.mxu1 %v2502_v46 }
 0x14b   :  { %1029 = vmatprep.subr.bf16.mxu1 %v2511_v47 }
 0x14e   :  { %1030 = vmatpush1.bf16.msra.mxu1 %v2510_v51 }
 0x14f   :  { %1031 = vmatprep.subr.bf16.mxu1 %v2519_v1 }
 0x152   :  { %1032 = vmatpush1.bf16.msra.mxu1 %v2518_v5 }
 0x153   :  { %1033 = vmatprep.subr.bf16.mxu1 %v2527_v54 }
 0x156   :  { %1034 = vmatpush1.bf16.msra.mxu1 %v2526_v57 }
 0x157   :  { %1035 = vmatprep.subr.bf16.mxu1 %v2535_v58 }
 0x15a   :  { %1036 = vmatpush1.bf16.msra.mxu1 %v2534_v61 }
 0x15b   :  { %1037 = vmatprep.subr.bf16.mxu1 %v2543_v62 }
 0x15e   :  { %1038 = vmatpush1.bf16.msra.mxu1 %v2542_v4 }
 0x15f   :  { %1039 = vmatprep.subr.bf16.mxu1 %v2551_v6 }
 0x162   :  { %1040 = vmatpush1.bf16.msra.mxu1 %v2550_v9 }
 0x163   :  { %1041 = vmatprep.subr.bf16.mxu1 %v2559_v10 }
 0x166   :  { %1042 = vmatpush1.bf16.msra.mxu1 %v2558_v13 }
 0x167   :  { %1043 = vmatprep.subr.bf16.mxu1 %v2567_v14 }
 0x16a   :  { %1044 = vmatpush1.bf16.msra.mxu1 %v2566_v17 }
 0x16b   :  { %1045 = vmatprep.subr.bf16.mxu1 %v2575_v18 }
 0x16e   :  { %1046 = vmatpush1.bf16.msra.mxu1 %v2574_v21 }
 0x16f   :  { %1047 = vmatprep.subr.bf16.mxu1 %v2583_v22 }
 0x172   :  { %1048 = vmatpush1.bf16.msra.mxu1 %v2582_v25 }
 0x173   :  { %1049 = vmatprep.subr.bf16.mxu1 %v2591_v26 }
 0x176   :  { %1050 = vmatpush1.bf16.msra.mxu1 %v2590_v29 }
 0x177   :  { %1051 = vmatprep.subr.bf16.mxu1 %v2599_v30 }
 0x17a   :  { %1052 = vmatpush1.bf16.msra.mxu1 %v2598_v31 }
 0x17d   :  { %1054 = vmatmul.mubr.bf16.vlgmr.msra.gmra.mrb[12].mxu1 %v3212_v52 }
 0x190   :  { %v926_v38 = vpop.f32.mrb[0].mxu1 }
 0x191   :  { %v3606_v0 = vadd.f32 %v926_v38, %v215_v33  ;;  %v928_v39 = vpop.f32.mrb[1].mxu1 }
 0x192   :  { %v3608_v40 = vadd.f32 %v928_v39, %v219_v34  ;;  %v930_v41 = vpop.f32.mrb[2].mxu1 }
 0x193   :  { %v3611_v52 = vmul.f32 0.70710677, %v3606_v0  ;;  %v3613_v42 = vadd.f32 %v930_v41, %v215_v33  ;;  %v932_v43 = vpop.f32.mrb[3].mxu1 }
 0x194   :  { %v3616_v44 = vmul.f32 0.70710677, %v3608_v40  ;;  %v3618_v45 = vadd.f32 %v932_v43, %v219_v34 }
 0x195   :  { %v1096_v46 = vand.u32 2147483647, %v3611_v52  ;;  %v3622_v47 = vmul.f32 0.70710677, %v3613_v42  ;;  %vm1416_vm4 = vcmp.ge.f32.partialorder %v3611_v52, 0.0 }
 0x196   :  { %v1097_v48 = vand.u32 2147483647, %v3616_v44  ;;  %v3626_v49 = vmul.f32 0.70710677, %v3618_v45  ;;  %vm1417_vm5 = vcmp.ge.f32.partialorder %v3616_v44, 0.0 }
 0x197   :  { %v1112_v50 = vmul.f32 0.3275911, %v1096_v46  ;;  %v1104_v51 = vand.u32 2147483647, %v3622_v47  ;;  %v1320_v58 = vsub.f32 0.0, %v1096_v46  ;;  %vm1424_vm6 = vcmp.ge.f32.partialorder %v3622_v47, 0.0 }
 0x198   :  { %v1113_v1 = vmul.f32 0.3275911, %v1097_v48  ;;  %v1105_v53 = vand.u32 2147483647, %v3626_v49  ;;  %v1321_v59 = vsub.f32 0.0, %v1097_v48  ;;  %vm1425_vm7 = vcmp.ge.f32.partialorder %v3626_v49, 0.0 }
 0x199   :  { %v1128_v2 = vadd.f32 1.0, %v1112_v50  ;;  %v1120_v5 = vmul.f32 0.3275911, %v1104_v51  ;;  %v1336_v61 = vmul.f32 %v1320_v58, %v1096_v46  ;;  %v1328_v62 = vsub.f32 0.0, %v1104_v51 }
 0x19a   :  { %v1129_v54 = vadd.f32 1.0, %v1113_v1  ;;  %v1121_v55 = vmul.f32 0.3275911, %v1105_v53  ;;  %v1337_v4 = vmul.f32 %v1321_v59, %v1097_v48  ;;  %v1329_v6 = vsub.f32 0.0, %v1105_v53 }
 0x19b   :  { %2944 = vrcp.f32 %v1128_v2  ;;  %v1136_v56 = vadd.f32 1.0, %v1120_v5  ;;  %v1352_v10 = vmul.f32 1.442695, %v1336_v61  ;;  %v1344_v11 = vmul.f32 %v1328_v62, %v1104_v51 }
 0x19c   :  { %2946 = vrcp.f32 %v1129_v54  ;;  %v1137_v57 = vadd.f32 1.0, %v1121_v55  ;;  %v1354_v14 = vmul.f32 1.442695, %v1337_v4  ;;  %v1345_v17 = vmul.f32 %v1329_v6, %v1105_v53 }
 0x19d   :  { %2948 = vrcp.f32 %v1136_v56  ;;  %v1368_v22 = vmul.f32 1.442695, %v1344_v11  ;;  %v226_v49 = vsub.s32 3, %v3187_v35 }
 0x19e   :  { %2950 = vrcp.f32 %v1137_v57  ;;  %v1370_v27 = vmul.f32 1.442695, %v1345_v17 }
 0x19f   :  { %2952 = vpow2.f32 %v1352_v10 }
 0x1a0   :  { %2954 = vpow2.f32 %v1354_v14 }
 0x1a1   :  { %2956 = vpow2.f32 %v1368_v22 }
 0x1a2   :  { %2958 = vpow2.f32 %v1370_v27 }
 0x1a5   :  { %v2945_v60 = vpop.eup %2944 }
 0x1a6   :  { %v2947_v63 = vpop.eup %2946  ;;  %v1176_v3 = vmul.f32 1.0614054, %v2945_v60 }
 0x1a7   :  { %v1177_v7 = vmul.f32 1.0614054, %v2947_v63  ;;  %v2949_v9 = vpop.eup %2948 }
 0x1a8   :  { %v1192_v8 = vadd.f32 -1.4531521, %v1176_v3  ;;  %v1184_v15 = vmul.f32 1.0614054, %v2949_v9  ;;  %v2951_v16 = vpop.eup %2950 }
 0x1a9   :  { %v1193_v12 = vadd.f32 -1.4531521, %v1177_v7  ;;  %v1185_v21 = vmul.f32 1.0614054, %v2951_v16  ;;  %v2953_v2 = vpop.eup %2952 }
 0x1aa   :  { %v1208_v13 = vmul.f32 %v2945_v60, %v1192_v8  ;;  %v1200_v20 = vadd.f32 -1.4531521, %v1184_v15  ;;  %v2955_v54 = vpop.eup %2954 }
 0x1ab   :  { %v1209_v18 = vmul.f32 %v2947_v63, %v1193_v12  ;;  %v1201_v26 = vadd.f32 -1.4531521, %v1185_v21  ;;  %v2957_v3 = vpop.eup %2956  ;;  %v1065_v21 = vmul.f32 0.5, %v3608_v40  ;;  %v2797_v40 = vld [vmem:[%s4127_s5 + $0x114] ss:$8 sps:$4 sm:$0xff]  }
 0x1ac   :  { %v1224_v19 = vadd.f32 1.4214138, %v1208_v13  ;;  %v1216_v25 = vmul.f32 %v2949_v9, %v1200_v20  ;;  %v2959_v10 = vpop.eup %2958 }
 0x1ad   :  { %v1225_v23 = vadd.f32 1.4214138, %v1209_v18  ;;  %v1217_v31 = vmul.f32 %v2951_v16, %v1201_v26 }
 0x1ae   :  { %v1240_v24 = vmul.f32 %v2945_v60, %v1224_v19  ;;  %v1232_v30 = vadd.f32 1.4214138, %v1216_v25 }
 0x1af   :  { %v1241_v28 = vmul.f32 %v2947_v63, %v1225_v23  ;;  %v1233_v39 = vadd.f32 1.4214138, %v1217_v31  ;;  %v2800_v31 = vld [vmem:[%s4127_s5 + $0x124] ss:$8 sps:$4 sm:$0xff]  }
 0x1b0   :  { %v1256_v29 = vadd.f32 -0.28449672, %v1240_v24  ;;  %v1248_v38 = vmul.f32 %v2949_v9, %v1232_v30  ;;  %v1073_v24 = vmul.f32 0.5, %v3618_v45  ;;  %v2795_v45 = vld [vmem:[%s4127_s5 + $0x110] ss:$8 sps:$4 sm:$0xff]   ;;  %v227_v30 = vrot.slane %v3600_v32, %v226_v49 }
 0x1b1   :  { %v1257_v33 = vadd.f32 -0.28449672, %v1241_v28  ;;  %v1249_v48 = vmul.f32 %v2951_v16, %v1233_v39  ;;  %v222_v28 = vsub.s32 2, %v3187_v35  ;;  %v2798_v39 = vld [vmem:[%s4127_s5 + $0x120] ss:$8 sps:$4 sm:$0xff]  }
 0x1b2   :  { %v1272_v34 = vmul.f32 %v2945_v60, %v1256_v29  ;;  %v1264_v46 = vadd.f32 -0.28449672, %v1248_v38  ;;  %v2821_v49 = vld [vmem:[%s4127_s5 + $0x194] ss:$8 sps:$4 sm:$0xff]  }
 0x1b3   :  { %v1273_v41 = vmul.f32 %v2947_v63, %v1257_v33  ;;  %v1265_v53 = vadd.f32 -0.28449672, %v1249_v48  ;;  %v223_v29 = vrot.slane %v3600_v32, %v222_v28 }
 0x1b4   :  { %v1288_v43 = vadd.f32 0.2548296, %v1272_v34  ;;  %v1280_v1 = vmul.f32 %v2949_v9, %v1264_v46  ;;  %v2803_v46 = vld [vmem:[%s4127_s5 + $0x134] ss:$8 sps:$4 sm:$0xff]  }
 0x1b5   :  { %v1289_v50 = vadd.f32 0.2548296, %v1273_v41  ;;  %v1281_v57 = vmul.f32 %v2951_v16, %v1265_v53 }
 0x1b6   :  { %v1304_v51 = vmul.f32 %v2945_v60, %v1288_v43  ;;  %v1296_v56 = vadd.f32 0.2548296, %v1280_v1 }
 0x1b7   :  { %v1305_v5 = vmul.f32 %v2947_v63, %v1289_v50  ;;  %v1297_v62 = vadd.f32 0.2548296, %v1281_v57  ;;  %v2806_v57 = vld [vmem:[%s4127_s5 + $0x144] ss:$8 sps:$4 sm:$0xff]  }
 0x1b8   :  { %v1384_v55 = vmul.f32 %v2953_v2, %v1304_v51  ;;  %v1312_v61 = vmul.f32 %v2949_v9, %v1296_v56  ;;  %v1064_v9 = vmul.f32 0.5, %v3606_v0 }
 0x1b9   :  { %v1385_v58 = vmul.f32 %v2955_v54, %v1305_v5  ;;  %v1313_v8 = vmul.f32 %v2951_v16, %v1297_v62  ;;  %v1072_v16 = vmul.f32 0.5, %v3613_v42  ;;  %v2792_v42 = vld [vmem:[%s4127_s5 + $0x100] ss:$8 sps:$4 sm:$0xff]   ;;  %v2801_v54 = vld [vmem:[%s4127_s5 + $0x130] ss:$8 sps:$4 sm:$0xff]  }
 0x1ba   :  { %v1400_v59 = vsub.f32 1.0, %v1384_v55  ;;  %v1392_v7 = vmul.f32 %v2957_v3, %v1312_v61 }
 0x1bb   :  { %v1401_v4 = vsub.f32 1.0, %v1385_v58  ;;  %v1393_v63 = vmul.f32 %v2959_v10, %v1313_v8  ;;  %v2809_v10 = vld [vmem:[%s4127_s5 + $0x154] ss:$8 sps:$4 sm:$0xff]  }
 0x1bc   :  { %v1432_v6 = vsub.f32 0.0, %v1400_v59  ;;  %v1408_v12 = vsub.f32 1.0, %v1392_v7 }
 0x1bd   :  { %v1433_v60 = vsub.f32 0.0, %v1401_v4  ;;  %v1409_v14 = vsub.f32 1.0, %v1393_v63  ;;  %v2812_v63 = vld [vmem:[%s4127_s5 + $0x164] ss:$8 sps:$4 sm:$0xff]  }
 0x1be   :  { %v1448_v11 = vsel %vm1416_vm4, %v1400_v59, %v1432_v6  ;;  %v1440_v13 = vsub.f32 0.0, %v1408_v12  ;;  %v2804_v6 = vld [vmem:[%s4127_s5 + $0x140] ss:$8 sps:$4 sm:$0xff]  }
 0x1bf   :  { %v1449_v15 = vsel %vm1417_vm5, %v1401_v4, %v1433_v60  ;;  %v1464_v17 = vadd.f32 1.0, %v1448_v11  ;;  %v1441_v19 = vsub.f32 0.0, %v1409_v14 }
 0x1c0   :  { %v1456_v18 = vsel %vm1424_vm6, %v1408_v12, %v1440_v13  ;;  %v1465_v52 = vadd.f32 1.0, %v1449_v15  ;;  %v2807_v12 = vld [vmem:[%s4127_s5 + $0x150] ss:$8 sps:$4 sm:$0xff]  }
 0x1c1   :  { %v1472_v20 = vadd.f32 1.0, %v1456_v18  ;;  %v1457_v22 = vsel %vm1425_vm7, %v1409_v14, %v1441_v19  ;;  %v1480_v44 = vmul.f32 %v1464_v17, %v1064_v9  ;;  %v2810_v14 = vld [vmem:[%s4127_s5 + $0x160] ss:$8 sps:$4 sm:$0xff]   ;;  %v2815_v17 = vld [vmem:[%s4127_s5 + $0x174] ss:$8 sps:$4 sm:$0xff]  }
 0x1c2   :  { %v1473_v25 = vadd.f32 1.0, %v1457_v22  ;;  %v1481_v26 = vmul.f32 %v1465_v52, %v1065_v21  ;;  %v2818_v22 = vld [vmem:[%s4127_s5 + $0x184] ss:$8 sps:$4 sm:$0xff]  }
 0x1c3   :  { %v1488_v23 = vmul.f32 %v1472_v20, %v1072_v16  ;;  %v2813_v16 = vld [vmem:[%s4127_s5 + $0x170] ss:$8 sps:$4 sm:$0xff]  }
 0x1c4   :  { %v1489_v47 = vmul.f32 %v1473_v25, %v1073_v24 }
 0x1c5   :  { %v1496_v27 = vpack.c.bf16 %v1488_v23, %v1480_v44 }
 0x1c6   :  { %v1497_v0 = vpack.c.bf16 %v1489_v47, %v1481_v26 }
 0x1c8   :  { %2316 = vmatprep.mubr.bf16.mxu0 %v1497_v0  ;;  %v2816_v0 = vld [vmem:[%s4127_s5 + $0x180] ss:$8 sps:$4 sm:$0xff]  }
 0x1c9   :  { %2317 = vmatmul.mubr.bf16.vlgmr.msra.gmra.mrb[0].mxu0 %v1496_v27 }
 0x1ca   :  { %2328 = vmatpush1.bf16.msra.mxu0 %v2792_v42 }
 0x1cb   :  { %2329 = vmatprep.subr.bf16.mxu0 %v2797_v40 }
 0x1ce   :  { %2330 = vmatpush1.bf16.msra.mxu0 %v2795_v45 }
 0x1cf   :  { %2331 = vmatprep.subr.bf16.mxu0 %v2800_v31 }
 0x1d0   :  { %v969_v33 = vpop.f32.mrb[4].mxu1 }
 0x1d1   :  { %v3654_v34 = vadd.f32 %v969_v33, %v223_v29  ;;  %v971_v38 = vpop.f32.mrb[5].mxu1 }
 0x1d2   :  { %v3659_v41 = vadd.f32 %v971_v38, %v227_v30  ;;  %v973_v43 = vpop.f32.mrb[6].mxu1  ;;  %2332 = vmatpush1.bf16.msra.mxu0 %v2798_v39 }
 0x1d3   :  { %v3665_v48 = vmul.f32 0.70710677, %v3654_v34  ;;  %v3667_v50 = vadd.f32 %v973_v43, %v223_v29  ;;  %v975_v51 = vpop.f32.mrb[7].mxu1  ;;  %2333 = vmatprep.subr.bf16.mxu0 %v2803_v46  ;;  %v2819_v46 = vld [vmem:[%s4127_s5 + $0x190] ss:$8 sps:$4 sm:$0xff]  }
 0x1d4   :  { %v3670_v1 = vmul.f32 0.70710677, %v3659_v41  ;;  %v3672_v53 = vadd.f32 %v975_v51, %v227_v30 }
 0x1d5   :  { %v1098_v2 = vand.u32 2147483647, %v3665_v48  ;;  %v3676_v5 = vmul.f32 0.70710677, %v3667_v50  ;;  %vm1418_vm8 = vcmp.ge.f32.partialorder %v3665_v48, 0.0 }
 0x1d6   :  { %v1099_v55 = vand.u32 2147483647, %v3670_v1  ;;  %v3683_v56 = vmul.f32 0.70710677, %v3672_v53  ;;  %2334 = vmatpush1.bf16.msra.mxu0 %v2801_v54  ;;  %vm1419_vm9 = vcmp.ge.f32.partialorder %v3670_v1, 0.0 }
 0x1d7   :  { %v1114_v58 = vmul.f32 0.3275911, %v1098_v2  ;;  %v1106_v59 = vand.u32 2147483647, %v3676_v5  ;;  %2335 = vmatprep.subr.bf16.mxu0 %v2806_v57  ;;  %v1322_v13 = vsub.f32 0.0, %v1098_v2  ;;  %vm1426_vm10 = vcmp.ge.f32.partialorder %v3676_v5, 0.0 }
 0x1d8   :  { %v1115_v61 = vmul.f32 0.3275911, %v1099_v55  ;;  %v1107_v62 = vand.u32 2147483647, %v3683_v56  ;;  %v1323_v15 = vsub.f32 0.0, %v1099_v55  ;;  %vm1427_vm11 = vcmp.ge.f32.partialorder %v3683_v56, 0.0 }
 0x1d9   :  { %v1130_v3 = vadd.f32 1.0, %v1114_v58  ;;  %v1122_v4 = vmul.f32 0.3275911, %v1106_v59  ;;  %v1338_v18 = vmul.f32 %v1322_v13, %v1098_v2  ;;  %v1330_v19 = vsub.f32 0.0, %v1106_v59  ;;  %v2839_v1 = vld [vmem:[%s4127_s5 + $0x1f4] ss:$8 sps:$4 sm:$0xff]  }
 0x1da   :  { %v1131_v7 = vadd.f32 1.0, %v1115_v61  ;;  %v1123_v8 = vmul.f32 0.3275911, %v1107_v62  ;;  %2336 = vmatpush1.bf16.msra.mxu0 %v2804_v6  ;;  %v1339_v21 = vmul.f32 %v1323_v15, %v1099_v55  ;;  %v1331_v23 = vsub.f32 0.0, %v1107_v62  ;;  %v2824_v55 = vld [vmem:[%s4127_s5 + $0x1a4] ss:$8 sps:$4 sm:$0xff]  }
 0x1db   :  { %2960 = vrcp.f32 %v1130_v3  ;;  %v1138_v60 = vadd.f32 1.0, %v1122_v4  ;;  %2337 = vmatprep.subr.bf16.mxu0 %v2809_v10  ;;  %v1356_v26 = vmul.f32 1.442695, %v1338_v18  ;;  %v1346_v27 = vmul.f32 %v1330_v19, %v1106_v59  ;;  %v2822_v4 = vld [vmem:[%s4127_s5 + $0x1a0] ss:$8 sps:$4 sm:$0xff]  }
 0x1dc   :  { %2962 = vrcp.f32 %v1131_v7  ;;  %v1139_v11 = vadd.f32 1.0, %v1123_v8  ;;  %v1358_v28 = vmul.f32 1.442695, %v1339_v21  ;;  %v1347_v30 = vmul.f32 %v1331_v23, %v1107_v62  ;;  %v2827_v10 = vld [vmem:[%s4127_s5 + $0x1b4] ss:$8 sps:$4 sm:$0xff]  }
 0x1dd   :  { %2964 = vrcp.f32 %v1138_v60  ;;  %v1372_v43 = vmul.f32 1.442695, %v1346_v27  ;;  %v2830_v19 = vld [vmem:[%s4127_s5 + $0x1c4] ss:$8 sps:$4 sm:$0xff]   ;;  %v1067_v5 = vmul.f32 0.5, %v3659_v41 }
 0x1de   :  { %2966 = vrcp.f32 %v1139_v11  ;;  %2338 = vmatpush1.bf16.msra.mxu0 %v2807_v12  ;;  %v1374_v58 = vmul.f32 1.442695, %v1347_v30 }
 0x1df   :  { %2339 = vmatprep.subr.bf16.mxu0 %v2812_v63  ;;  %2968 = vpow2.f32 %v1356_v26 }
 0x1e0   :  { %2970 = vpow2.f32 %v1358_v28 }
 0x1e1   :  { %2972 = vpow2.f32 %v1372_v43 }
 0x1e2   :  { %2340 = vmatpush1.bf16.msra.mxu0 %v2810_v14  ;;  %2974 = vpow2.f32 %v1374_v58  ;;  %v2825_v14 = vld [vmem:[%s4127_s5 + $0x1b0] ss:$8 sps:$4 sm:$0xff]   ;;  %v1074_v58 = vmul.f32 0.5, %v3667_v50  ;;  %v2842_v50 = vld [vmem:[%s4127_s5 + $0x204] ss:$8 sps:$4 sm:$0xff]  }
 0x1e3   :  { %2341 = vmatprep.subr.bf16.mxu0 %v2815_v17 }
 0x1e5   :  { %v3708_v9 = vpop.eup %2960 }
 0x1e6   :  { %v3713_v20 = vpop.eup %2962  ;;  %v1178_v52 = vmul.f32 1.0614054, %v3708_v9  ;;  %2342 = vmatpush1.bf16.msra.mxu0 %v2813_v16 }
 0x1e7   :  { %v1179_v44 = vmul.f32 1.0614054, %v3713_v20  ;;  %v3720_v25 = vpop.eup %2964  ;;  %2343 = vmatprep.subr.bf16.mxu0 %v2818_v22 }
 0x1e8   :  { %v1194_v24 = vadd.f32 -1.4531521, %v1178_v52  ;;  %v1186_v40 = vmul.f32 1.0614054, %v3720_v25  ;;  %v2967_v45 = vpop.eup %2966 }
 0x1e9   :  { %v1195_v47 = vadd.f32 -1.4531521, %v1179_v44  ;;  %v1187_v38 = vmul.f32 1.0614054, %v2967_v45  ;;  %v2969_v16 = vpop.eup %2968 }
 0x1ea   :  { %v1210_v42 = vmul.f32 %v3708_v9, %v1194_v24  ;;  %v1202_v33 = vadd.f32 -1.4531521, %v1186_v40  ;;  %2344 = vmatpush1.bf16.msra.mxu0 %v2816_v0  ;;  %v2971_v21 = vpop.eup %2970  ;;  %v2833_v0 = vld [vmem:[%s4127_s5 + $0x1d4] ss:$8 sps:$4 sm:$0xff]  }
 0x1eb   :  { %v1211_v29 = vmul.f32 %v3713_v20, %v1195_v47  ;;  %v1203_v54 = vadd.f32 -1.4531521, %v1187_v38  ;;  %2345 = vmatprep.subr.bf16.mxu0 %v2821_v49 }
 0x1ec   :  { %v1226_v31 = vadd.f32 1.4214138, %v1210_v42  ;;  %v1218_v2 = vmul.f32 %v3720_v25, %v1202_v33 }
 0x1ed   :  { %v1227_v39 = vadd.f32 1.4214138, %v1211_v29  ;;  %v1219_v62 = vmul.f32 %v2967_v45, %v1203_v54 }
 0x1ee   :  { %v1242_v51 = vmul.f32 %v3708_v9, %v1226_v31  ;;  %v1234_v61 = vadd.f32 1.4214138, %v1218_v2  ;;  %2346 = vmatpush1.bf16.msra.mxu0 %v2819_v46  ;;  %v1066_v2 = vmul.f32 0.5, %v3654_v34  ;;  %v1075_v34 = vmul.f32 0.5, %v3672_v53  ;;  %v2840_v53 = vld [vmem:[%s4127_s5 + $0x200] ss:$8 sps:$4 sm:$0xff]  }
 0x1ef   :  { %v1243_v57 = vmul.f32 %v3713_v20, %v1227_v39  ;;  %v1235_v8 = vadd.f32 1.4214138, %v1219_v62  ;;  %2347 = vmatprep.subr.bf16.mxu0 %v2824_v55  ;;  %v2836_v39 = vld [vmem:[%s4127_s5 + $0x1e4] ss:$8 sps:$4 sm:$0xff]  }
 0x1f0   :  { %v1258_v59 = vadd.f32 -0.28449672, %v1242_v51  ;;  %v1250_v7 = vmul.f32 %v3720_v25, %v1234_v61  ;;  %v2834_v51 = vld [vmem:[%s4127_s5 + $0x1e0] ss:$8 sps:$4 sm:$0xff]  }
 0x1f1   :  { %v1259_v3 = vadd.f32 -0.28449672, %v1243_v57  ;;  %v1251_v63 = vmul.f32 %v2967_v45, %v1235_v8 }
 0x1f2   :  { %v1274_v6 = vmul.f32 %v3708_v9, %v1258_v59  ;;  %v1266_v12 = vadd.f32 -0.28449672, %v1250_v7  ;;  %2348 = vmatpush1.bf16.msra.mxu0 %v2822_v4 }
 0x1f3   :  { %v1275_v60 = vmul.f32 %v3713_v20, %v1259_v3  ;;  %v1267_v18 = vadd.f32 -0.28449672, %v1251_v63  ;;  %2349 = vmatprep.subr.bf16.mxu0 %v2827_v10  ;;  %v230_v10 = vsub.s32 4, %v3187_v35 }
 0x1f4   :  { %v1290_v11 = vadd.f32 0.2548296, %v1274_v6  ;;  %v1282_v17 = vmul.f32 %v3720_v25, %v1266_v12  ;;  %v2837_v6 = vld [vmem:[%s4127_s5 + $0x1f0] ss:$8 sps:$4 sm:$0xff]  }
 0x1f5   :  { %v1291_v13 = vadd.f32 0.2548296, %v1275_v60  ;;  %v1283_v23 = vmul.f32 %v2967_v45, %v1267_v18  ;;  %v2845_v60 = vld [vmem:[%s4127_s5 + $0x214] ss:$8 sps:$4 sm:$0xff]   ;;  %v2843_v12 = vld [vmem:[%s4127_s5 + $0x210] ss:$8 sps:$4 sm:$0xff]   ;;  %v231_v63 = vrot.slane %v3600_v32, %v230_v10 }
 0x1f6   :  { %v1306_v15 = vmul.f32 %v3708_v9, %v1290_v11  ;;  %v1298_v44 = vadd.f32 0.2548296, %v1282_v17  ;;  %2350 = vmatpush1.bf16.msra.mxu0 %v2825_v14  ;;  %v2828_v9 = vld [vmem:[%s4127_s5 + $0x1c0] ss:$8 sps:$4 sm:$0xff]   ;;  %v234_v11 = vsub.s32 5, %v3187_v35 }
 0x1f7   :  { %v1307_v52 = vmul.f32 %v3713_v20, %v1291_v13  ;;  %v1299_v27 = vadd.f32 0.2548296, %v1283_v23  ;;  %2351 = vmatprep.subr.bf16.mxu0 %v2830_v19  ;;  %v2973_v20 = vpop.eup %2972  ;;  %v2848_v14 = vld [vmem:[%s4127_s5 + $0x224] ss:$8 sps:$4 sm:$0xff]   ;;  %v2846_v19 = vld [vmem:[%s4127_s5 + $0x220] ss:$8 sps:$4 sm:$0xff]  }
 0x1f8   :  { %v1386_v22 = vmul.f32 %v2969_v16, %v1306_v15  ;;  %v1314_v47 = vmul.f32 %v3720_v25, %v1298_v44  ;;  %v2975_v29 = vpop.eup %2974  ;;  %v2831_v25 = vld [vmem:[%s4127_s5 + $0x1d0] ss:$8 sps:$4 sm:$0xff]   ;;  %v235_v13 = vrot.slane %v3600_v32, %v234_v11  ;;  %v2851_v32 = vld [vmem:[%s4127_s5 + $0x234] ss:$8 sps:$4 sm:$0xff]  }
 0x1f9   :  { %v1387_v24 = vmul.f32 %v2971_v21, %v1307_v52  ;;  %v1315_v49 = vmul.f32 %v2967_v45, %v1299_v27 }
 0x1fa   :  { %v1402_v26 = vsub.f32 1.0, %v1386_v22  ;;  %v1394_v40 = vmul.f32 %v2973_v20, %v1314_v47  ;;  %2352 = vmatpush1.bf16.msra.mxu0 %v2828_v9  ;;  %v2849_v47 = vld [vmem:[%s4127_s5 + $0x230] ss:$8 sps:$4 sm:$0xff]   ;;  %v2854_v20 = vld [vmem:[%s4127_s5 + $0x244] ss:$8 sps:$4 sm:$0xff]  }
 0x1fb   :  { %v1403_v42 = vsub.f32 1.0, %v1387_v24  ;;  %v1395_v38 = vmul.f32 %v2975_v29, %v1315_v49  ;;  %2353 = vmatprep.subr.bf16.mxu0 %v2833_v0 }
 0x1fc   :  { %v1434_v28 = vsub.f32 0.0, %v1402_v26  ;;  %v1410_v33 = vsub.f32 1.0, %v1394_v40 }
 0x1fd   :  { %v1435_v30 = vsub.f32 0.0, %v1403_v42  ;;  %v1411_v46 = vsub.f32 1.0, %v1395_v38  ;;  %v2857_v38 = vld [vmem:[%s4127_s5 + $0x254] ss:$8 sps:$4 sm:$0xff]  }
 0x1fe   :  { %v1450_v31 = vsel %vm1418_vm8, %v1402_v26, %v1434_v28  ;;  %v1442_v43 = vsub.f32 0.0, %v1410_v33  ;;  %2354 = vmatpush1.bf16.msra.mxu0 %v2831_v25  ;;  %v2852_v25 = vld [vmem:[%s4127_s5 + $0x240] ss:$8 sps:$4 sm:$0xff]  }
 0x1ff   :  { %v1451_v45 = vsel %vm1419_vm9, %v1403_v42, %v1435_v30  ;;  %v1466_v48 = vadd.f32 1.0, %v1450_v31  ;;  %v1443_v55 = vsub.f32 0.0, %v1411_v46  ;;  %2355 = vmatprep.subr.bf16.mxu0 %v2836_v39 }
 0x200   :  { %v1458_v54 = vsel %vm1426_vm10, %v1410_v33, %v1442_v43  ;;  %v1467_v57 = vadd.f32 1.0, %v1451_v45  ;;  %v2855_v43 = vld [vmem:[%s4127_s5 + $0x250] ss:$8 sps:$4 sm:$0xff]  }
 0x201   :  { %v1474_v59 = vadd.f32 1.0, %v1458_v54  ;;  %v1459_v61 = vsel %vm1427_vm11, %v1411_v46, %v1443_v55  ;;  %v1482_v62 = vmul.f32 %v1466_v48, %v1066_v2  ;;  %v2860_v46 = vld [vmem:[%s4127_s5 + $0x264] ss:$8 sps:$4 sm:$0xff]   ;;  %v2863_v54 = vld [vmem:[%s4127_s5 + $0x274] ss:$8 sps:$4 sm:$0xff]  }
 0x202   :  { %v1475_v4 = vadd.f32 1.0, %v1459_v61  ;;  %2356 = vmatpush1.bf16.msra.mxu0 %v2834_v51  ;;  %v1483_v7 = vmul.f32 %v1467_v57, %v1067_v5  ;;  %v2858_v51 = vld [vmem:[%s4127_s5 + $0x260] ss:$8 sps:$4 sm:$0xff]  }
 0x203   :  { %v1490_v3 = vmul.f32 %v1474_v59, %v1074_v58  ;;  %2357 = vmatprep.subr.bf16.mxu0 %v2839_v1  ;;  %v2861_v58 = vld [vmem:[%s4127_s5 + $0x270] ss:$8 sps:$4 sm:$0xff]  }
 0x204   :  { %v1491_v8 = vmul.f32 %v1475_v4, %v1075_v34 }
 0x205   :  { %v1498_v56 = vpack.c.bf16 %v1490_v3, %v1482_v62  ;;  %v2866_v62 = vld [vmem:[%s4127_s5 + $0x284] ss:$8 sps:$4 sm:$0xff]  }
 0x206   :  { %2358 = vmatpush1.bf16.msra.mxu0 %v2837_v6  ;;  %v1499_v41 = vpack.c.bf16 %v1491_v8, %v1483_v7  ;;  %v2864_v8 = vld [vmem:[%s4127_s5 + $0x280] ss:$8 sps:$4 sm:$0xff]  }
 0x207   :  { %2370 = vmatprep.subr.bf16.mxu0 %v2842_v50 }
 0x208   :  { %2359 = vmatprep.mubr.bf16.mxu0 %v1499_v41 }
 0x209   :  { %2360 = vmatmul.mubr.bf16.vlgmr.msra.gmra.mrb[0].mxu0 %v1498_v56 }
 0x20a   :  { %2371 = vmatpush1.bf16.msra.mxu0 %v2840_v53 }
 0x20b   :  { %2372 = vmatprep.subr.bf16.mxu0 %v2845_v60  ;;  %v2869_v60 = vld [vmem:[%s4127_s5 + $0x294] ss:$8 sps:$4 sm:$0xff]  }
 0x20e   :  { %2373 = vmatpush1.bf16.msra.mxu0 %v2843_v12 }
 0x20f   :  { %2374 = vmatprep.subr.bf16.mxu0 %v2848_v14 }
 0x210   :  { %v1012_v15 = vpop.f32.mrb[8].mxu1 }
 0x211   :  { %v3807_v17 = vadd.f32 %v1012_v15, %v231_v63  ;;  %v1014_v18 = vpop.f32.mrb[9].mxu1 }
 0x212   :  { %v3812_v16 = vadd.f32 %v1014_v18, %v235_v13  ;;  %v1016_v52 = vpop.f32.mrb[10].mxu1  ;;  %2375 = vmatpush1.bf16.msra.mxu0 %v2846_v19 }
 0x213   :  { %v3818_v21 = vmul.f32 0.70710677, %v3807_v17  ;;  %v3820_v22 = vadd.f32 %v1016_v52, %v231_v63  ;;  %v1018_v44 = vpop.f32.mrb[11].mxu1  ;;  %2376 = vmatprep.subr.bf16.mxu0 %v2851_v32  ;;  %v2867_v52 = vld [vmem:[%s4127_s5 + $0x290] ss:$8 sps:$4 sm:$0xff]  }
 0x214   :  { %v3823_v23 = vmul.f32 0.70710677, %v3812_v16  ;;  %v3825_v24 = vadd.f32 %v1018_v44, %v235_v13 }
 0x215   :  { %v1100_v9 = vand.u32 2147483647, %v3818_v21  ;;  %v3829_v26 = vmul.f32 0.70710677, %v3820_v22  ;;  %vm1420_vm12 = vcmp.ge.f32.partialorder %v3818_v21, 0.0 }
 0x216   :  { %v1101_v27 = vand.u32 2147483647, %v3823_v23  ;;  %v3836_v0 = vmul.f32 0.70710677, %v3825_v24  ;;  %2377 = vmatpush1.bf16.msra.mxu0 %v2849_v47  ;;  %v2872_v47 = vld [vmem:[%s4127_s5 + $0x2a4] ss:$8 sps:$4 sm:$0xff]  }
 0x217   :  { %v1116_v42 = vmul.f32 0.3275911, %v1100_v9  ;;  %v1108_v28 = vand.u32 2147483647, %v3829_v26  ;;  %2378 = vmatprep.subr.bf16.mxu0 %v2854_v20  ;;  %v1324_v48 = vsub.f32 0.0, %v1100_v9  ;;  %vm1421_vm13 = vcmp.ge.f32.partialorder %v3823_v23, 0.0 }
 0x218   :  { %v1117_v40 = vmul.f32 0.3275911, %v1101_v27  ;;  %v1109_v49 = vand.u32 2147483647, %v3836_v0  ;;  %v1325_v2 = vsub.f32 0.0, %v1101_v27  ;;  %vm1428_vm14 = vcmp.ge.f32.partialorder %v3829_v26, 0.0 }
 0x219   :  { %v1132_v29 = vadd.f32 1.0, %v1116_v42  ;;  %v1124_v30 = vmul.f32 0.3275911, %v1108_v28  ;;  %v1340_v1 = vmul.f32 %v1324_v48, %v1100_v9  ;;  %v1332_v57 = vsub.f32 0.0, %v1108_v28  ;;  %v2873_v48 = vld [vmem:[%s4127_s5 + $0x2b0] ss:$8 sps:$4 sm:$0xff]  }
 0x21a   :  { %v1133_v31 = vadd.f32 1.0, %v1117_v40  ;;  %v1125_v33 = vmul.f32 0.3275911, %v1109_v49  ;;  %2379 = vmatpush1.bf16.msra.mxu0 %v2852_v25  ;;  %v1341_v61 = vmul.f32 %v1325_v2, %v1101_v27  ;;  %v1333_v34 = vsub.f32 0.0, %v1109_v49  ;;  %v2887_v23 = vld [vmem:[%s4127_s5 + $0x2f4] ss:$8 sps:$4 sm:$0xff]  }
 0x21b   :  { %2976 = vrcp.f32 %v1132_v29  ;;  %v1140_v39 = vadd.f32 1.0, %v1124_v30  ;;  %2380 = vmatprep.subr.bf16.mxu0 %v2857_v38  ;;  %v1360_v50 = vmul.f32 1.442695, %v1340_v1  ;;  %v1348_v56 = vmul.f32 %v1332_v57, %v1108_v28  ;;  %v2870_v29 = vld [vmem:[%s4127_s5 + $0x2a0] ss:$8 sps:$4 sm:$0xff]  }
 0x21c   :  { %2978 = vrcp.f32 %v1133_v31  ;;  %v1141_v45 = vadd.f32 1.0, %v1125_v33  ;;  %v1362_v53 = vmul.f32 1.442695, %v1341_v61  ;;  %v1349_v63 = vmul.f32 %v1333_v34, %v1109_v49  ;;  %v2875_v33 = vld [vmem:[%s4127_s5 + $0x2b4] ss:$8 sps:$4 sm:$0xff]  }
 0x21d   :  { %2980 = vrcp.f32 %v1140_v39  ;;  %v1376_v19 = vmul.f32 1.442695, %v1348_v56  ;;  %v2878_v1 = vld [vmem:[%s4127_s5 + $0x2c4] ss:$8 sps:$4 sm:$0xff]   ;;  %v2881_v56 = vld [vmem:[%s4127_s5 + $0x2d4] ss:$8 sps:$4 sm:$0xff]  }
 0x21e   :  { %2982 = vrcp.f32 %v1141_v45  ;;  %2381 = vmatpush1.bf16.msra.mxu0 %v2855_v43  ;;  %v1378_v20 = vmul.f32 1.442695, %v1349_v63  ;;  %vm1429_vm15 = vcmp.ge.f32.partialorder %v3836_v0, 0.0  ;;  %v1069_v26 = vmul.f32 0.5, %v3812_v16 }
 0x21f   :  { %2382 = vmatprep.subr.bf16.mxu0 %v2860_v46  ;;  %2984 = vpow2.f32 %v1360_v50 }
 0x220   :  { %2986 = vpow2.f32 %v1362_v53 }
 0x221   :  { %2988 = vpow2.f32 %v1376_v19 }
 0x222   :  { %2383 = vmatpush1.bf16.msra.mxu0 %v2858_v51  ;;  %2990 = vpow2.f32 %v1378_v20 }
 0x223   :  { %2384 = vmatprep.subr.bf16.mxu0 %v2863_v54 }
 0x225   :  { %v3861_v55 = vpop.eup %2976 }
 0x226   :  { %v3866_v59 = vpop.eup %2978  ;;  %v1180_v5 = vmul.f32 1.0614054, %v3861_v55  ;;  %2385 = vmatpush1.bf16.msra.mxu0 %v2861_v58 }
 0x227   :  { %v1181_v3 = vmul.f32 1.0614054, %v3866_v59  ;;  %v3873_v6 = vpop.eup %2980  ;;  %2386 = vmatprep.subr.bf16.mxu0 %v2866_v62 }
 0x228   :  { %v1196_v4 = vadd.f32 -1.4531521, %v1180_v5  ;;  %v1188_v10 = vmul.f32 1.0614054, %v3873_v6  ;;  %v2983_v11 = vpop.eup %2982 }
 0x229   :  { %v1197_v7 = vadd.f32 -1.4531521, %v1181_v3  ;;  %v1189_v15 = vmul.f32 1.0614054, %v2983_v11  ;;  %v2985_v57 = vpop.eup %2984 }
 0x22a   :  { %v1212_v41 = vmul.f32 %v3861_v55, %v1196_v4  ;;  %v1204_v14 = vadd.f32 -1.4531521, %v1188_v10  ;;  %2387 = vmatpush1.bf16.msra.mxu0 %v2864_v8  ;;  %v2987_v5 = vpop.eup %2986 }
 0x22b   :  { %v1213_v12 = vmul.f32 %v3866_v59, %v1197_v7  ;;  %v1205_v9 = vadd.f32 -1.4531521, %v1189_v15  ;;  %2388 = vmatprep.subr.bf16.mxu0 %v2869_v60  ;;  %v2884_v15 = vld [vmem:[%s4127_s5 + $0x2e4] ss:$8 sps:$4 sm:$0xff]  }
 0x22c   :  { %v1228_v13 = vadd.f32 1.4214138, %v1212_v41  ;;  %v1220_v44 = vmul.f32 %v3873_v6, %v1204_v14 }
 0x22d   :  { %v1229_v18 = vadd.f32 1.4214138, %v1213_v12  ;;  %v1221_v40 = vmul.f32 %v2983_v11, %v1205_v9 }
 0x22e   :  { %v1244_v32 = vmul.f32 %v3861_v55, %v1228_v13  ;;  %v1236_v28 = vadd.f32 1.4214138, %v1220_v44  ;;  %2389 = vmatpush1.bf16.msra.mxu0 %v2867_v52  ;;  %v2882_v52 = vld [vmem:[%s4127_s5 + $0x2e0] ss:$8 sps:$4 sm:$0xff]  }
 0x22f   :  { %v1245_v27 = vmul.f32 %v3866_v59, %v1229_v18  ;;  %v1237_v31 = vadd.f32 1.4214138, %v1221_v40  ;;  %2390 = vmatprep.subr.bf16.mxu0 %v2872_v47 }
 0x230   :  { %v1260_v42 = vadd.f32 -0.28449672, %v1244_v32  ;;  %v1252_v25 = vmul.f32 %v3873_v6, %v1236_v28  ;;  %v1068_v32 = vmul.f32 0.5, %v3807_v17  ;;  %v1077_v17 = vmul.f32 0.5, %v3825_v24  ;;  %v2888_v24 = vld [vmem:[%s4127_s5 + $0x300] ss:$8 sps:$4 sm:$0xff]  }
 0x231   :  { %v1261_v49 = vadd.f32 -0.28449672, %v1245_v27  ;;  %v1253_v43 = vmul.f32 %v2983_v11, %v1237_v31  ;;  %v1076_v27 = vmul.f32 0.5, %v3820_v22  ;;  %v2890_v22 = vld [vmem:[%s4127_s5 + $0x304] ss:$8 sps:$4 sm:$0xff]   ;;  %v238_v31 = vsub.s32 6, %v3187_v35 }
 0x232   :  { %v1276_v30 = vmul.f32 %v3861_v55, %v1260_v42  ;;  %v1268_v45 = vadd.f32 -0.28449672, %v1252_v25  ;;  %2391 = vmatpush1.bf16.msra.mxu0 %v2870_v29  ;;  %v2885_v29 = vld [vmem:[%s4127_s5 + $0x2f0] ss:$8 sps:$4 sm:$0xff]  }
 0x233   :  { %v1277_v38 = vmul.f32 %v3866_v59, %v1261_v49  ;;  %v1269_v54 = vadd.f32 -0.28449672, %v1253_v43  ;;  %2392 = vmatprep.subr.bf16.mxu0 %v2875_v33  ;;  %v2893_v33 = vld [vmem:[%s4127_s5 + $0x314] ss:$8 sps:$4 sm:$0xff]  }
 0x234   :  { %v1292_v39 = vadd.f32 0.2548296, %v1276_v30  ;;  %v1284_v2 = vmul.f32 %v3873_v6, %v1268_v45  ;;  %v3008_v45 = vld [vmem:[%s4128_s4] sm:$0xff] }
 0x235   :  { %v1293_v46 = vadd.f32 0.2548296, %v1277_v38  ;;  %v1285_v3 = vmul.f32 %v2983_v11, %v1269_v54  ;;  %v242_v38 = vsub.s32 7, %v3187_v35  ;;  %v239_v43 = vrot.slane %v3008_v45, %v238_v31  ;;  %v2894_v54 = vld [vmem:[%s4127_s5 + $0x320] ss:$8 sps:$4 sm:$0xff]  }
 0x236   :  { %v1308_v51 = vmul.f32 %v3861_v55, %v1292_v39  ;;  %v1300_v62 = vadd.f32 0.2548296, %v1284_v2  ;;  %2393 = vmatpush1.bf16.msra.mxu0 %v2873_v48  ;;  %v2876_v55 = vld [vmem:[%s4127_s5 + $0x2c0] ss:$8 sps:$4 sm:$0xff]   ;;  %v2891_v39 = vld [vmem:[%s4127_s5 + $0x310] ss:$8 sps:$4 sm:$0xff]  }
 0x237   :  { %v1309_v58 = vmul.f32 %v3866_v59, %v1293_v46  ;;  %v1301_v7 = vadd.f32 0.2548296, %v1285_v3  ;;  %2394 = vmatprep.subr.bf16.mxu0 %v2878_v1  ;;  %v2989_v59 = vpop.eup %2988  ;;  %v243_v46 = vrot.slane %v3008_v45, %v242_v38  ;;  %v2896_v48 = vld [vmem:[%s4127_s5 + $0x324] ss:$8 sps:$4 sm:$0xff]  }
 0x238   :  { %v1388_v61 = vmul.f32 %v2985_v57, %v1308_v51  ;;  %v1316_v50 = vmul.f32 %v3873_v6, %v1300_v62  ;;  %v2991_v60 = vpop.eup %2990  ;;  %v2879_v6 = vld [vmem:[%s4127_s5 + $0x2d0] ss:$8 sps:$4 sm:$0xff]  }
 0x239   :  { %v1389_v34 = vmul.f32 %v2987_v5, %v1309_v58  ;;  %v1317_v10 = vmul.f32 %v2983_v11, %v1301_v7  ;;  %v2899_v58 = vld [vmem:[%s4127_s5 + $0x334] ss:$8 sps:$4 sm:$0xff]  }
 0x23a   :  { %v1404_v4 = vsub.f32 1.0, %v1388_v61  ;;  %v1396_v53 = vmul.f32 %v2989_v59, %v1316_v50  ;;  %2395 = vmatpush1.bf16.msra.mxu0 %v2876_v55  ;;  %v2897_v50 = vld [vmem:[%s4127_s5 + $0x330] ss:$8 sps:$4 sm:$0xff]   ;;  %v2902_v59 = vld [vmem:[%s4127_s5 + $0x344] ss:$8 sps:$4 sm:$0xff]  }
 0x23b   :  { %v1405_v8 = vsub.f32 1.0, %v1389_v34  ;;  %v1397_v14 = vmul.f32 %v2991_v60, %v1317_v10  ;;  %2396 = vmatprep.subr.bf16.mxu0 %v2881_v56 }
 0x23c   :  { %v1436_v41 = vsub.f32 0.0, %v1404_v4  ;;  %v1412_v13 = vsub.f32 1.0, %v1396_v53 }
 0x23d   :  { %v1437_v12 = vsub.f32 0.0, %v1405_v8  ;;  %v1413_v19 = vsub.f32 1.0, %v1397_v14  ;;  %v2905_v14 = vld [vmem:[%s4127_s5 + $0x354] ss:$8 sps:$4 sm:$0xff]  }
 0x23e   :  { %v1452_v63 = vsel %vm1420_vm12, %v1404_v4, %v1436_v41  ;;  %v1444_v18 = vsub.f32 0.0, %v1412_v13  ;;  %2397 = vmatpush1.bf16.msra.mxu0 %v2879_v6  ;;  %v2900_v6 = vld [vmem:[%s4127_s5 + $0x340] ss:$8 sps:$4 sm:$0xff]  }
 0x23f   :  { %v1453_v11 = vsel %vm1421_vm13, %v1405_v8, %v1437_v12  ;;  %v1468_v21 = vadd.f32 1.0, %v1452_v63  ;;  %v1445_v9 = vsub.f32 0.0, %v1413_v19  ;;  %2398 = vmatprep.subr.bf16.mxu0 %v2884_v15 }
 0x240   :  { %v1460_v44 = vsel %vm1428_vm14, %v1412_v13, %v1444_v18  ;;  %v1469_v47 = vadd.f32 1.0, %v1453_v11  ;;  %v2903_v18 = vld [vmem:[%s4127_s5 + $0x350] ss:$8 sps:$4 sm:$0xff]  }
 0x241   :  { %v1476_v20 = vadd.f32 1.0, %v1460_v44  ;;  %v1461_v42 = vsel %vm1429_vm15, %v1413_v19, %v1445_v9  ;;  %v1484_v28 = vmul.f32 %v1468_v21, %v1068_v32  ;;  %v2908_v19 = vld [vmem:[%s4127_s5 + $0x364] ss:$8 sps:$4 sm:$0xff]   ;;  %v2911_v44 = vld [vmem:[%s4127_s5 + $0x374] ss:$8 sps:$4 sm:$0xff]  }
 0x242   :  { %v1477_v49 = vadd.f32 1.0, %v1461_v42  ;;  %2399 = vmatpush1.bf16.msra.mxu0 %v2882_v52  ;;  %v1485_v30 = vmul.f32 %v1469_v47, %v1069_v26  ;;  %v2906_v52 = vld [vmem:[%s4127_s5 + $0x360] ss:$8 sps:$4 sm:$0xff]  }
 0x243   :  { %v1492_v40 = vmul.f32 %v1476_v20, %v1076_v27  ;;  %2400 = vmatprep.subr.bf16.mxu0 %v2887_v23  ;;  %v2909_v27 = vld [vmem:[%s4127_s5 + $0x370] ss:$8 sps:$4 sm:$0xff]  }
 0x244   :  { %v1493_v25 = vmul.f32 %v1477_v49, %v1077_v17 }
 0x245   :  { %v1500_v0 = vpack.c.bf16 %v1492_v40, %v1484_v28  ;;  %v2914_v28 = vld [vmem:[%s4127_s5 + $0x384] ss:$8 sps:$4 sm:$0xff]  }
 0x246   :  { %2401 = vmatpush1.bf16.msra.mxu0 %v2885_v29  ;;  %v1501_v16 = vpack.c.bf16 %v1493_v25, %v1485_v30  ;;  %v2912_v25 = vld [vmem:[%s4127_s5 + $0x380] ss:$8 sps:$4 sm:$0xff]  }
 0x247   :  { %2413 = vmatprep.subr.bf16.mxu0 %v2890_v22 }
 0x248   :  { %2402 = vmatprep.mubr.bf16.mxu0 %v1501_v16 }
 0x249   :  { %2403 = vmatmul.mubr.bf16.vlgmr.msra.gmra.mrb[0].mxu0 %v1500_v0 }
 0x24a   :  { %2414 = vmatpush1.bf16.msra.mxu0 %v2888_v24 }
 0x24b   :  { %2415 = vmatprep.subr.bf16.mxu0 %v2893_v33  ;;  %v2917_v33 = vld [vmem:[%s4127_s5 + $0x394] ss:$8 sps:$4 sm:$0xff]  }
 0x24e   :  { %2416 = vmatpush1.bf16.msra.mxu0 %v2891_v39 }
 0x24f   :  { %2417 = vmatprep.subr.bf16.mxu0 %v2896_v48 }
 0x250   :  { %v1055_v51 = vpop.f32.mrb[12].mxu1 }
 0x251   :  { %v3961_v35 = vadd.f32 %v1055_v51, %v239_v43  ;;  %v1057_v2 = vpop.f32.mrb[13].mxu1 }
 0x252   :  { %v3966_v1 = vadd.f32 %v1057_v2, %v243_v46  ;;  %v1059_v57 = vpop.f32.mrb[14].mxu1  ;;  %2418 = vmatpush1.bf16.msra.mxu0 %v2894_v54  ;;  %v2915_v54 = vld [vmem:[%s4127_s5 + $0x390] ss:$8 sps:$4 sm:$0xff]  }
 0x253   :  { %v3972_v5 = vmul.f32 0.70710677, %v3961_v35  ;;  %v3974_v61 = vadd.f32 %v1059_v57, %v239_v43  ;;  %v1061_v62 = vpop.f32.mrb[15].mxu1  ;;  %2419 = vmatprep.subr.bf16.mxu0 %v2899_v58 }
 0x254   :  { %v3977_v3 = vmul.f32 0.70710677, %v3966_v1  ;;  %v3979_v34 = vadd.f32 %v1061_v62, %v243_v46 }
 0x255   :  { %v1102_v55 = vand.u32 2147483647, %v3972_v5  ;;  %v3983_v4 = vmul.f32 0.70710677, %v3974_v61  ;;  %vm1422_vm0 = vcmp.ge.f32.partialorder %v3972_v5, 0.0 }
 0x256   :  { %v1103_v7 = vand.u32 2147483647, %v3977_v3  ;;  %v3990_v56 = vmul.f32 0.70710677, %v3979_v34  ;;  %2420 = vmatpush1.bf16.msra.mxu0 %v2897_v50  ;;  %vm1423_vm1 = vcmp.ge.f32.partialorder %v3977_v3, 0.0 }
 0x257   :  { %v1118_v8 = vmul.f32 0.3275911, %v1102_v55  ;;  %v1110_v41 = vand.u32 2147483647, %v3983_v4  ;;  %2421 = vmatprep.subr.bf16.mxu0 %v2902_v59  ;;  %v1326_v21 = vsub.f32 0.0, %v1102_v55  ;;  %vm1430_vm2 = vcmp.ge.f32.partialorder %v3983_v4, 0.0 }
 0x258   :  { %v1119_v53 = vmul.f32 0.3275911, %v1103_v7  ;;  %v1111_v10 = vand.u32 2147483647, %v3990_v56  ;;  %v1327_v32 = vsub.f32 0.0, %v1103_v7  ;;  %vm1431_vm3 = vcmp.ge.f32.partialorder %v3990_v56, 0.0 }
 0x259   :  { %v1134_v60 = vadd.f32 1.0, %v1118_v8  ;;  %v1126_v12 = vmul.f32 0.3275911, %v1110_v41  ;;  %v1342_v23 = vmul.f32 %v1326_v21, %v1102_v55  ;;  %v1334_v47 = vsub.f32 0.0, %v1110_v41  ;;  %v2920_v55 = vld [vmem:[%s4127_s5 + $0x3a4] ss:$8 sps:$4 sm:$0xff]  }
 0x25a   :  { %v1135_v63 = vadd.f32 1.0, %v1119_v53  ;;  %v1127_v13 = vmul.f32 0.3275911, %v1111_v10  ;;  %2422 = vmatpush1.bf16.msra.mxu0 %v2900_v6  ;;  %v1343_v42 = vmul.f32 %v1327_v32, %v1103_v7  ;;  %v1335_v17 = vsub.f32 0.0, %v1111_v10  ;;  %v2935_v3 = vld [vmem:[%s4127_s5 + $0x3f4] ss:$8 sps:$4 sm:$0xff]  }
 0x25b   :  { %2992 = vrcp.f32 %v1134_v60  ;;  %v1142_v15 = vadd.f32 1.0, %v1126_v12  ;;  %2423 = vmatprep.subr.bf16.mxu0 %v2905_v14  ;;  %v1364_v22 = vmul.f32 1.442695, %v1342_v23  ;;  %v1350_v0 = vmul.f32 %v1334_v47, %v1110_v41 }
 0x25c   :  { %2994 = vrcp.f32 %v1135_v63  ;;  %v1143_v11 = vadd.f32 1.0, %v1127_v13  ;;  %v1366_v24 = vmul.f32 1.442695, %v1343_v42  ;;  %v1351_v45 = vmul.f32 %v1335_v17, %v1111_v10  ;;  %v2918_v10 = vld [vmem:[%s4127_s5 + $0x3a0] ss:$8 sps:$4 sm:$0xff]  }
 0x25d   :  { %2996 = vrcp.f32 %v1142_v15  ;;  %v1380_v2 = vmul.f32 1.442695, %v1350_v0  ;;  %v2923_v63 = vld [vmem:[%s4127_s5 + $0x3b4] ss:$8 sps:$4 sm:$0xff]   ;;  %v1071_v4 = vmul.f32 0.5, %v3966_v1 }
 0x25e   :  { %2998 = vrcp.f32 %v1143_v11  ;;  %2424 = vmatpush1.bf16.msra.mxu0 %v2903_v18  ;;  %v1382_v7 = vmul.f32 1.442695, %v1351_v45  ;;  %v1632_v1 = vld [vmem:[%s4129_s6] sm:$0x3] }
 0x25f   :  { %2425 = vmatprep.subr.bf16.mxu0 %v2908_v19  ;;  %3000 = vpow2.f32 %v1364_v22  ;;  %v2921_v19 = vld [vmem:[%s4127_s5 + $0x3b0] ss:$8 sps:$4 sm:$0xff]   ;;  %v1641_v56 = vrot.slane %v1632_v1, %v3190_v36 }
 0x260   :  { %3002 = vpow2.f32 %v1366_v24 }
 0x261   :  { %3004 = vpow2.f32 %v1380_v2  ;;  %v2930_v2 = vld [vmem:[%s4127_s5 + $0x3e0] ss:$8 sps:$4 sm:$0xff]  }
 0x262   :  { %2426 = vmatpush1.bf16.msra.mxu0 %v2906_v52  ;;  %3006 = vpow2.f32 %v1382_v7 }
 0x263   :  { %2427 = vmatprep.subr.bf16.mxu0 %v2911_v44  ;;  %v2926_v44 = vld [vmem:[%s4127_s5 + $0x3c4] ss:$8 sps:$4 sm:$0xff]  }
 0x265   :  { %v4015_v9 = vpop.eup %2992 }
 0x266   :  { %v4020_v20 = vpop.eup %2994  ;;  %v1182_v26 = vmul.f32 1.0614054, %v4015_v9  ;;  %2428 = vmatpush1.bf16.msra.mxu0 %v2909_v27 }
 0x267   :  { %v1183_v40 = vmul.f32 1.0614054, %v4020_v20  ;;  %v4027_v29 = vpop.eup %2996  ;;  %2429 = vmatprep.subr.bf16.mxu0 %v2914_v28 }
 0x268   :  { %v1198_v49 = vadd.f32 -1.4531521, %v1182_v26  ;;  %v1190_v31 = vmul.f32 1.0614054, %v4027_v29  ;;  %v2999_v38 = vpop.eup %2998 }
 0x269   :  { %v1199_v30 = vadd.f32 -1.4531521, %v1183_v40  ;;  %v1191_v48 = vmul.f32 1.0614054, %v2999_v38  ;;  %v3001_v23 = vpop.eup %3000 }
 0x26a   :  { %v1214_v16 = vmul.f32 %v4015_v9, %v1198_v49  ;;  %v1206_v46 = vadd.f32 -1.4531521, %v1190_v31  ;;  %2430 = vmatpush1.bf16.msra.mxu0 %v2912_v25  ;;  %v3003_v27 = vpop.eup %3002 }
 0x26b   :  { %v1215_v39 = vmul.f32 %v4020_v20, %v1199_v30  ;;  %v1207_v62 = vadd.f32 -1.4531521, %v1191_v48  ;;  %2431 = vmatprep.subr.bf16.mxu0 %v2917_v33  ;;  %v2929_v30 = vld [vmem:[%s4127_s5 + $0x3d4] ss:$8 sps:$4 sm:$0xff]  }
 0x26c   :  { %v1230_v43 = vadd.f32 1.4214138, %v1214_v16  ;;  %v1222_v58 = vmul.f32 %v4027_v29, %v1206_v46  ;;  %v2932_v46 = vld [vmem:[%s4127_s5 + $0x3e4] ss:$8 sps:$4 sm:$0xff]  }
 0x26d   :  { %v1231_v51 = vadd.f32 1.4214138, %v1215_v39  ;;  %v1223_v41 = vmul.f32 %v2999_v38, %v1207_v62 }
 0x26e   :  { %v1246_v57 = vmul.f32 %v4015_v9, %v1230_v43  ;;  %v1238_v8 = vadd.f32 1.4214138, %v1222_v58  ;;  %2432 = vmatpush1.bf16.msra.mxu0 %v2915_v54  ;;  %v1070_v54 = vmul.f32 0.5, %v3961_v35  ;;  %v1079_v35 = vmul.f32 0.5, %v3979_v34 }
 0x26f   :  { %v1247_v50 = vmul.f32 %v4020_v20, %v1231_v51  ;;  %v1239_v6 = vadd.f32 1.4214138, %v1223_v41  ;;  %2433 = vmatprep.subr.bf16.mxu0 %v2920_v55  ;;  %v1078_v55 = vmul.f32 0.5, %v3974_v61  ;;  %v1637_v34 = vrot.slane %v1632_v1, %v3193_v37 }
 0x270   :  { %v1262_v59 = vadd.f32 -0.28449672, %v1246_v57  ;;  %v1254_v12 = vmul.f32 %v4027_v29, %v1238_v8 }
 0x271   :  { %v1263_v53 = vadd.f32 -0.28449672, %v1247_v50  ;;  %v1255_v11 = vmul.f32 %v2999_v38, %v1239_v6 }
 0x272   :  { %v1278_v60 = vmul.f32 %v4015_v9, %v1262_v59  ;;  %v1270_v15 = vadd.f32 -0.28449672, %v1254_v12  ;;  %2434 = vmatpush1.bf16.msra.mxu0 %v2918_v10 }
 0x273   :  { %v1279_v13 = vmul.f32 %v4020_v20, %v1263_v53  ;;  %v1271_v32 = vadd.f32 -0.28449672, %v1255_v11  ;;  %2435 = vmatprep.subr.bf16.mxu0 %v2923_v63  ;;  %v2933_v53 = vld [vmem:[%s4127_s5 + $0x3f0] ss:$8 sps:$4 sm:$0xff]   ;;  %v2456_v63 = vld [vmem:[%s4130_s1] sm:$0xff] }
 0x274   :  { %v1294_v14 = vadd.f32 0.2548296, %v1278_v60  ;;  %v1286_v52 = vmul.f32 %v4027_v29, %v1270_v15  ;;  %v2457_v15 = vld [vmem:[%s4130_s1 + $0x8] sm:$0xff] }
 0x275   :  { %v1295_v18 = vadd.f32 0.2548296, %v1279_v13  ;;  %v1287_v28 = vmul.f32 %v2999_v38, %v1271_v32 }
 0x276   :  { %v1310_v21 = vmul.f32 %v4015_v9, %v1294_v14  ;;  %v1302_v42 = vadd.f32 0.2548296, %v1286_v52  ;;  %2436 = vmatpush1.bf16.msra.mxu0 %v2921_v19  ;;  %v2924_v9 = vld [vmem:[%s4127_s5 + $0x3c0] ss:$8 sps:$4 sm:$0xff]   ;;  %v2458_v19 = vld [vmem:[%s4130_s1 + $0x10] sm:$0xff]  ;;  %v2459_v52 = vld [vmem:[%s4130_s1 + $0x18] sm:$0xff] }
 0x277   :  { %v1311_v47 = vmul.f32 %v4020_v20, %v1295_v18  ;;  %v1303_v22 = vadd.f32 0.2548296, %v1287_v28  ;;  %2437 = vmatprep.subr.bf16.mxu0 %v2926_v44  ;;  %v3005_v20 = vpop.eup %3004 }
 0x278   :  { %v1390_v26 = vmul.f32 %v3001_v23, %v1310_v21  ;;  %v1318_v49 = vmul.f32 %v4027_v29, %v1302_v42  ;;  %v3007_v31 = vpop.eup %3006  ;;  %v2927_v29 = vld [vmem:[%s4127_s5 + $0x3d0] ss:$8 sps:$4 sm:$0xff]  }
 0x279   :  { %v1391_v40 = vmul.f32 %v3003_v27, %v1311_v47  ;;  %v1319_v24 = vmul.f32 %v2999_v38, %v1303_v22 }
 0x27a   :  { %v1406_v17 = vsub.f32 1.0, %v1390_v26  ;;  %v1398_v16 = vmul.f32 %v3005_v20, %v1318_v49  ;;  %2438 = vmatpush1.bf16.msra.mxu0 %v2924_v9 }
 0x27b   :  { %v1407_v0 = vsub.f32 1.0, %v1391_v40  ;;  %v1399_v43 = vmul.f32 %v3007_v31, %v1319_v24  ;;  %2439 = vmatprep.subr.bf16.mxu0 %v2929_v30 }
 0x27c   :  { %v1438_v25 = vsub.f32 0.0, %v1406_v17  ;;  %v1414_v45 = vsub.f32 1.0, %v1398_v16 }
 0x27d   :  { %v1439_v33 = vsub.f32 0.0, %v1407_v0  ;;  %v1415_v51 = vsub.f32 1.0, %v1399_v43 }
 0x27e   :  { %v1454_v39 = vsel %vm1422_vm0, %v1406_v17, %v1438_v25  ;;  %v1446_v48 = vsub.f32 0.0, %v1414_v45  ;;  %2440 = vmatpush1.bf16.msra.mxu0 %v2927_v29 }
 0x27f   :  { %v1455_v38 = vsel %vm1423_vm1, %v1407_v0, %v1439_v33  ;;  %v1470_v5 = vadd.f32 1.0, %v1454_v39  ;;  %v1447_v58 = vsub.f32 0.0, %v1415_v51  ;;  %2441 = vmatprep.subr.bf16.mxu0 %v2932_v46 }
 0x280   :  { %v1462_v57 = vsel %vm1430_vm2, %v1414_v45, %v1446_v48  ;;  %v1471_v62 = vadd.f32 1.0, %v1455_v38 }
 0x281   :  { %v1478_v50 = vadd.f32 1.0, %v1462_v57  ;;  %v1463_v7 = vsel %vm1431_vm3, %v1415_v51, %v1447_v58  ;;  %v1486_v59 = vmul.f32 %v1470_v5, %v1070_v54 }
 0x282   :  { %v1479_v41 = vadd.f32 1.0, %v1463_v7  ;;  %2442 = vmatpush1.bf16.msra.mxu0 %v2930_v2  ;;  %v1487_v10 = vmul.f32 %v1471_v62, %v1071_v4 }
 0x283   :  { %v1494_v8 = vmul.f32 %v1478_v50, %v1078_v55  ;;  %2443 = vmatprep.subr.bf16.mxu0 %v2935_v3 }
 0x284   :  { %v1495_v61 = vmul.f32 %v1479_v41, %v1079_v35 }
 0x285   :  { %v1502_v60 = vpack.c.bf16 %v1494_v8, %v1486_v59 }
 0x286   :  { %2444 = vmatpush1.bf16.msra.mxu0 %v2933_v53  ;;  %v1503_v12 = vpack.c.bf16 %v1495_v61, %v1487_v10 }
 0x288   :  { %2445 = vmatprep.mubr.bf16.mxu0 %v1503_v12 }
 0x289   :  { %2446 = vmatmul.mubr.bf16.vlgmr.msra.gmra.mrb[0].mxu0 %v1502_v60 }
 0x35c   :  { %v2447_v6 = vpop.f32.mrb[0].mxu0 }
 0x35d   :  { %v2728_v13 = vadd.f32 %v2447_v6, %v1637_v34  ;;  %v2449_v14 = vpop.f32.mrb[1].mxu0 }
 0x35e   :  { %v2729_v11 = vadd.f32 %v2449_v14, %v1641_v56  ;;  %v2451_v18 = vpop.f32.mrb[2].mxu0 }
 0x35f   :  { %v2460_v37 = vadd.f32 %v2728_v13, %v2456_v63  ;;  %v2730_v21 = vadd.f32 %v2451_v18, %v1637_v34  ;;  %v2453_v36 = vpop.f32.mrb[3].mxu0 }
 0x360   :  { %v2461_v32 = vadd.f32 %v2729_v11, %v2457_v15  ;;  %v2731_v44 = vadd.f32 %v2453_v36, %v1641_v56 }
 0x361   :  { %2464 = vst [vmem:[%s4131_s7] sm:$0xff] %v2460_v37  ;;  %v2462_v23 = vadd.f32 %v2730_v21, %v2458_v19 }
 0x362   :  { %2465 = vst [vmem:[%s4131_s7 + $0x8] sm:$0xff] %v2461_v32  ;;  %v2463_v47 = vadd.f32 %v2731_v44, %v2459_v52 }
 0x363   :  { %2466 = vst [vmem:[%s4131_s7 + $0x10] sm:$0xff] %v2462_v23 }
 0x364   :  { %2467 = vst [vmem:[%s4131_s7 + $0x18] sm:$0xff] %v2463_v47 }

// kernel: megabyte_forward.13
= control target key start
LH: loop header
LB: loop body
LE: loop exit
PB: predicated region body
PF: predicated region fallthrough
CT: control target
= control target key end

     0   :  { %v263_v1 = vmov 0   ;;  %v41_v25 = vlaneseq  ;;  %s380_s1 = inlined_call_operand.vmem [shape: bf16[128,256], index: 1, kind: input, shape index: {}]   ;;  %s381_s0 = inlined_call_operand.vmem [shape: f32[40,128], index: 0, kind: input, shape index: {}]   ;;  %s382_s2 = inlined_call_operand.vmem [shape: f32[1,256], index: 2, kind: input, shape index: {}]   ;;  %s383_s3 = inlined_call_operand.vmem [shape: f32[40,256], index: 3, kind: output, shape index: {}]  }
   0x1   :  { %v239_v0 = vld [vmem:[%s380_s1 + $0x4] ss:$8 sps:$4 sm:$0xff]   ;;  %173 = vmatprep.mubr.bf16.mxu1 %v263_v1  ;;  %163 = vmatprep.mubr.bf16.mxu0 %v263_v1  ;;  %v241_v2 = vld [vmem:[%s380_s1] ss:$8 sps:$4 sm:$0xff]   ;;  %v242_v3 = vld [vmem:[%s380_s1 + $0x14] ss:$8 sps:$4 sm:$0xff]  }
   0x2   :  { %222 = vmatprep.subr.bf16.mxu1 %v239_v0  ;;  %131 = vmatprep.subr.bf16.mxu0 %v239_v0  ;;  %v244_v4 = vld [vmem:[%s380_s1 + $0x10] ss:$8 sps:$4 sm:$0xff]   ;;  %v245_v5 = vld [vmem:[%s380_s1 + $0x24] ss:$8 sps:$4 sm:$0xff]   ;;  %v247_v6 = vld [vmem:[%s380_s1 + $0x20] ss:$8 sps:$4 sm:$0xff]  }
   0x3   :  { %230 = vmatpush1.bf16.msra.mxu1 %v241_v2  ;;  %132 = vmatpush1.bf16.msra.mxu0 %v241_v2  ;;  %v248_v7 = vld [vmem:[%s380_s1 + $0x34] ss:$8 sps:$4 sm:$0xff]   ;;  %v250_v8 = vld [vmem:[%s380_s1 + $0x30] ss:$8 sps:$4 sm:$0xff]   ;;  %v251_v9 = vld [vmem:[%s380_s1 + $0x44] ss:$8 sps:$4 sm:$0xff]  }
   0x4   :  { %223 = vmatprep.subr.bf16.mxu1 %v242_v3  ;;  %133 = vmatprep.subr.bf16.mxu0 %v242_v3  ;;  %v253_v10 = vld [vmem:[%s380_s1 + $0x40] ss:$8 sps:$4 sm:$0xff]   ;;  %v254_v11 = vld [vmem:[%s380_s1 + $0x54] ss:$8 sps:$4 sm:$0xff]   ;;  %v256_v12 = vld [vmem:[%s380_s1 + $0x50] ss:$8 sps:$4 sm:$0xff]  }
   0x5   :  { %v257_v13 = vld [vmem:[%s380_s1 + $0x64] ss:$8 sps:$4 sm:$0xff]   ;;  %v259_v14 = vld [vmem:[%s380_s1 + $0x60] ss:$8 sps:$4 sm:$0xff]   ;;  %v260_v15 = vld [vmem:[%s380_s1 + $0x74] ss:$8 sps:$4 sm:$0xff]  }
   0x6   :  { %v262_v16 = vld [vmem:[%s380_s1 + $0x70] ss:$8 sps:$4 sm:$0xff]   ;;  %v15_v19 = vld [vmem:[%s381_s0] sm:$0xff]  ;;  %v16_v20 = vld [vmem:[%s381_s0 + $0x8] sm:$0xff]  ;;  %v42_v26 = vshrl.u32 %v41_v25, 7 }
   0x7   :  { %231 = vmatpush1.bf16.msra.mxu1 %v244_v4  ;;  %134 = vmatpush1.bf16.msra.mxu0 %v244_v4  ;;  %v17_v17 = vld [vmem:[%s381_s0 + $0x10] sm:$0xff]  ;;  %v18_v18 = vld [vmem:[%s381_s0 + $0x18] sm:$0xff]  ;;  %v20_v22 = vpack.c.bf16 %v16_v20, %v15_v19  ;;  %v19_v23 = vld [vmem:[%s381_s0 + $0x20] sm:$0xff] }
   0x8   :  { %224 = vmatprep.subr.bf16.mxu1 %v245_v5  ;;  %135 = vmatprep.subr.bf16.mxu0 %v245_v5  ;;  %v21_v21 = vpack.c.bf16 %v18_v18, %v17_v17  ;;  %v22_v24 = vpack.c.bf16 %v19_v23, %v19_v23  ;;  %v43_v27 = vsub.s32 0, %v42_v26  ;;  %v39_v28 = vld [vmem:[%s382_s2] sm:$0x3]  ;;  %v47_v29 = vsub.s32 1, %v42_v26 }
   0xa   :  { %v44_v30 = vrot.slane %v39_v28, %v43_v27  ;;  %v48_v31 = vrot.slane %v39_v28, %v47_v29 }
   0xb   :  { %232 = vmatpush1.bf16.msra.mxu1 %v247_v6  ;;  %136 = vmatpush1.bf16.msra.mxu0 %v247_v6 }
   0xc   :  { %225 = vmatprep.subr.bf16.mxu1 %v248_v7  ;;  %137 = vmatprep.subr.bf16.mxu0 %v248_v7 }
   0xf   :  { %233 = vmatpush1.bf16.msra.mxu1 %v250_v8  ;;  %138 = vmatpush1.bf16.msra.mxu0 %v250_v8 }
  0x10   :  { %226 = vmatprep.subr.bf16.mxu1 %v251_v9  ;;  %139 = vmatprep.subr.bf16.mxu0 %v251_v9 }
  0x13   :  { %234 = vmatpush1.bf16.msra.mxu1 %v253_v10  ;;  %140 = vmatpush1.bf16.msra.mxu0 %v253_v10 }
  0x14   :  { %227 = vmatprep.subr.bf16.mxu1 %v254_v11  ;;  %141 = vmatprep.subr.bf16.mxu0 %v254_v11 }
  0x17   :  { %235 = vmatpush1.bf16.msra.mxu1 %v256_v12  ;;  %142 = vmatpush1.bf16.msra.mxu0 %v256_v12 }
  0x18   :  { %228 = vmatprep.subr.bf16.mxu1 %v257_v13  ;;  %143 = vmatprep.subr.bf16.mxu0 %v257_v13 }
  0x1b   :  { %236 = vmatpush1.bf16.msra.mxu1 %v259_v14  ;;  %144 = vmatpush1.bf16.msra.mxu0 %v259_v14 }
  0x1c   :  { %229 = vmatprep.subr.bf16.mxu1 %v260_v15  ;;  %145 = vmatprep.subr.bf16.mxu0 %v260_v15 }
  0x1f   :  { %237 = vmatpush1.bf16.msra.mxu1 %v262_v16  ;;  %146 = vmatpush1.bf16.msra.mxu0 %v262_v16 }
  0x22   :  { %174 = vmatmul.mubr.bf16.vlgmr.msra.gmra.mrb[0].mxu1 %v21_v21  ;;  %164 = vmatmul.mubr.bf16.vlgmr.msra.gmra.mrb[0].mxu0 %v20_v22 }
  0x23   :  { %183 = vmatprep.mubr.bf16.mxu1 %v263_v1 }
  0x2a   :  { %184 = vmatmul.mubr.bf16.gmra.mrb[4].mxu1 %v22_v24 }
  0xf5   :  { %v175_v32 = vpop.f32.mrb[0].mxu1  ;;  %v165_v33 = vpop.f32.mrb[0].mxu0 }
  0xf6   :  { %v176_v34 = vadd.f32 %v175_v32, %v44_v30  ;;  %v177_v35 = vpop.f32.mrb[1].mxu1  ;;  %v166_v36 = vadd.f32 %v165_v33, %v44_v30  ;;  %v167_v37 = vpop.f32.mrb[1].mxu0 }
  0xf7   :  { %v178_v38 = vadd.f32 %v177_v35, %v48_v31  ;;  %v179_v39 = vpop.f32.mrb[2].mxu1  ;;  %v168_v40 = vadd.f32 %v167_v37, %v48_v31  ;;  %v169_v41 = vpop.f32.mrb[2].mxu0 }
  0xf8   :  { %196 = vst [vmem:[%s383_s3 + $0x20] sm:$0xff] %v176_v34  ;;  %v180_v42 = vadd.f32 %v179_v39, %v44_v30  ;;  %192 = vst [vmem:[%s383_s3] sm:$0xff] %v166_v36  ;;  %v181_v43 = vpop.f32.mrb[3].mxu1  ;;  %v170_v44 = vadd.f32 %v169_v41, %v44_v30  ;;  %v171_v45 = vpop.f32.mrb[3].mxu0 }
  0xf9   :  { %197 = vst [vmem:[%s383_s3 + $0x28] sm:$0xff] %v178_v38  ;;  %v182_v46 = vadd.f32 %v181_v43, %v48_v31  ;;  %193 = vst [vmem:[%s383_s3 + $0x8] sm:$0xff] %v168_v40  ;;  %v172_v47 = vadd.f32 %v171_v45, %v48_v31 }
  0xfa   :  { %198 = vst [vmem:[%s383_s3 + $0x30] sm:$0xff] %v180_v42  ;;  %194 = vst [vmem:[%s383_s3 + $0x10] sm:$0xff] %v170_v44 }
  0xfb   :  { %199 = vst [vmem:[%s383_s3 + $0x38] sm:$0xff] %v182_v46  ;;  %195 = vst [vmem:[%s383_s3 + $0x18] sm:$0xff] %v172_v47 }
  0xfd   :  { %v185_v48 = vpop.f32.mrb[4].mxu1 }
  0xfe   :  { %v186_v49 = vadd.f32 %v185_v48, %v44_v30  ;;  %v187_v50 = vpop.f32.mrb[5].mxu1 }
  0xff   :  { %v188_v51 = vadd.f32 %v187_v50, %v48_v31  ;;  %v189_v52 = vpop.f32.mrb[6].mxu1 }
 0x100   :  { %200 = vst [vmem:[%s383_s3 + $0x40] sm:$0xff] %v186_v49  ;;  %v190_v53 = vpop.f32.mrb[7].mxu1 }
 0x101   :  { %201 = vst [vmem:[%s383_s3 + $0x48] sm:$0xff] %v188_v51 }

// kernel: megabyte_forward.11
= control target key start
LH: loop header
LB: loop body
LE: loop exit
PB: predicated region body
PF: predicated region fallthrough
CT: control target
= control target key end

     0   :  { %v2855_v32 = vmov 0   ;;  %s3541_s0 = inlined_call_operand.vmem [shape: f32[8,8,128], index: 0, kind: input, shape index: {}]   ;;  %s3542_s3 = inlined_call_operand.vmem [shape: bf16[128,256], index: 3, kind: input, shape index: {}]   ;;  %s3543_s4 = inlined_call_operand.vmem [shape: bf16[128,256], index: 4, kind: input, shape index: {}]   ;;  %s3544_s2 = inlined_call_operand.vmem [shape: f32[1,128], index: 2, kind: input, shape index: {}]   ;;  %s3545_s6 = inlined_call_operand.vmem [shape: f32[2,8,8], index: 6, kind: input, shape index: {}]   ;;  %s3546_s5 = inlined_call_operand.vmem [shape: bf16[256,128], index: 5, kind: input, shape index: {}]   ;;  %s3547_s1 = inlined_call_operand.vmem [shape: f32[8,8,128], index: 1, kind: input, shape index: {}]   ;;  %s3548_s7 = inlined_call_operand.vmem [shape: f32[8,8,128], index: 7, kind: output, shape index: {}]  }
   0x1   :  { %v2901_v0 = vld [vmem:[%s3541_s0 + $0x10] sm:$0xff]  ;;  %v2906_v1 = vld [vmem:[%s3541_s0] sm:$0xff]  ;;  %v2911_v2 = vld [vmem:[%s3541_s0 + $0x18] sm:$0xff]  ;;  %294 = vmatprep.mubr.bf16.mxu1 %v2855_v32 }
   0x2   :  { %v38_v3 = vmul.f32 %v2901_v0, %v2901_v0  ;;  %v36_v4 = vmul.f32 %v2906_v1, %v2906_v1  ;;  %v2920_v5 = vld [vmem:[%s3541_s0 + $0x8] sm:$0xff]  ;;  %v39_v6 = vmul.f32 %v2911_v2, %v2911_v2  ;;  %v2934_v9 = vld [vmem:[%s3541_s0 + $0x20] sm:$0xff]  ;;  %v2943_v12 = vld [vmem:[%s3541_s0 + $0x38] sm:$0xff] }
   0x3   :  { %v37_v7 = vmul.f32 %v2920_v5, %v2920_v5  ;;  %v2929_v8 = vld [vmem:[%s3541_s0 + $0x28] sm:$0xff]  ;;  %v40_v11 = vmul.f32 %v2934_v9, %v2934_v9  ;;  %v2948_v13 = vld [vmem:[%s3541_s0 + $0x30] sm:$0xff]  ;;  %v43_v14 = vmul.f32 %v2943_v12, %v2943_v12 }
   0x4   :  { %48 = vadd.xlane.f32.xlu1 %v38_v3  ;;  %44 = vadd.xlane.f32.xlu0 %v36_v4  ;;  %v41_v10 = vmul.f32 %v2929_v8, %v2929_v8  ;;  %v42_v15 = vmul.f32 %v2948_v13, %v2948_v13  ;;  %v2695_v16 = vld [vmem:[%s3542_s3 + $0x4] ss:$8 sps:$4 sm:$0xff]   ;;  %v2697_v17 = vld [vmem:[%s3542_s3] ss:$8 sps:$4 sm:$0xff]   ;;  %v2698_v18 = vld [vmem:[%s3542_s3 + $0x14] ss:$8 sps:$4 sm:$0xff]  }
   0x5   :  { %262 = vmatprep.subr.bf16.mxu1 %v2695_v16  ;;  %v2700_v19 = vld [vmem:[%s3542_s3 + $0x10] ss:$8 sps:$4 sm:$0xff]   ;;  %v2701_v20 = vld [vmem:[%s3542_s3 + $0x24] ss:$8 sps:$4 sm:$0xff]   ;;  %v2703_v21 = vld [vmem:[%s3542_s3 + $0x20] ss:$8 sps:$4 sm:$0xff]  }
   0x6   :  { %263 = vmatpush1.bf16.msra.mxu1 %v2697_v17  ;;  %v2704_v22 = vld [vmem:[%s3542_s3 + $0x34] ss:$8 sps:$4 sm:$0xff]   ;;  %v2706_v23 = vld [vmem:[%s3542_s3 + $0x30] ss:$8 sps:$4 sm:$0xff]   ;;  %v2707_v24 = vld [vmem:[%s3542_s3 + $0x44] ss:$8 sps:$4 sm:$0xff]  }
   0x7   :  { %264 = vmatprep.subr.bf16.mxu1 %v2698_v18  ;;  %v2709_v25 = vld [vmem:[%s3542_s3 + $0x40] ss:$8 sps:$4 sm:$0xff]   ;;  %v2710_v26 = vld [vmem:[%s3542_s3 + $0x54] ss:$8 sps:$4 sm:$0xff]   ;;  %v2712_v27 = vld [vmem:[%s3542_s3 + $0x50] ss:$8 sps:$4 sm:$0xff]  }
   0x8   :  { %50 = vadd.xlane.f32.xlu1 %v39_v6  ;;  %46 = vadd.xlane.f32.xlu0 %v37_v7  ;;  %v2713_v28 = vld [vmem:[%s3542_s3 + $0x64] ss:$8 sps:$4 sm:$0xff]   ;;  %v2715_v29 = vld [vmem:[%s3542_s3 + $0x60] ss:$8 sps:$4 sm:$0xff]   ;;  %v2716_v30 = vld [vmem:[%s3542_s3 + $0x74] ss:$8 sps:$4 sm:$0xff]  }
   0x9   :  { %v2718_v31 = vld [vmem:[%s3542_s3 + $0x70] ss:$8 sps:$4 sm:$0xff]   ;;  %v2721_v33 = vld [vmem:[%s3543_s4 + $0x4] ss:$8 sps:$4 sm:$0xff]  }
   0xa   :  { %265 = vmatpush1.bf16.msra.mxu1 %v2700_v19 }
   0xb   :  { %266 = vmatprep.subr.bf16.mxu1 %v2701_v20 }
   0xc   :  { %54 = vadd.xlane.f32.xlu1 %v41_v10  ;;  %52 = vadd.xlane.f32.xlu0 %v40_v11 }
   0xe   :  { %267 = vmatpush1.bf16.msra.mxu1 %v2703_v21 }
   0xf   :  { %268 = vmatprep.subr.bf16.mxu1 %v2704_v22 }
  0x10   :  { %58 = vadd.xlane.f32.xlu1 %v43_v14  ;;  %56 = vadd.xlane.f32.xlu0 %v42_v15 }
  0x12   :  { %269 = vmatpush1.bf16.msra.mxu1 %v2706_v23 }
  0x13   :  { %270 = vmatprep.subr.bf16.mxu1 %v2707_v24 }
  0x16   :  { %271 = vmatpush1.bf16.msra.mxu1 %v2709_v25 }
  0x17   :  { %272 = vmatprep.subr.bf16.mxu1 %v2710_v26 }
  0x1a   :  { %273 = vmatpush1.bf16.msra.mxu1 %v2712_v27 }
  0x1b   :  { %274 = vmatprep.subr.bf16.mxu1 %v2713_v28 }
  0x1e   :  { %275 = vmatpush1.bf16.msra.mxu1 %v2715_v29 }
  0x1f   :  { %276 = vmatprep.subr.bf16.mxu1 %v2716_v30 }
  0x22   :  { %277 = vmatpush1.bf16.msra.mxu1 %v2718_v31 }
  0x23   :  { %431 = vmatprep.subr.bf16.mxu1 %v2721_v33 }
  0x91   :  { %v49_v34 = vpop.xlane.xlu1 %48  ;;  %v45_v35 = vpop.xlane.xlu0 %44 }
  0x92   :  { %2759 = vrsqrt.f32 %v49_v34  ;;  %vm76_vm0 = vcmp.eq.f32.partialorder %v49_v34, inf  ;;  %vm78_vm1 = vcmp.eq.f32.partialorder %v49_v34, 0.0  ;;  %v79_v43 = vand.u32 2147483648, %v49_v34 }
  0x93   :  { %2761 = vrsqrt.f32 %v45_v35  ;;  %vm62_vm2 = vcmp.eq.f32.partialorder %v45_v35, inf  ;;  %vm64_vm3 = vcmp.eq.f32.partialorder %v45_v35, 0.0  ;;  %v65_v47 = vand.u32 2147483648, %v45_v35 }
  0x95   :  { %v51_v36 = vpop.xlane.xlu1 %50  ;;  %v47_v37 = vpop.xlane.xlu0 %46 }
  0x96   :  { %2763 = vrsqrt.f32 %v51_v36  ;;  %vm83_vm4 = vcmp.eq.f32.partialorder %v51_v36, inf  ;;  %vm85_vm5 = vcmp.eq.f32.partialorder %v51_v36, 0.0  ;;  %v86_v51 = vand.u32 2147483648, %v51_v36 }
  0x97   :  { %2765 = vrsqrt.f32 %v47_v37  ;;  %vm69_vm6 = vcmp.eq.f32.partialorder %v47_v37, inf  ;;  %vm71_vm7 = vcmp.eq.f32.partialorder %v47_v37, 0.0  ;;  %v72_v55 = vand.u32 2147483648, %v47_v37 }
  0x99   :  { %v55_v38 = vpop.xlane.xlu1 %54  ;;  %v53_v39 = vpop.xlane.xlu0 %52 }
  0x9a   :  { %2767 = vrsqrt.f32 %v55_v38  ;;  %vm97_vm8 = vcmp.eq.f32.partialorder %v55_v38, inf  ;;  %vm99_vm9 = vcmp.eq.f32.partialorder %v55_v38, 0.0  ;;  %v100_v60 = vand.u32 2147483648, %v55_v38 }
  0x9b   :  { %2769 = vrsqrt.f32 %v53_v39  ;;  %vm90_vm10 = vcmp.eq.f32.partialorder %v53_v39, inf  ;;  %vm92_vm11 = vcmp.eq.f32.partialorder %v53_v39, 0.0  ;;  %v93_v11 = vand.u32 2147483648, %v53_v39 }
  0x9c   :  { %v2760_v40 = vpop.eup %2759 }
  0x9d   :  { %v2762_v41 = vpop.eup %2761  ;;  %v75_v42 = vmul.f32 %v2760_v40, %v49_v34  ;;  %v3006_v44 = vpop.xlane.xlu1 %58 }
  0x9e   :  { %v3008_v45 = vpop.xlane.xlu0 %56  ;;  %v61_v46 = vmul.f32 %v2762_v41, %v45_v35  ;;  %2771 = vrsqrt.f32 %v3006_v44  ;;  %vm111_vm12 = vcmp.eq.f32.partialorder %v3006_v44, inf  ;;  %v114_v30 = vand.u32 2147483648, %v3006_v44 }
  0x9f   :  { %2773 = vrsqrt.f32 %v3008_v45  ;;  %v77_v49 = vsel %vm76_vm0, %v49_v34, %v75_v42  ;;  %vm104_vm13 = vcmp.eq.f32.partialorder %v3008_v45, inf  ;;  %vm113_vm14 = vcmp.eq.f32.partialorder %v3006_v44, 0.0 }
  0xa0   :  { %v2764_v48 = vpop.eup %2763  ;;  %v63_v50 = vsel %vm62_vm2, %v45_v35, %v61_v46  ;;  %v80_v58 = vsel %vm78_vm1, %v79_v43, %v77_v49  ;;  %v107_v33 = vand.u32 2147483648, %v3008_v45  ;;  %vm106_vm15 = vcmp.eq.f32.partialorder %v3008_v45, 0.0 }
  0xa1   :  { %v2766_v52 = vpop.eup %2765  ;;  %v66_v53 = vsel %vm64_vm3, %v65_v47, %v63_v50  ;;  %v82_v54 = vmul.f32 %v2764_v48, %v51_v36  ;;  %v118_v14 = vmul.f32 0.088388346, %v80_v58  ;;  %v2727_v58 = vld [vmem:[%s3543_s4 + $0x24] ss:$8 sps:$4 sm:$0xff]   ;;  %vm2857_vm0 = vmmov 0  }
  0xa2   :  { %v116_v56 = vmul.f32 0.088388346, %v66_v53  ;;  %v68_v57 = vmul.f32 %v2766_v52, %v47_v37  ;;  %v2719_v52 = vld [vmem:[%s3543_s4] ss:$8 sps:$4 sm:$0xff]   ;;  %v2724_v53 = vld [vmem:[%s3543_s4 + $0x14] ss:$8 sps:$4 sm:$0xff]  }
  0xa3   :  { %v84_v59 = vsel %vm83_vm4, %v51_v36, %v82_v54  ;;  %v126_v26 = vmax.f32 %v118_v14, 1e-08  ;;  %v2736_v14 = vld [vmem:[%s3543_s4 + $0x54] ss:$8 sps:$4 sm:$0xff]   ;;  %vm949_vm1 = vcmask 1043456   ;;  %vm865_vm2 = vcmask 64512  }
  0xa4   :  { %v2768_v61 = vpop.eup %2767  ;;  %v124_v62 = vmax.f32 %v116_v56, 1e-08  ;;  %v87_v63 = vsel %vm85_vm5, %v86_v51, %v84_v59  ;;  %v70_v3 = vsel %vm69_vm6, %v47_v37, %v68_v57 }
  0xa5   :  { %v2770_v4 = vpop.eup %2769  ;;  %v119_v6 = vmul.f32 0.088388346, %v87_v63  ;;  %v73_v7 = vsel %vm71_vm7, %v72_v55, %v70_v3  ;;  %v96_v10 = vmul.f32 %v2768_v61, %v55_v38  ;;  %v2722_v55 = vld [vmem:[%s3543_s4 + $0x10] ss:$8 sps:$4 sm:$0xff]   ;;  %v2730_v61 = vld [vmem:[%s3543_s4 + $0x34] ss:$8 sps:$4 sm:$0xff]  }
  0xa6   :  { %2775 = vrcp.f32 %v124_v62  ;;  %v117_v15 = vmul.f32 0.088388346, %v73_v7  ;;  %v89_v16 = vmul.f32 %v2770_v4, %v53_v39  ;;  %v2728_v3 = vld [vmem:[%s3543_s4 + $0x30] ss:$8 sps:$4 sm:$0xff]  }
  0xa7   :  { %v98_v17 = vsel %vm97_vm8, %v55_v38, %v96_v10  ;;  %v127_v19 = vmax.f32 %v119_v6, 1e-08  ;;  %v2733_v10 = vld [vmem:[%s3543_s4 + $0x44] ss:$8 sps:$4 sm:$0xff]  }
  0xa8   :  { %v2772_v18 = vpop.eup %2771  ;;  %v125_v20 = vmax.f32 %v117_v15, 1e-08  ;;  %v101_v21 = vsel %vm99_vm9, %v100_v60, %v98_v17  ;;  %v91_v22 = vsel %vm90_vm10, %v53_v39, %v89_v16  ;;  %v2734_v17 = vld [vmem:[%s3543_s4 + $0x50] ss:$8 sps:$4 sm:$0xff]  }
  0xa9   :  { %v2774_v23 = vpop.eup %2773  ;;  %v94_v24 = vsel %vm92_vm11, %v93_v11, %v91_v22  ;;  %v110_v25 = vmul.f32 %v2772_v18, %v3006_v44  ;;  %v121_v28 = vmul.f32 0.088388346, %v101_v21  ;;  %v2742_v21 = vld [vmem:[%s3543_s4 + $0x74] ss:$8 sps:$4 sm:$0xff]   ;;  %v2740_v22 = vld [vmem:[%s3543_s4 + $0x70] ss:$8 sps:$4 sm:$0xff]  }
  0xaa   :  { %2777 = vrcp.f32 %v125_v20  ;;  %v103_v27 = vmul.f32 %v2774_v23, %v3008_v45  ;;  %v120_v29 = vmul.f32 0.088388346, %v94_v24  ;;  %v2739_v20 = vld [vmem:[%s3543_s4 + $0x64] ss:$8 sps:$4 sm:$0xff]   ;;  %v2856_v23 = vmov 0.0  }
  0xab   :  { %2779 = vrcp.f32 %v127_v19  ;;  %v112_v31 = vsel %vm111_vm12, %v3006_v44, %v110_v25  ;;  %v129_v35 = vmax.f32 %v121_v28, 1e-08  ;;  %v2330_v44 = vld [vmem:[%s3544_s2] ss:$0 sm:$0xff]  ;;  %2500 = vmatprep.subr.bf16.mxu0 %v2856_v23  ;;  %2502 = vmatprep.mubr.msk.bf16.mxu0 %vm2857_vm0, %v2856_v23 }
  0xac   :  { %2781 = vrcp.f32 %v126_v26  ;;  %v105_v34 = vsel %vm104_vm13, %v3008_v45, %v103_v27  ;;  %v128_v37 = vmax.f32 %v120_v29, 1e-08  ;;  %v115_v38 = vsel %vm113_vm14, %v114_v30, %v112_v31 }
  0xad   :  { %v108_v39 = vsel %vm106_vm15, %v107_v33, %v105_v34  ;;  %2783 = vrcp.f32 %v129_v35  ;;  %v123_v40 = vmul.f32 0.088388346, %v115_v38 }
  0xae   :  { %2785 = vrcp.f32 %v128_v37  ;;  %v122_v43 = vmul.f32 0.088388346, %v108_v39 }
  0xaf   :  { %v131_v45 = vmax.f32 %v123_v40, 1e-08 }
  0xb0   :  { %v2776_v36 = vpop.eup %2775  ;;  %v130_v51 = vmax.f32 %v122_v43, 1e-08 }
  0xb1   :  { %v140_v41 = vmul.f32 %v2776_v36, %v2906_v1  ;;  %2787 = vrcp.f32 %v131_v45 }
  0xb2   :  { %2789 = vrcp.f32 %v130_v51 }
  0xb3   :  { %v154_v48 = vmul.f32 %v2330_v44, %v140_v41 }
  0xb4   :  { %v2778_v42 = vpop.eup %2777 }
  0xb5   :  { %v141_v46 = vmul.f32 %v2778_v42, %v2920_v5  ;;  %v2780_v47 = vpop.eup %2779 }
  0xb6   :  { %v2782_v50 = vpop.eup %2781  ;;  %v143_v54 = vmul.f32 %v2780_v47, %v2911_v2 }
  0xb7   :  { %v155_v49 = vmul.f32 %v2330_v44, %v141_v46  ;;  %v142_v5 = vmul.f32 %v2782_v50, %v2901_v0  ;;  %v2784_v56 = vpop.eup %2783  ;;  %v2725_v0 = vld [vmem:[%s3543_s4 + $0x20] ss:$8 sps:$4 sm:$0xff]  }
  0xb8   :  { %v157_v57 = vmul.f32 %v2330_v44, %v143_v54  ;;  %v2786_v2 = vpop.eup %2785  ;;  %v145_v63 = vmul.f32 %v2784_v56, %v2929_v8  ;;  %v2731_v8 = vld [vmem:[%s3543_s4 + $0x40] ss:$8 sps:$4 sm:$0xff]  }
  0xb9   :  { %v162_v1 = vpack.c.bf16 %v155_v49, %v154_v48  ;;  %v156_v59 = vmul.f32 %v2330_v44, %v142_v5  ;;  %v144_v62 = vmul.f32 %v2786_v2, %v2934_v9 }
  0xba   :  { %v159_v7 = vmul.f32 %v2330_v44, %v145_v63 }
  0xbb   :  { %295 = vmatmul.mubr.bf16.vlgmr.msra.gmra.mrb[0].mxu1 %v162_v1  ;;  %v163_v60 = vpack.c.bf16 %v157_v57, %v156_v59  ;;  %v2788_v4 = vpop.eup %2787  ;;  %v158_v6 = vmul.f32 %v2330_v44, %v144_v62 }
  0xbc   :  { %432 = vmatpush1.bf16.msra.mxu1 %v2719_v52  ;;  %304 = vmatprep.mubr.bf16.mxu1 %v2855_v32  ;;  %v2790_v11 = vpop.eup %2789  ;;  %v147_v16 = vmul.f32 %v2788_v4, %v2943_v12  ;;  %v2737_v12 = vld [vmem:[%s3543_s4 + $0x60] ss:$8 sps:$4 sm:$0xff]  }
  0xbd   :  { %433 = vmatprep.subr.bf16.mxu1 %v2724_v53  ;;  %v164_v9 = vpack.c.bf16 %v159_v7, %v158_v6  ;;  %v146_v15 = vmul.f32 %v2790_v11, %v2948_v13 }
  0xbe   :  { %v161_v19 = vmul.f32 %v2330_v44, %v147_v16 }
  0xbf   :  { %v160_v18 = vmul.f32 %v2330_v44, %v146_v15 }
  0xc0   :  { %434 = vmatpush1.bf16.msra.mxu1 %v2722_v55 }
  0xc1   :  { %435 = vmatprep.subr.bf16.mxu1 %v2727_v58  ;;  %v165_v13 = vpack.c.bf16 %v161_v19, %v160_v18 }
  0xc3   :  { %305 = vmatmul.mubr.bf16.gmra.mrb[4].mxu1 %v163_v60 }
  0xc4   :  { %436 = vmatpush1.bf16.msra.mxu1 %v2725_v0  ;;  %314 = vmatprep.mubr.bf16.mxu1 %v2855_v32 }
  0xc5   :  { %437 = vmatprep.subr.bf16.mxu1 %v2730_v61 }
  0xc8   :  { %438 = vmatpush1.bf16.msra.mxu1 %v2728_v3 }
  0xc9   :  { %439 = vmatprep.subr.bf16.mxu1 %v2733_v10 }
  0xcb   :  { %315 = vmatmul.mubr.bf16.gmra.mrb[8].mxu1 %v164_v9 }
  0xcc   :  { %440 = vmatpush1.bf16.msra.mxu1 %v2731_v8  ;;  %324 = vmatprep.mubr.bf16.mxu1 %v2855_v32 }
  0xcd   :  { %441 = vmatprep.subr.bf16.mxu1 %v2736_v14 }
  0xd0   :  { %442 = vmatpush1.bf16.msra.mxu1 %v2734_v17 }
  0xd1   :  { %443 = vmatprep.subr.bf16.mxu1 %v2739_v20 }
  0xd3   :  { %325 = vmatmul.mubr.bf16.gmra.mrb[12].mxu1 %v165_v13 }
  0xd4   :  { %444 = vmatpush1.bf16.msra.mxu1 %v2737_v12  ;;  %463 = vmatprep.mubr.bf16.mxu1 %v2855_v32 }
  0xd5   :  { %445 = vmatprep.subr.bf16.mxu1 %v2742_v21 }
  0xd8   :  { %446 = vmatpush1.bf16.msra.mxu1 %v2740_v22 }
  0xd9   :  { %2530 = vmatprep.subr.bf16.mxu1 %v2856_v23 }
  0xdb   :  { %464 = vmatmul.mubr.bf16.vlgmr.msra.gmra.mrb[16].mxu1 %v162_v1 }
  0xdc   :  { %473 = vmatprep.mubr.bf16.mxu1 %v2855_v32 }
  0xe3   :  { %474 = vmatmul.mubr.bf16.gmra.mrb[20].mxu1 %v163_v60 }
  0xe4   :  { %483 = vmatprep.mubr.bf16.mxu1 %v2855_v32 }
  0xeb   :  { %484 = vmatmul.mubr.bf16.gmra.mrb[24].mxu1 %v164_v9 }
  0xec   :  { %493 = vmatprep.mubr.bf16.mxu1 %v2855_v32 }
  0xf3   :  { %494 = vmatmul.mubr.bf16.gmra.mrb[28].mxu1 %v165_v13 }
  0xf4   :  { %2532 = vmatprep.mubr.msk.bf16.mxu1 %vm2857_vm0, %v2856_v23 }
 0x18e   :  { %v296_v24 = vpop.f32.mrb[0].mxu1 }
 0x18f   :  { %v3100_v25 = vpop.f32.mrb[1].mxu1  ;;  %v504_v46 = vmul.f32 0.088388346, %v296_v24 }
 0x190   :  { %v300_v26 = vpop.f32.mrb[2].mxu1 }
 0x191   :  { %v3102_v27 = vpop.f32.mrb[3].mxu1  ;;  %v536_v47 = vpack.c.bf16 %v504_v46, %v504_v46  ;;  %v506_v1 = vmul.f32 0.088388346, %v300_v26 }
 0x193   :  { %v537_v55 = vpack.c.bf16 %v506_v1, %v506_v1 }
 0x196   :  { %v306_v32 = vpop.f32.mrb[4].mxu1 }
 0x197   :  { %v3104_v28 = vpop.f32.mrb[5].mxu1  ;;  %v508_v61 = vmul.f32 0.088388346, %v306_v32 }
 0x198   :  { %v3106_v29 = vpop.f32.mrb[6].mxu1 }
 0x199   :  { %v3108_v30 = vpop.f32.mrb[7].mxu1  ;;  %v538_v6 = vpack.c.bf16 %v508_v61, %v508_v61  ;;  %v510_v17 = vmul.f32 0.088388346, %v3106_v29 }
 0x19b   :  { %v539_v13 = vpack.c.bf16 %v510_v17, %v510_v17 }
 0x19e   :  { %v3110_v31 = vpop.f32.mrb[8].mxu1 }
 0x19f   :  { %v3112_v33 = vpop.f32.mrb[9].mxu1  ;;  %v512_v26 = vmul.f32 0.088388346, %v3110_v31 }
 0x1a0   :  { %v320_v34 = vpop.f32.mrb[10].mxu1 }
 0x1a1   :  { %v3114_v35 = vpop.f32.mrb[11].mxu1  ;;  %v514_v3 = vmul.f32 0.088388346, %v320_v34  ;;  %v540_v29 = vpack.c.bf16 %v512_v26, %v512_v26 }
 0x1a3   :  { %v541_v8 = vpack.c.bf16 %v514_v3, %v514_v3 }
 0x1a6   :  { %v3116_v36 = vpop.f32.mrb[12].mxu1 }
 0x1a7   :  { %v3118_v37 = vpop.f32.mrb[13].mxu1  ;;  %v516_v31 = vmul.f32 0.088388346, %v3116_v36  ;;  %v544_v36 = vld [vmem:[%s3545_s6] sm:$0xff] }
 0x1a8   :  { %v3120_v38 = vpop.f32.mrb[14].mxu1 }
 0x1a9   :  { %v3122_v39 = vpop.f32.mrb[15].mxu1  ;;  %v518_v20 = vmul.f32 0.088388346, %v3120_v38 }
 0x1ab   :  { %v543_v24 = vpack.c.bf16 %v518_v20, %v518_v20 }
 0x1ae   :  { %v465_v40 = vpop.f32.mrb[16].mxu1 }
 0x1af   :  { %v3124_v41 = vpack.c.bf16 %v465_v40, %v465_v40  ;;  %v3126_v42 = vpop.f32.mrb[17].mxu1  ;;  %v542_v40 = vpack.c.bf16 %v516_v31, %v516_v31 }
 0x1b0   :  { %v469_v43 = vpop.f32.mrb[18].mxu1  ;;  %v528_v38 = vpack.c.bf16 %v3126_v42, %v3126_v42 }
 0x1b1   :  { %v3128_v44 = vpop.f32.mrb[19].mxu1  ;;  %2501 = vmatpush3.bf16.xpose.msra.mxu0 %v3124_v41  ;;  %v3132_v48 = vpack.c.bf16 %v469_v43, %v469_v43 }
 0x1b2   :  { %2506 = vmatprep.subr.bf16.mxu0 %v2856_v23  ;;  %v529_v21 = vpack.c.bf16 %v3128_v44, %v3128_v44  ;;  %v3206_v43 = vsel %vm949_vm1, %v528_v38, 0 }
 0x1b4   :  { %v3189_v32 = vsel %vm949_vm1, %v529_v21, 0 }
 0x1b6   :  { %v475_v45 = vpop.f32.mrb[20].mxu1 }
 0x1b7   :  { %v477_v49 = vpop.f32.mrb[21].mxu1  ;;  %v3144_v57 = vpack.c.bf16 %v475_v45, %v475_v45 }
 0x1b8   :  { %v530_v50 = vpack.c.bf16 %v477_v49, %v477_v49  ;;  %v479_v51 = vpop.f32.mrb[22].mxu1  ;;  %2503 = vmatmul.mubr.bf16.vlgmr.msra.gmra.mrb[0].mxu0 %v536_v47 }
 0x1b9   :  { %v481_v52 = vpop.f32.mrb[23].mxu1  ;;  %2507 = vmatpush3.bf16.xpose.msra.mxu0 %v3132_v48  ;;  %2508 = vmatprep.mubr.msk.bf16.mxu0 %vm2857_vm0, %v2856_v23  ;;  %v3160_v10 = vpack.c.bf16 %v479_v51, %v479_v51 }
 0x1ba   :  { %v3138_v53 = vsel %vm949_vm1, %v530_v50, 0  ;;  %v531_v54 = vpack.c.bf16 %v481_v52, %v481_v52  ;;  %2512 = vmatprep.subr.bf16.mxu0 %v2856_v23 }
 0x1bc   :  { %v3142_v5 = vsel %vm949_vm1, %v531_v54, 0 }
 0x1be   :  { %v485_v56 = vpop.f32.mrb[24].mxu1 }
 0x1bf   :  { %v487_v58 = vpop.f32.mrb[25].mxu1  ;;  %v3182_v22 = vpack.c.bf16 %v485_v56, %v485_v56 }
 0x1c0   :  { %v532_v2 = vpack.c.bf16 %v487_v58, %v487_v58  ;;  %v489_v59 = vpop.f32.mrb[26].mxu1  ;;  %2509 = vmatmul.mubr.bf16.vlgmr.msra.gmra.mrb[4].mxu0 %v537_v55 }
 0x1c1   :  { %v3146_v0 = vpack.c.bf16 %v489_v59, %v489_v59  ;;  %v491_v60 = vpop.f32.mrb[27].mxu1  ;;  %2513 = vmatpush3.bf16.xpose.msra.mxu0 %v3144_v57  ;;  %2514 = vmatprep.mubr.msk.bf16.mxu0 %vm2857_vm0, %v2856_v23 }
 0x1c2   :  { %v3152_v62 = vsel %vm949_vm1, %v532_v2, 0  ;;  %v533_v63 = vpack.c.bf16 %v491_v60, %v491_v60  ;;  %2518 = vmatprep.subr.bf16.mxu0 %v2856_v23 }
 0x1c3   :  { %2531 = vmatpush3.bf16.xpose.msra.mxu1 %v3146_v0 }
 0x1c4   :  { %v3157_v4 = vsel %vm949_vm1, %v533_v63, 0  ;;  %2542 = vmatprep.subr.bf16.mxu1 %v2856_v23 }
 0x1c6   :  { %v495_v7 = vpop.f32.mrb[28].mxu1 }
 0x1c7   :  { %v497_v11 = vpop.f32.mrb[29].mxu1  ;;  %v3196_v34 = vpack.c.bf16 %v495_v7, %v495_v7 }
 0x1c8   :  { %v534_v9 = vpack.c.bf16 %v497_v11, %v497_v11  ;;  %v499_v14 = vpop.f32.mrb[30].mxu1  ;;  %2515 = vmatmul.mubr.bf16.vlgmr.msra.gmra.mrb[8].mxu0 %v538_v6 }
 0x1c9   :  { %v3162_v15 = vpack.c.bf16 %v499_v14, %v499_v14  ;;  %v501_v16 = vpop.f32.mrb[31].mxu1  ;;  %2519 = vmatpush3.bf16.xpose.msra.mxu0 %v3160_v10  ;;  %2520 = vmatprep.mubr.msk.bf16.mxu0 %vm2857_vm0, %v2856_v23 }
 0x1ca   :  { %v3169_v18 = vsel %vm949_vm1, %v534_v9, 0  ;;  %v535_v19 = vpack.c.bf16 %v501_v16, %v501_v16  ;;  %2533 = vmatmul.mubr.bf16.vlgmr.msra.gmra.mrb[32].mxu1 %v541_v8  ;;  %2524 = vmatprep.subr.bf16.mxu0 %v2856_v23 }
 0x1cb   :  { %2543 = vmatpush3.bf16.xpose.msra.mxu1 %v3162_v15  ;;  %2544 = vmatprep.mubr.msk.bf16.mxu1 %vm2857_vm0, %v2856_v23 }
 0x1cc   :  { %v3177_v12 = vsel %vm949_vm1, %v535_v19, 0  ;;  %2554 = vmatprep.subr.bf16.mxu1 %v2856_v23 }
 0x1d0   :  { %2521 = vmatmul.mubr.bf16.vlgmr.msra.gmra.mrb[12].mxu0 %v539_v13 }
 0x1d1   :  { %2525 = vmatpush3.bf16.xpose.msra.mxu0 %v3182_v22  ;;  %2526 = vmatprep.mubr.msk.bf16.mxu0 %vm2857_vm0, %v2856_v23 }
 0x1d2   :  { %2545 = vmatmul.mubr.bf16.vlgmr.msra.gmra.mrb[36].mxu1 %v543_v24  ;;  %2536 = vmatprep.subr.bf16.mxu0 %v2856_v23 }
 0x1d3   :  { %2555 = vmatpush3.bf16.msra.mxu1 %v3189_v32  ;;  %2556 = vmatprep.mubr.msk.bf16.mxu1 %vm2857_vm0, %v2856_v23 }
 0x1d4   :  { %2566 = vmatprep.subr.bf16.mxu1 %v2856_v23 }
 0x1d8   :  { %2527 = vmatmul.mubr.bf16.vlgmr.msra.gmra.mrb[16].mxu0 %v540_v29 }
 0x1d9   :  { %2537 = vmatpush3.bf16.xpose.msra.mxu0 %v3196_v34  ;;  %2538 = vmatprep.mubr.msk.bf16.mxu0 %vm2857_vm0, %v2856_v23 }
 0x1da   :  { %2548 = vmatprep.subr.bf16.mxu0 %v2856_v23 }
 0x1e0   :  { %2539 = vmatmul.mubr.bf16.vlgmr.msra.gmra.mrb[20].mxu0 %v542_v40 }
 0x1e1   :  { %2549 = vmatpush3.bf16.msra.mxu0 %v3206_v43  ;;  %2550 = vmatprep.mubr.msk.bf16.mxu0 %vm2857_vm0, %v2856_v23 }
 0x1e2   :  { %2560 = vmatprep.subr.bf16.mxu0 %v2856_v23 }
 0x28b   :  { %v579_v44 = vpop.f32.mrb[0].mxu0 }
 0x28c   :  { %v580_v46 = vadd.f32 %v579_v44, %v544_v36  ;;  %v2504_v42 = vpop.f32.mrb[1].mxu0 }
 0x28d   :  { %v582_v47 = vpop.f32.mrb[2].mxu0 }
 0x28e   :  { %v2505_v45 = vpop.f32.mrb[3].mxu0  ;;  %v866_v49 = vsel %vm865_vm2, %v580_v46, -inf }
 0x28f   :  { %867 = vmax.xlane.f32.xlu0 %v866_v49 }
 0x293   :  { %v619_v50 = vpop.f32.mrb[4].mxu0 }
 0x294   :  { %v620_v51 = vadd.f32 %v619_v50, %v544_v36  ;;  %v2510_v52 = vpop.f32.mrb[5].mxu0 }
 0x295   :  { %v622_v1 = vpop.f32.mrb[6].mxu0 }
 0x296   :  { %v2511_v54 = vpop.f32.mrb[7].mxu0  ;;  %v869_v55 = vsel %vm865_vm2, %v620_v51, -inf }
 0x297   :  { %870 = vmax.xlane.f32.xlu1 %v869_v55 }
 0x29b   :  { %v659_v56 = vpop.f32.mrb[8].mxu0 }
 0x29c   :  { %v660_v58 = vadd.f32 %v659_v56, %v544_v36  ;;  %v2516_v2 = vpop.f32.mrb[9].mxu0 }
 0x29d   :  { %v662_v59 = vpop.f32.mrb[10].mxu0  ;;  %v779_v60 = vpop.f32.mrb[32].mxu1 }
 0x29e   :  { %v2517_v61 = vpop.f32.mrb[11].mxu0  ;;  %v2534_v63 = vpop.f32.mrb[33].mxu1  ;;  %v872_v3 = vsel %vm865_vm2, %v660_v58, -inf  ;;  %v780_v17 = vadd.f32 %v779_v60, %v544_v36 }
 0x29f   :  { %873 = vmax.xlane.f32.xlu0 %v872_v3  ;;  %v782_v6 = vpop.f32.mrb[34].mxu1 }
 0x2a0   :  { %v2535_v7 = vpop.f32.mrb[35].mxu1  ;;  %v881_v29 = vsel %vm865_vm2, %v780_v17, -inf }
 0x2a3   :  { %v699_v11 = vpop.f32.mrb[12].mxu0 }
 0x2a4   :  { %v700_v8 = vadd.f32 %v699_v11, %v544_v36  ;;  %v2522_v9 = vpop.f32.mrb[13].mxu0 }
 0x2a5   :  { %v702_v14 = vpop.f32.mrb[14].mxu0  ;;  %v859_v16 = vpop.f32.mrb[36].mxu1 }
 0x2a6   :  { %v2523_v19 = vpop.f32.mrb[15].mxu0  ;;  %v2546_v20 = vpop.f32.mrb[37].mxu1  ;;  %v875_v13 = vsel %vm865_vm2, %v700_v8, -inf  ;;  %v3219_v26 = vadd.f32 %v859_v16, %v544_v36 }
 0x2a7   :  { %876 = vmax.xlane.f32.xlu1 %v875_v13  ;;  %v862_v21 = vpop.f32.mrb[38].mxu1 }
 0x2a8   :  { %v2547_v24 = vpop.f32.mrb[39].mxu1  ;;  %v887_v45 = vsel %vm865_vm2, %v3219_v26, -inf }
 0x2ab   :  { %v739_v31 = vpop.f32.mrb[16].mxu0  ;;  %882 = vmax.xlane.f32.xlu1 %v881_v29 }
 0x2ac   :  { %v740_v38 = vadd.f32 %v739_v31, %v544_v36  ;;  %v2528_v40 = vpop.f32.mrb[17].mxu0 }
 0x2ad   :  { %v742_v44 = vpop.f32.mrb[18].mxu0 }
 0x2ae   :  { %v2529_v42 = vpop.f32.mrb[19].mxu0  ;;  %v878_v47 = vsel %vm865_vm2, %v740_v38, -inf }
 0x2af   :  { %879 = vmax.xlane.f32.xlu0 %v878_v47  ;;  %888 = vmax.xlane.f32.xlu1 %v887_v45 }
 0x2b3   :  { %v819_v49 = vpop.f32.mrb[20].mxu0 }
 0x2b4   :  { %v820_v50 = vadd.f32 %v819_v49, %v544_v36  ;;  %v2540_v52 = vpop.f32.mrb[21].mxu0 }
 0x2b5   :  { %v822_v1 = vpop.f32.mrb[22].mxu0 }
 0x2b6   :  { %v2541_v54 = vpop.f32.mrb[23].mxu0  ;;  %v884_v55 = vsel %vm865_vm2, %v820_v50, -inf }
 0x2b7   :  { %885 = vmax.xlane.f32.xlu0 %v884_v55 }
 0x31c   :  { %v868_v56 = vpop.xlane.xlu0 %867 }
 0x31d   :  { %v890_v2 = vsub.f32 %v580_v46, %v868_v56 }
 0x31f   :  { %v898_v59 = vmul.f32 1.442695, %v890_v2  ;;  %v505_v2 = vmul.f32 0.088388346, %v3100_v25 }
 0x321   :  { %2791 = vpow2.f32 %v898_v59  ;;  %v507_v59 = vmul.f32 0.088388346, %v3102_v27 }
 0x324   :  { %v871_v60 = vpop.xlane.xlu1 %870 }
 0x325   :  { %v891_v61 = vsub.f32 %v620_v51, %v871_v60  ;;  %v1331_v60 = vpack.c.bf16 %v505_v2, %v505_v2 }
 0x327   :  { %v900_v63 = vmul.f32 1.442695, %v891_v61  ;;  %v1332_v61 = vpack.c.bf16 %v507_v59, %v507_v59 }
 0x329   :  { %2793 = vpow2.f32 %v900_v63 }
 0x32b   :  { %v3226_v3 = vpop.eup %2791 }
 0x32c   :  { %v874_v6 = vpop.xlane.xlu0 %873  ;;  %v938_v36 = vpack.c.bf16 %v3226_v3, %v3226_v3 }
 0x32d   :  { %v892_v7 = vsub.f32 %v660_v58, %v874_v6 }
 0x32e   :  { %2551 = vmatmul.mubr.msk.bf16.vlgmr.msra.gmra.mrb[24].mxu0 %vm865_vm2, %v938_v36 }
 0x32f   :  { %v902_v11 = vmul.f32 1.442695, %v892_v7  ;;  %2561 = vmatpush3.bf16.msra.mxu0 %v3138_v53  ;;  %2562 = vmatprep.mubr.msk.bf16.mxu0 %vm2857_vm0, %v2856_v23 }
 0x330   :  { %2572 = vmatprep.subr.bf16.mxu0 %v2856_v23 }
 0x331   :  { %2795 = vpow2.f32 %v902_v11 }
 0x333   :  { %v3235_v46 = vpop.eup %2793 }
 0x334   :  { %v877_v51 = vpop.xlane.xlu1 %876  ;;  %v939_v9 = vpack.c.bf16 %v3235_v46, %v3235_v46 }
 0x335   :  { %v893_v14 = vsub.f32 %v700_v8, %v877_v51 }
 0x336   :  { %2557 = vmatmul.mubr.msk.bf16.vlgmr.msra.gmra.mrb[40].mxu1 %vm865_vm2, %v939_v9 }
 0x337   :  { %v904_v58 = vmul.f32 1.442695, %v893_v14  ;;  %2567 = vmatpush3.bf16.msra.mxu1 %v3142_v5  ;;  %2568 = vmatprep.mubr.msk.bf16.mxu1 %vm2857_vm0, %v2856_v23 }
 0x338   :  { %v883_v16 = vpop.xlane.xlu1 %882  ;;  %2578 = vmatprep.subr.bf16.mxu1 %v2856_v23 }
 0x339   :  { %2797 = vpow2.f32 %v904_v58  ;;  %v895_v19 = vsub.f32 %v780_v17, %v883_v16 }
 0x33b   :  { %v3244_v20 = vpop.eup %2795  ;;  %v908_v13 = vmul.f32 1.442695, %v895_v19 }
 0x33c   :  { %v880_v21 = vpop.xlane.xlu0 %879  ;;  %v889_v24 = vpop.xlane.xlu1 %888  ;;  %v940_v8 = vpack.c.bf16 %v3244_v20, %v3244_v20 }
 0x33d   :  { %v894_v29 = vsub.f32 %v740_v38, %v880_v21  ;;  %2799 = vpow2.f32 %v908_v13  ;;  %v897_v40 = vsub.f32 %v3219_v26, %v889_v24 }
 0x33e   :  { %2563 = vmatmul.mubr.msk.bf16.vlgmr.msra.gmra.mrb[28].mxu0 %vm865_vm2, %v940_v8 }
 0x33f   :  { %v906_v31 = vmul.f32 1.442695, %v894_v29  ;;  %2573 = vmatpush3.bf16.msra.mxu0 %v3152_v62  ;;  %2574 = vmatprep.mubr.msk.bf16.mxu0 %vm2857_vm0, %v2856_v23  ;;  %v912_v44 = vmul.f32 1.442695, %v897_v40 }
 0x340   :  { %2584 = vmatprep.subr.bf16.mxu0 %v2856_v23 }
 0x341   :  { %2801 = vpow2.f32 %v906_v31 }
 0x342   :  { %2803 = vpow2.f32 %v912_v44 }
 0x343   :  { %v3254_v17 = vpop.eup %2797 }
 0x344   :  { %v886_v42 = vpop.xlane.xlu0 %885  ;;  %v941_v38 = vpack.c.bf16 %v3254_v17, %v3254_v17 }
 0x345   :  { %v896_v47 = vsub.f32 %v820_v50, %v886_v42 }
 0x346   :  { %2569 = vmatmul.mubr.msk.bf16.vlgmr.msra.gmra.mrb[44].mxu1 %vm865_vm2, %v941_v38 }
 0x347   :  { %v910_v26 = vmul.f32 1.442695, %v896_v47  ;;  %2579 = vmatpush3.bf16.msra.mxu1 %v3157_v4  ;;  %2580 = vmatprep.mubr.msk.bf16.mxu1 %vm2857_vm0, %v2856_v23  ;;  %v3263_v45 = vpop.eup %2799 }
 0x348   :  { %2590 = vmatprep.subr.bf16.mxu1 %v2856_v23  ;;  %v943_v50 = vpack.c.bf16 %v3263_v45, %v3263_v45 }
 0x349   :  { %2805 = vpow2.f32 %v910_v26 }
 0x34b   :  { %v3265_v49 = vpop.eup %2801 }
 0x34c   :  { %v942_v52 = vpack.c.bf16 %v3265_v49, %v3265_v49  ;;  %v3279_v1 = vpop.eup %2803 }
 0x34d   :  { %v945_v56 = vpack.c.bf16 %v3279_v1, %v3279_v1 }
 0x34e   :  { %2575 = vmatmul.mubr.msk.bf16.vlgmr.msra.gmra.mrb[32].mxu0 %vm865_vm2, %v942_v52  ;;  %2581 = vmatmul.mubr.msk.bf16.vlgmr.msra.gmra.mrb[48].mxu1 %vm865_vm2, %v943_v50 }
 0x34f   :  { %2585 = vmatpush3.bf16.msra.mxu0 %v3169_v18  ;;  %2591 = vmatpush3.bf16.msra.mxu1 %v3177_v12 }
 0x350   :  { %2586 = vmatprep.mubr.msk.bf16.mxu0 %vm2857_vm0, %v2856_v23  ;;  %2592 = vmatprep.mubr.msk.bf16.mxu1 %vm2857_vm0, %v2856_v23 }
 0x351   :  { %2596 = vmatprep.subr.bf16.mxu0 %v2856_v23  ;;  %2602 = vmatprep.subr.bf16.mxu1 %v2856_v23 }
 0x353   :  { %v3283_v54 = vpop.eup %2805 }
 0x354   :  { %v944_v55 = vpack.c.bf16 %v3283_v54, %v3283_v54 }
 0x356   :  { %2587 = vmatmul.mubr.msk.bf16.vlgmr.msra.gmra.mrb[36].mxu0 %vm865_vm2, %v944_v55  ;;  %2593 = vmatmul.mubr.msk.bf16.vlgmr.msra.gmra.mrb[52].mxu1 %vm865_vm2, %v945_v56  ;;  %v2371_v56 = vld [vmem:[%s3545_s6 + $0x8] sm:$0xff] }
 0x357   :  { %2598 = vmatprep.mubr.msk.bf16.mxu0 %vm2857_vm0, %v2856_v23  ;;  %2604 = vmatprep.mubr.msk.bf16.mxu1 %vm2857_vm0, %v2856_v23 }
 0x358   :  { %2597 = vmatpush3.bf16.xpose.msra.mxu0 %v3124_v41  ;;  %2603 = vmatpush3.bf16.xpose.msra.mxu1 %v3132_v48  ;;  %v509_v41 = vmul.f32 0.088388346, %v3104_v28  ;;  %v511_v48 = vmul.f32 0.088388346, %v3108_v30  ;;  %v513_v28 = vmul.f32 0.088388346, %v3112_v33 }
 0x359   :  { %2608 = vmatprep.subr.bf16.mxu0 %v2856_v23  ;;  %2614 = vmatprep.subr.bf16.mxu1 %v2856_v23  ;;  %v515_v30 = vmul.f32 0.088388346, %v3114_v35  ;;  %v517_v33 = vmul.f32 0.088388346, %v3118_v37  ;;  %v519_v35 = vmul.f32 0.088388346, %v3122_v39 }
 0x35a   :  { %v1333_v25 = vpack.c.bf16 %v509_v41, %v509_v41  ;;  %v1334_v27 = vpack.c.bf16 %v511_v48, %v511_v48 }
 0x35f   :  { %2599 = vmatmul.mubr.bf16.vlgmr.msra.gmra.mrb[40].mxu0 %v1331_v60  ;;  %2605 = vmatmul.mubr.bf16.vlgmr.msra.gmra.mrb[56].mxu1 %v1332_v61 }
 0x360   :  { %2609 = vmatpush3.bf16.xpose.msra.mxu0 %v3144_v57  ;;  %2615 = vmatpush3.bf16.xpose.msra.mxu1 %v3160_v10  ;;  %v1335_v57 = vpack.c.bf16 %v513_v28, %v513_v28  ;;  %v1336_v10 = vpack.c.bf16 %v515_v30, %v515_v30 }
 0x361   :  { %2610 = vmatprep.mubr.msk.bf16.mxu0 %vm2857_vm0, %v2856_v23  ;;  %2616 = vmatprep.mubr.msk.bf16.mxu1 %vm2857_vm0, %v2856_v23 }
 0x362   :  { %2620 = vmatprep.subr.bf16.mxu0 %v2856_v23  ;;  %2626 = vmatprep.subr.bf16.mxu1 %v2856_v23 }
 0x367   :  { %2611 = vmatmul.mubr.bf16.vlgmr.msra.gmra.mrb[44].mxu0 %v1333_v25  ;;  %2617 = vmatmul.mubr.bf16.vlgmr.msra.gmra.mrb[60].mxu1 %v1334_v27 }
 0x368   :  { %2621 = vmatpush3.bf16.xpose.msra.mxu0 %v3182_v22  ;;  %2627 = vmatpush3.bf16.xpose.msra.mxu1 %v3146_v0  ;;  %v1337_v0 = vpack.c.bf16 %v517_v33, %v517_v33  ;;  %v1338_v22 = vpack.c.bf16 %v519_v35, %v519_v35 }
 0x369   :  { %2622 = vmatprep.mubr.msk.bf16.mxu0 %vm2857_vm0, %v2856_v23  ;;  %2628 = vmatprep.mubr.msk.bf16.mxu1 %vm2857_vm0, %v2856_v23 }
 0x36a   :  { %2632 = vmatprep.subr.bf16.mxu0 %v2856_v23  ;;  %2638 = vmatprep.subr.bf16.mxu1 %v2856_v23 }
 0x36f   :  { %2623 = vmatmul.mubr.bf16.vlgmr.msra.gmra.mrb[48].mxu0 %v1335_v57  ;;  %2629 = vmatmul.mubr.bf16.vlgmr.msra.gmra.mrb[64].mxu1 %v1336_v10 }
 0x370   :  { %2633 = vmatpush3.bf16.xpose.msra.mxu0 %v3196_v34  ;;  %2639 = vmatpush3.bf16.xpose.msra.mxu1 %v3162_v15 }
 0x371   :  { %2634 = vmatprep.mubr.msk.bf16.mxu0 %vm2857_vm0, %v2856_v23  ;;  %2640 = vmatprep.mubr.msk.bf16.mxu1 %vm2857_vm0, %v2856_v23 }
 0x372   :  { %2644 = vmatprep.subr.bf16.mxu0 %v2856_v23  ;;  %2650 = vmatprep.subr.bf16.mxu1 %v2856_v23 }
 0x377   :  { %2635 = vmatmul.mubr.bf16.vlgmr.msra.gmra.mrb[52].mxu0 %v1337_v0  ;;  %2641 = vmatmul.mubr.bf16.vlgmr.msra.gmra.mrb[68].mxu1 %v1338_v22 }
 0x378   :  { %2645 = vmatpush3.bf16.msra.mxu0 %v3206_v43  ;;  %2651 = vmatpush3.bf16.msra.mxu1 %v3189_v32 }
 0x379   :  { %2646 = vmatprep.mubr.msk.bf16.mxu0 %vm2857_vm0, %v2856_v23  ;;  %2656 = vmatprep.subr.bf16.mxu0 %v2856_v23 }
 0x37a   :  { %2652 = vmatprep.mubr.msk.bf16.mxu1 %vm2857_vm0, %v2856_v23  ;;  %2662 = vmatprep.subr.bf16.mxu1 %v2856_v23 }
 0x401   :  { %v3339_v37 = vpop.f32.mrb[24].mxu0 }
 0x402   :  { %v2552_v39 = vpop.f32.mrb[25].mxu0 }
 0x403   :  { %v990_v15 = vpop.f32.mrb[26].mxu0 }
 0x404   :  { %v2553_v34 = vpop.f32.mrb[27].mxu0 }
 0x409   :  { %v3341_v63 = vpop.f32.mrb[40].mxu1 }
 0x40a   :  { %v2558_v43 = vpop.f32.mrb[41].mxu1 }
 0x40b   :  { %v1036_v6 = vpop.f32.mrb[42].mxu1 }
 0x40c   :  { %v2559_v32 = vpop.f32.mrb[43].mxu1 }
 0x411   :  { %v3343_v36 = vpop.f32.mrb[28].mxu0 }
 0x412   :  { %v2564_v7 = vpop.f32.mrb[29].mxu0 }
 0x413   :  { %v1082_v11 = vpop.f32.mrb[30].mxu0 }
 0x414   :  { %v2565_v51 = vpop.f32.mrb[31].mxu0 }
 0x419   :  { %v3345_v9 = vpop.f32.mrb[44].mxu1 }
 0x41a   :  { %v2570_v14 = vpop.f32.mrb[45].mxu1 }
 0x41b   :  { %v1128_v58 = vpop.f32.mrb[46].mxu1 }
 0x41c   :  { %v2571_v16 = vpop.f32.mrb[47].mxu1 }
 0x421   :  { %v3347_v19 = vpop.f32.mrb[32].mxu0  ;;  %v3349_v13 = vpop.f32.mrb[48].mxu1 }
 0x422   :  { %v2576_v21 = vpop.f32.mrb[33].mxu0  ;;  %v2582_v24 = vpop.f32.mrb[49].mxu1 }
 0x423   :  { %v1174_v8 = vpop.f32.mrb[34].mxu0  ;;  %v1220_v29 = vpop.f32.mrb[50].mxu1 }
 0x424   :  { %v2577_v31 = vpop.f32.mrb[35].mxu0  ;;  %v2583_v40 = vpop.f32.mrb[51].mxu1 }
 0x429   :  { %v3351_v44 = vpop.f32.mrb[36].mxu0  ;;  %v3353_v42 = vpop.f32.mrb[52].mxu1 }
 0x42a   :  { %v2588_v38 = vpop.f32.mrb[37].mxu0  ;;  %v2594_v47 = vpop.f32.mrb[53].mxu1 }
 0x42b   :  { %v1266_v26 = vpop.f32.mrb[38].mxu0  ;;  %v1312_v52 = vpop.f32.mrb[54].mxu1 }
 0x42c   :  { %v2589_v50 = vpop.f32.mrb[39].mxu0  ;;  %v2595_v55 = vpop.f32.mrb[55].mxu1 }
 0x432   :  { %v1375_v2 = vpop.f32.mrb[40].mxu0  ;;  %v1415_v59 = vpop.f32.mrb[56].mxu1 }
 0x433   :  { %v1376_v60 = vadd.f32 %v2371_v56, %v1375_v2  ;;  %v1416_v61 = vadd.f32 %v2371_v56, %v1415_v59  ;;  %v2600_v41 = vpop.f32.mrb[41].mxu0  ;;  %v2606_v48 = vpop.f32.mrb[57].mxu1 }
 0x434   :  { %v1378_v25 = vpop.f32.mrb[42].mxu0  ;;  %v1418_v27 = vpop.f32.mrb[58].mxu1 }
 0x435   :  { %v2601_v28 = vpop.f32.mrb[43].mxu0  ;;  %v2607_v30 = vpop.f32.mrb[59].mxu1  ;;  %v1661_v57 = vsel %vm865_vm2, %v1376_v60, -inf  ;;  %v1664_v10 = vsel %vm865_vm2, %v1416_v61, -inf }
 0x436   :  { %1662 = vmax.xlane.f32.xlu0 %v1661_v57  ;;  %1665 = vmax.xlane.f32.xlu1 %v1664_v10 }
 0x43a   :  { %v1455_v33 = vpop.f32.mrb[44].mxu0  ;;  %v1495_v35 = vpop.f32.mrb[60].mxu1 }
 0x43b   :  { %v1456_v0 = vadd.f32 %v2371_v56, %v1455_v33  ;;  %v1496_v22 = vadd.f32 %v2371_v56, %v1495_v35  ;;  %v2612_v39 = vpop.f32.mrb[45].mxu0  ;;  %v2618_v15 = vpop.f32.mrb[61].mxu1 }
 0x43c   :  { %v1458_v34 = vpop.f32.mrb[46].mxu0  ;;  %v1498_v43 = vpop.f32.mrb[62].mxu1 }
 0x43d   :  { %v2613_v6 = vpop.f32.mrb[47].mxu0  ;;  %v2619_v32 = vpop.f32.mrb[63].mxu1  ;;  %v1667_v7 = vsel %vm865_vm2, %v1456_v0, -inf  ;;  %v1670_v11 = vsel %vm865_vm2, %v1496_v22, -inf }
 0x43e   :  { %1668 = vmax.xlane.f32.xlu0 %v1667_v7  ;;  %1671 = vmax.xlane.f32.xlu1 %v1670_v11 }
 0x442   :  { %v1535_v51 = vpop.f32.mrb[48].mxu0  ;;  %v1575_v14 = vpop.f32.mrb[64].mxu1 }
 0x443   :  { %v1536_v58 = vadd.f32 %v2371_v56, %v1535_v51  ;;  %v1576_v16 = vadd.f32 %v2371_v56, %v1575_v14  ;;  %v2624_v21 = vpop.f32.mrb[49].mxu0  ;;  %v2630_v24 = vpop.f32.mrb[65].mxu1 }
 0x444   :  { %v1538_v8 = vpop.f32.mrb[50].mxu0  ;;  %v1578_v29 = vpop.f32.mrb[66].mxu1 }
 0x445   :  { %v2625_v31 = vpop.f32.mrb[51].mxu0  ;;  %v2631_v40 = vpop.f32.mrb[67].mxu1  ;;  %v1673_v38 = vsel %vm865_vm2, %v1536_v58, -inf  ;;  %v1676_v47 = vsel %vm865_vm2, %v1576_v16, -inf }
 0x446   :  { %1674 = vmax.xlane.f32.xlu0 %v1673_v38  ;;  %1677 = vmax.xlane.f32.xlu1 %v1676_v47  ;;  %v914_v40 = vsel %vm865_vm2, %v3226_v3, 0.0 }
 0x44a   :  { %v1615_v26 = vpop.f32.mrb[52].mxu0  ;;  %v1655_v52 = vpop.f32.mrb[68].mxu1 }
 0x44b   :  { %v3364_v50 = vadd.f32 %v2371_v56, %v1615_v26  ;;  %v3366_v55 = vadd.f32 %v2371_v56, %v1655_v52  ;;  %v2636_v2 = vpop.f32.mrb[53].mxu0  ;;  %v2642_v59 = vpop.f32.mrb[69].mxu1 }
 0x44c   :  { %v1618_v41 = vpop.f32.mrb[54].mxu0  ;;  %v1658_v48 = vpop.f32.mrb[70].mxu1 }
 0x44d   :  { %v2637_v25 = vpop.f32.mrb[55].mxu0  ;;  %v2643_v27 = vpop.f32.mrb[71].mxu1  ;;  %v1679_v28 = vsel %vm865_vm2, %v3364_v50, -inf  ;;  %v1682_v30 = vsel %vm865_vm2, %v3366_v55, -inf }
 0x44e   :  { %1680 = vmax.xlane.f32.xlu0 %v1679_v28  ;;  %1683 = vmax.xlane.f32.xlu1 %v1682_v30  ;;  %v929_v28 = vsel %vm865_vm2, %v3263_v45, 0.0  ;;  %v932_v45 = vsel %vm865_vm2, %v3283_v54, 0.0  ;;  %v2746_v54 = vld [vmem:[%s3546_s5 + $0x8] sm:$0xff]  }
 0x4c3   :  { %v1663_v57 = vpop.xlane.xlu0 %1662  ;;  %v1666_v10 = vpop.xlane.xlu1 %1665 }
 0x4c4   :  { %v1685_v33 = vsub.f32 %v1376_v60, %v1663_v57  ;;  %v1686_v35 = vsub.f32 %v1416_v61, %v1666_v10 }
 0x4c6   :  { %v1693_v56 = vmul.f32 1.442695, %v1685_v33  ;;  %v1695_v39 = vmul.f32 1.442695, %v1686_v35  ;;  %v2743_v33 = vld [vmem:[%s3546_s5 + $0x40] sm:$0xff]  }
 0x4c7   :  { %v2744_v35 = vld [vmem:[%s3546_s5] sm:$0xff]  }
 0x4c8   :  { %2807 = vpow2.f32 %v1693_v56  ;;  %v2745_v56 = vld [vmem:[%s3546_s5 + $0x48] sm:$0xff]  }
 0x4c9   :  { %2809 = vpow2.f32 %v1695_v39  ;;  %v2748_v39 = vld [vmem:[%s3546_s5 + $0x10] sm:$0xff]  }
 0x4cb   :  { %v1669_v15 = vpop.xlane.xlu0 %1668  ;;  %v1672_v34 = vpop.xlane.xlu1 %1671 }
 0x4cc   :  { %v1687_v43 = vsub.f32 %v1456_v0, %v1669_v15  ;;  %v1688_v6 = vsub.f32 %v1496_v22, %v1672_v34  ;;  %v2749_v15 = vld [vmem:[%s3546_s5 + $0x58] sm:$0xff]  }
 0x4cd   :  { %v2750_v34 = vld [vmem:[%s3546_s5 + $0x18] sm:$0xff]  }
 0x4ce   :  { %v1697_v32 = vmul.f32 1.442695, %v1687_v43  ;;  %v1699_v7 = vmul.f32 1.442695, %v1688_v6  ;;  %v2751_v43 = vld [vmem:[%s3546_s5 + $0x60] sm:$0xff]  }
 0x4cf   :  { %v2752_v6 = vld [vmem:[%s3546_s5 + $0x20] sm:$0xff]  }
 0x4d0   :  { %2811 = vpow2.f32 %v1697_v32  ;;  %v2753_v32 = vld [vmem:[%s3546_s5 + $0x68] sm:$0xff]  }
 0x4d1   :  { %2813 = vpow2.f32 %v1699_v7  ;;  %v2754_v7 = vld [vmem:[%s3546_s5 + $0x28] sm:$0xff]  }
 0x4d2   :  { %v2808_v11 = vpop.eup %2807 }
 0x4d3   :  { %v2810_v51 = vpop.eup %2809  ;;  %v1675_v14 = vpop.xlane.xlu0 %1674  ;;  %v1709_v24 = vsel %vm865_vm2, %v2808_v11, 0.0  ;;  %v1733_v60 = vpack.c.bf16 %v2808_v11, %v2808_v11  ;;  %v2755_v11 = vld [vmem:[%s3546_s5 + $0x70] sm:$0xff]  }
 0x4d4   :  { %v1678_v21 = vpop.xlane.xlu1 %1677  ;;  %v1689_v61 = vsub.f32 %v1536_v58, %v1675_v14  ;;  %1710 = vadd.xlane.f32.xlu0 %v1709_v24  ;;  %v1712_v29 = vsel %vm865_vm2, %v2810_v51, 0.0  ;;  %v1734_v31 = vpack.c.bf16 %v2810_v51, %v2810_v51  ;;  %v917_v58 = vsel %vm865_vm2, %v3235_v46, 0.0  ;;  %v2756_v51 = vld [vmem:[%s3546_s5 + $0x30] sm:$0xff]   ;;  %v2757_v14 = vld [vmem:[%s3546_s5 + $0x78] sm:$0xff]  }
 0x4d5   :  { %v1690_v8 = vsub.f32 %v1576_v16, %v1678_v21  ;;  %1713 = vadd.xlane.f32.xlu1 %v1712_v29  ;;  %2647 = vmatmul.mubr.msk.bf16.vlgmr.msra.gmra.mrb[56].mxu0 %vm865_vm2, %v1733_v60  ;;  %v2758_v21 = vld [vmem:[%s3546_s5 + $0x38] sm:$0xff]  }
 0x4d6   :  { %v1701_v0 = vmul.f32 1.442695, %v1689_v61  ;;  %2653 = vmatmul.mubr.msk.bf16.vlgmr.msra.gmra.mrb[72].mxu1 %vm865_vm2, %v1734_v31  ;;  %2657 = vmatpush3.bf16.msra.mxu0 %v3138_v53 }
 0x4d7   :  { %v1703_v22 = vmul.f32 1.442695, %v1690_v8  ;;  %2663 = vmatpush3.bf16.msra.mxu1 %v3142_v5  ;;  %2658 = vmatprep.mubr.msk.bf16.mxu0 %vm2857_vm0, %v2856_v23 }
 0x4d8   :  { %2815 = vpow2.f32 %v1701_v0  ;;  %915 = vadd.xlane.f32.xlu0 %v914_v40  ;;  %2668 = vmatprep.subr.bf16.mxu0 %v2856_v23 }
 0x4d9   :  { %2817 = vpow2.f32 %v1703_v22  ;;  %918 = vadd.xlane.f32.xlu1 %v917_v58  ;;  %2664 = vmatprep.mubr.msk.bf16.mxu1 %vm2857_vm0, %v2856_v23 }
 0x4da   :  { %v2812_v53 = vpop.eup %2811  ;;  %2674 = vmatprep.subr.bf16.mxu1 %v2856_v23 }
 0x4db   :  { %v2814_v5 = vpop.eup %2813  ;;  %v1681_v3 = vpop.xlane.xlu0 %1680  ;;  %v1715_v38 = vsel %vm865_vm2, %v2812_v53, 0.0  ;;  %v1735_v47 = vpack.c.bf16 %v2812_v53, %v2812_v53 }
 0x4dc   :  { %v1684_v16 = vpop.xlane.xlu1 %1683  ;;  %v1691_v26 = vsub.f32 %v3364_v50, %v1681_v3  ;;  %1716 = vadd.xlane.f32.xlu0 %v1715_v38  ;;  %v1718_v52 = vsel %vm865_vm2, %v2814_v5, 0.0  ;;  %v1736_v2 = vpack.c.bf16 %v2814_v5, %v2814_v5  ;;  %v920_v50 = vsel %vm865_vm2, %v3244_v20, 0.0 }
 0x4dd   :  { %v1692_v46 = vsub.f32 %v3366_v55, %v1684_v16  ;;  %1719 = vadd.xlane.f32.xlu1 %v1718_v52  ;;  %2659 = vmatmul.mubr.msk.bf16.vlgmr.msra.gmra.mrb[60].mxu0 %vm865_vm2, %v1735_v47  ;;  %v923_v55 = vsel %vm865_vm2, %v3254_v17, 0.0  ;;  %v926_v17 = vsel %vm865_vm2, %v3265_v49, 0.0 }
 0x4de   :  { %v1705_v59 = vmul.f32 1.442695, %v1691_v26  ;;  %2665 = vmatmul.mubr.msk.bf16.vlgmr.msra.gmra.mrb[76].mxu1 %vm865_vm2, %v1736_v2  ;;  %2669 = vmatpush3.bf16.msra.mxu0 %v3152_v62 }
 0x4df   :  { %v1707_v41 = vmul.f32 1.442695, %v1692_v46  ;;  %2675 = vmatpush3.bf16.msra.mxu1 %v3157_v4  ;;  %2670 = vmatprep.mubr.msk.bf16.mxu0 %vm2857_vm0, %v2856_v23 }
 0x4e0   :  { %2819 = vpow2.f32 %v1705_v59  ;;  %921 = vadd.xlane.f32.xlu0 %v920_v50  ;;  %2680 = vmatprep.subr.bf16.mxu0 %v2856_v23 }
 0x4e1   :  { %2821 = vpow2.f32 %v1707_v41  ;;  %924 = vadd.xlane.f32.xlu1 %v923_v55  ;;  %2676 = vmatprep.mubr.msk.bf16.mxu1 %vm2857_vm0, %v2856_v23 }
 0x4e2   :  { %v2816_v62 = vpop.eup %2815  ;;  %2686 = vmatprep.subr.bf16.mxu1 %v2856_v23 }
 0x4e3   :  { %v2818_v4 = vpop.eup %2817  ;;  %v1721_v20 = vsel %vm865_vm2, %v2816_v62, 0.0  ;;  %v1737_v48 = vpack.c.bf16 %v2816_v62, %v2816_v62 }
 0x4e4   :  { %1722 = vadd.xlane.f32.xlu0 %v1721_v20  ;;  %v1724_v25 = vsel %vm865_vm2, %v2818_v4, 0.0  ;;  %v1738_v27 = vpack.c.bf16 %v2818_v4, %v2818_v4 }
 0x4e5   :  { %1725 = vadd.xlane.f32.xlu1 %v1724_v25  ;;  %2671 = vmatmul.mubr.msk.bf16.vlgmr.msra.gmra.mrb[64].mxu0 %vm865_vm2, %v1737_v48 }
 0x4e6   :  { %2677 = vmatmul.mubr.msk.bf16.vlgmr.msra.gmra.mrb[80].mxu1 %vm865_vm2, %v1738_v27  ;;  %2681 = vmatpush3.bf16.msra.mxu0 %v3169_v18 }
 0x4e7   :  { %2687 = vmatpush3.bf16.msra.mxu1 %v3177_v12  ;;  %2682 = vmatprep.mubr.msk.bf16.mxu0 %vm2857_vm0, %v2856_v23 }
 0x4e8   :  { %927 = vadd.xlane.f32.xlu0 %v926_v17  ;;  %2688 = vmatprep.mubr.msk.bf16.mxu1 %vm2857_vm0, %v2856_v23  ;;  %v935_v23 = vsel %vm865_vm2, %v3279_v1, 0.0  ;;  %v2747_v1 = vld [vmem:[%s3546_s5 + $0x50] sm:$0xff]  }
 0x4e9   :  { %930 = vadd.xlane.f32.xlu1 %v929_v28  ;;  %2460 = vmatprep.subr.bf16.mxu0 %v2743_v33 }
 0x4ea   :  { %v2820_v30 = vpop.eup %2819 }
 0x4eb   :  { %v2822_v57 = vpop.eup %2821  ;;  %v1727_v18 = vsel %vm865_vm2, %v2820_v30, 0.0  ;;  %v1739_v10 = vpack.c.bf16 %v2820_v30, %v2820_v30 }
 0x4ec   :  { %1728 = vadd.xlane.f32.xlu0 %v1727_v18  ;;  %v1730_v12 = vsel %vm865_vm2, %v2822_v57, 0.0  ;;  %v1740_v49 = vpack.c.bf16 %v2822_v57, %v2822_v57 }
 0x4ed   :  { %1731 = vadd.xlane.f32.xlu1 %v1730_v12  ;;  %2683 = vmatmul.mubr.msk.bf16.vlgmr.msra.gmra.mrb[68].mxu0 %vm865_vm2, %v1739_v10 }
 0x4ee   :  { %2689 = vmatmul.mubr.msk.bf16.vlgmr.msra.gmra.mrb[84].mxu1 %vm865_vm2, %v1740_v49  ;;  %2461 = vmatpush3.bf16.msra.mxu0 %v2744_v35 }
 0x4ef   :  { %2462 = vmatprep.subr.bf16.mxu0 %v2745_v56 }
 0x4f0   :  { %933 = vadd.xlane.f32.xlu0 %v932_v45 }
 0x4f1   :  { %936 = vadd.xlane.f32.xlu1 %v935_v23 }
 0x4f2   :  { %2463 = vmatpush3.bf16.msra.mxu0 %v2746_v54 }
 0x4f3   :  { %2464 = vmatprep.subr.bf16.mxu0 %v2747_v1 }
 0x4f6   :  { %2465 = vmatpush3.bf16.msra.mxu0 %v2748_v39 }
 0x4f7   :  { %2466 = vmatprep.subr.bf16.mxu0 %v2749_v15 }
 0x4fa   :  { %2467 = vmatpush3.bf16.msra.mxu0 %v2750_v34 }
 0x4fb   :  { %2468 = vmatprep.subr.bf16.mxu0 %v2751_v43 }
 0x4fe   :  { %2469 = vmatpush3.bf16.msra.mxu0 %v2752_v6 }
 0x4ff   :  { %2470 = vmatprep.subr.bf16.mxu0 %v2753_v32 }
 0x502   :  { %2471 = vmatpush3.bf16.msra.mxu0 %v2754_v7 }
 0x503   :  { %2472 = vmatprep.subr.bf16.mxu0 %v2755_v11 }
 0x506   :  { %2473 = vmatpush3.bf16.msra.mxu0 %v2756_v51 }
 0x507   :  { %2474 = vmatprep.subr.bf16.mxu0 %v2757_v14 }
 0x50a   :  { %2475 = vmatpush3.bf16.msra.mxu0 %v2758_v21 }
 0x561   :  { %v1711_v24 = vpop.xlane.xlu0 %1710 }
 0x562   :  { %v1714_v60 = vpop.xlane.xlu1 %1713 }
 0x565   :  { %v916_v61 = vpop.xlane.xlu0 %915 }
 0x566   :  { %2823 = vrcp.f32 %v916_v61  ;;  %v919_v8 = vpop.xlane.xlu1 %918 }
 0x567   :  { %2825 = vrcp.f32 %v919_v8 }
 0x569   :  { %v1717_v29 = vpop.xlane.xlu0 %1716 }
 0x56a   :  { %v1720_v31 = vpop.xlane.xlu1 %1719 }
 0x56d   :  { %v922_v0 = vpop.xlane.xlu0 %921 }
 0x56e   :  { %2827 = vrcp.f32 %v922_v0  ;;  %v925_v22 = vpop.xlane.xlu1 %924 }
 0x56f   :  { %2829 = vrcp.f32 %v925_v22 }
 0x570   :  { %v2824_v40 = vpop.eup %2823 }
 0x571   :  { %v2826_v58 = vpop.eup %2825  ;;  %v1723_v53 = vpop.xlane.xlu0 %1722  ;;  %v1323_v5 = vmul.f32 %v2824_v40, %v3339_v37 }
 0x572   :  { %v1726_v3 = vpop.xlane.xlu1 %1725  ;;  %v1324_v16 = vmul.f32 %v2826_v58, %v3341_v63 }
 0x574   :  { %v2101_v38 = vpack.c.bf16 %v1324_v16, %v1323_v5 }
 0x575   :  { %v928_v47 = vpop.xlane.xlu0 %927 }
 0x576   :  { %2831 = vrcp.f32 %v928_v47  ;;  %v931_v26 = vpop.xlane.xlu1 %930 }
 0x577   :  { %2833 = vrcp.f32 %v931_v26 }
 0x578   :  { %v2828_v46 = vpop.eup %2827 }
 0x579   :  { %v2830_v52 = vpop.eup %2829  ;;  %v1729_v2 = vpop.xlane.xlu0 %1728  ;;  %v1325_v59 = vmul.f32 %v2828_v46, %v3343_v36 }
 0x57a   :  { %v1732_v41 = vpop.xlane.xlu1 %1731  ;;  %v1326_v50 = vmul.f32 %v2830_v52, %v3345_v9 }
 0x57c   :  { %v2103_v55 = vpack.c.bf16 %v1326_v50, %v1325_v59 }
 0x57d   :  { %v934_v62 = vpop.xlane.xlu0 %933 }
 0x57e   :  { %2835 = vrcp.f32 %v934_v62  ;;  %v937_v37 = vpop.xlane.xlu1 %936 }
 0x57f   :  { %2837 = vrcp.f32 %v937_v37 }
 0x580   :  { %v2832_v4 = vpop.eup %2831  ;;  %2839 = vrcp.f32 %v1711_v24 }
 0x581   :  { %v2834_v63 = vpop.eup %2833  ;;  %v1327_v20 = vmul.f32 %v2832_v4, %v3347_v19  ;;  %2841 = vrcp.f32 %v1714_v60  ;;  %v2302_v4 = vld [vmem:[%s3547_s1] sm:$0xff] }
 0x582   :  { %v1328_v48 = vmul.f32 %v2834_v63, %v3349_v13  ;;  %2843 = vrcp.f32 %v1717_v29 }
 0x583   :  { %2845 = vrcp.f32 %v1720_v31 }
 0x584   :  { %v2105_v25 = vpack.c.bf16 %v1328_v48, %v1327_v20  ;;  %2847 = vrcp.f32 %v1723_v53 }
 0x585   :  { %2849 = vrcp.f32 %v1726_v3 }
 0x586   :  { %2851 = vrcp.f32 %v1729_v2 }
 0x587   :  { %2853 = vrcp.f32 %v1732_v41 }
 0x588   :  { %v2836_v27 = vpop.eup %2835 }
 0x589   :  { %v2838_v17 = vpop.eup %2837  ;;  %v3483_v28 = vmul.f32 %v2836_v27, %v3351_v44 }
 0x58a   :  { %v3486_v36 = vmul.f32 %v2838_v17, %v3353_v42  ;;  %v2840_v30 = vpop.eup %2839 }
 0x58b   :  { %v2842_v57 = vpop.eup %2841 }
 0x58c   :  { %v2107_v9 = vpack.c.bf16 %v3486_v36, %v3483_v28  ;;  %v2844_v35 = vpop.eup %2843 }
 0x58d   :  { %v2846_v54 = vpop.eup %2845 }
 0x58e   :  { %v2848_v14 = vpop.eup %2847 }
 0x58f   :  { %v2850_v24 = vpop.eup %2849 }
 0x590   :  { %v2852_v5 = vpop.eup %2851 }
 0x591   :  { %v2854_v16 = vpop.eup %2853 }
 0x5a8   :  { %v1778_v19 = vpop.f32.mrb[56].mxu0 }
 0x5a9   :  { %v2093_v13 = vmul.f32 %v2840_v30, %v1778_v19  ;;  %v1821_v18 = vpop.f32.mrb[72].mxu1  ;;  %v2648_v10 = vpop.f32.mrb[57].mxu0  ;;  %v2304_v30 = vld [vmem:[%s3547_s1 + $0x10] sm:$0xff] }
 0x5aa   :  { %v2094_v12 = vmul.f32 %v2842_v57, %v1821_v18  ;;  %v2654_v49 = vpop.f32.mrb[73].mxu1  ;;  %v1781_v44 = vpop.f32.mrb[58].mxu0  ;;  %v2305_v18 = vld [vmem:[%s3547_s1 + $0x18] sm:$0xff] }
 0x5ab   :  { %v1824_v45 = vpop.f32.mrb[74].mxu1  ;;  %v2649_v23 = vpop.f32.mrb[59].mxu0 }
 0x5ac   :  { %v2102_v42 = vpack.c.bf16 %v2094_v12, %v2093_v13  ;;  %v2655_v33 = vpop.f32.mrb[75].mxu1  ;;  %v2306_v23 = vld [vmem:[%s3547_s1 + $0x20] sm:$0xff] }
 0x5ae   :  { %2269 = vmatprep.mubr.bf16.mxu0 %v2102_v42 }
 0x5af   :  { %2270 = vmatmul.mubr.bf16.vlgmr.msra.gmra.mrb[72].mxu0 %v2101_v38 }
 0x5b0   :  { %v1864_v56 = vpop.f32.mrb[60].mxu0 }
 0x5b1   :  { %v2095_v1 = vmul.f32 %v2844_v35, %v1864_v56  ;;  %v1907_v39 = vpop.f32.mrb[76].mxu1  ;;  %v2660_v15 = vpop.f32.mrb[61].mxu0  ;;  %v2307_v56 = vld [vmem:[%s3547_s1 + $0x28] sm:$0xff] }
 0x5b2   :  { %v2096_v34 = vmul.f32 %v2846_v54, %v1907_v39  ;;  %v2666_v43 = vpop.f32.mrb[77].mxu1  ;;  %v1867_v6 = vpop.f32.mrb[62].mxu0 }
 0x5b3   :  { %v1910_v32 = vpop.f32.mrb[78].mxu1  ;;  %v2661_v7 = vpop.f32.mrb[63].mxu0  ;;  %v2308_v43 = vld [vmem:[%s3547_s1 + $0x30] sm:$0xff] }
 0x5b4   :  { %v2104_v11 = vpack.c.bf16 %v2096_v34, %v2095_v1  ;;  %v2667_v51 = vpop.f32.mrb[79].mxu1 }
 0x5b6   :  { %2277 = vmatprep.mubr.bf16.mxu0 %v2104_v11  ;;  %v2309_v11 = vld [vmem:[%s3547_s1 + $0x38] sm:$0xff] }
 0x5b7   :  { %2278 = vmatmul.mubr.bf16.gmra.mrb[76].mxu0 %v2103_v55 }
 0x5b8   :  { %v1950_v21 = vpop.f32.mrb[64].mxu0 }
 0x5b9   :  { %v2097_v60 = vmul.f32 %v2848_v14, %v1950_v21  ;;  %v1993_v61 = vpop.f32.mrb[80].mxu1  ;;  %v2672_v8 = vpop.f32.mrb[65].mxu0 }
 0x5ba   :  { %v2098_v29 = vmul.f32 %v2850_v24, %v1993_v61  ;;  %v2678_v31 = vpop.f32.mrb[81].mxu1  ;;  %v1953_v0 = vpop.f32.mrb[66].mxu0 }
 0x5bb   :  { %v1996_v22 = vpop.f32.mrb[82].mxu1  ;;  %v2673_v40 = vpop.f32.mrb[67].mxu0 }
 0x5bc   :  { %v2106_v58 = vpack.c.bf16 %v2098_v29, %v2097_v60  ;;  %v2679_v53 = vpop.f32.mrb[83].mxu1 }
 0x5be   :  { %2285 = vmatprep.mubr.bf16.mxu0 %v2106_v58 }
 0x5bf   :  { %2286 = vmatmul.mubr.bf16.gmra.mrb[80].mxu0 %v2105_v25  ;;  %v2303_v25 = vld [vmem:[%s3547_s1 + $0x8] sm:$0xff] }
 0x5c0   :  { %v2036_v3 = vpop.f32.mrb[68].mxu0 }
 0x5c1   :  { %v2099_v38 = vmul.f32 %v2852_v5, %v2036_v3  ;;  %v2079_v47 = vpop.f32.mrb[84].mxu1  ;;  %v2684_v26 = vpop.f32.mrb[69].mxu0 }
 0x5c2   :  { %v2100_v46 = vmul.f32 %v2854_v16, %v2079_v47  ;;  %v2690_v52 = vpop.f32.mrb[85].mxu1  ;;  %v2039_v2 = vpop.f32.mrb[70].mxu0 }
 0x5c3   :  { %v2082_v59 = vpop.f32.mrb[86].mxu1  ;;  %v2685_v41 = vpop.f32.mrb[71].mxu0 }
 0x5c4   :  { %v2108_v50 = vpack.c.bf16 %v2100_v46, %v2099_v38  ;;  %v2691_v55 = vpop.f32.mrb[87].mxu1 }
 0x5c6   :  { %2293 = vmatprep.mubr.bf16.mxu0 %v2108_v50 }
 0x5c7   :  { %2294 = vmatmul.mubr.bf16.gmra.mrb[84].mxu0 %v2107_v9 }
 0x682   :  { %v2476_v62 = vpop.f32.mrb[72].mxu0 }
 0x683   :  { %v2477_v37 = vpop.f32.mrb[73].mxu0 }
 0x684   :  { %v2478_v63 = vadd.f32 %v2477_v37, %v2476_v62  ;;  %v2479_v20 = vpop.f32.mrb[74].mxu0 }
 0x685   :  { %v2480_v48 = vpop.f32.mrb[75].mxu0 }
 0x686   :  { %v2310_v27 = vadd.f32 %v2478_v63, %v2302_v4  ;;  %v2481_v17 = vadd.f32 %v2480_v48, %v2479_v20 }
 0x688   :  { %2318 = vst [vmem:[%s3548_s7] sm:$0xff] %v2310_v27  ;;  %v2311_v28 = vadd.f32 %v2481_v17, %v2303_v25 }
 0x68a   :  { %2319 = vst [vmem:[%s3548_s7 + $0x8] sm:$0xff] %v2311_v28  ;;  %v2482_v36 = vpop.f32.mrb[76].mxu0 }
 0x68b   :  { %v2483_v9 = vpop.f32.mrb[77].mxu0 }
 0x68c   :  { %v2484_v19 = vadd.f32 %v2483_v9, %v2482_v36  ;;  %v2485_v57 = vpop.f32.mrb[78].mxu0 }
 0x68d   :  { %v2486_v13 = vpop.f32.mrb[79].mxu0 }
 0x68e   :  { %v2312_v10 = vadd.f32 %v2484_v19, %v2304_v30  ;;  %v2487_v12 = vadd.f32 %v2486_v13, %v2485_v57 }
 0x690   :  { %2320 = vst [vmem:[%s3548_s7 + $0x10] sm:$0xff] %v2312_v10  ;;  %v2313_v49 = vadd.f32 %v2487_v12, %v2305_v18 }
 0x692   :  { %2321 = vst [vmem:[%s3548_s7 + $0x18] sm:$0xff] %v2313_v49  ;;  %v2488_v44 = vpop.f32.mrb[80].mxu0 }
 0x693   :  { %v2489_v45 = vpop.f32.mrb[81].mxu0 }
 0x694   :  { %v2490_v42 = vadd.f32 %v2489_v45, %v2488_v44  ;;  %v2491_v33 = vpop.f32.mrb[82].mxu0 }
 0x695   :  { %v2492_v35 = vpop.f32.mrb[83].mxu0 }
 0x696   :  { %v2314_v54 = vadd.f32 %v2490_v42, %v2306_v23  ;;  %v2493_v1 = vadd.f32 %v2492_v35, %v2491_v33 }
 0x698   :  { %2322 = vst [vmem:[%s3548_s7 + $0x20] sm:$0xff] %v2314_v54  ;;  %v2315_v39 = vadd.f32 %v2493_v1, %v2307_v56 }
 0x69a   :  { %2323 = vst [vmem:[%s3548_s7 + $0x28] sm:$0xff] %v2315_v39  ;;  %v2494_v15 = vpop.f32.mrb[84].mxu0 }
 0x69b   :  { %v2495_v34 = vpop.f32.mrb[85].mxu0 }
 0x69c   :  { %v2496_v6 = vadd.f32 %v2495_v34, %v2494_v15  ;;  %v2497_v32 = vpop.f32.mrb[86].mxu0 }
 0x69d   :  { %v2498_v7 = vpop.f32.mrb[87].mxu0 }
 0x69e   :  { %v2316_v51 = vadd.f32 %v2496_v6, %v2308_v43  ;;  %v2499_v14 = vadd.f32 %v2498_v7, %v2497_v32 }
 0x6a0   :  { %2324 = vst [vmem:[%s3548_s7 + $0x30] sm:$0xff] %v2316_v51  ;;  %v2317_v21 = vadd.f32 %v2499_v14, %v2309_v11 }
 0x6a2   :  { %2325 = vst [vmem:[%s3548_s7 + $0x38] sm:$0xff] %v2317_v21 }

// kernel: megabyte_forward.12
= control target key start
LH: loop header
LB: loop body
LE: loop exit
PB: predicated region body
PF: predicated region fallthrough
CT: control target
= control target key end

     0   :  { %v2214_v48 = vmov 0   ;;  %s3588_s0 = inlined_call_operand.vmem [shape: f32[8,8,128], index: 0, kind: input, shape index: {}]   ;;  %s3589_s3 = inlined_call_operand.vmem [shape: bf16[128,512], index: 3, kind: input, shape index: {}]   ;;  %s3590_s2 = inlined_call_operand.vmem [shape: f32[1,128], index: 2, kind: input, shape index: {}]   ;;  %s3591_s4 = inlined_call_operand.vmem [shape: f32[1,512], index: 4, kind: input, shape index: {}]   ;;  %s3592_s5 = inlined_call_operand.vmem [shape: bf16[512,128], index: 5, kind: input, shape index: {}]   ;;  %s3593_s6 = inlined_call_operand.vmem [shape: f32[1,128], index: 6, kind: input, shape index: {}]   ;;  %s3594_s1 = inlined_call_operand.vmem [shape: f32[8,8,128], index: 1, kind: input, shape index: {}]   ;;  %s3595_s7 = inlined_call_operand.vmem [shape: f32[8,8,128], index: 7, kind: output, shape index: {}]  }
   0x1   :  { %v2258_v0 = vld [vmem:[%s3588_s0 + $0x10] sm:$0xff]  ;;  %v2263_v1 = vld [vmem:[%s3588_s0] sm:$0xff]  ;;  %v2268_v2 = vld [vmem:[%s3588_s0 + $0x18] sm:$0xff]  ;;  %412 = vmatprep.mubr.bf16.mxu0 %v2214_v48  ;;  %485 = vmatprep.mubr.bf16.mxu1 %v2214_v48 }
   0x2   :  { %v38_v3 = vmul.f32 %v2258_v0, %v2258_v0  ;;  %v36_v4 = vmul.f32 %v2263_v1, %v2263_v1  ;;  %v2277_v5 = vld [vmem:[%s3588_s0 + $0x8] sm:$0xff]  ;;  %v39_v6 = vmul.f32 %v2268_v2, %v2268_v2  ;;  %v2291_v9 = vld [vmem:[%s3588_s0 + $0x20] sm:$0xff]  ;;  %v2300_v12 = vld [vmem:[%s3588_s0 + $0x38] sm:$0xff] }
   0x3   :  { %v37_v7 = vmul.f32 %v2277_v5, %v2277_v5  ;;  %v2286_v8 = vld [vmem:[%s3588_s0 + $0x28] sm:$0xff]  ;;  %v40_v11 = vmul.f32 %v2291_v9, %v2291_v9  ;;  %v2305_v13 = vld [vmem:[%s3588_s0 + $0x30] sm:$0xff]  ;;  %v43_v14 = vmul.f32 %v2300_v12, %v2300_v12 }
   0x4   :  { %48 = vadd.xlane.f32.xlu1 %v38_v3  ;;  %44 = vadd.xlane.f32.xlu0 %v36_v4  ;;  %v41_v10 = vmul.f32 %v2286_v8, %v2286_v8  ;;  %v42_v15 = vmul.f32 %v2305_v13, %v2305_v13  ;;  %v1974_v16 = vld [vmem:[%s3589_s3 + $0x4] ss:$16 sps:$4 sm:$0xff]   ;;  %v1976_v17 = vld [vmem:[%s3589_s3 + $0xc] ss:$16 sps:$4 sm:$0xff]   ;;  %v1978_v18 = vld [vmem:[%s3589_s3] ss:$16 sps:$4 sm:$0xff]  }
   0x5   :  { %380 = vmatprep.subr.bf16.mxu0 %v1974_v16  ;;  %v1979_v19 = vld [vmem:[%s3589_s3 + $0x8] ss:$16 sps:$4 sm:$0xff]   ;;  %453 = vmatprep.subr.bf16.mxu1 %v1976_v17  ;;  %v1980_v20 = vld [vmem:[%s3589_s3 + $0x24] ss:$16 sps:$4 sm:$0xff]   ;;  %v1982_v21 = vld [vmem:[%s3589_s3 + $0x2c] ss:$16 sps:$4 sm:$0xff]  }
   0x6   :  { %381 = vmatpush1.bf16.msra.mxu0 %v1978_v18  ;;  %454 = vmatpush1.bf16.msra.mxu1 %v1979_v19  ;;  %v1984_v22 = vld [vmem:[%s3589_s3 + $0x20] ss:$16 sps:$4 sm:$0xff]   ;;  %v1985_v23 = vld [vmem:[%s3589_s3 + $0x28] ss:$16 sps:$4 sm:$0xff]   ;;  %v1986_v24 = vld [vmem:[%s3589_s3 + $0x44] ss:$16 sps:$4 sm:$0xff]  }
   0x7   :  { %382 = vmatprep.subr.bf16.mxu0 %v1980_v20  ;;  %455 = vmatprep.subr.bf16.mxu1 %v1982_v21  ;;  %v1988_v25 = vld [vmem:[%s3589_s3 + $0x4c] ss:$16 sps:$4 sm:$0xff]   ;;  %v1990_v26 = vld [vmem:[%s3589_s3 + $0x40] ss:$16 sps:$4 sm:$0xff]   ;;  %v1991_v27 = vld [vmem:[%s3589_s3 + $0x48] ss:$16 sps:$4 sm:$0xff]  }
   0x8   :  { %50 = vadd.xlane.f32.xlu1 %v39_v6  ;;  %46 = vadd.xlane.f32.xlu0 %v37_v7  ;;  %v1992_v28 = vld [vmem:[%s3589_s3 + $0x64] ss:$16 sps:$4 sm:$0xff]   ;;  %v1994_v29 = vld [vmem:[%s3589_s3 + $0x6c] ss:$16 sps:$4 sm:$0xff]   ;;  %v1996_v30 = vld [vmem:[%s3589_s3 + $0x60] ss:$16 sps:$4 sm:$0xff]  }
   0x9   :  { %v1997_v31 = vld [vmem:[%s3589_s3 + $0x68] ss:$16 sps:$4 sm:$0xff]   ;;  %v1998_v32 = vld [vmem:[%s3589_s3 + $0x84] ss:$16 sps:$4 sm:$0xff]   ;;  %v2000_v33 = vld [vmem:[%s3589_s3 + $0x8c] ss:$16 sps:$4 sm:$0xff]  }
   0xa   :  { %383 = vmatpush1.bf16.msra.mxu0 %v1984_v22  ;;  %456 = vmatpush1.bf16.msra.mxu1 %v1985_v23  ;;  %v2002_v34 = vld [vmem:[%s3589_s3 + $0x80] ss:$16 sps:$4 sm:$0xff]   ;;  %v2003_v35 = vld [vmem:[%s3589_s3 + $0x88] ss:$16 sps:$4 sm:$0xff]   ;;  %v2004_v36 = vld [vmem:[%s3589_s3 + $0xa4] ss:$16 sps:$4 sm:$0xff]  }
   0xb   :  { %384 = vmatprep.subr.bf16.mxu0 %v1986_v24  ;;  %457 = vmatprep.subr.bf16.mxu1 %v1988_v25  ;;  %v2006_v37 = vld [vmem:[%s3589_s3 + $0xac] ss:$16 sps:$4 sm:$0xff]   ;;  %v2008_v38 = vld [vmem:[%s3589_s3 + $0xa0] ss:$16 sps:$4 sm:$0xff]   ;;  %v2009_v39 = vld [vmem:[%s3589_s3 + $0xa8] ss:$16 sps:$4 sm:$0xff]  }
   0xc   :  { %54 = vadd.xlane.f32.xlu1 %v41_v10  ;;  %52 = vadd.xlane.f32.xlu0 %v40_v11  ;;  %v2010_v40 = vld [vmem:[%s3589_s3 + $0xc4] ss:$16 sps:$4 sm:$0xff]   ;;  %v2012_v41 = vld [vmem:[%s3589_s3 + $0xcc] ss:$16 sps:$4 sm:$0xff]   ;;  %v2014_v42 = vld [vmem:[%s3589_s3 + $0xc0] ss:$16 sps:$4 sm:$0xff]  }
   0xd   :  { %v2015_v43 = vld [vmem:[%s3589_s3 + $0xc8] ss:$16 sps:$4 sm:$0xff]   ;;  %v2016_v44 = vld [vmem:[%s3589_s3 + $0xe4] ss:$16 sps:$4 sm:$0xff]   ;;  %v2018_v45 = vld [vmem:[%s3589_s3 + $0xec] ss:$16 sps:$4 sm:$0xff]  }
   0xe   :  { %385 = vmatpush1.bf16.msra.mxu0 %v1990_v26  ;;  %458 = vmatpush1.bf16.msra.mxu1 %v1991_v27  ;;  %v2020_v46 = vld [vmem:[%s3589_s3 + $0xe0] ss:$16 sps:$4 sm:$0xff]   ;;  %v2021_v47 = vld [vmem:[%s3589_s3 + $0xe8] ss:$16 sps:$4 sm:$0xff]  }
   0xf   :  { %386 = vmatprep.subr.bf16.mxu0 %v1992_v28  ;;  %459 = vmatprep.subr.bf16.mxu1 %v1994_v29 }
  0x10   :  { %58 = vadd.xlane.f32.xlu1 %v43_v14  ;;  %56 = vadd.xlane.f32.xlu0 %v42_v15 }
  0x12   :  { %387 = vmatpush1.bf16.msra.mxu0 %v1996_v30  ;;  %460 = vmatpush1.bf16.msra.mxu1 %v1997_v31 }
  0x13   :  { %388 = vmatprep.subr.bf16.mxu0 %v1998_v32  ;;  %461 = vmatprep.subr.bf16.mxu1 %v2000_v33 }
  0x16   :  { %389 = vmatpush1.bf16.msra.mxu0 %v2002_v34  ;;  %462 = vmatpush1.bf16.msra.mxu1 %v2003_v35 }
  0x17   :  { %390 = vmatprep.subr.bf16.mxu0 %v2004_v36  ;;  %463 = vmatprep.subr.bf16.mxu1 %v2006_v37 }
  0x1a   :  { %391 = vmatpush1.bf16.msra.mxu0 %v2008_v38  ;;  %464 = vmatpush1.bf16.msra.mxu1 %v2009_v39 }
  0x1b   :  { %392 = vmatprep.subr.bf16.mxu0 %v2010_v40  ;;  %465 = vmatprep.subr.bf16.mxu1 %v2012_v41 }
  0x1e   :  { %393 = vmatpush1.bf16.msra.mxu0 %v2014_v42  ;;  %466 = vmatpush1.bf16.msra.mxu1 %v2015_v43 }
  0x1f   :  { %394 = vmatprep.subr.bf16.mxu0 %v2016_v44  ;;  %467 = vmatprep.subr.bf16.mxu1 %v2018_v45 }
  0x22   :  { %395 = vmatpush1.bf16.msra.mxu0 %v2020_v46  ;;  %468 = vmatpush1.bf16.msra.mxu1 %v2021_v47 }
  0x91   :  { %v49_v49 = vpop.xlane.xlu1 %48  ;;  %v45_v50 = vpop.xlane.xlu0 %44 }
  0x92   :  { %2054 = vrsqrt.f32 %v49_v49  ;;  %vm76_vm0 = vcmp.eq.f32.partialorder %v49_v49, inf  ;;  %vm78_vm1 = vcmp.eq.f32.partialorder %v49_v49, 0.0  ;;  %v79_v58 = vand.u32 2147483648, %v49_v49 }
  0x93   :  { %2056 = vrsqrt.f32 %v45_v50  ;;  %vm62_vm2 = vcmp.eq.f32.partialorder %v45_v50, inf  ;;  %vm64_vm3 = vcmp.eq.f32.partialorder %v45_v50, 0.0  ;;  %v65_v62 = vand.u32 2147483648, %v45_v50 }
  0x95   :  { %v51_v51 = vpop.xlane.xlu1 %50  ;;  %v47_v52 = vpop.xlane.xlu0 %46 }
  0x96   :  { %2058 = vrsqrt.f32 %v51_v51  ;;  %vm83_vm4 = vcmp.eq.f32.partialorder %v51_v51, inf  ;;  %vm85_vm5 = vcmp.eq.f32.partialorder %v51_v51, 0.0  ;;  %v86_v6 = vand.u32 2147483648, %v51_v51 }
  0x97   :  { %2060 = vrsqrt.f32 %v47_v52  ;;  %vm69_vm6 = vcmp.eq.f32.partialorder %v47_v52, inf  ;;  %vm71_vm7 = vcmp.eq.f32.partialorder %v47_v52, 0.0  ;;  %v72_v14 = vand.u32 2147483648, %v47_v52 }
  0x99   :  { %v55_v53 = vpop.xlane.xlu1 %54  ;;  %v53_v54 = vpop.xlane.xlu0 %52 }
  0x9a   :  { %2062 = vrsqrt.f32 %v55_v53  ;;  %vm97_vm8 = vcmp.eq.f32.partialorder %v55_v53, inf  ;;  %vm99_vm9 = vcmp.eq.f32.partialorder %v55_v53, 0.0  ;;  %v100_v19 = vand.u32 2147483648, %v55_v53 }
  0x9b   :  { %2064 = vrsqrt.f32 %v53_v54  ;;  %vm90_vm10 = vcmp.eq.f32.partialorder %v53_v54, inf  ;;  %vm92_vm11 = vcmp.eq.f32.partialorder %v53_v54, 0.0  ;;  %v93_v28 = vand.u32 2147483648, %v53_v54 }
  0x9c   :  { %v2055_v55 = vpop.eup %2054 }
  0x9d   :  { %v2057_v56 = vpop.eup %2056  ;;  %v75_v57 = vmul.f32 %v2055_v55, %v49_v49  ;;  %v2409_v59 = vpop.xlane.xlu1 %58 }
  0x9e   :  { %v2411_v60 = vpop.xlane.xlu0 %56  ;;  %v61_v61 = vmul.f32 %v2057_v56, %v45_v50  ;;  %2066 = vrsqrt.f32 %v2409_v59  ;;  %vm111_vm12 = vcmp.eq.f32.partialorder %v2409_v59, inf  ;;  %v114_v45 = vand.u32 2147483648, %v2409_v59 }
  0x9f   :  { %2068 = vrsqrt.f32 %v2411_v60  ;;  %v77_v3 = vsel %vm76_vm0, %v49_v49, %v75_v57  ;;  %vm104_vm13 = vcmp.eq.f32.partialorder %v2411_v60, inf  ;;  %vm113_vm14 = vcmp.eq.f32.partialorder %v2409_v59, 0.0 }
  0xa0   :  { %v2059_v63 = vpop.eup %2058  ;;  %v63_v4 = vsel %vm62_vm2, %v45_v50, %v61_v61  ;;  %v80_v17 = vsel %vm78_vm1, %v79_v58, %v77_v3  ;;  %v107_v47 = vand.u32 2147483648, %v2411_v60  ;;  %vm106_vm15 = vcmp.eq.f32.partialorder %v2411_v60, 0.0 }
  0xa1   :  { %v2061_v7 = vpop.eup %2060  ;;  %v66_v10 = vsel %vm64_vm3, %v65_v62, %v63_v4  ;;  %v82_v11 = vmul.f32 %v2059_v63, %v51_v51  ;;  %v118_v29 = vmul.f32 0.088388346, %v80_v17 }
  0xa2   :  { %v116_v15 = vmul.f32 0.088388346, %v66_v10  ;;  %v68_v16 = vmul.f32 %v2061_v7, %v47_v52 }
  0xa3   :  { %v84_v18 = vsel %vm83_vm4, %v51_v51, %v82_v11  ;;  %v126_v41 = vmax.f32 %v118_v29, 1e-08 }
  0xa4   :  { %v2063_v20 = vpop.eup %2062  ;;  %v124_v21 = vmax.f32 %v116_v15, 1e-08  ;;  %v87_v22 = vsel %vm85_vm5, %v86_v6, %v84_v18  ;;  %v70_v23 = vsel %vm69_vm6, %v47_v52, %v68_v16 }
  0xa5   :  { %v2065_v24 = vpop.eup %2064  ;;  %v119_v25 = vmul.f32 0.088388346, %v87_v22  ;;  %v73_v26 = vsel %vm71_vm7, %v72_v14, %v70_v23  ;;  %v96_v27 = vmul.f32 %v2063_v20, %v55_v53 }
  0xa6   :  { %2070 = vrcp.f32 %v124_v21  ;;  %v117_v30 = vmul.f32 0.088388346, %v73_v26  ;;  %v89_v31 = vmul.f32 %v2065_v24, %v53_v54 }
  0xa7   :  { %v98_v32 = vsel %vm97_vm8, %v55_v53, %v96_v27  ;;  %v127_v34 = vmax.f32 %v119_v25, 1e-08  ;;  %v200_v25 = vlaneseq }
  0xa8   :  { %v2067_v33 = vpop.eup %2066  ;;  %v125_v35 = vmax.f32 %v117_v30, 1e-08  ;;  %v101_v36 = vsel %vm99_vm9, %v100_v19, %v98_v32  ;;  %v91_v37 = vsel %vm90_vm10, %v53_v54, %v89_v31 }
  0xa9   :  { %v2069_v38 = vpop.eup %2068  ;;  %v94_v39 = vsel %vm92_vm11, %v93_v28, %v91_v37  ;;  %v110_v40 = vmul.f32 %v2067_v33, %v2409_v59  ;;  %v121_v43 = vmul.f32 0.088388346, %v101_v36  ;;  %v201_v26 = vshrl.u32 %v200_v25, 7 }
  0xaa   :  { %2072 = vrcp.f32 %v125_v35  ;;  %v103_v42 = vmul.f32 %v2069_v38, %v2411_v60  ;;  %v120_v44 = vmul.f32 0.088388346, %v94_v39 }
  0xab   :  { %2074 = vrcp.f32 %v127_v34  ;;  %v112_v46 = vsel %vm111_vm12, %v2409_v59, %v110_v40  ;;  %v129_v50 = vmax.f32 %v121_v43, 1e-08  ;;  %v1827_v59 = vld [vmem:[%s3590_s2] ss:$0 sm:$0xff]  ;;  %v202_v27 = vsub.s32 0, %v201_v26 }
  0xac   :  { %2076 = vrcp.f32 %v126_v41  ;;  %v105_v49 = vsel %vm104_vm13, %v2411_v60, %v103_v42  ;;  %v128_v52 = vmax.f32 %v120_v44, 1e-08  ;;  %v115_v53 = vsel %vm113_vm14, %v114_v45, %v112_v46 }
  0xad   :  { %v108_v54 = vsel %vm106_vm15, %v107_v47, %v105_v49  ;;  %2078 = vrcp.f32 %v129_v50  ;;  %v123_v55 = vmul.f32 0.088388346, %v115_v53  ;;  %v210_v28 = vsub.s32 2, %v201_v26 }
  0xae   :  { %2080 = vrcp.f32 %v128_v52  ;;  %v122_v58 = vmul.f32 0.088388346, %v108_v54  ;;  %v214_v29 = vsub.s32 3, %v201_v26 }
  0xaf   :  { %v131_v60 = vmax.f32 %v123_v55, 1e-08 }
  0xb0   :  { %v2071_v51 = vpop.eup %2070  ;;  %v130_v6 = vmax.f32 %v122_v58, 1e-08 }
  0xb1   :  { %v140_v56 = vmul.f32 %v2071_v51, %v2263_v1  ;;  %2082 = vrcp.f32 %v131_v60 }
  0xb2   :  { %2084 = vrcp.f32 %v130_v6 }
  0xb3   :  { %v154_v63 = vmul.f32 %v1827_v59, %v140_v56 }
  0xb4   :  { %v2073_v57 = vpop.eup %2072 }
  0xb5   :  { %v141_v61 = vmul.f32 %v2073_v57, %v2277_v5  ;;  %v2075_v62 = vpop.eup %2074 }
  0xb6   :  { %v2077_v4 = vpop.eup %2076  ;;  %v143_v10 = vmul.f32 %v2075_v62, %v2268_v2 }
  0xb7   :  { %v155_v3 = vmul.f32 %v1827_v59, %v141_v61  ;;  %v142_v1 = vmul.f32 %v2077_v4, %v2258_v0  ;;  %v2079_v5 = vpop.eup %2078 }
  0xb8   :  { %v157_v11 = vmul.f32 %v1827_v59, %v143_v10  ;;  %v2081_v14 = vpop.eup %2080  ;;  %v145_v18 = vmul.f32 %v2079_v5, %v2286_v8 }
  0xb9   :  { %v162_v7 = vpack.c.bf16 %v155_v3, %v154_v63  ;;  %v156_v15 = vmul.f32 %v1827_v59, %v142_v1  ;;  %v144_v17 = vmul.f32 %v2081_v14, %v2291_v9 }
  0xba   :  { %v159_v19 = vmul.f32 %v1827_v59, %v145_v18 }
  0xbb   :  { %413 = vmatmul.mubr.bf16.vlgmr.msra.gmra.mrb[0].mxu0 %v162_v7  ;;  %486 = vmatmul.mubr.bf16.vlgmr.msra.gmra.mrb[0].mxu1 %v162_v7  ;;  %v163_v16 = vpack.c.bf16 %v157_v11, %v156_v15  ;;  %v2083_v0 = vpop.eup %2082  ;;  %v158_v2 = vmul.f32 %v1827_v59, %v144_v17 }
  0xbc   :  { %422 = vmatprep.mubr.bf16.mxu0 %v2214_v48  ;;  %495 = vmatprep.mubr.bf16.mxu1 %v2214_v48  ;;  %v2085_v20 = vpop.eup %2084  ;;  %v147_v23 = vmul.f32 %v2083_v0, %v2300_v12  ;;  %v206_v12 = vsub.s32 1, %v201_v26 }
  0xbd   :  { %v164_v21 = vpack.c.bf16 %v159_v19, %v158_v2  ;;  %v146_v22 = vmul.f32 %v2085_v20, %v2305_v13  ;;  %v198_v13 = vld [vmem:[%s3591_s4] sm:$0xf] }
  0xbe   :  { %v161_v9 = vmul.f32 %v1827_v59, %v147_v23  ;;  %v2454_v30 = vrot.slane %v198_v13, %v202_v27  ;;  %v2456_v31 = vrot.slane %v198_v13, %v210_v28  ;;  %v2460_v32 = vrot.slane %v198_v13, %v214_v29 }
  0xbf   :  { %v160_v8 = vmul.f32 %v1827_v59, %v146_v22 }
  0xc1   :  { %v165_v24 = vpack.c.bf16 %v161_v9, %v160_v8 }
  0xc3   :  { %423 = vmatmul.mubr.bf16.gmra.mrb[4].mxu0 %v163_v16  ;;  %496 = vmatmul.mubr.bf16.gmra.mrb[4].mxu1 %v163_v16 }
  0xc4   :  { %432 = vmatprep.mubr.bf16.mxu0 %v2214_v48  ;;  %505 = vmatprep.mubr.bf16.mxu1 %v2214_v48 }
  0xcb   :  { %433 = vmatmul.mubr.bf16.gmra.mrb[8].mxu0 %v164_v21  ;;  %506 = vmatmul.mubr.bf16.gmra.mrb[8].mxu1 %v164_v21 }
  0xcc   :  { %442 = vmatprep.mubr.bf16.mxu0 %v2214_v48  ;;  %515 = vmatprep.mubr.bf16.mxu1 %v2214_v48  ;;  %v2458_v48 = vrot.slane %v198_v13, %v206_v12 }
  0xd3   :  { %443 = vmatmul.mubr.bf16.gmra.mrb[12].mxu0 %v165_v24  ;;  %516 = vmatmul.mubr.bf16.gmra.mrb[12].mxu1 %v165_v24 }
 0x18e   :  { %v414_v33 = vpop.f32.mrb[0].mxu0  ;;  %v487_v34 = vpop.f32.mrb[0].mxu1 }
 0x18f   :  { %v2463_v35 = vadd.f32 %v414_v33, %v2454_v30  ;;  %v2466_v36 = vadd.f32 %v487_v34, %v2456_v31  ;;  %v416_v37 = vpop.f32.mrb[1].mxu0  ;;  %v489_v38 = vpop.f32.mrb[1].mxu1 }
 0x190   :  { %v2469_v39 = vadd.f32 %v416_v37, %v2458_v48  ;;  %v2472_v40 = vadd.f32 %v489_v38, %v2460_v32  ;;  %v418_v41 = vpop.f32.mrb[2].mxu0  ;;  %v491_v42 = vpop.f32.mrb[2].mxu1 }
 0x191   :  { %v2475_v43 = vmul.f32 0.70710677, %v2463_v35  ;;  %v2478_v44 = vmul.f32 0.70710677, %v2466_v36  ;;  %v420_v58 = vpop.f32.mrb[3].mxu0  ;;  %v493_v59 = vpop.f32.mrb[3].mxu1  ;;  %v2499_v63 = vadd.f32 %v418_v41, %v2454_v30  ;;  %v2506_v6 = vadd.f32 %v491_v42, %v2456_v31 }
 0x192   :  { %v2481_v45 = vmul.f32 0.70710677, %v2469_v39  ;;  %v2484_v46 = vmul.f32 0.70710677, %v2472_v40  ;;  %v2516_v11 = vadd.f32 %v420_v58, %v2458_v48  ;;  %v2529_v0 = vadd.f32 %v493_v59, %v2460_v32 }
 0x193   :  { %v590_v47 = vand.u32 2147483647, %v2475_v43  ;;  %v592_v49 = vand.u32 2147483647, %v2478_v44  ;;  %v2513_v5 = vmul.f32 0.70710677, %v2499_v63 }
 0x194   :  { %v2489_v50 = vand.u32 2147483647, %v2481_v45  ;;  %v2492_v51 = vand.u32 2147483647, %v2484_v46  ;;  %v2523_v16 = vmul.f32 0.70710677, %v2506_v6 }
 0x195   :  { %v622_v52 = vmul.f32 0.3275911, %v590_v47  ;;  %v624_v53 = vmul.f32 0.3275911, %v592_v49  ;;  %v1038_v17 = vsub.f32 0.0, %v590_v47  ;;  %v1040_v2 = vsub.f32 0.0, %v592_v49 }
 0x196   :  { %v623_v54 = vmul.f32 0.3275911, %v2489_v50  ;;  %v625_v57 = vmul.f32 0.3275911, %v2492_v51  ;;  %v424_v61 = vpop.f32.mrb[4].mxu0  ;;  %v2496_v62 = vpop.f32.mrb[4].mxu1 }
 0x197   :  { %v654_v55 = vadd.f32 1.0, %v622_v52  ;;  %v656_v56 = vadd.f32 1.0, %v624_v53  ;;  %v2501_v3 = vpop.f32.mrb[5].mxu0  ;;  %v2503_v4 = vpop.f32.mrb[5].mxu1  ;;  %v2526_v18 = vand.u32 2147483647, %v2513_v5  ;;  %v1070_v26 = vmul.f32 %v1038_v17, %v590_v47 }
 0x198   :  { %v655_v60 = vadd.f32 1.0, %v623_v54  ;;  %v2508_v7 = vpop.f32.mrb[6].mxu0  ;;  %v2510_v10 = vpop.f32.mrb[6].mxu1  ;;  %v657_v1 = vadd.f32 1.0, %v625_v57  ;;  %v2532_v19 = vand.u32 2147483647, %v2523_v16  ;;  %v1072_v29 = vmul.f32 %v1040_v2, %v592_v49 }
 0x199   :  { %2086 = vrcp.f32 %v654_v55  ;;  %v2518_v14 = vpop.f32.mrb[7].mxu0  ;;  %v2520_v15 = vpop.f32.mrb[7].mxu1  ;;  %v2535_v20 = vmul.f32 0.70710677, %v2516_v11  ;;  %v626_v22 = vmul.f32 0.3275911, %v2526_v18  ;;  %v2575_v58 = vadd.f32 %v424_v61, %v2454_v30 }
 0x19a   :  { %2088 = vrcp.f32 %v656_v56  ;;  %v628_v9 = vmul.f32 0.3275911, %v2532_v19  ;;  %v2551_v28 = vmul.f32 0.70710677, %v2529_v0  ;;  %v2022_v47 = vld [vmem:[%s3592_s5 + $0x40] sm:$0xff]   ;;  %v1044_v61 = vsub.f32 0.0, %v2532_v19 }
 0x19b   :  { %2090 = vrcp.f32 %v655_v60  ;;  %v2546_v24 = vand.u32 2147483647, %v2535_v20  ;;  %v658_v27 = vadd.f32 1.0, %v626_v22  ;;  %v1102_v54 = vmul.f32 1.442695, %v1070_v26  ;;  %1893 = vmatprep.subr.bf16.mxu0 %v2022_v47 }
 0x19c   :  { %2092 = vrcp.f32 %v657_v1  ;;  %3621 = vst [vmem:[#allocation6_spill] sm:$0xff] %v2551_v28  ;;  %v660_v33 = vadd.f32 1.0, %v628_v9  ;;  %v2565_v42 = vand.u32 2147483647, %v2551_v28  ;;  %v1106_v57 = vmul.f32 1.442695, %v1072_v29 }
 0x19d   :  { %v627_v34 = vmul.f32 0.3275911, %v2546_v24  ;;  %2094 = vrcp.f32 %v658_v27  ;;  %v1042_v27 = vsub.f32 0.0, %v2526_v18  ;;  %vm1230_vm0 = vcmp.ge.f32.partialorder %v2475_v43, 0.0 }
 0x19e   :  { %v2537_v21 = vpop.f32.mrb[8].mxu0  ;;  %v2540_v23 = vpop.f32.mrb[8].mxu1  ;;  %2096 = vrcp.f32 %v660_v33  ;;  %v629_v2 = vmul.f32 0.3275911, %v2565_v42  ;;  %vm1232_vm1 = vcmp.ge.f32.partialorder %v2478_v44, 0.0  ;;  %vm1234_vm2 = vcmp.ge.f32.partialorder %v2513_v5, 0.0 }
 0x19f   :  { %3617 = vst [vmem:[#allocation2_spill] sm:$0xff] %v2537_v21  ;;  %3618 = vst [vmem:[#allocation3_spill] sm:$0xff] %v2540_v23  ;;  %v2542_v8 = vpop.f32.mrb[9].mxu0  ;;  %v2548_v25 = vpop.f32.mrb[9].mxu1  ;;  %v659_v53 = vadd.f32 1.0, %v627_v34  ;;  %vm1236_vm3 = vcmp.ge.f32.partialorder %v2523_v16, 0.0 }
 0x1a0   :  { %3619 = vst [vmem:[#allocation4_spill] sm:$0xff] %v2542_v8  ;;  %3620 = vst [vmem:[#allocation5_spill] sm:$0xff] %v2548_v25  ;;  %v2553_v13 = vpop.f32.mrb[10].mxu0  ;;  %v2555_v12 = vpop.f32.mrb[10].mxu1  ;;  %v2594_v34 = vmul.f32 0.70710677, %v2575_v58 }
 0x1a1   :  { %3622 = vst [vmem:[#allocation7_spill] sm:$0xff] %v2553_v13  ;;  %3623 = vst [vmem:[#allocation8_spill] sm:$0xff] %v2555_v12  ;;  %v2558_v37 = vpop.f32.mrb[11].mxu0  ;;  %v2560_v38 = vpop.f32.mrb[11].mxu1  ;;  %2098 = vrcp.f32 %v659_v53  ;;  %vm1231_vm4 = vcmp.ge.f32.partialorder %v2481_v45, 0.0  ;;  %vm1233_vm5 = vcmp.ge.f32.partialorder %v2484_v46, 0.0 }
 0x1a2   :  { %3624 = vst [vmem:[#allocation9_spill] sm:$0xff] %v2558_v37  ;;  %3625 = vst [vmem:[#allocation10_spill] sm:$0xff] %v2560_v38  ;;  %2100 = vpow2.f32 %v1102_v54  ;;  %v2606_v54 = vmul.f32 0.5, %v2463_v35  ;;  %v2035_v45 = vld [vmem:[%s3592_s5 + $0x18] sm:$0xff]   ;;  %vm1235_vm6 = vcmp.ge.f32.partialorder %v2535_v20, 0.0  ;;  %v2046_v20 = vld [vmem:[%s3592_s5 + $0x70] sm:$0xff]  }
 0x1a3   :  { %v2562_v41 = vpop.eup %2086  ;;  %3629 = vst [vmem:[#allocation14_spill] sm:$0xff] %v2594_v34  ;;  %2102 = vpow2.f32 %v1106_v57 }
 0x1a4   :  { %v2570_v52 = vpop.eup %2088  ;;  %v750_v49 = vmul.f32 1.0614054, %v2562_v41 }
 0x1a5   :  { %v752_v55 = vmul.f32 1.0614054, %v2570_v52  ;;  %v2581_v1 = vpop.eup %2090 }
 0x1a6   :  { %v782_v56 = vadd.f32 -1.4531521, %v750_v49  ;;  %v2577_v59 = vpop.f32.mrb[12].mxu0  ;;  %v2579_v60 = vpop.f32.mrb[12].mxu1  ;;  %v751_v26 = vmul.f32 1.0614054, %v2581_v1 }
 0x1a7   :  { %3626 = vst [vmem:[#allocation11_spill] sm:$0xff] %v2577_v59  ;;  %3627 = vst [vmem:[#allocation12_spill] sm:$0xff] %v2579_v60  ;;  %v784_v17 = vadd.f32 -1.4531521, %v752_v55  ;;  %v2584_v22 = vpop.f32.mrb[13].mxu0  ;;  %v2590_v29 = vpop.eup %2092 }
 0x1a8   :  { %3628 = vst [vmem:[#allocation13_spill] sm:$0xff] %v2584_v22  ;;  %v814_v9 = vmul.f32 %v2562_v41, %v782_v56  ;;  %v783_v49 = vadd.f32 -1.4531521, %v751_v26  ;;  %v753_v53 = vmul.f32 1.0614054, %v2590_v29  ;;  %v661_v56 = vadd.f32 1.0, %v629_v2  ;;  %v2603_v37 = vpop.eup %2094 }
 0x1a9   :  { %v816_v33 = vmul.f32 %v2570_v52, %v784_v17  ;;  %v2598_v22 = vand.u32 2147483647, %v2594_v34  ;;  %v1074_v17 = vmul.f32 %v1042_v27, %v2526_v18  ;;  %v2613_v26 = vpop.eup %2096  ;;  %v1076_v18 = vmul.f32 %v1044_v61, %v2532_v19 }
 0x1aa   :  { %v846_v47 = vadd.f32 1.4214138, %v814_v9  ;;  %v815_v59 = vmul.f32 %v2581_v1, %v783_v49  ;;  %v785_v38 = vadd.f32 -1.4531521, %v753_v53  ;;  %v2609_v9 = vmul.f32 0.5, %v2466_v36  ;;  %v2619_v36 = vpop.f32.mrb[13].mxu1 }
 0x1ab   :  { %v848_v55 = vadd.f32 1.4214138, %v816_v33  ;;  %v630_v2 = vmul.f32 0.3275911, %v2598_v22  ;;  %v754_v49 = vmul.f32 1.0614054, %v2603_v37  ;;  %2104 = vrcp.f32 %v661_v56 }
 0x1ac   :  { %v878_v60 = vmul.f32 %v2562_v41, %v846_v47  ;;  %v847_v47 = vadd.f32 1.4214138, %v815_v59  ;;  %v1039_v53 = vsub.f32 0.0, %v2489_v50  ;;  %v756_v35 = vmul.f32 1.0614054, %v2613_v26  ;;  %3630 = vst [vmem:[#allocation15_spill] sm:$0xff] %v2619_v36 }
 0x1ad   :  { %v880_v57 = vmul.f32 %v2570_v52, %v848_v55  ;;  %v817_v12 = vmul.f32 %v2590_v29, %v785_v38  ;;  %v786_v13 = vadd.f32 -1.4531521, %v754_v49  ;;  %v1110_v25 = vmul.f32 1.442695, %v1074_v17 }
 0x1ae   :  { %v910_v33 = vadd.f32 -0.28449672, %v878_v60  ;;  %v2623_v60 = vpop.eup %2098  ;;  %v1041_v19 = vsub.f32 0.0, %v2492_v51  ;;  %v788_v61 = vadd.f32 -1.4531521, %v756_v35  ;;  %v879_v34 = vmul.f32 %v2581_v1, %v847_v47 }
 0x1af   :  { %v912_v27 = vadd.f32 -0.28449672, %v880_v57  ;;  %v662_v57 = vadd.f32 1.0, %v630_v2  ;;  %v818_v56 = vmul.f32 %v2603_v37, %v786_v13  ;;  %v1114_v36 = vmul.f32 1.442695, %v1076_v18  ;;  %v2101_v49 = vpop.eup %2100 }
 0x1b0   :  { %v942_v55 = vmul.f32 %v2562_v41, %v910_v33  ;;  %v1071_v33 = vmul.f32 %v1039_v53, %v2489_v50  ;;  %v820_v38 = vmul.f32 %v2613_v26, %v788_v61  ;;  %v755_v17 = vmul.f32 1.0614054, %v2623_v60  ;;  %v2103_v2 = vpop.eup %2102 }
 0x1b1   :  { %v944_v59 = vmul.f32 %v2570_v52, %v912_v27  ;;  %v849_v23 = vadd.f32 1.4214138, %v817_v12  ;;  %v850_v21 = vadd.f32 1.4214138, %v818_v56  ;;  %2106 = vpow2.f32 %v1110_v25  ;;  %v2024_v25 = vld [vmem:[%s3592_s5 + $0xc0] sm:$0xff]  }
 0x1b2   :  { %v974_v8 = vadd.f32 0.2548296, %v942_v55  ;;  %v852_v47 = vadd.f32 1.4214138, %v820_v38  ;;  %v787_v55 = vadd.f32 -1.4531521, %v755_v17  ;;  %2108 = vrcp.f32 %v662_v57  ;;  %1933 = vmatprep.subr.bf16.mxu1 %v2024_v25 }
 0x1b3   :  { %v976_v28 = vadd.f32 0.2548296, %v944_v59  ;;  %v911_v18 = vadd.f32 -0.28449672, %v879_v34  ;;  %v882_v50 = vmul.f32 %v2603_v37, %v850_v21  ;;  %2110 = vpow2.f32 %v1114_v36  ;;  %v2023_v21 = vld [vmem:[%s3592_s5] sm:$0xff]   ;;  %v2651_v38 = vpop.f32.mrb[14].mxu0 }
 0x1b4   :  { %v1006_v27 = vmul.f32 %v2562_v41, %v974_v8  ;;  %v1073_v59 = vmul.f32 %v1041_v19, %v2492_v51  ;;  %v884_v61 = vmul.f32 %v2613_v26, %v852_v47  ;;  %v819_v8 = vmul.f32 %v2623_v60, %v787_v55  ;;  %1894 = vmatpush3.bf16.msra.mxu0 %v2023_v21  ;;  %v2665_v25 = vpop.f32.mrb[14].mxu1  ;;  %v2686_v44 = vpop.f32.mrb[15].mxu0 }
 0x1b5   :  { %v1008_v35 = vmul.f32 %v2570_v52, %v976_v28  ;;  %v1104_v28 = vmul.f32 1.442695, %v1071_v33  ;;  %v914_v12 = vadd.f32 -0.28449672, %v882_v50  ;;  %v1043_v41 = vsub.f32 0.0, %v2546_v24  ;;  %v2646_v52 = vpop.eup %2104  ;;  %3631 = vst [vmem:[#allocation16_spill] sm:$0xff] %v2651_v38 }
 0x1b6   :  { %v1166_v13 = vmul.f32 %v2101_v49, %v1006_v27  ;;  %v881_v34 = vmul.f32 %v2590_v29, %v849_v23  ;;  %v916_v36 = vadd.f32 -0.28449672, %v884_v61  ;;  %v851_v19 = vadd.f32 1.4214138, %v819_v8  ;;  %3632 = vst [vmem:[#allocation17_spill] sm:$0xff] %v2665_v25  ;;  %3633 = vst [vmem:[#allocation18_spill] sm:$0xff] %v2686_v44 }
 0x1b7   :  { %v1168_v53 = vmul.f32 %v2103_v2, %v1008_v35  ;;  %v943_v56 = vmul.f32 %v2581_v1, %v911_v18  ;;  %v946_v33 = vmul.f32 %v2603_v37, %v914_v12  ;;  %v1108_v17 = vmul.f32 1.442695, %v1073_v59  ;;  %v3647_v25 = vld [vmem:[#allocation14_spill] sm:$0xff] }
 0x1b8   :  { %v1198_v51 = vsub.f32 1.0, %v1166_v13  ;;  %v530_v49 = vmul.f32 0.5, %v2499_v63  ;;  %v948_v27 = vmul.f32 %v2613_v26, %v916_v36  ;;  %2112 = vpow2.f32 %v1104_v28 }
 0x1b9   :  { %v1200_v57 = vsub.f32 1.0, %v1168_v53  ;;  %v978_v23 = vadd.f32 0.2548296, %v946_v33  ;;  %v1075_v2 = vmul.f32 %v1043_v41, %v2546_v24  ;;  %v757_v35 = vmul.f32 1.0614054, %v2646_v52 }
 0x1ba   :  { %v1262_v47 = vsub.f32 0.0, %v1198_v51  ;;  %v913_v55 = vadd.f32 -0.28449672, %v881_v34  ;;  %v980_v13 = vadd.f32 0.2548296, %v948_v27  ;;  %v883_v18 = vmul.f32 %v2623_v60, %v851_v19  ;;  %v2025_v19 = vld [vmem:[%s3592_s5 + $0x80] sm:$0xff]  }
 0x1bb   :  { %v2107_v50 = vpop.eup %2106  ;;  %v1264_v53 = vsub.f32 0.0, %v1200_v57  ;;  %v975_v61 = vadd.f32 0.2548296, %v943_v56  ;;  %v1010_v59 = vmul.f32 %v2603_v37, %v978_v23  ;;  %v532_v63 = vmul.f32 0.5, %v2506_v6  ;;  %1934 = vmatpush3.bf16.msra.mxu1 %v2025_v19 }
 0x1bc   :  { %v2661_v8 = vpop.eup %2108  ;;  %v1012_v24 = vmul.f32 %v2613_v26, %v980_v13  ;;  %v789_v41 = vadd.f32 -1.4531521, %v757_v35  ;;  %v2669_v21 = vadd.f32 %v2496_v62, %v2456_v31  ;;  %v1294_v37 = vsel %vm1230_vm0, %v1198_v51, %v1262_v47 }
 0x1bd   :  { %v2111_v28 = vpop.eup %2110  ;;  %v1170_v12 = vmul.f32 %v2107_v50, %v1010_v59  ;;  %v915_v6 = vadd.f32 -0.28449672, %v883_v18  ;;  %v1112_v36 = vmul.f32 1.442695, %v1075_v2  ;;  %v1296_v26 = vsel %vm1232_vm1, %v1200_v57, %v1264_v53 }
 0x1be   :  { %v1172_v34 = vmul.f32 %v2111_v28, %v1012_v24  ;;  %v758_v33 = vmul.f32 1.0614054, %v2661_v8  ;;  %v1007_v62 = vmul.f32 %v2581_v1, %v975_v61  ;;  %v945_v43 = vmul.f32 %v2590_v29, %v913_v55 }
 0x1bf   :  { %v1202_v56 = vsub.f32 1.0, %v1170_v12  ;;  %2114 = vpow2.f32 %v1108_v17  ;;  %v1326_v27 = vadd.f32 1.0, %v1294_v37  ;;  %v821_v2 = vmul.f32 %v2646_v52, %v789_v41 }
 0x1c0   :  { %v1204_v51 = vsub.f32 1.0, %v1172_v34  ;;  %v2684_v35 = vmul.f32 0.70710677, %v2669_v21  ;;  %v1328_v57 = vadd.f32 1.0, %v1296_v26  ;;  %v947_v13 = vmul.f32 %v2623_v60, %v915_v6  ;;  %v2711_v6 = vpop.f32.mrb[15].mxu1 }
 0x1c1   :  { %v1266_v23 = vsub.f32 0.0, %v1202_v56  ;;  %v2691_v1 = vadd.f32 %v2501_v3, %v2458_v48  ;;  %v790_v18 = vadd.f32 -1.4531521, %v758_v33  ;;  %v977_v53 = vadd.f32 0.2548296, %v945_v43  ;;  %3636 = vst [vmem:[#allocation21_spill] sm:$0xff] %v2711_v6 }
 0x1c2   :  { %v1268_v47 = vsub.f32 0.0, %v1204_v51  ;;  %v2113_v17 = vpop.eup %2112  ;;  %v2696_v50 = vand.u32 2147483647, %v2684_v35  ;;  %2116 = vpow2.f32 %v1112_v36  ;;  %v853_v12 = vadd.f32 1.4214138, %v821_v2  ;;  %v2028_v2 = vld [vmem:[%s3592_s5 + $0xc8] sm:$0xff]  }
 0x1c3   :  { %v1298_v55 = vsel %vm1234_vm2, %v1202_v56, %v1266_v23  ;;  %v2700_v24 = vmul.f32 %v2113_v17, %v1007_v62  ;;  %v2704_v41 = vmul.f32 %v1326_v27, %v2606_v54  ;;  %v979_v37 = vadd.f32 0.2548296, %v947_v13  ;;  %1935 = vmatprep.subr.bf16.mxu1 %v2028_v2 }
 0x1c4   :  { %v1330_v61 = vadd.f32 1.0, %v1298_v55  ;;  %v1300_v59 = vsel %vm1236_vm3, %v1204_v51, %v1268_v47  ;;  %v632_v3 = vmul.f32 0.3275911, %v2696_v50  ;;  %v2709_v34 = vmul.f32 0.70710677, %v2691_v1 }
 0x1c5   :  { %v1332_v28 = vadd.f32 1.0, %v1300_v59  ;;  %3634 = vst [vmem:[#allocation19_spill] sm:$0xff] %v2704_v41  ;;  %v2714_v16 = vmul.f32 %v1328_v57, %v2609_v9  ;;  %v822_v19 = vmul.f32 %v2661_v8, %v790_v18  ;;  %v2725_v56 = vmul.f32 0.5, %v2469_v39  ;;  %v2026_v39 = vld [vmem:[%s3592_s5 + $0x48] sm:$0xff]   ;;  %v3645_v41 = vld [vmem:[#allocation6_spill] sm:$0xff] }
 0x1c6   :  { %v2706_v5 = vmul.f32 %v1330_v61, %v530_v49  ;;  %v664_v26 = vadd.f32 1.0, %v632_v3  ;;  %v2722_v49 = vand.u32 2147483647, %v2709_v34  ;;  %v2728_v33 = vmul.f32 0.5, %v2472_v40  ;;  %v2029_v57 = vld [vmem:[%s3592_s5 + $0x88] sm:$0xff]   ;;  %1895 = vmatprep.subr.bf16.mxu0 %v2026_v39 }
 0x1c7   :  { %3637 = vst [vmem:[#allocation22_spill] sm:$0xff] %v2714_v16  ;;  %v2716_v36 = vmul.f32 %v1332_v28, %v532_v63  ;;  %v1009_v9 = vmul.f32 %v2590_v29, %v977_v53  ;;  %v885_v43 = vmul.f32 %v2646_v52, %v853_v12  ;;  %v1045_v51 = vsub.f32 0.0, %v2565_v42  ;;  %v2027_v29 = vld [vmem:[%s3592_s5 + $0x8] sm:$0xff]   ;;  %1936 = vmatpush3.bf16.msra.mxu1 %v2029_v57 }
 0x1c8   :  { %3635 = vst [vmem:[#allocation20_spill] sm:$0xff] %v2706_v5  ;;  %2118 = vrcp.f32 %v664_v26  ;;  %v631_v27 = vmul.f32 0.3275911, %v2722_v49  ;;  %v1199_v40 = vsub.f32 1.0, %v2700_v24  ;;  %v854_v23 = vadd.f32 1.4214138, %v822_v19  ;;  %1896 = vmatpush3.bf16.msra.mxu0 %v2027_v29 }
 0x1c9   :  { %3638 = vst [vmem:[#allocation23_spill] sm:$0xff] %v2716_v36  ;;  %v2115_v62 = vpop.eup %2114  ;;  %v1011_v47 = vmul.f32 %v2623_v60, %v979_v37  ;;  %v1046_v13 = vsub.f32 0.0, %v2598_v22  ;;  %v2753_v55 = vadd.f32 %v2503_v4, %v2460_v32  ;;  %v2760_v53 = vadd.f32 %v2508_v7, %v2454_v30  ;;  %v2030_v7 = vld [vmem:[%s3592_s5 + $0x50] sm:$0xff]  }
 0x1ca   :  { %v663_v17 = vadd.f32 1.0, %v631_v27  ;;  %v2756_v18 = vmul.f32 %v2115_v62, %v1009_v9  ;;  %v2764_v61 = vadd.f32 %v2510_v10, %v2456_v31  ;;  %v2767_v59 = vmul.f32 0.5, %v2516_v11  ;;  %v2032_v10 = vld [vmem:[%s3592_s5 + $0xd0] sm:$0xff]   ;;  %1897 = vmatprep.subr.bf16.mxu0 %v2030_v7 }
 0x1cb   :  { %v917_v4 = vadd.f32 -0.28449672, %v885_v43  ;;  %v1077_v24 = vmul.f32 %v1045_v51, %v2565_v42  ;;  %v1263_v28 = vsub.f32 0.0, %v1199_v40  ;;  %v886_v12 = vmul.f32 %v2661_v8, %v854_v23  ;;  %v2031_v42 = vld [vmem:[%s3592_s5 + $0x10] sm:$0xff]   ;;  %1937 = vmatprep.subr.bf16.mxu1 %v2032_v10  ;;  %v2034_v23 = vld [vmem:[%s3592_s5 + $0x58] sm:$0xff]  }
 0x1cc   :  { %v2117_v60 = vpop.eup %2116  ;;  %2120 = vrcp.f32 %v663_v17  ;;  %v2778_v3 = vmul.f32 0.70710677, %v2753_v55  ;;  %v2781_v11 = vmul.f32 0.70710677, %v2760_v53  ;;  %v2789_v19 = vmul.f32 0.5, %v2529_v0  ;;  %v2033_v62 = vld [vmem:[%s3592_s5 + $0x90] sm:$0xff]   ;;  %1898 = vmatpush3.bf16.msra.mxu0 %v2031_v42 }
 0x1cd   :  { %v2786_v37 = vmul.f32 %v2117_v60, %v1011_v47  ;;  %v1078_v26 = vmul.f32 %v1046_v13, %v2598_v22  ;;  %v2793_v9 = vmul.f32 0.70710677, %v2764_v61  ;;  %v1201_v43 = vsub.f32 1.0, %v2756_v18  ;;  %1938 = vmatpush3.bf16.msra.mxu1 %v2033_v62  ;;  %1899 = vmatprep.subr.bf16.mxu0 %v2034_v23  ;;  %v2040_v62 = vld [vmem:[%s3592_s5 + $0xe0] sm:$0xff]  }
 0x1ce   :  { %v2800_v51 = vmul.f32 0.5, %v2575_v58  ;;  %v2803_v27 = vand.u32 2147483647, %v2778_v3  ;;  %v2806_v0 = vand.u32 2147483647, %v2781_v11  ;;  %v2036_v58 = vld [vmem:[%s3592_s5 + $0xd8] sm:$0xff]   ;;  %v1295_v29 = vsel %vm1231_vm4, %v1199_v40, %v1263_v28 }
 0x1cf   :  { %v1116_v22 = vmul.f32 1.442695, %v1077_v24  ;;  %v2809_v39 = vand.u32 2147483647, %v2793_v9  ;;  %v918_v2 = vadd.f32 -0.28449672, %v886_v12  ;;  %v949_v60 = vmul.f32 %v2646_v52, %v917_v4  ;;  %1939 = vmatprep.subr.bf16.mxu1 %v2036_v58 }
 0x1d0   :  { %v633_v57 = vmul.f32 0.3275911, %v2803_v27  ;;  %v634_v47 = vmul.f32 0.3275911, %v2806_v0  ;;  %v1203_v17 = vsub.f32 1.0, %v2786_v37  ;;  %v1265_v40 = vsub.f32 0.0, %v1201_v43  ;;  %1900 = vmatpush3.bf16.msra.mxu0 %v2035_v45 }
 0x1d1   :  { %v1118_v24 = vmul.f32 1.442695, %v1078_v26  ;;  %v636_v7 = vmul.f32 0.3275911, %v2809_v39  ;;  %v2836_v4 = vadd.f32 %v2518_v14, %v2458_v48  ;;  %v2037_v12 = vld [vmem:[%s3592_s5 + $0x98] sm:$0xff]   ;;  %v2841_v42 = vadd.f32 1.0, %v1295_v29 }
 0x1d2   :  { %v2822_v13 = vpop.eup %2118  ;;  %v665_v28 = vadd.f32 1.0, %v633_v57  ;;  %2122 = vpow2.f32 %v1116_v22  ;;  %v666_v37 = vadd.f32 1.0, %v634_v47  ;;  %v2038_v26 = vld [vmem:[%s3592_s5 + $0x60] sm:$0xff]   ;;  %v950_v14 = vmul.f32 %v2661_v8, %v918_v2  ;;  %1940 = vmatpush3.bf16.msra.mxu1 %v2037_v12 }
 0x1d3   :  { %v760_v10 = vmul.f32 1.0614054, %v2822_v13  ;;  %v668_v58 = vadd.f32 1.0, %v636_v7  ;;  %v2039_v22 = vld [vmem:[%s3592_s5 + $0x20] sm:$0xff]   ;;  %v1267_v47 = vsub.f32 0.0, %v1203_v17  ;;  %v1048_v63 = vsub.f32 0.0, %v2696_v50  ;;  %1901 = vmatprep.subr.bf16.mxu0 %v2038_v26  ;;  %1941 = vmatprep.subr.bf16.mxu1 %v2040_v62 }
 0x1d4   :  { %2124 = vrcp.f32 %v665_v28  ;;  %v2041_v29 = vld [vmem:[%s3592_s5 + $0xa0] sm:$0xff]   ;;  %v981_v45 = vadd.f32 0.2548296, %v949_v60  ;;  %v1047_v28 = vsub.f32 0.0, %v2722_v49  ;;  %v2867_v12 = vadd.f32 %v2520_v15, %v2460_v32  ;;  %1902 = vmatpush3.bf16.msra.mxu0 %v2039_v22 }
 0x1d5   :  { %v792_v23 = vadd.f32 -1.4531521, %v760_v10  ;;  %2126 = vrcp.f32 %v666_v37  ;;  %v2862_v10 = vmul.f32 0.70710677, %v2836_v4  ;;  %v3640_v60 = vld [vmem:[#allocation2_spill] sm:$0xff]  ;;  %v2042_v37 = vld [vmem:[%s3592_s5 + $0x68] sm:$0xff]   ;;  %v1297_v15 = vsel %vm1233_vm5, %v1201_v43, %v1265_v40 }
 0x1d6   :  { %v2856_v57 = vpop.eup %2120  ;;  %2128 = vpow2.f32 %v1118_v24  ;;  %v2871_v54 = vadd.f32 %v3640_v60, %v2454_v30  ;;  %v982_v26 = vadd.f32 0.2548296, %v950_v14  ;;  %1942 = vmatpush3.bf16.msra.mxu1 %v2041_v29  ;;  %v2884_v60 = vmul.f32 0.70710677, %v2867_v12  ;;  %1903 = vmatprep.subr.bf16.mxu0 %v2042_v37  ;;  %v2043_v14 = vld [vmem:[%s3592_s5 + $0x28] sm:$0xff]  }
 0x1d7   :  { %v824_v2 = vmul.f32 %v2822_v13, %v792_v23  ;;  %v759_v7 = vmul.f32 1.0614054, %v2856_v57  ;;  %3639 = vst [vmem:[#allocation24_spill] sm:$0xff] %v2862_v10  ;;  %2130 = vrcp.f32 %v668_v58  ;;  %v2877_v24 = vand.u32 2147483647, %v2862_v10  ;;  %v2044_v58 = vld [vmem:[%s3592_s5 + $0xe8] sm:$0xff]  }
 0x1d8   :  { %3641 = vst [vmem:[#allocation2_spill] sm:$0xff] %v2884_v60  ;;  %v1013_v22 = vmul.f32 %v2646_v52, %v981_v45  ;;  %v2894_v18 = vmul.f32 0.5, %v2669_v21  ;;  %v2045_v40 = vld [vmem:[%s3592_s5 + $0xa8] sm:$0xff]   ;;  %v1299_v29 = vsel %vm1235_vm6, %v1203_v17, %v1267_v47  ;;  %v2908_v52 = vmul.f32 0.70710677, %v2871_v54  ;;  %1904 = vmatpush3.bf16.msra.mxu0 %v2043_v14  ;;  %1943 = vmatprep.subr.bf16.mxu1 %v2044_v58 }
 0x1d9   :  { %v791_v62 = vadd.f32 -1.4531521, %v759_v7  ;;  %v856_v23 = vadd.f32 1.4214138, %v824_v2  ;;  %v635_v43 = vmul.f32 0.3275911, %v2877_v24  ;;  %v1080_v2 = vmul.f32 %v1048_v63, %v2696_v50  ;;  %1905 = vmatprep.subr.bf16.mxu0 %v2046_v20 }
 0x1da   :  { %v2905_v7 = vand.u32 2147483647, %v2884_v60  ;;  %3642 = vst [vmem:[#allocation25_spill] sm:$0xff] %v2908_v52  ;;  %v2910_v21 = vadd.f32 1.0, %v1297_v15  ;;  %v2913_v45 = vmul.f32 0.5, %v2691_v1  ;;  %v1079_v37 = vmul.f32 %v1047_v28, %v2722_v49  ;;  %1944 = vmatpush3.bf16.msra.mxu1 %v2045_v40  ;;  %v2047_v40 = vld [vmem:[%s3592_s5 + $0x30] sm:$0xff]  }
 0x1db   :  { %v823_v46 = vmul.f32 %v2856_v57, %v791_v62  ;;  %v667_v62 = vadd.f32 1.0, %v635_v43  ;;  %v888_v63 = vmul.f32 %v2822_v13, %v856_v23  ;;  %v2922_v15 = vand.u32 2147483647, %v2908_v52 }
 0x1dc   :  { %3643 = vst [vmem:[#allocation26_spill] sm:$0xff] %v2913_v45  ;;  %v2123_v50 = vpop.eup %2122  ;;  %v637_v47 = vmul.f32 0.3275911, %v2905_v7  ;;  %v2926_v1 = vadd.f32 1.0, %v1299_v29  ;;  %v1014_v28 = vmul.f32 %v2661_v8, %v982_v26  ;;  %v1122_v43 = vmul.f32 1.442695, %v1080_v2  ;;  %1906 = vmatpush3.bf16.msra.mxu0 %v2047_v40 }
 0x1dd   :  { %v855_v17 = vadd.f32 1.4214138, %v823_v46  ;;  %v2928_v49 = vmul.f32 %v2123_v50, %v1013_v22  ;;  %2132 = vrcp.f32 %v667_v62  ;;  %v1120_v16 = vmul.f32 1.442695, %v1079_v37  ;;  %v2048_v2 = vld [vmem:[%s3592_s5 + $0xf0] sm:$0xff]  }
 0x1de   :  { %v2924_v14 = vpop.eup %2124  ;;  %v669_v46 = vadd.f32 1.0, %v637_v47  ;;  %v638_v22 = vmul.f32 0.3275911, %v2922_v15  ;;  %v920_v36 = vadd.f32 -0.28449672, %v888_v63  ;;  %v2049_v63 = vld [vmem:[%s3592_s5 + $0xb0] sm:$0xff]   ;;  %1945 = vmatprep.subr.bf16.mxu1 %v2048_v2  ;;  %v3000_v10 = vmul.f32 %v2841_v42, %v2725_v56 }
 0x1df   :  { %v2931_v58 = vpop.eup %2126  ;;  %v761_v23 = vmul.f32 1.0614054, %v2924_v14  ;;  %v887_v8 = vmul.f32 %v2856_v57, %v855_v17  ;;  %v1205_v20 = vsub.f32 1.0, %v2928_v49  ;;  %vm1237_vm7 = vcmp.ge.f32.partialorder %v3645_v41, 0.0  ;;  %1946 = vmatpush3.bf16.msra.mxu1 %v2049_v63 }
 0x1e0   :  { %v762_v29 = vmul.f32 1.0614054, %v2931_v58  ;;  %v2129_v50 = vpop.eup %2128  ;;  %2134 = vrcp.f32 %v669_v46  ;;  %v3644_v46 = vld [vmem:[#allocation3_spill] sm:$0xff]  ;;  %v1049_v49 = vsub.f32 0.0, %v2803_v27  ;;  %v1050_v5 = vsub.f32 0.0, %v2806_v0 }
 0x1e1   :  { %v793_v26 = vadd.f32 -1.4531521, %v761_v23  ;;  %v2943_v62 = vpop.eup %2130  ;;  %v2946_v37 = vmul.f32 %v2129_v50, %v1014_v28  ;;  %v2955_v40 = vadd.f32 %v3644_v46, %v2456_v31  ;;  %v919_v50 = vadd.f32 -0.28449672, %v887_v8 }
 0x1e2   :  { %v794_v47 = vadd.f32 -1.4531521, %v762_v29  ;;  %v764_v23 = vmul.f32 1.0614054, %v2943_v62  ;;  %v670_v29 = vadd.f32 1.0, %v638_v22  ;;  %2136 = vpow2.f32 %v1122_v43 }
 0x1e3   :  { %v825_v17 = vmul.f32 %v2924_v14, %v793_v26  ;;  %v2050_v26 = vld [vmem:[%s3592_s5 + $0x78] sm:$0xff]   ;;  %v1206_v46 = vsub.f32 1.0, %v2946_v37  ;;  %v2966_v2 = vmul.f32 0.70710677, %v2955_v40  ;;  %vm1238_vm8 = vcmp.ge.f32.partialorder %v3647_v25, 0.0 }
 0x1e4   :  { %v826_v28 = vmul.f32 %v2931_v58, %v794_v47  ;;  %v796_v6 = vadd.f32 -1.4531521, %v764_v23  ;;  %v2051_v47 = vld [vmem:[%s3592_s5 + $0x38] sm:$0xff]   ;;  %1907 = vmatprep.subr.bf16.mxu0 %v2050_v26  ;;  %v1269_v23 = vsub.f32 0.0, %v1205_v20  ;;  %2138 = vrcp.f32 %v670_v29 }
 0x1e5   :  { %v857_v44 = vadd.f32 1.4214138, %v825_v17  ;;  %3646 = vst [vmem:[#allocation3_spill] sm:$0xff] %v2966_v2  ;;  %v2976_v37 = vand.u32 2147483647, %v2966_v2  ;;  %1908 = vmatpush3.bf16.msra.mxu0 %v2051_v47  ;;  %v2052_v17 = vld [vmem:[%s3592_s5 + $0xf8] sm:$0xff]   ;;  %2140 = vpow2.f32 %v1120_v16  ;;  %v1081_v43 = vmul.f32 %v1049_v49, %v2803_v27 }
 0x1e6   :  { %v858_v22 = vadd.f32 1.4214138, %v826_v28  ;;  %v828_v8 = vmul.f32 %v2943_v62, %v796_v6  ;;  %v1082_v6 = vmul.f32 %v1050_v5, %v2806_v0  ;;  %v1270_v26 = vsub.f32 0.0, %v1206_v46  ;;  %1947 = vmatprep.subr.bf16.mxu1 %v2052_v17  ;;  %v2053_v47 = vld [vmem:[%s3592_s5 + $0xb8] sm:$0xff]  }
 0x1e7   :  { %v2972_v63 = vpop.eup %2132  ;;  %v952_v38 = vmul.f32 %v2822_v13, %v920_v36  ;;  %v951_v29 = vmul.f32 %v2856_v57, %v919_v50  ;;  %v1052_v2 = vsub.f32 0.0, %v2809_v39  ;;  %v889_v16 = vmul.f32 %v2924_v14, %v857_v44  ;;  %1948 = vmatpush3.bf16.msra.mxu1 %v2053_v47 }
 0x1e8   :  { %v763_v28 = vmul.f32 1.0614054, %v2972_v63  ;;  %v890_v5 = vmul.f32 %v2931_v58, %v858_v22  ;;  %v860_v27 = vadd.f32 1.4214138, %v828_v8  ;;  %v640_v36 = vmul.f32 0.3275911, %v2976_v37 }
 0x1e9   :  { %v1301_v50 = vsel %vm1237_vm7, %v1205_v20, %v1269_v23  ;;  %v1124_v17 = vmul.f32 1.442695, %v1081_v43  ;;  %v1126_v60 = vmul.f32 1.442695, %v1082_v6  ;;  %v984_v45 = vadd.f32 0.2548296, %v952_v38 }
 0x1ea   :  { %v2990_v52 = vpop.eup %2134  ;;  %v795_v0 = vadd.f32 -1.4531521, %v763_v28  ;;  %v983_v44 = vadd.f32 0.2548296, %v951_v29  ;;  %v3005_v8 = vmul.f32 %v2910_v21, %v2728_v33  ;;  %v3009_v28 = vmul.f32 %v2926_v1, %v2767_v59 }
 0x1eb   :  { %v765_v49 = vmul.f32 1.0614054, %v2990_v52  ;;  %v921_v41 = vadd.f32 -0.28449672, %v889_v16  ;;  %v922_v20 = vadd.f32 -0.28449672, %v890_v5  ;;  %v892_v43 = vmul.f32 %v2943_v62, %v860_v27 }
 0x1ec   :  { %v827_v22 = vmul.f32 %v2972_v63, %v795_v0  ;;  %3648 = vst [vmem:[#allocation6_spill] sm:$0xff] %v3005_v8  ;;  %3649 = vst [vmem:[#allocation14_spill] sm:$0xff] %v3009_v28  ;;  %v1333_v23 = vadd.f32 1.0, %v1301_v50  ;;  %v672_v56 = vadd.f32 1.0, %v640_v36  ;;  %v2137_v42 = vpop.eup %2136  ;;  %v1302_v38 = vsel %vm1238_vm8, %v1206_v46, %v1270_v26 }
 0x1ed   :  { %v797_v6 = vadd.f32 -1.4531521, %v765_v49  ;;  %v3015_v29 = vmul.f32 0.5, %v2753_v55  ;;  %2142 = vpow2.f32 %v1124_v17  ;;  %v1084_v33 = vmul.f32 %v1052_v2, %v2809_v39  ;;  %v3650_v55 = vld [vmem:[#allocation4_spill] sm:$0xff] }
 0x1ee   :  { %v3018_v21 = vpop.eup %2138  ;;  %v1016_v59 = vmul.f32 %v2822_v13, %v984_v45  ;;  %v1015_v1 = vmul.f32 %v2856_v57, %v983_v44  ;;  %2144 = vpow2.f32 %v1126_v60  ;;  %v859_v47 = vadd.f32 1.4214138, %v827_v22 }
 0x1ef   :  { %v2141_v16 = vpop.eup %2140  ;;  %v953_v5 = vmul.f32 %v2924_v14, %v921_v41  ;;  %v954_v25 = vmul.f32 %v2931_v58, %v922_v20  ;;  %v1051_v46 = vsub.f32 0.0, %v2877_v24  ;;  %v3027_v26 = vadd.f32 %v3650_v55, %v2458_v48 }
 0x1f0   :  { %v3030_v39 = vmul.f32 0.5, %v2760_v53  ;;  %v924_v2 = vadd.f32 -0.28449672, %v892_v43  ;;  %v829_v13 = vmul.f32 %v2990_v52, %v797_v6  ;;  %2146 = vrcp.f32 %v672_v56 }
 0x1f1   :  { %v3034_v57 = vmul.f32 %v1333_v23, %v2789_v19  ;;  %v1130_v60 = vmul.f32 1.442695, %v1084_v33  ;;  %v1053_v45 = vsub.f32 0.0, %v2905_v7  ;;  %v766_v27 = vmul.f32 1.0614054, %v3018_v21 }
 0x1f2   :  { %v1334_v0 = vadd.f32 1.0, %v1302_v38  ;;  %v1176_v49 = vmul.f32 %v2137_v42, %v1016_v59  ;;  %v1175_v36 = vmul.f32 %v2141_v16, %v1015_v1  ;;  %v891_v50 = vmul.f32 %v2972_v63, %v859_v47 }
 0x1f3   :  { %3651 = vst [vmem:[#allocation4_spill] sm:$0xff] %v3034_v57  ;;  %v985_v17 = vadd.f32 0.2548296, %v953_v5  ;;  %v986_v53 = vadd.f32 0.2548296, %v954_v25  ;;  %v1083_v44 = vmul.f32 %v1051_v46, %v2877_v24  ;;  %v3044_v19 = vmul.f32 0.5, %v2764_v61 }
 0x1f4   :  { %v3041_v22 = vmul.f32 0.70710677, %v3027_v26  ;;  %v956_v41 = vmul.f32 %v2943_v62, %v924_v2  ;;  %v3048_v20 = vmul.f32 0.5, %v2836_v4  ;;  %v861_v23 = vadd.f32 1.4214138, %v829_v13 }
 0x1f5   :  { %vm1240_vm9 = vcmp.ge.f32.partialorder %v2684_v35, 0.0  ;;  %vm1239_vm10 = vcmp.ge.f32.partialorder %v2709_v34, 0.0  ;;  %2148 = vpow2.f32 %v1130_v60  ;;  %v1085_v43 = vmul.f32 %v1053_v45, %v2905_v7 }
 0x1f6   :  { %v798_v24 = vadd.f32 -1.4531521, %v766_v27  ;;  %v1054_v6 = vsub.f32 0.0, %v2922_v15  ;;  %v1208_v56 = vsub.f32 1.0, %v1176_v49  ;;  %v1207_v42 = vsub.f32 1.0, %v1175_v36  ;;  %v3653_v49 = vld [vmem:[#allocation5_spill] sm:$0xff] }
 0x1f7   :  { %v923_v61 = vadd.f32 -0.28449672, %v891_v50  ;;  %v3055_v38 = vand.u32 2147483647, %v3041_v22  ;;  %v2143_v33 = vpop.eup %2142  ;;  %v3058_v4 = vmul.f32 %v1334_v0, %v2800_v51  ;;  %v1017_v59 = vmul.f32 %v2924_v14, %v985_v17 }
 0x1f8   :  { %v1018_v1 = vmul.f32 %v2931_v58, %v986_v53  ;;  %v1128_v47 = vmul.f32 1.442695, %v1083_v44  ;;  %v2145_v16 = vpop.eup %2144  ;;  %v988_v7 = vadd.f32 0.2548296, %v956_v41  ;;  %v3063_v5 = vmul.f32 0.5, %v2867_v12 }
 0x1f9   :  { %3652 = vst [vmem:[#allocation27_spill] sm:$0xff] %v3058_v4  ;;  %v893_v25 = vmul.f32 %v2990_v52, %v861_v23  ;;  %v639_v46 = vmul.f32 0.3275911, %v3055_v38  ;;  %v1132_v55 = vmul.f32 1.442695, %v1085_v43  ;;  %v3068_v2 = vmul.f32 0.5, %v2871_v54 }
 0x1fa   :  { %v830_v51 = vmul.f32 %v3018_v21, %v798_v24  ;;  %v1086_v14 = vmul.f32 %v1054_v6, %v2922_v15  ;;  %v3072_v13 = vpop.eup %2146  ;;  %v1272_v58 = vsub.f32 0.0, %v1208_v56  ;;  %v1271_v60 = vsub.f32 0.0, %v1207_v42  ;;  %v3654_v15 = vld [vmem:[#allocation7_spill] sm:$0xff] }
 0x1fb   :  { %v955_v45 = vmul.f32 %v2972_v63, %v923_v61  ;;  %v671_v12 = vadd.f32 1.0, %v639_v46  ;;  %v1177_v27 = vmul.f32 %v2143_v33, %v1017_v59  ;;  %v1178_v0 = vmul.f32 %v2145_v16, %v1018_v1 }
 0x1fc   :  { %2150 = vpow2.f32 %v1128_v47  ;;  %v3077_v36 = vadd.f32 %v3653_v49, %v2460_v32  ;;  %v1020_v54 = vmul.f32 %v2943_v62, %v988_v7  ;;  %v925_v50 = vadd.f32 -0.28449672, %v893_v25 }
 0x1fd   :  { %2152 = vrcp.f32 %v671_v12  ;;  %v3082_v17 = vadd.f32 %v3654_v15, %v2454_v30  ;;  %v862_v53 = vadd.f32 1.4214138, %v830_v51  ;;  %v1134_v44 = vmul.f32 1.442695, %v1086_v14 }
 0x1fe   :  { %2154 = vpow2.f32 %v1132_v55  ;;  %v768_v41 = vmul.f32 1.0614054, %v3072_v13  ;;  %v1304_v23 = vsel %vm1240_vm9, %v1208_v56, %v1272_v58  ;;  %v1303_v43 = vsel %vm1239_vm10, %v1207_v42, %v1271_v60 }
 0x1ff   :  { %vm1241_vm11 = vcmp.ge.f32.partialorder %v2778_v3, 0.0  ;;  %v987_v62 = vadd.f32 0.2548296, %v955_v45  ;;  %v3091_v24 = vmul.f32 0.70710677, %v3077_v36  ;;  %v2149_v6 = vpop.eup %2148  ;;  %v1209_v61 = vsub.f32 1.0, %v1177_v27 }
 0x200   :  { %v1210_v33 = vsub.f32 1.0, %v1178_v0  ;;  %vm1242_vm12 = vcmp.ge.f32.partialorder %v2781_v11, 0.0  ;;  %v1056_v59 = vsub.f32 0.0, %v2976_v37  ;;  %v3096_v1 = vmul.f32 0.70710677, %v3082_v17  ;;  %v3655_v0 = vld [vmem:[#allocation8_spill] sm:$0xff] }
 0x201   :  { %v1180_v35 = vmul.f32 %v2149_v6, %v1020_v54  ;;  %v957_v34 = vmul.f32 %v2990_v52, %v925_v50  ;;  %v3100_v56 = vmul.f32 0.5, %v2955_v40  ;;  %v3103_v42 = vand.u32 2147483647, %v3091_v24  ;;  %v3660_v3 = vld [vmem:[#allocation9_spill] sm:$0xff] }
 0x202   :  { %v1336_v47 = vadd.f32 1.0, %v1304_v23  ;;  %v894_v16 = vmul.f32 %v3018_v21, %v862_v53  ;;  %v800_v7 = vadd.f32 -1.4531521, %v768_v41  ;;  %v3107_v25 = vand.u32 2147483647, %v3096_v1 }
 0x203   :  { %v1335_v46 = vadd.f32 1.0, %v1303_v43  ;;  %v1019_v55 = vmul.f32 %v2972_v63, %v987_v62  ;;  %2156 = vpow2.f32 %v1134_v44  ;;  %v641_v51 = vmul.f32 0.3275911, %v3103_v42  ;;  %v3657_v44 = vld [vmem:[#allocation26_spill] sm:$0xff] }
 0x204   :  { %v1273_v14 = vsub.f32 0.0, %v1209_v61  ;;  %v1274_v58 = vsub.f32 0.0, %v1210_v33  ;;  %v1088_v40 = vmul.f32 %v1056_v59, %v2976_v37  ;;  %v642_v60 = vmul.f32 0.3275911, %v3107_v25 }
 0x205   :  { %v1212_v45 = vsub.f32 1.0, %v1180_v35  ;;  %vm1244_vm13 = vcmp.ge.f32.partialorder %v2793_v9, 0.0  ;;  %v989_v12 = vadd.f32 0.2548296, %v957_v34  ;;  %v673_v27 = vadd.f32 1.0, %v641_v51  ;;  %v3661_v51 = vld [vmem:[#allocation10_spill] sm:$0xff] }
 0x206   :  { %v3116_v49 = vadd.f32 %v3655_v0, %v2456_v31  ;;  %v2151_v54 = vpop.eup %2150  ;;  %v3119_v63 = vmul.f32 %v1336_v47, %v2894_v18  ;;  %v926_v50 = vadd.f32 -0.28449672, %v894_v16  ;;  %v832_v15 = vmul.f32 %v3072_v13, %v800_v7  ;;  %v3659_v7 = vld [vmem:[#allocation24_spill] sm:$0xff]  ;;  %v3664_v9 = vld [vmem:[#allocation2_spill] sm:$0xff] }
 0x207   :  { %v674_v53 = vadd.f32 1.0, %v642_v60  ;;  %v3122_v37 = vpop.eup %2152  ;;  %v3125_v41 = vmul.f32 %v1335_v46, %v3657_v44  ;;  %v1179_v23 = vmul.f32 %v2151_v54, %v1019_v55  ;;  %2158 = vrcp.f32 %v673_v27 }
 0x208   :  { %3656 = vst [vmem:[#allocation5_spill] sm:$0xff] %v3119_v63  ;;  %v3128_v43 = vmul.f32 0.70710677, %v3116_v49  ;;  %v2155_v62 = vpop.eup %2154  ;;  %v1305_v6 = vsel %vm1241_vm11, %v1209_v61, %v1273_v14  ;;  %v1138_v18 = vmul.f32 1.442695, %v1088_v40  ;;  %v1306_v35 = vsel %vm1242_vm12, %v1210_v33, %v1274_v58 }
 0x209   :  { %3658 = vst [vmem:[#allocation7_spill] sm:$0xff] %v3125_v41  ;;  %v767_v59 = vmul.f32 1.0614054, %v3122_v37  ;;  %2160 = vrcp.f32 %v674_v53  ;;  %v1276_v34 = vsub.f32 0.0, %v1212_v45  ;;  %v1021_v47 = vmul.f32 %v2990_v52, %v989_v12 }
 0x20a   :  { %v3137_v16 = vand.u32 2147483647, %v3128_v43  ;;  %vm1243_vm14 = vcmp.ge.f32.partialorder %v3659_v7, 0.0  ;;  %v958_v46 = vmul.f32 %v3018_v21, %v926_v50  ;;  %v864_v55 = vadd.f32 1.4214138, %v832_v15 }
 0x20b   :  { %v3143_v61 = vadd.f32 %v3660_v3, %v2458_v48  ;;  %v3147_v14 = vadd.f32 %v3661_v51, %v2460_v32  ;;  %v1211_v11 = vsub.f32 1.0, %v1179_v23  ;;  %v3150_v33 = vmul.f32 0.5, %v3027_v26  ;;  %v3665_v3 = vld [vmem:[#allocation11_spill] sm:$0xff] }
 0x20c   :  { %v1055_v52 = vsub.f32 0.0, %v3055_v38  ;;  %v644_v58 = vmul.f32 0.3275911, %v3137_v16  ;;  %v1337_v40 = vadd.f32 1.0, %v1305_v6  ;;  %v1338_v60 = vadd.f32 1.0, %v1306_v35 }
 0x20d   :  { %v799_v12 = vadd.f32 -1.4531521, %v767_v59  ;;  %v3155_v27 = vmul.f32 0.70710677, %v3143_v61  ;;  %v2157_v0 = vpop.eup %2156  ;;  %v1181_v54 = vmul.f32 %v2155_v62, %v1021_v47  ;;  %2162 = vpow2.f32 %v1138_v18 }
 0x20e   :  { %v676_v50 = vadd.f32 1.0, %v644_v58  ;;  %v3158_v15 = vmul.f32 0.70710677, %v3147_v14  ;;  %v1308_v26 = vsel %vm1244_vm13, %v1212_v45, %v1276_v34  ;;  %v990_v53 = vadd.f32 0.2548296, %v958_v46 }
 0x20f   :  { %v896_v44 = vmul.f32 %v3072_v13, %v864_v55  ;;  %v3164_v23 = vand.u32 2147483647, %v3155_v27  ;;  %v1275_v6 = vsub.f32 0.0, %v1211_v11  ;;  %v1087_v59 = vmul.f32 %v1055_v52, %v3055_v38 }
 0x210   :  { %2164 = vrcp.f32 %v676_v50  ;;  %v3168_v62 = vand.u32 2147483647, %v3158_v15  ;;  %v3171_v18 = vmul.f32 %v1337_v40, %v3015_v29  ;;  %v3174_v35 = vmul.f32 %v1338_v60, %v3030_v39 }
 0x211   :  { %vm1245_vm15 = vcmp.ge.f32.partialorder %v3664_v9, 0.0  ;;  %v831_v45 = vmul.f32 %v3122_v37, %v799_v12  ;;  %v643_v34 = vmul.f32 0.3275911, %v3164_v23  ;;  %v3179_v47 = vpop.eup %2158  ;;  %v3181_v46 = vadd.f32 1.0, %v1308_v26 }
 0x212   :  { %3662 = vst [vmem:[#allocation8_spill] sm:$0xff] %v3171_v18  ;;  %3663 = vst [vmem:[#allocation26_spill] sm:$0xff] %v3174_v35  ;;  %v1213_v38 = vsub.f32 1.0, %v1181_v54  ;;  %v645_v55 = vmul.f32 0.3275911, %v3168_v62  ;;  %v3186_v29 = vadd.f32 %v3665_v3, %v2454_v30  ;;  %v1022_v39 = vmul.f32 %v3018_v21, %v990_v53  ;;  %v3672_v18 = vld [vmem:[#allocation13_spill] sm:$0xff] }
 0x213   :  { %v3188_v51 = vpop.eup %2160  ;;  %v928_v52 = vadd.f32 -0.28449672, %v896_v44  ;;  %v769_v58 = vmul.f32 1.0614054, %v3179_v47  ;;  %v675_v40 = vadd.f32 1.0, %v643_v34  ;;  %v1307_v60 = vsel %vm1243_vm14, %v1211_v11, %v1275_v6  ;;  %v3668_v44 = vld [vmem:[#allocation12_spill] sm:$0xff] }
 0x214   :  { %3666 = vst [vmem:[#allocation24_spill] sm:$0xff] %v3186_v29  ;;  %v1136_v12 = vmul.f32 1.442695, %v1087_v59  ;;  %v770_v54 = vmul.f32 1.0614054, %v3188_v51  ;;  %v677_v50 = vadd.f32 1.0, %v645_v55  ;;  %v3206_v6 = vadd.f32 %v3668_v44, %v2456_v31 }
 0x215   :  { %v863_v26 = vadd.f32 1.4214138, %v831_v45  ;;  %v3196_v63 = vmul.f32 0.5, %v3077_v36  ;;  %v801_v3 = vadd.f32 -1.4531521, %v769_v58  ;;  %2166 = vrcp.f32 %v675_v40 }
 0x216   :  { %v1277_v35 = vsub.f32 0.0, %v1213_v38  ;;  %v802_v4 = vadd.f32 -1.4531521, %v770_v54  ;;  %2168 = vrcp.f32 %v677_v50  ;;  %v3199_v21 = vmul.f32 0.70710677, %v3186_v29  ;;  %3669 = vst [vmem:[#allocation10_spill] sm:$0xff] %v3206_v6 }
 0x217   :  { %v960_v53 = vmul.f32 %v3072_v13, %v928_v52  ;;  %v833_v7 = vmul.f32 %v3179_v47, %v801_v3  ;;  %v1057_v11 = vsub.f32 0.0, %v3103_v42  ;;  %v3208_v36 = vpop.eup %2162  ;;  %v3210_v59 = vmul.f32 %v2157_v0, %v1022_v39 }
 0x218   :  { %3667 = vst [vmem:[#allocation9_spill] sm:$0xff] %v3199_v21  ;;  %v834_v45 = vmul.f32 %v3188_v51, %v802_v4  ;;  %v1058_v34 = vsub.f32 0.0, %v3107_v25  ;;  %v3215_v55 = vand.u32 2147483647, %v3199_v21  ;;  %v3217_v52 = vadd.f32 1.0, %v1307_v60 }
 0x219   :  { %v895_v58 = vmul.f32 %v3122_v37, %v863_v26  ;;  %v865_v40 = vadd.f32 1.4214138, %v833_v7  ;;  %v3221_v54 = vmul.f32 0.70710677, %v3206_v6  ;;  %v1309_v0 = vsel %vm1245_vm15, %v1213_v38, %v1277_v35 }
 0x21a   :  { %v3223_v50 = vpop.eup %2164  ;;  %v866_v39 = vadd.f32 1.4214138, %v834_v45  ;;  %v1060_v4 = vsub.f32 0.0, %v3137_v16  ;;  %v646_v3 = vmul.f32 0.3275911, %v3215_v55  ;;  %v1089_v60 = vmul.f32 %v1057_v11, %v3103_v42 }
 0x21b   :  { %3670 = vst [vmem:[#allocation2_spill] sm:$0xff] %v3221_v54  ;;  %v992_v44 = vadd.f32 0.2548296, %v960_v53  ;;  %v772_v29 = vmul.f32 1.0614054, %v3223_v50  ;;  %2170 = vpow2.f32 %v1136_v12  ;;  %v1090_v6 = vmul.f32 %v1058_v34, %v3107_v25 }
 0x21c   :  { %v3232_v26 = vand.u32 2147483647, %v3221_v54  ;;  %v678_v9 = vadd.f32 1.0, %v646_v3  ;;  %v3236_v35 = vadd.f32 1.0, %v1309_v0  ;;  %v927_v38 = vadd.f32 -0.28449672, %v895_v58 }
 0x21d   :  { %v897_v45 = vmul.f32 %v3179_v47, %v865_v40  ;;  %v804_v21 = vadd.f32 -1.4531521, %v772_v29  ;;  %v898_v53 = vmul.f32 %v3188_v51, %v866_v39  ;;  %v1092_v42 = vmul.f32 %v1060_v4, %v3137_v16 }
 0x21e   :  { %2172 = vrcp.f32 %v678_v9  ;;  %v648_v11 = vmul.f32 0.3275911, %v3232_v26  ;;  %v1024_v12 = vmul.f32 %v3072_v13, %v992_v44  ;;  %v1140_v7 = vmul.f32 1.442695, %v1089_v60  ;;  %v3671_v13 = vld [vmem:[#allocation25_spill] sm:$0xff] }
 0x21f   :  { %v3242_v54 = vpop.eup %2166  ;;  %v836_v25 = vmul.f32 %v3223_v50, %v804_v21  ;;  %v1059_v34 = vsub.f32 0.0, %v3164_v23  ;;  %v1142_v40 = vmul.f32 1.442695, %v1090_v6  ;;  %v1061_v0 = vsub.f32 0.0, %v3168_v62 }
 0x220   :  { %v3247_v58 = vpop.eup %2168  ;;  %v771_v29 = vmul.f32 1.0614054, %v3242_v54  ;;  %v680_v16 = vadd.f32 1.0, %v648_v11  ;;  %v959_v39 = vmul.f32 %v3122_v37, %v927_v38  ;;  %v929_v4 = vadd.f32 -0.28449672, %v897_v45 }
 0x221   :  { %v868_v3 = vadd.f32 1.4214138, %v836_v25  ;;  %v773_v9 = vmul.f32 1.0614054, %v3247_v58  ;;  %vm1246_vm0 = vcmp.ge.f32.partialorder %v3671_v13, 0.0  ;;  %v3256_v41 = vadd.f32 %v3672_v18, %v2458_v48 }
 0x222   :  { %v930_v44 = vadd.f32 -0.28449672, %v898_v53  ;;  %v1146_v21 = vmul.f32 1.442695, %v1092_v42  ;;  %v803_v60 = vadd.f32 -1.4531521, %v771_v29  ;;  %v1091_v57 = vmul.f32 %v1059_v34, %v3164_v23 }
 0x223   :  { %v900_v6 = vmul.f32 %v3223_v50, %v868_v3  ;;  %v805_v11 = vadd.f32 -1.4531521, %v773_v9  ;;  %2174 = vrcp.f32 %v680_v16  ;;  %v3673_v38 = vsub.f32 1.0, %v3210_v59 }
 0x224   :  { %2176 = vpow2.f32 %v1140_v7  ;;  %v835_v25 = vmul.f32 %v3242_v54, %v803_v60  ;;  %v1093_v53 = vmul.f32 %v1061_v0, %v3168_v62  ;;  %v991_v42 = vadd.f32 0.2548296, %v959_v39 }
 0x225   :  { %v1278_v45 = vsub.f32 0.0, %v3673_v38  ;;  %v961_v29 = vmul.f32 %v3179_v47, %v929_v4  ;;  %v932_v8 = vadd.f32 -0.28449672, %v900_v6  ;;  %v837_v18 = vmul.f32 %v3247_v58, %v805_v11  ;;  %v2171_v28 = vpop.eup %2170 }
 0x226   :  { %v962_v3 = vmul.f32 %v3188_v51, %v930_v44  ;;  %2178 = vpow2.f32 %v1142_v40  ;;  %v867_v23 = vadd.f32 1.4214138, %v835_v25  ;;  %v3268_v34 = vmul.f32 0.70710677, %v3256_v41 }
 0x227   :  { %v1184_v7 = vmul.f32 %v3208_v36, %v1024_v12  ;;  %2180 = vpow2.f32 %v1146_v21  ;;  %v1144_v16 = vmul.f32 1.442695, %v1091_v57  ;;  %v869_v9 = vadd.f32 1.4214138, %v837_v18  ;;  %v3674_v12 = vld [vmem:[#allocation3_spill] sm:$0xff] }
 0x228   :  { %v3271_v62 = vpop.eup %2172  ;;  %v964_v0 = vmul.f32 %v3223_v50, %v932_v8  ;;  %v899_v39 = vmul.f32 %v3242_v54, %v867_v23  ;;  %v1148_v4 = vmul.f32 1.442695, %v1093_v53  ;;  %v3276_v60 = vand.u32 2147483647, %v3268_v34 }
 0x229   :  { %v1023_v40 = vmul.f32 %v3122_v37, %v991_v42  ;;  %v993_v44 = vadd.f32 0.2548296, %v961_v29  ;;  %v901_v6 = vmul.f32 %v3247_v58, %v869_v9  ;;  %v774_v36 = vmul.f32 1.0614054, %v3271_v62  ;;  %v3675_v9 = vld [vmem:[#allocation15_spill] sm:$0xff] }
 0x22a   :  { %v3283_v57 = vmul.f32 %v3181_v46, %v3044_v19  ;;  %vm1248_vm1 = vcmp.ge.f32.partialorder %v3674_v12, 0.0  ;;  %v994_v8 = vadd.f32 0.2548296, %v962_v3  ;;  %v931_v21 = vadd.f32 -0.28449672, %v899_v39 }
 0x22b   :  { %v647_v11 = vmul.f32 0.3275911, %v3276_v60  ;;  %v1310_v37 = vsel %vm1246_vm0, %v3673_v38, %v1278_v45  ;;  %v1216_v25 = vsub.f32 1.0, %v1184_v7  ;;  %v933_v53 = vadd.f32 -0.28449672, %v901_v6 }
 0x22c   :  { %v806_v42 = vadd.f32 -1.4531521, %v774_v36  ;;  %v996_v29 = vadd.f32 0.2548296, %v964_v0  ;;  %v963_v18 = vmul.f32 %v3242_v54, %v931_v21  ;;  %2182 = vpow2.f32 %v1144_v16 }
 0x22d   :  { %v679_v19 = vadd.f32 1.0, %v647_v11  ;;  %v3292_v46 = vpop.eup %2174  ;;  %v1183_v23 = vmul.f32 %v2171_v28, %v1023_v40  ;;  %v965_v3 = vmul.f32 %v3247_v58, %v933_v53  ;;  %2184 = vpow2.f32 %v1148_v4 }
 0x22e   :  { %v3297_v59 = vadd.f32 %v3675_v9, %v2460_v32  ;;  %v2177_v13 = vpop.eup %2176  ;;  %v1342_v45 = vadd.f32 1.0, %v1310_v37  ;;  %v1025_v7 = vmul.f32 %v3179_v47, %v993_v44  ;;  %v1026_v0 = vmul.f32 %v3188_v51, %v994_v8 }
 0x22f   :  { %2186 = vrcp.f32 %v679_v19  ;;  %v1280_v39 = vsub.f32 0.0, %v1216_v25  ;;  %v3302_v16 = vmul.f32 0.5, %v3082_v17  ;;  %v995_v6 = vadd.f32 0.2548296, %v963_v18 }
 0x230   :  { %v838_v28 = vmul.f32 %v3271_v62, %v806_v42  ;;  %v2179_v40 = vpop.eup %2178  ;;  %v3307_v4 = vmul.f32 %v3217_v52, %v3048_v20  ;;  %vm1247_vm2 = vcmp.ge.f32.partialorder %v3041_v22, 0.0  ;;  %v1028_v36 = vmul.f32 %v3223_v50, %v996_v29 }
 0x231   :  { %v997_v47 = vadd.f32 0.2548296, %v965_v3  ;;  %v776_v51 = vmul.f32 1.0614054, %v3292_v46  ;;  %v2181_v44 = vpop.eup %2180  ;;  %v3314_v17 = vmul.f32 %v3236_v35, %v3063_v5  ;;  %v1215_v8 = vsub.f32 1.0, %v1183_v23 }
 0x232   :  { %v1062_v21 = vsub.f32 0.0, %v3215_v55  ;;  %v3318_v11 = vmul.f32 0.70710677, %v3297_v59  ;;  %v3321_v20 = vmul.f32 %v1342_v45, %v3068_v2  ;;  %v1185_v52 = vmul.f32 %v2177_v13, %v1025_v7  ;;  %v3676_v2 = vld [vmem:[#allocation16_spill] sm:$0xff] }
 0x233   :  { %v1186_v38 = vmul.f32 %v2179_v40, %v1026_v0  ;;  %v3324_v50 = vmul.f32 0.5, %v3116_v49  ;;  %v1312_v37 = vsel %vm1248_vm1, %v1216_v25, %v1280_v39  ;;  %v1027_v5 = vmul.f32 %v3242_v54, %v995_v6 }
 0x234   :  { %v870_v35 = vadd.f32 1.4214138, %v838_v28  ;;  %v3330_v53 = vand.u32 2147483647, %v3318_v11  ;;  %v1188_v42 = vmul.f32 %v2181_v44, %v1028_v36  ;;  %v1029_v29 = vmul.f32 %v3247_v58, %v997_v47 }
 0x235   :  { %v808_v18 = vadd.f32 -1.4531521, %v776_v51  ;;  %v3335_v19 = vadd.f32 %v3676_v2, %v2454_v30  ;;  %v1279_v23 = vsub.f32 0.0, %v1215_v8  ;;  %vm1249_vm3 = vcmp.ge.f32.partialorder %v3091_v24, 0.0 }
 0x236   :  { %vm1250_vm4 = vcmp.ge.f32.partialorder %v3096_v1, 0.0  ;;  %v1094_v49 = vmul.f32 %v1062_v21, %v3215_v55  ;;  %v1064_v54 = vsub.f32 0.0, %v3232_v26  ;;  %v649_v12 = vmul.f32 0.3275911, %v3330_v53  ;;  %v2183_v25 = vpop.eup %2182 }
 0x237   :  { %v1217_v3 = vsub.f32 1.0, %v1185_v52  ;;  %v1218_v9 = vsub.f32 1.0, %v1186_v38  ;;  %v3343_v58 = vmul.f32 0.5, %v3143_v61  ;;  %v3346_v30 = vmul.f32 0.5, %v3147_v14  ;;  %v2185_v13 = vpop.eup %2184  ;;  %v3677_v52 = vld [vmem:[#allocation17_spill] sm:$0xff] }
 0x238   :  { %v1344_v45 = vadd.f32 1.0, %v1312_v37  ;;  %vm1252_vm5 = vcmp.ge.f32.partialorder %v3128_v43, 0.0  ;;  %v1187_v7 = vmul.f32 %v2183_v25, %v1027_v5  ;;  %v902_v55 = vmul.f32 %v3271_v62, %v870_v35 }
 0x239   :  { %v681_v0 = vadd.f32 1.0, %v649_v12  ;;  %v3350_v39 = vpop.eup %2186  ;;  %v1220_v6 = vsub.f32 1.0, %v1188_v42  ;;  %v1189_v28 = vmul.f32 %v2185_v13, %v1029_v29  ;;  %v840_v40 = vmul.f32 %v3292_v46, %v808_v18 }
 0x23a   :  { %v3354_v61 = vmul.f32 0.70710677, %v3335_v19  ;;  %v1311_v14 = vsel %vm1247_vm2, %v1215_v8, %v1279_v23  ;;  %v1150_v36 = vmul.f32 1.442695, %v1094_v49  ;;  %v1096_v47 = vmul.f32 %v1064_v54, %v3232_v26 }
 0x23b   :  { %v775_v51 = vmul.f32 1.0614054, %v3350_v39  ;;  %v1281_v44 = vsub.f32 0.0, %v1217_v3  ;;  %v1282_v21 = vsub.f32 0.0, %v1218_v9  ;;  %vm1251_vm6 = vcmp.ge.f32.partialorder %v3155_v27, 0.0 }
 0x23c   :  { %2188 = vrcp.f32 %v681_v0  ;;  %v3363_v38 = vadd.f32 %v3677_v52, %v2456_v31  ;;  %v3366_v37 = vmul.f32 %v1344_v45, %v3100_v56  ;;  %v1219_v5 = vsub.f32 1.0, %v1187_v7  ;;  %v3678_v45 = vld [vmem:[#allocation18_spill] sm:$0xff]  ;;  %v3679_v52 = vld [vmem:[#allocation21_spill] sm:$0xff] }
 0x23d   :  { %vm1253_vm7 = vcmp.ge.f32.partialorder %v3158_v15, 0.0  ;;  %v934_v22 = vadd.f32 -0.28449672, %v902_v55  ;;  %v3370_v26 = vand.u32 2147483647, %v3354_v61  ;;  %v1343_v8 = vadd.f32 1.0, %v1311_v14 }
 0x23e   :  { %v1284_v35 = vsub.f32 0.0, %v1220_v6  ;;  %v1221_v42 = vsub.f32 1.0, %v1189_v28  ;;  %v872_v29 = vadd.f32 1.4214138, %v840_v40  ;;  %2190 = vpow2.f32 %v1150_v36 }
 0x23f   :  { %v1154_v18 = vmul.f32 1.442695, %v1096_v47  ;;  %v807_v2 = vadd.f32 -1.4531521, %v775_v51  ;;  %v650_v31 = vmul.f32 0.3275911, %v3370_v26  ;;  %v1313_v56 = vsel %vm1249_vm3, %v1217_v3, %v1281_v44 }
 0x240   :  { %v1314_v23 = vsel %vm1250_vm4, %v1218_v9, %v1282_v21  ;;  %v1063_v49 = vsub.f32 0.0, %v3276_v60  ;;  %v3379_v54 = vmul.f32 0.70710677, %v3363_v38  ;;  %v1283_v12 = vsub.f32 0.0, %v1219_v5 }
 0x241   :  { %v966_v25 = vmul.f32 %v3271_v62, %v934_v22  ;;  %v682_v13 = vadd.f32 1.0, %v650_v31  ;;  %v3384_v7 = vadd.f32 %v3678_v45, %v2458_v48  ;;  %v1316_v24 = vsel %vm1252_vm5, %v1220_v6, %v1284_v35 }
 0x242   :  { %v1285_v3 = vsub.f32 0.0, %v1221_v42  ;;  %v904_v1 = vmul.f32 %v3292_v46, %v872_v29  ;;  %v3390_v9 = vand.u32 2147483647, %v3379_v54  ;;  %v3393_v55 = vmul.f32 %v1343_v8, %v3150_v33 }
 0x243   :  { %v1345_v0 = vadd.f32 1.0, %v1313_v56  ;;  %v839_v28 = vmul.f32 %v3350_v39, %v807_v2  ;;  %2192 = vrcp.f32 %v682_v13  ;;  %v1346_v40 = vadd.f32 1.0, %v1314_v23 }
 0x244   :  { %2194 = vpow2.f32 %v1154_v18  ;;  %v1095_v48 = vmul.f32 %v1063_v49, %v3276_v60  ;;  %v652_v43 = vmul.f32 0.3275911, %v3390_v9  ;;  %v1348_v6 = vadd.f32 1.0, %v1316_v24 }
 0x245   :  { %v1315_v14 = vsel %vm1251_vm6, %v1219_v5, %v1283_v12  ;;  %v998_v36 = vadd.f32 0.2548296, %v966_v25  ;;  %v3401_v47 = vmul.f32 0.70710677, %v3384_v7  ;;  %v1317_v51 = vsel %vm1253_vm7, %v1221_v42, %v1285_v3 }
 0x246   :  { %v3403_v33 = vpop.eup %2188  ;;  %v936_v44 = vadd.f32 -0.28449672, %v904_v1  ;;  %v684_v21 = vadd.f32 1.0, %v652_v43  ;;  %v3409_v60 = vadd.f32 %v3679_v52, %v2460_v32  ;;  %v3412_v22 = vmul.f32 %v1345_v0, %v3196_v63  ;;  %v3681_v1 = vld [vmem:[#allocation6_spill] sm:$0xff]  ;;  %v3682_v0 = vld [vmem:[#allocation4_spill] sm:$0xff] }
 0x247   :  { %v871_v27 = vadd.f32 1.4214138, %v839_v28  ;;  %v777_v5 = vmul.f32 1.0614054, %v3403_v33  ;;  %v3416_v8 = vand.u32 2147483647, %v3401_v47  ;;  %v3419_v35 = vmul.f32 %v1346_v40, %v3302_v16 }
 0x248   :  { %v1347_v15 = vadd.f32 1.0, %v1315_v14  ;;  %v1152_v42 = vmul.f32 1.442695, %v1095_v48  ;;  %2196 = vrcp.f32 %v684_v21  ;;  %v2191_v29 = vpop.eup %2190  ;;  %v1349_v18 = vadd.f32 1.0, %v1317_v51  ;;  %v3680_v16 = vld [vmem:[#allocation14_spill] sm:$0xff]  ;;  %v3683_v43 = vld [vmem:[#allocation20_spill] sm:$0xff] }
 0x249   :  { %v809_v2 = vadd.f32 -1.4531521, %v777_v5  ;;  %v1065_v32 = vsub.f32 0.0, %v3330_v53  ;;  %v1066_v63 = vsub.f32 0.0, %v3370_v26  ;;  %v3424_v31 = vmul.f32 %v1348_v6, %v3324_v50  ;;  %v3684_v6 = vld [vmem:[#allocation19_spill] sm:$0xff] }
 0x24a   :  { %v651_v56 = vmul.f32 0.3275911, %v3416_v8  ;;  %v3428_v23 = vmul.f32 0.70710677, %v3409_v60  ;;  %v1391_v49 = vpack.c.bf16 %v3680_v16, %v3000_v10  ;;  %v1030_v12 = vmul.f32 %v3271_v62, %v998_v36  ;;  %v3687_v5 = vld [vmem:[#allocation23_spill] sm:$0xff] }
 0x24b   :  { %v968_v25 = vmul.f32 %v3292_v46, %v936_v44  ;;  %v903_v13 = vmul.f32 %v3350_v39, %v871_v27  ;;  %v841_v45 = vmul.f32 %v3403_v33, %v809_v2  ;;  %v1379_v24 = vmul.f32 %v1347_v15, %v3343_v58  ;;  %v3686_v58 = vld [vmem:[#allocation7_spill] sm:$0xff]  ;;  %v3688_v15 = vld [vmem:[#allocation22_spill] sm:$0xff] }
 0x24c   :  { %v683_v50 = vadd.f32 1.0, %v651_v56  ;;  %v3438_v3 = vand.u32 2147483647, %v3428_v23  ;;  %1701 = vmatprep.mubr.bf16.mxu0 %v1391_v49  ;;  %v1393_v28 = vpack.c.bf16 %v3682_v0, %v3681_v1  ;;  %v1381_v10 = vmul.f32 %v1349_v18, %v3346_v30  ;;  %v3691_v49 = vld [vmem:[#allocation27_spill] sm:$0xff] }
 0x24d   :  { %v3442_v40 = vpop.eup %2192  ;;  %v873_v62 = vadd.f32 1.4214138, %v841_v45  ;;  %v1098_v48 = vmul.f32 %v1066_v63, %v3370_v26  ;;  %v3685_v14 = vpack.c.bf16 %v3683_v43, %v3684_v6  ;;  %v1395_v36 = vpack.c.bf16 %v3307_v4, %v3686_v58  ;;  %v3690_v4 = vld [vmem:[#allocation8_spill] sm:$0xff]  ;;  %v3692_v45 = vld [vmem:[#allocation26_spill] sm:$0xff] }
 0x24e   :  { %v2195_v51 = vpop.eup %2194  ;;  %v778_v44 = vmul.f32 1.0614054, %v3442_v40  ;;  %v1068_v21 = vsub.f32 0.0, %v3390_v9  ;;  %2198 = vrcp.f32 %v683_v50  ;;  %v653_v52 = vmul.f32 0.3275911, %v3438_v3  ;;  %1766 = vmatprep.mubr.bf16.mxu1 %v1393_v28 }
 0x24f   :  { %1702 = vmatmul.mubr.bf16.vlgmr.msra.gmra.mrb[16].mxu0 %v3685_v14  ;;  %v3454_v30 = vmul.f32 %v2191_v29, %v1030_v12  ;;  %v935_v27 = vadd.f32 -0.28449672, %v903_v13  ;;  %v1097_v26 = vmul.f32 %v1065_v32, %v3330_v53  ;;  %v3689_v18 = vpack.c.bf16 %v3687_v5, %v3688_v15  ;;  %v3693_v13 = vld [vmem:[#allocation5_spill] sm:$0xff] }
 0x250   :  { %1709 = vmatprep.mubr.bf16.mxu0 %v1395_v36  ;;  %v1397_v2 = vpack.c.bf16 %v3314_v17, %v3690_v4  ;;  %v905_v63 = vmul.f32 %v3403_v33, %v873_v62  ;;  %v810_v56 = vadd.f32 -1.4531521, %v778_v44  ;;  %v685_v16 = vadd.f32 1.0, %v653_v52 }
 0x251   :  { %1767 = vmatmul.mubr.bf16.vlgmr.msra.gmra.mrb[16].mxu1 %v3689_v18  ;;  %v1394_v50 = vpack.c.bf16 %v3692_v45, %v3691_v49  ;;  %v1000_v29 = vadd.f32 0.2548296, %v968_v25  ;;  %v1158_v12 = vmul.f32 1.442695, %v1098_v48  ;;  %v1396_v53 = vpack.c.bf16 %v3283_v57, %v3693_v13 }
 0x252   :  { %1774 = vmatprep.mubr.bf16.mxu1 %v1397_v2  ;;  %v1399_v32 = vpack.c.bf16 %v1379_v24, %v3393_v55  ;;  %v3468_v1 = vpop.eup %2196  ;;  %v842_v0 = vmul.f32 %v3442_v40, %v810_v56  ;;  %v1100_v17 = vmul.f32 %v1068_v21, %v3390_v9  ;;  %2200 = vrcp.f32 %v685_v16  ;;  %v3694_v16 = vld [vmem:[#allocation9_spill] sm:$0xff] }
 0x253   :  { %v1401_v28 = vpack.c.bf16 %v1381_v10, %v3412_v22  ;;  %v967_v62 = vmul.f32 %v3350_v39, %v935_v27  ;;  %2202 = vpow2.f32 %v1152_v42  ;;  %v780_v25 = vmul.f32 1.0614054, %v3468_v1 }
 0x254   :  { %v1398_v48 = vpack.c.bf16 %v3419_v35, %v3321_v20  ;;  %v937_v57 = vadd.f32 -0.28449672, %v905_v63  ;;  %v874_v43 = vadd.f32 1.4214138, %v842_v0  ;;  %v1067_v55 = vsub.f32 0.0, %v3416_v8 }
 0x255   :  { %v1400_v24 = vpack.c.bf16 %v3424_v31, %v3366_v37  ;;  %v1156_v6 = vmul.f32 1.442695, %v1097_v26  ;;  %2204 = vpow2.f32 %v1158_v12  ;;  %v812_v9 = vadd.f32 -1.4531521, %v780_v25 }
 0x256   :  { %v1222_v22 = vsub.f32 1.0, %v3454_v30  ;;  %v1032_v42 = vmul.f32 %v3292_v46, %v1000_v29  ;;  %v906_v10 = vmul.f32 %v3442_v40, %v874_v43  ;;  %v1162_v14 = vmul.f32 1.442695, %v1100_v17 }
 0x257   :  { %1710 = vmatmul.mubr.bf16.gmra.mrb[20].mxu0 %v1394_v50  ;;  %v999_v20 = vadd.f32 0.2548296, %v967_v62  ;;  %v844_v35 = vmul.f32 %v3468_v1, %v812_v9  ;;  %v969_v37 = vmul.f32 %v3403_v33, %v937_v57  ;;  %v1099_v36 = vmul.f32 %v1067_v55, %v3416_v8  ;;  %v3695_v57 = vld [vmem:[#allocation2_spill] sm:$0xff] }
 0x258   :  { %1717 = vmatprep.mubr.bf16.mxu0 %v1399_v32  ;;  %v3484_v58 = vpop.eup %2198  ;;  %v938_v31 = vadd.f32 -0.28449672, %v906_v10  ;;  %v1069_v44 = vsub.f32 0.0, %v3438_v3  ;;  %2206 = vpow2.f32 %v1156_v6  ;;  %v1286_v52 = vsub.f32 0.0, %v1222_v22 }
 0x259   :  { %1775 = vmatmul.mubr.bf16.gmra.mrb[20].mxu1 %v1396_v53  ;;  %v876_v46 = vadd.f32 1.4214138, %v844_v35  ;;  %v779_v21 = vmul.f32 1.0614054, %v3484_v58  ;;  %v1192_v30 = vmul.f32 %v2195_v51, %v1032_v42  ;;  %2208 = vpow2.f32 %v1162_v14 }
 0x25a   :  { %1782 = vmatprep.mubr.bf16.mxu1 %v1401_v28  ;;  %v970_v27 = vmul.f32 %v3442_v40, %v938_v31  ;;  %v1031_v26 = vmul.f32 %v3350_v39, %v999_v20  ;;  %v1001_v8 = vadd.f32 0.2548296, %v969_v37  ;;  %v1160_v2 = vmul.f32 1.442695, %v1099_v36  ;;  %v3696_v31 = vld [vmem:[#allocation24_spill] sm:$0xff] }
 0x25b   :  { %v908_v5 = vmul.f32 %v3468_v1, %v876_v46  ;;  %v811_v15 = vadd.f32 -1.4531521, %v779_v21  ;;  %v1101_v63 = vmul.f32 %v1069_v44, %v3438_v3  ;;  %vm1254_vm8 = vcmp.ge.f32.partialorder %v3694_v16, 0.0 }
 0x25c   :  { %v3493_v18 = vpop.eup %2200  ;;  %v1002_v4 = vadd.f32 0.2548296, %v970_v27  ;;  %v1318_v39 = vsel %vm1254_vm8, %v1222_v22, %v1286_v52  ;;  %v1224_v50 = vsub.f32 1.0, %v1192_v30  ;;  %v1033_v3 = vmul.f32 %v3403_v33, %v1001_v8 }
 0x25d   :  { %v2203_v56 = vpop.eup %2202  ;;  %v940_v49 = vadd.f32 -0.28449672, %v908_v5  ;;  %v843_v51 = vmul.f32 %v3484_v58, %v811_v15  ;;  %v781_v45 = vmul.f32 1.0614054, %v3493_v18  ;;  %2210 = vpow2.f32 %v1160_v2 }
 0x25e   :  { %v1034_v29 = vmul.f32 %v3442_v40, %v1002_v4  ;;  %v1191_v13 = vmul.f32 %v2203_v56, %v1031_v26  ;;  %v1164_v28 = vmul.f32 1.442695, %v1101_v63  ;;  %vm1256_vm9 = vcmp.ge.f32.partialorder %v3695_v57, 0.0 }
 0x25f   :  { %1718 = vmatmul.mubr.bf16.gmra.mrb[24].mxu0 %v1398_v48  ;;  %v2205_v12 = vpop.eup %2204  ;;  %v972_v53 = vmul.f32 %v3468_v1, %v940_v49  ;;  %v875_v32 = vadd.f32 1.4214138, %v843_v51  ;;  %v813_v0 = vadd.f32 -1.4531521, %v781_v45  ;;  %v1288_v40 = vsub.f32 0.0, %v1224_v50  ;;  %v3697_v45 = vld [vmem:[#allocation10_spill] sm:$0xff] }
 0x260   :  { %v1194_v17 = vmul.f32 %v2205_v12, %v1034_v29  ;;  %v1350_v6 = vadd.f32 1.0, %v1318_v39  ;;  %v1223_v33 = vsub.f32 1.0, %v1191_v13  ;;  %2212 = vpow2.f32 %v1164_v28 }
 0x261   :  { %1783 = vmatmul.mubr.bf16.gmra.mrb[24].mxu1 %v1400_v24  ;;  %v1004_v62 = vadd.f32 0.2548296, %v972_v53  ;;  %v907_v25 = vmul.f32 %v3484_v58, %v875_v32  ;;  %v845_v48 = vmul.f32 %v3493_v18, %v813_v0  ;;  %vm1258_vm10 = vcmp.ge.f32.partialorder %v3354_v61, 0.0 }
 0x262   :  { %v1226_v43 = vsub.f32 1.0, %v1194_v17  ;;  %v2207_v55 = vpop.eup %2206  ;;  %v550_v36 = vmul.f32 0.5, %v3696_v31  ;;  %v1320_v44 = vsel %vm1256_vm9, %v1224_v50, %v1288_v40  ;;  %v1287_v5 = vsub.f32 0.0, %v1223_v33 }
 0x263   :  { %v1036_v9 = vmul.f32 %v3468_v1, %v1004_v62  ;;  %v939_v22 = vadd.f32 -0.28449672, %v907_v25  ;;  %v877_v24 = vadd.f32 1.4214138, %v845_v48  ;;  %v2209_v42 = vpop.eup %2208  ;;  %v1193_v10 = vmul.f32 %v2207_v55, %v1033_v3 }
 0x264   :  { %v1290_v14 = vsub.f32 0.0, %v1226_v43  ;;  %v554_v1 = vmul.f32 0.5, %v3335_v19  ;;  %v1382_v26 = vmul.f32 %v1350_v6, %v550_v36  ;;  %v1352_v56 = vadd.f32 1.0, %v1320_v44 }
 0x265   :  { %v1196_v20 = vmul.f32 %v2209_v42, %v1036_v9  ;;  %v971_v35 = vmul.f32 %v3484_v58, %v939_v22  ;;  %v909_v37 = vmul.f32 %v3493_v18, %v877_v24  ;;  %v1225_v61 = vsub.f32 1.0, %v1193_v10  ;;  %v3530_v10 = vld [vmem:[%s3593_s6] ss:$0 sm:$0xff] }
 0x266   :  { %v1322_v46 = vsel %vm1258_vm10, %v1226_v43, %v1290_v14  ;;  %vm1260_vm11 = vcmp.ge.f32.partialorder %v3379_v54, 0.0  ;;  %v552_v39 = vmul.f32 0.5, %v3697_v45  ;;  %vm1255_vm12 = vcmp.ge.f32.partialorder %v3268_v34, 0.0 }
 0x267   :  { %v1354_v21 = vadd.f32 1.0, %v1322_v46  ;;  %v1228_v52 = vsub.f32 1.0, %v1196_v20  ;;  %v1003_v30 = vadd.f32 0.2548296, %v971_v35  ;;  %v941_v27 = vadd.f32 -0.28449672, %v909_v37  ;;  %v2211_v63 = vpop.eup %2210 }
 0x268   :  { %v556_v50 = vmul.f32 0.5, %v3363_v38  ;;  %v1319_v12 = vsel %vm1255_vm12, %v1223_v33, %v1287_v5  ;;  %v1289_v13 = vsub.f32 0.0, %v1225_v61  ;;  %v1384_v0 = vmul.f32 %v1352_v56, %v552_v39  ;;  %v1801_v39 = vld [vmem:[%s3594_s1 + $0x10] sm:$0xff] }
 0x269   :  { %v1386_v15 = vmul.f32 %v1354_v21, %v554_v1  ;;  %v1292_v8 = vsub.f32 0.0, %v1228_v52  ;;  %v1035_v4 = vmul.f32 %v3484_v58, %v1003_v30  ;;  %v973_v2 = vmul.f32 %v3493_v18, %v941_v27  ;;  %v1799_v1 = vld [vmem:[%s3594_s1] sm:$0xff]  ;;  %v1800_v27 = vld [vmem:[%s3594_s1 + $0x8] sm:$0xff] }
 0x26a   :  { %v2213_v32 = vpop.eup %2212  ;;  %v1351_v28 = vadd.f32 1.0, %v1319_v12  ;;  %vm1257_vm13 = vcmp.ge.f32.partialorder %v3318_v11, 0.0  ;;  %vm1259_vm14 = vcmp.ge.f32.partialorder %v3401_v47, 0.0  ;;  %v551_v48 = vmul.f32 0.5, %v3256_v41 }
 0x26b   :  { %v1324_v16 = vsel %vm1260_vm11, %v1228_v52, %v1292_v8  ;;  %v1195_v19 = vmul.f32 %v2211_v63, %v1035_v4  ;;  %v1005_v49 = vadd.f32 0.2548296, %v973_v2  ;;  %v1402_v51 = vpack.c.bf16 %v1386_v15, %v1382_v26 }
 0x26c   :  { %v1356_v29 = vadd.f32 1.0, %v1324_v16  ;;  %v1321_v34 = vsel %vm1257_vm13, %v1225_v61, %v1289_v13  ;;  %v555_v57 = vmul.f32 0.5, %v3384_v7  ;;  %v1383_v43 = vmul.f32 %v1351_v28, %v551_v48 }
 0x26d   :  { %v1227_v58 = vsub.f32 1.0, %v1195_v19  ;;  %v1037_v53 = vmul.f32 %v3493_v18, %v1005_v49  ;;  %v1353_v55 = vadd.f32 1.0, %v1321_v34  ;;  %vm1261_vm15 = vcmp.ge.f32.partialorder %v3428_v23, 0.0 }
 0x26e   :  { %v1388_v3 = vmul.f32 %v1356_v29, %v556_v50  ;;  %v553_v11 = vmul.f32 0.5, %v3297_v59  ;;  %v557_v47 = vmul.f32 0.5, %v3409_v60 }
 0x26f   :  { %v1291_v54 = vsub.f32 0.0, %v1227_v58  ;;  %v1197_v17 = vmul.f32 %v2213_v32, %v1037_v53 }
 0x270   :  { %v1404_v62 = vpack.c.bf16 %v1388_v3, %v1384_v0  ;;  %v1385_v42 = vmul.f32 %v1353_v55, %v553_v11  ;;  %v1804_v11 = vld [vmem:[%s3594_s1 + $0x28] sm:$0xff] }
 0x271   :  { %v1323_v25 = vsel %vm1259_vm14, %v1227_v58, %v1291_v54  ;;  %v1229_v38 = vsub.f32 1.0, %v1197_v17  ;;  %v1802_v58 = vld [vmem:[%s3594_s1 + $0x18] sm:$0xff] }
 0x272   :  { %v1355_v40 = vadd.f32 1.0, %v1323_v25 }
 0x273   :  { %v1293_v18 = vsub.f32 0.0, %v1229_v38 }
 0x274   :  { %v1387_v6 = vmul.f32 %v1355_v40, %v555_v57 }
 0x275   :  { %v1325_v9 = vsel %vm1261_vm15, %v1229_v38, %v1293_v18  ;;  %v1803_v18 = vld [vmem:[%s3594_s1 + $0x20] sm:$0xff] }
 0x276   :  { %v1357_v22 = vadd.f32 1.0, %v1325_v9  ;;  %v1403_v24 = vpack.c.bf16 %v1387_v6, %v1383_v43 }
 0x278   :  { %v1389_v33 = vmul.f32 %v1357_v22, %v557_v47  ;;  %1725 = vmatprep.mubr.bf16.mxu0 %v1403_v24 }
 0x279   :  { %1726 = vmatmul.mubr.bf16.gmra.mrb[28].mxu0 %v1402_v51 }
 0x27a   :  { %v1405_v41 = vpack.c.bf16 %v1389_v33, %v1385_v42 }
 0x27c   :  { %1790 = vmatprep.mubr.bf16.mxu1 %v1405_v41 }
 0x27d   :  { %1791 = vmatmul.mubr.bf16.gmra.mrb[28].mxu1 %v1404_v62 }
 0x322   :  { %v1909_v7 = vpop.f32.mrb[16].mxu0 }
 0x323   :  { %v1910_v23 = vpop.f32.mrb[17].mxu0 }
 0x324   :  { %v1949_v14 = vpop.f32.mrb[16].mxu1  ;;  %v1911_v59 = vadd.f32 %v1910_v23, %v1909_v7  ;;  %v1912_v20 = vpop.f32.mrb[18].mxu0 }
 0x325   :  { %v1950_v60 = vpop.f32.mrb[17].mxu1  ;;  %v1913_v35 = vpop.f32.mrb[19].mxu0 }
 0x326   :  { %v1704_v37 = vadd.f32 %v1911_v59, %v3530_v10  ;;  %v1951_v31 = vadd.f32 %v1950_v60, %v1949_v14  ;;  %v1952_v36 = vpop.f32.mrb[18].mxu1  ;;  %v1914_v44 = vadd.f32 %v1913_v35, %v1912_v20 }
 0x327   :  { %v1953_v46 = vpop.f32.mrb[19].mxu1 }
 0x328   :  { %v1769_v21 = vadd.f32 %v1951_v31, %v1704_v37  ;;  %v1707_v52 = vadd.f32 %v1914_v44, %v3530_v10  ;;  %v1954_v30 = vadd.f32 %v1953_v46, %v1952_v36  ;;  %v1805_v36 = vld [vmem:[%s3594_s1 + $0x30] sm:$0xff] }
 0x32a   :  { %v1807_v26 = vadd.f32 %v1799_v1, %v1769_v21  ;;  %v1772_v5 = vadd.f32 %v1954_v30, %v1707_v52  ;;  %v1915_v61 = vpop.f32.mrb[20].mxu0  ;;  %v1806_v21 = vld [vmem:[%s3594_s1 + $0x38] sm:$0xff] }
 0x32b   :  { %v1916_v15 = vpop.f32.mrb[21].mxu0 }
 0x32c   :  { %1815 = vst [vmem:[%s3595_s7] sm:$0xff] %v1807_v26  ;;  %v1808_v8 = vadd.f32 %v1800_v27, %v1772_v5  ;;  %v1955_v4 = vpop.f32.mrb[20].mxu1  ;;  %v1917_v2 = vadd.f32 %v1916_v15, %v1915_v61  ;;  %v1918_v63 = vpop.f32.mrb[22].mxu0 }
 0x32d   :  { %v1956_v56 = vpop.f32.mrb[21].mxu1  ;;  %v1919_v16 = vpop.f32.mrb[23].mxu0 }
 0x32e   :  { %1816 = vst [vmem:[%s3595_s7 + $0x8] sm:$0xff] %v1808_v8  ;;  %v1712_v19 = vadd.f32 %v1917_v2, %v3530_v10  ;;  %v1957_v49 = vadd.f32 %v1956_v56, %v1955_v4  ;;  %v1958_v51 = vpop.f32.mrb[22].mxu1  ;;  %v1920_v45 = vadd.f32 %v1919_v16, %v1918_v63 }
 0x32f   :  { %v1959_v50 = vpop.f32.mrb[23].mxu1 }
 0x330   :  { %v1777_v29 = vadd.f32 %v1957_v49, %v1712_v19  ;;  %v1715_v12 = vadd.f32 %v1920_v45, %v3530_v10  ;;  %v1960_v13 = vadd.f32 %v1959_v50, %v1958_v51 }
 0x332   :  { %v1809_v53 = vadd.f32 %v1801_v39, %v1777_v29  ;;  %v1780_v32 = vadd.f32 %v1960_v13, %v1715_v12  ;;  %v1921_v0 = vpop.f32.mrb[24].mxu0 }
 0x333   :  { %v1922_v3 = vpop.f32.mrb[25].mxu0 }
 0x334   :  { %1817 = vst [vmem:[%s3595_s7 + $0x10] sm:$0xff] %v1809_v53  ;;  %v1810_v54 = vadd.f32 %v1802_v58, %v1780_v32  ;;  %v1961_v17 = vpop.f32.mrb[24].mxu1  ;;  %v1923_v28 = vadd.f32 %v1922_v3, %v1921_v0  ;;  %v1924_v62 = vpop.f32.mrb[26].mxu0 }
 0x335   :  { %v1962_v34 = vpop.f32.mrb[25].mxu1  ;;  %v1925_v25 = vpop.f32.mrb[27].mxu0 }
 0x336   :  { %1818 = vst [vmem:[%s3595_s7 + $0x18] sm:$0xff] %v1810_v54  ;;  %v1720_v38 = vadd.f32 %v1923_v28, %v3530_v10  ;;  %v1963_v48 = vadd.f32 %v1962_v34, %v1961_v17  ;;  %v1964_v57 = vpop.f32.mrb[26].mxu1  ;;  %v1926_v40 = vadd.f32 %v1925_v25, %v1924_v62 }
 0x337   :  { %v1965_v43 = vpop.f32.mrb[27].mxu1 }
 0x338   :  { %v1785_v55 = vadd.f32 %v1963_v48, %v1720_v38  ;;  %v1723_v6 = vadd.f32 %v1926_v40, %v3530_v10  ;;  %v1966_v9 = vadd.f32 %v1965_v43, %v1964_v57 }
 0x33a   :  { %v1811_v47 = vadd.f32 %v1803_v18, %v1785_v55  ;;  %v1788_v22 = vadd.f32 %v1966_v9, %v1723_v6 }
 0x33c   :  { %1819 = vst [vmem:[%s3595_s7 + $0x20] sm:$0xff] %v1811_v47  ;;  %v1812_v24 = vadd.f32 %v1804_v11, %v1788_v22 }
 0x33e   :  { %1820 = vst [vmem:[%s3595_s7 + $0x28] sm:$0xff] %v1812_v24 }
 0x34c   :  { %v1927_v42 = vpop.f32.mrb[28].mxu0 }
 0x34d   :  { %v1928_v33 = vpop.f32.mrb[29].mxu0 }
 0x34e   :  { %v1929_v41 = vadd.f32 %v1928_v33, %v1927_v42  ;;  %v1930_v7 = vpop.f32.mrb[30].mxu0 }
 0x34f   :  { %v1931_v23 = vpop.f32.mrb[31].mxu0 }
 0x350   :  { %v1967_v14 = vpop.f32.mrb[28].mxu1  ;;  %v1728_v59 = vadd.f32 %v1929_v41, %v3530_v10  ;;  %v1932_v20 = vadd.f32 %v1931_v23, %v1930_v7 }
 0x351   :  { %v1968_v60 = vpop.f32.mrb[29].mxu1 }
 0x352   :  { %v1969_v35 = vadd.f32 %v1968_v60, %v1967_v14  ;;  %v1970_v37 = vpop.f32.mrb[30].mxu1  ;;  %v1731_v31 = vadd.f32 %v1932_v20, %v3530_v10 }
 0x353   :  { %v1971_v44 = vpop.f32.mrb[31].mxu1 }
 0x354   :  { %v1793_v1 = vadd.f32 %v1969_v35, %v1728_v59  ;;  %v1972_v46 = vadd.f32 %v1971_v44, %v1970_v37 }
 0x356   :  { %v1813_v52 = vadd.f32 %v1805_v36, %v1793_v1  ;;  %v1796_v30 = vadd.f32 %v1972_v46, %v1731_v31 }
 0x358   :  { %1821 = vst [vmem:[%s3595_s7 + $0x30] sm:$0xff] %v1813_v52  ;;  %v1814_v27 = vadd.f32 %v1806_v21, %v1796_v30 }
 0x35a   :  { %1822 = vst [vmem:[%s3595_s7 + $0x38] sm:$0xff] %v1814_v27 }

</bundles_post_ra>
